<compile_context>
chip_gen: v5e
topology: v5e:2x2
jax: 0.10.0
libtpu: 0.0.40
codegen_flags: <defaults>
</compile_context>

<pallas_src>
import functools

import jax
import jax.numpy as jnp
from jax.experimental import pallas as pl
from jax.experimental.pallas import tpu as pltpu


def _encdec_kernel(*refs, H, W, n_layers, rows_per_strip):
    """Fused EncDecBlock forward for one batch element.

    refs layout (inputs..., output, scratches...):
      refs[0]                      : layer-0 im2col slab (1, H*W, 9*Cin0)  bf16
      refs[1 : 1+2L] (alternating) : w_l (9*Cin_l, Cout_l) bf16, b_l (1, Cout_l) f32
      refs[1+2L]                   : output block (1, C_out, H*W)          f32
      refs[2+2L : 1+3L]            : padded bf16 scratch (H+2, W+2, Cin_l)
                                     for layers l = 1 .. L-1
    """
    x_ref = refs[0]
    wb = refs[1:1 + 2 * n_layers]
    o_ref = refs[1 + 2 * n_layers]
    pad_refs = refs[2 + 2 * n_layers:]

    # Static row strips (H, W, rows_per_strip are Python ints).
    strips = []
    row = 0
    while row < H:
        t = min(rows_per_strip, H - row)
        strips.append((row, t))
        row += t

    def matmul_bias_relu(slab_bf16, w_ref, b_ref):
        acc = jnp.dot(slab_bf16, w_ref[...],
                      preferred_element_type=jnp.float32)   # MXU, f32 acc
        return jnp.maximum(acc + b_ref[...], 0.0)           # f32 epilogue

    def zero_halo(pad_ref):
        hp, wp, c = pad_ref.shape
        zr = jnp.zeros((1, wp, c), pad_ref.dtype)
        pad_ref[0:1, :, :] = zr
        pad_ref[hp - 1:hp, :, :] = zr
        zc = jnp.zeros((hp - 2, 1, c), pad_ref.dtype)
        pad_ref[1:hp - 1, 0:1, :] = zc
        pad_ref[1:hp - 1, wp - 1:wp, :] = zc

    # Only the thin halo ring needs (re)initialising; interiors are overwritten.
    for p in pad_refs:
        zero_halo(p)

    # ---- Layer 0: input already im2col'd by the wrapper -> one matmul/strip.
    w0, b0 = wb[0], wb[1]
    dst0 = pad_refs[0]
    for (r0, t) in strips:
        slab = x_ref[0, r0 * W:(r0 + t) * W, :]              # (t*W, 9*Cin0) bf16
        a = matmul_bias_relu(slab, w0, b0)                   # (t*W, C1) f32
        dst0[1 + r0:1 + r0 + t, 1:1 + W, :] = (
            a.reshape(t, W, dst0.shape[-1]).astype(dst0.dtype))

    # ---- Layers 1 .. L-1: per-strip im2col of the padded bf16 scratch.
    for l in range(1, n_layers):
        w_ref, b_ref = wb[2 * l], wb[2 * l + 1]
        src = pad_refs[l - 1]
        cin = src.shape[-1]
        last = (l == n_layers - 1)
        for (r0, t) in strips:
            # 3 kw-shifted (sublane) views, loaded once, reused across kh.
            wide = jnp.concatenate(
                [src[r0:r0 + t + 2, kw:kw + W, :] for kw in range(3)],
                axis=-1)                                     # (t+2, W, 3*Cin)
            slab = jnp.concatenate(
                [wide[kh:kh + t, :, :].reshape(t * W, 3 * cin)
                 for kh in range(3)], axis=-1)               # (t*W, 9*Cin), (kh,kw,c)
            a = matmul_bias_relu(slab, w_ref, b_ref)         # (t*W, Cout) f32
            if not last:
                dst = pad_refs[l]
                dst[1 + r0:1 + r0 + t, 1:1 + W, :] = (
                    a.reshape(t, W, dst.shape[-1]).astype(dst.dtype))
            else:
                # Lane-dense NCHW store: (t*W, Cout) -> (Cout, t*W), pixels on lanes.
                o_ref[:, :, r0 * W:(r0 + t) * W] = a.T[None].astype(o_ref.dtype)


def _to_im2col_w(w_torch):
    """(Cout, Cin, 3, 3) PyTorch Conv2d layout -> (9*Cin, Cout) im2col, bf16.

    Row order is tap-major (kh, kw) with Cin contiguous per tap, matching both
    the wrapper layer-0 im2col and the in-kernel patch concatenation order.
    """
    cout, cin, kh, kw = w_torch.shape
    return (jnp.transpose(w_torch, (2, 3, 1, 0))
            .reshape(kh * kw * cin, cout).astype(jnp.bfloat16))


def _im2col_input(x_nchw):
    """NCHW (N, C, H, W) -> lane-packed layer-0 slab (N, H*W, 9*C), bf16."""
    n, c, h, w = x_nchw.shape
    xp = jnp.pad(x_nchw, ((0, 0), (0, 0), (1, 1), (1, 1)))
    cols = []
    for kh in range(3):
        for kw in range(3):
            patch = xp[:, :, kh:kh + h, kw:kw + w]           # (N, C, H, W)
            cols.append(jnp.transpose(patch, (0, 2, 3, 1)).reshape(n, h * w, c))
    return jnp.concatenate(cols, axis=-1).astype(jnp.bfloat16)


def _pick_rows_per_strip(h, w, target_m=2048):
    """Rows per in-kernel strip: ~2K-row M per MXU matmul, multiple of 8."""
    rows = max(1, target_m // max(w, 1))
    rows = min(h, rows)
    if rows >= 8:
        rows -= rows % 8
    return max(1, rows)


def _vmem_limit_bytes(h, w, chans, rows):
    """Rough live-VMEM footprint (with 2x headroom), capped at v7x's 64 MiB."""
    up = lambda a, b: -(-a // b) * b
    lane = lambda c: up(c, 128)
    bf, f4 = 2, 4
    k0 = 9 * chans[0]
    in_blk = 2 * up(h * w, 8) * lane(k0) * bf                       # dbl-buffered
    out_blk = 2 * up(chans[-1], 8) * lane(h * w) * f4
    wgt = 2 * sum(up(9 * chans[i], 8) * lane(chans[i + 1]) * bf
                  for i in range(len(chans) - 1))
    pads = sum((h + 2) * up(w + 2, 16) * lane(c) * bf for c in chans[1:-1])
    cmax = max(chans[1:-1]) if len(chans) > 2 else chans[-1]
    m = up(rows * w, 8)
    trans = (up(rows + 2, 16) * w * lane(3 * cmax) * bf             # wide view
             + m * lane(9 * cmax) * bf                              # slab
             + m * lane(max(chans[1:])) * f4)                       # f32 acc
    total = in_blk + out_blk + wgt + pads + trans
    return int(min(max(2 * total, 16 * 1024 * 1024), 64 * 1024 * 1024))


@jax.jit
def encdec_block_forward(x_nchw, params):
    """Forward pass of EncDecBlock. Input/output are NCHW like PyTorch."""
    n, c0, h, w = x_nchw.shape
    n_layers = len(params)
    c_out = params[-1][0].shape[0]
    chans = [c0] + [p[0].shape[0] for p in params]
    rows = _pick_rows_per_strip(h, w)

    x_cols = _im2col_input(x_nchw.astype(jnp.float32))        # (N, H*W, 9*C0) bf16

    flat_args = [x_cols]
    in_specs = [pl.BlockSpec((1, h * w, 9 * c0), lambda i: (i, 0, 0))]
    scratch_shapes = []
    for li, (w_t, b_t) in enumerate(params):
        cout, cin = w_t.shape[0], w_t.shape[1]
        flat_args.append(_to_im2col_w(w_t.astype(jnp.float32)))       # bf16 weights
        flat_args.append(b_t.astype(jnp.float32).reshape(1, cout))    # f32 bias
        in_specs.append(pl.BlockSpec((9 * cin, cout), lambda i: (0, 0)))
        in_specs.append(pl.BlockSpec((1, cout), lambda i: (0, 0)))
        if li > 0:  # padded bf16 scratch for this layer's input activation
            scratch_shapes.append(pltpu.VMEM((h + 2, w + 2, cin), jnp.bfloat16))

    kernel = functools.partial(_encdec_kernel, H=h, W=w,
                               n_layers=n_layers, rows_per_strip=rows)
    out = pl.pallas_call(
        kernel,
        out_shape=jax.ShapeDtypeStruct((n, c_out, h * w), jnp.float32),
        grid=(n,),
        in_specs=in_specs,
        out_specs=pl.BlockSpec((1, c_out, h * w), lambda i: (i, 0, 0)),
        scratch_shapes=scratch_shapes,
        compiler_params=pltpu.CompilerParams(
            dimension_semantics=("parallel",),
            vmem_limit_bytes=_vmem_limit_bytes(h, w, chans, rows)),
    )(*flat_args)
    # Kernel already emitted channel-major (NC, H*W); this reshape is free.
    return out.reshape(n, c_out, h, w)


def init_params(key, n_in_channels=3, n_hidden_layers=1, n_kernels=32,
                out_chan=3):
    """Synthetic weights in PyTorch Conv2d layout (Cout, Cin, 3, 3): 3->32->64->32->3."""
    chans = [n_in_channels, n_kernels]
    c = n_kernels
    for _ in range(n_hidden_layers):
        c *= 2
        chans.append(c)
    for _ in range(n_hidden_layers):
        c //= 2
        chans.append(c)
    chans.append(out_chan)

    params = []
    keys = jax.random.split(key, 2 * (len(chans) - 1))
    for i in range(len(chans) - 1):
        cin, cout = chans[i], chans[i + 1]
        w_t = jax.random.normal(keys[2 * i], (cout, cin, 3, 3), jnp.float32) * 0.1
        b_t = jax.random.normal(keys[2 * i + 1], (cout,), jnp.float32) * 0.1
        params.append((w_t, b_t))
    return params


def _reference(x_nchw, params):
    y = x_nchw
    for (w_t, b_t) in params:
        y = jax.lax.conv_general_dilated(
            y, w_t, window_strides=(1, 1), padding=((1, 1), (1, 1)),
            dimension_numbers=("NCHW", "OIHW", "NCHW"))
        y = jnp.maximum(y + b_t[None, :, None, None], 0.0)
    return y


if __name__ == "__main__":
    key = jax.random.PRNGKey(0)
    kx, kp = jax.random.split(key)
    # NCHW input like PyTorch; module defaults imply 3 input channels.
    x = jax.random.normal(kx, (2, 3, 16, 16), jnp.float32)
    params = init_params(kp)
    out = encdec_block_forward(x, params)
    jax.block_until_ready(out)
    assert out.shape == (2, 3, 16, 16), out.shape
    # Loose tolerance: bf16 MXU operands vs the f32 reference.
    ref = _reference(x, params)
    err = float(jnp.max(jnp.abs(out - ref)))
    scale = float(jnp.max(jnp.abs(ref))) + 1e-6
    assert err <= 0.08 * scale + 2e-2, (err, scale)
    print("KERNEL_OK")
</pallas_src>

<mosaic_0001>
module attributes {stable_mosaic.version = 11 : i64} {
  func.func @_encdec_kernel(%arg0: i32, %arg1: memref<1x256x27xbf16, #tpu.memory_space<vmem>>, %arg2: memref<27x32xbf16, #tpu.memory_space<vmem>>, %arg3: memref<1x32xf32, #tpu.memory_space<vmem>>, %arg4: memref<288x64xbf16, #tpu.memory_space<vmem>>, %arg5: memref<1x64xf32, #tpu.memory_space<vmem>>, %arg6: memref<576x32xbf16, #tpu.memory_space<vmem>>, %arg7: memref<1x32xf32, #tpu.memory_space<vmem>>, %arg8: memref<288x3xbf16, #tpu.memory_space<vmem>>, %arg9: memref<1x3xf32, #tpu.memory_space<vmem>>, %arg10: memref<1x3x256xf32, #tpu.memory_space<vmem>>, %arg11: memref<18x18x32xbf16, #tpu.memory_space<vmem>>, %arg12: memref<18x18x64xbf16, #tpu.memory_space<vmem>>, %arg13: memref<18x18x32xbf16, #tpu.memory_space<vmem>>) attributes {dimension_semantics = [#tpu.dimension_semantics<parallel>], iteration_bounds = array<i64: 2>, scalar_prefetch = 0 : i64, scratch_operands = 3 : i64, tpu.core_type = #tpu.core_type<tc>, window_params = [{transform_indices = @transform_0, window_bounds = array<i64: 1, 256, 27>}, {pipeline_mode = #tpu.pipeline_mode<synchronous>, transform_indices = @transform_1, window_bounds = array<i64: 27, 32>}, {pipeline_mode = #tpu.pipeline_mode<synchronous>, transform_indices = @transform_2, window_bounds = array<i64: 1, 32>}, {pipeline_mode = #tpu.pipeline_mode<synchronous>, transform_indices = @transform_3, window_bounds = array<i64: 288, 64>}, {pipeline_mode = #tpu.pipeline_mode<synchronous>, transform_indices = @transform_4, window_bounds = array<i64: 1, 64>}, {pipeline_mode = #tpu.pipeline_mode<synchronous>, transform_indices = @transform_5, window_bounds = array<i64: 576, 32>}, {pipeline_mode = #tpu.pipeline_mode<synchronous>, transform_indices = @transform_6, window_bounds = array<i64: 1, 32>}, {pipeline_mode = #tpu.pipeline_mode<synchronous>, transform_indices = @transform_7, window_bounds = array<i64: 288, 3>}, {pipeline_mode = #tpu.pipeline_mode<synchronous>, transform_indices = @transform_8, window_bounds = array<i64: 1, 3>}, {transform_indices = @transform_9, window_bounds = array<i64: 1, 3, 256>}]} {
    %cst = arith.constant 0.000000e+00 : bf16
    %0 = vector.broadcast %cst : bf16 to vector<1x18x32xbf16>
    %c0 = arith.constant 0 : index
    %c0_0 = arith.constant 0 : index
    %c0_1 = arith.constant 0 : index
    %1 = vector.load %arg11[%c0, %c0_0, %c0_1] : memref<18x18x32xbf16, #tpu.memory_space<vmem>>, vector<1x18x32xbf16>
    tpu.vector_store %arg11[%c0, %c0_0, %c0_1], %0 {strides = array<i32>} : memref<18x18x32xbf16, #tpu.memory_space<vmem>>, vector<1x18x32xbf16>,
    %c17 = arith.constant 17 : index
    %c0_2 = arith.constant 0 : index
    %c0_3 = arith.constant 0 : index
    %2 = vector.load %arg11[%c17, %c0_2, %c0_3] : memref<18x18x32xbf16, #tpu.memory_space<vmem>>, vector<1x18x32xbf16>
    tpu.vector_store %arg11[%c17, %c0_2, %c0_3], %0 {strides = array<i32>} : memref<18x18x32xbf16, #tpu.memory_space<vmem>>, vector<1x18x32xbf16>,
    %cst_4 = arith.constant 0.000000e+00 : bf16
    %3 = vector.broadcast %cst_4 : bf16 to vector<16x1x32xbf16>
    %c1 = arith.constant 1 : index
    %c0_5 = arith.constant 0 : index
    %c0_6 = arith.constant 0 : index
    %4 = vector.load %arg11[%c1, %c0_5, %c0_6] : memref<18x18x32xbf16, #tpu.memory_space<vmem>>, vector<16x1x32xbf16>
    tpu.vector_store %arg11[%c1, %c0_5, %c0_6], %3 {strides = array<i32>} : memref<18x18x32xbf16, #tpu.memory_space<vmem>>, vector<16x1x32xbf16>,
    %c1_7 = arith.constant 1 : index
    %c17_8 = arith.constant 17 : index
    %c0_9 = arith.constant 0 : index
    %5 = vector.load %arg11[%c1_7, %c17_8, %c0_9] : memref<18x18x32xbf16, #tpu.memory_space<vmem>>, vector<16x1x32xbf16>
    tpu.vector_store %arg11[%c1_7, %c17_8, %c0_9], %3 {strides = array<i32>} : memref<18x18x32xbf16, #tpu.memory_space<vmem>>, vector<16x1x32xbf16>,
    %cst_10 = arith.constant 0.000000e+00 : bf16
    %6 = vector.broadcast %cst_10 : bf16 to vector<1x18x64xbf16>
    %c0_11 = arith.constant 0 : index
    %c0_12 = arith.constant 0 : index
    %c0_13 = arith.constant 0 : index
    %7 = vector.load %arg12[%c0_11, %c0_12, %c0_13] : memref<18x18x64xbf16, #tpu.memory_space<vmem>>, vector<1x18x64xbf16>
    tpu.vector_store %arg12[%c0_11, %c0_12, %c0_13], %6 {strides = array<i32>} : memref<18x18x64xbf16, #tpu.memory_space<vmem>>, vector<1x18x64xbf16>,
    %c17_14 = arith.constant 17 : index
    %c0_15 = arith.constant 0 : index
    %c0_16 = arith.constant 0 : index
    %8 = vector.load %arg12[%c17_14, %c0_15, %c0_16] : memref<18x18x64xbf16, #tpu.memory_space<vmem>>, vector<1x18x64xbf16>
    tpu.vector_store %arg12[%c17_14, %c0_15, %c0_16], %6 {strides = array<i32>} : memref<18x18x64xbf16, #tpu.memory_space<vmem>>, vector<1x18x64xbf16>,
    %cst_17 = arith.constant 0.000000e+00 : bf16
    %9 = vector.broadcast %cst_17 : bf16 to vector<16x1x64xbf16>
    %c1_18 = arith.constant 1 : index
    %c0_19 = arith.constant 0 : index
    %c0_20 = arith.constant 0 : index
    %10 = vector.load %arg12[%c1_18, %c0_19, %c0_20] : memref<18x18x64xbf16, #tpu.memory_space<vmem>>, vector<16x1x64xbf16>
    tpu.vector_store %arg12[%c1_18, %c0_19, %c0_20], %9 {strides = array<i32>} : memref<18x18x64xbf16, #tpu.memory_space<vmem>>, vector<16x1x64xbf16>,
    %c1_21 = arith.constant 1 : index
    %c17_22 = arith.constant 17 : index
    %c0_23 = arith.constant 0 : index
    %11 = vector.load %arg12[%c1_21, %c17_22, %c0_23] : memref<18x18x64xbf16, #tpu.memory_space<vmem>>, vector<16x1x64xbf16>
    tpu.vector_store %arg12[%c1_21, %c17_22, %c0_23], %9 {strides = array<i32>} : memref<18x18x64xbf16, #tpu.memory_space<vmem>>, vector<16x1x64xbf16>,
    %cst_24 = arith.constant 0.000000e+00 : bf16
    %12 = vector.broadcast %cst_24 : bf16 to vector<1x18x32xbf16>
    %c0_25 = arith.constant 0 : index
    %c0_26 = arith.constant 0 : index
    %c0_27 = arith.constant 0 : index
    %13 = vector.load %arg13[%c0_25, %c0_26, %c0_27] : memref<18x18x32xbf16, #tpu.memory_space<vmem>>, vector<1x18x32xbf16>
    tpu.vector_store %arg13[%c0_25, %c0_26, %c0_27], %12 {strides = array<i32>} : memref<18x18x32xbf16, #tpu.memory_space<vmem>>, vector<1x18x32xbf16>,
    %c17_28 = arith.constant 17 : index
    %c0_29 = arith.constant 0 : index
    %c0_30 = arith.constant 0 : index
    %14 = vector.load %arg13[%c17_28, %c0_29, %c0_30] : memref<18x18x32xbf16, #tpu.memory_space<vmem>>, vector<1x18x32xbf16>
    tpu.vector_store %arg13[%c17_28, %c0_29, %c0_30], %12 {strides = array<i32>} : memref<18x18x32xbf16, #tpu.memory_space<vmem>>, vector<1x18x32xbf16>,
    %cst_31 = arith.constant 0.000000e+00 : bf16
    %15 = vector.broadcast %cst_31 : bf16 to vector<16x1x32xbf16>
    %c1_32 = arith.constant 1 : index
    %c0_33 = arith.constant 0 : index
    %c0_34 = arith.constant 0 : index
    %16 = vector.load %arg13[%c1_32, %c0_33, %c0_34] : memref<18x18x32xbf16, #tpu.memory_space<vmem>>, vector<16x1x32xbf16>
    tpu.vector_store %arg13[%c1_32, %c0_33, %c0_34], %15 {strides = array<i32>} : memref<18x18x32xbf16, #tpu.memory_space<vmem>>, vector<16x1x32xbf16>,
    %c1_35 = arith.constant 1 : index
    %c17_36 = arith.constant 17 : index
    %c0_37 = arith.constant 0 : index
    %17 = vector.load %arg13[%c1_35, %c17_36, %c0_37] : memref<18x18x32xbf16, #tpu.memory_space<vmem>>, vector<16x1x32xbf16>
    tpu.vector_store %arg13[%c1_35, %c17_36, %c0_37], %15 {strides = array<i32>} : memref<18x18x32xbf16, #tpu.memory_space<vmem>>, vector<16x1x32xbf16>,
    %c0_38 = arith.constant 0 : index
    %c0_39 = arith.constant 0 : index
    %c0_40 = arith.constant 0 : index
    %18 = vector.load %arg1[%c0_38, %c0_39, %c0_40] : memref<1x256x27xbf16, #tpu.memory_space<vmem>>, vector<1x256x27xbf16>
    %19 = vector.shape_cast %18 : vector<1x256x27xbf16> to vector<256x27xbf16>
    %c0_41 = arith.constant 0 : index
    %c0_42 = arith.constant 0 : index
    %20 = vector.load %arg2[%c0_41, %c0_42] : memref<27x32xbf16, #tpu.memory_space<vmem>>, vector<27x32xbf16>
    %cst_43 = arith.constant dense<0.000000e+00> : vector<256x32xf32>
    %21 = tpu.matmul %19, %20, %cst_43 {dimension_numbers = #tpu.dot_dimension_numbers<[1], [0], [0], [1], [0, 0, 1, 1], [], []>} : vector<256x27xbf16>, vector<27x32xbf16>, vector<256x32xf32> -> vector<256x32xf32>
    %c0_44 = arith.constant 0 : index
    %c0_45 = arith.constant 0 : index
    %22 = vector.load %arg3[%c0_44, %c0_45] : memref<1x32xf32, #tpu.memory_space<vmem>>, vector<1x32xf32>
    %23 = vector.broadcast %22 : vector<1x32xf32> to vector<256x32xf32>
    %24 = arith.addf %21, %23 : vector<256x32xf32>
    %cst_46 = arith.constant 0.000000e+00 : f32
    %25 = vector.broadcast %cst_46 : f32 to vector<256x32xf32>
    %26 = arith.maximumf %24, %25 : vector<256x32xf32>
    %27 = vector.shape_cast %26 : vector<256x32xf32> to vector<16x16x32xf32>
    %28 = arith.truncf %27 : vector<16x16x32xf32> to vector<16x16x32xbf16>
    %c1_47 = arith.constant 1 : index
    %c1_48 = arith.constant 1 : index
    %c0_49 = arith.constant 0 : index
    %29 = vector.load %arg11[%c1_47, %c1_48, %c0_49] : memref<18x18x32xbf16, #tpu.memory_space<vmem>>, vector<16x16x32xbf16>
    tpu.vector_store %arg11[%c1_47, %c1_48, %c0_49], %28 {strides = array<i32>} : memref<18x18x32xbf16, #tpu.memory_space<vmem>>, vector<16x16x32xbf16>,
    %c0_50 = arith.constant 0 : index
    %c0_51 = arith.constant 0 : index
    %c0_52 = arith.constant 0 : index
    %30 = vector.load %arg11[%c0_50, %c0_51, %c0_52] : memref<18x18x32xbf16, #tpu.memory_space<vmem>>, vector<18x16x32xbf16>
    %c0_53 = arith.constant 0 : index
    %c1_54 = arith.constant 1 : index
    %c0_55 = arith.constant 0 : index
    %31 = vector.load %arg11[%c0_53, %c1_54, %c0_55] : memref<18x18x32xbf16, #tpu.memory_space<vmem>>, vector<18x16x32xbf16>
    %c0_56 = arith.constant 0 : index
    %c2 = arith.constant 2 : index
    %c0_57 = arith.constant 0 : index
    %32 = vector.load %arg11[%c0_56, %c2, %c0_57] : memref<18x18x32xbf16, #tpu.memory_space<vmem>>, vector<18x16x32xbf16>
    %33 = tpu.concatenate %30, %31, %32 in 2 : vector<18x16x32xbf16>, vector<18x16x32xbf16>, vector<18x16x32xbf16> -> vector<18x16x96xbf16>
    %34 = vector.extract_strided_slice %33 {offsets = [0, 0, 0], sizes = [16, 16, 96], strides = [1, 1, 1]} : vector<18x16x96xbf16> to vector<16x16x96xbf16>
    %35 = vector.shape_cast %34 : vector<16x16x96xbf16> to vector<256x96xbf16>
    %36 = vector.extract_strided_slice %33 {offsets = [1, 0, 0], sizes = [16, 16, 96], strides = [1, 1, 1]} : vector<18x16x96xbf16> to vector<16x16x96xbf16>
    %37 = vector.shape_cast %36 : vector<16x16x96xbf16> to vector<256x96xbf16>
    %38 = vector.extract_strided_slice %33 {offsets = [2, 0, 0], sizes = [16, 16, 96], strides = [1, 1, 1]} : vector<18x16x96xbf16> to vector<16x16x96xbf16>
    %39 = vector.shape_cast %38 : vector<16x16x96xbf16> to vector<256x96xbf16>
    %40 = tpu.concatenate %35, %37, %39 in 1 : vector<256x96xbf16>, vector<256x96xbf16>, vector<256x96xbf16> -> vector<256x288xbf16>
    %c0_58 = arith.constant 0 : index
    %c0_59 = arith.constant 0 : index
    %41 = vector.load %arg4[%c0_58, %c0_59] : memref<288x64xbf16, #tpu.memory_space<vmem>>, vector<288x64xbf16>
    %cst_60 = arith.constant dense<0.000000e+00> : vector<256x64xf32>
    %42 = tpu.matmul %40, %41, %cst_60 {dimension_numbers = #tpu.dot_dimension_numbers<[1], [0], [0], [1], [0, 0, 1, 1], [], []>} : vector<256x288xbf16>, vector<288x64xbf16>, vector<256x64xf32> -> vector<256x64xf32>
    %c0_61 = arith.constant 0 : index
    %c0_62 = arith.constant 0 : index
    %43 = vector.load %arg5[%c0_61, %c0_62] : memref<1x64xf32, #tpu.memory_space<vmem>>, vector<1x64xf32>
    %44 = vector.broadcast %43 : vector<1x64xf32> to vector<256x64xf32>
    %45 = arith.addf %42, %44 : vector<256x64xf32>
    %cst_63 = arith.constant 0.000000e+00 : f32
    %46 = vector.broadcast %cst_63 : f32 to vector<256x64xf32>
    %47 = arith.maximumf %45, %46 : vector<256x64xf32>
    %48 = vector.shape_cast %47 : vector<256x64xf32> to vector<16x16x64xf32>
    %49 = arith.truncf %48 : vector<16x16x64xf32> to vector<16x16x64xbf16>
    %c1_64 = arith.constant 1 : index
    %c1_65 = arith.constant 1 : index
    %c0_66 = arith.constant 0 : index
    %50 = vector.load %arg12[%c1_64, %c1_65, %c0_66] : memref<18x18x64xbf16, #tpu.memory_space<vmem>>, vector<16x16x64xbf16>
    tpu.vector_store %arg12[%c1_64, %c1_65, %c0_66], %49 {strides = array<i32>} : memref<18x18x64xbf16, #tpu.memory_space<vmem>>, vector<16x16x64xbf16>,
    %c0_67 = arith.constant 0 : index
    %c0_68 = arith.constant 0 : index
    %c0_69 = arith.constant 0 : index
    %51 = vector.load %arg12[%c0_67, %c0_68, %c0_69] : memref<18x18x64xbf16, #tpu.memory_space<vmem>>, vector<18x16x64xbf16>
    %c0_70 = arith.constant 0 : index
    %c1_71 = arith.constant 1 : index
    %c0_72 = arith.constant 0 : index
    %52 = vector.load %arg12[%c0_70, %c1_71, %c0_72] : memref<18x18x64xbf16, #tpu.memory_space<vmem>>, vector<18x16x64xbf16>
    %c0_73 = arith.constant 0 : index
    %c2_74 = arith.constant 2 : index
    %c0_75 = arith.constant 0 : index
    %53 = vector.load %arg12[%c0_73, %c2_74, %c0_75] : memref<18x18x64xbf16, #tpu.memory_space<vmem>>, vector<18x16x64xbf16>
    %54 = tpu.concatenate %51, %52, %53 in 2 : vector<18x16x64xbf16>, vector<18x16x64xbf16>, vector<18x16x64xbf16> -> vector<18x16x192xbf16>
    %55 = vector.extract_strided_slice %54 {offsets = [0, 0, 0], sizes = [16, 16, 192], strides = [1, 1, 1]} : vector<18x16x192xbf16> to vector<16x16x192xbf16>
    %56 = vector.shape_cast %55 : vector<16x16x192xbf16> to vector<256x192xbf16>
    %57 = vector.extract_strided_slice %54 {offsets = [1, 0, 0], sizes = [16, 16, 192], strides = [1, 1, 1]} : vector<18x16x192xbf16> to vector<16x16x192xbf16>
    %58 = vector.shape_cast %57 : vector<16x16x192xbf16> to vector<256x192xbf16>
    %59 = vector.extract_strided_slice %54 {offsets = [2, 0, 0], sizes = [16, 16, 192], strides = [1, 1, 1]} : vector<18x16x192xbf16> to vector<16x16x192xbf16>
    %60 = vector.shape_cast %59 : vector<16x16x192xbf16> to vector<256x192xbf16>
    %61 = tpu.concatenate %56, %58, %60 in 1 : vector<256x192xbf16>, vector<256x192xbf16>, vector<256x192xbf16> -> vector<256x576xbf16>
    %c0_76 = arith.constant 0 : index
    %c0_77 = arith.constant 0 : index
    %62 = vector.load %arg6[%c0_76, %c0_77] : memref<576x32xbf16, #tpu.memory_space<vmem>>, vector<576x32xbf16>
    %cst_78 = arith.constant dense<0.000000e+00> : vector<256x32xf32>
    %63 = tpu.matmul %61, %62, %cst_78 {dimension_numbers = #tpu.dot_dimension_numbers<[1], [0], [0], [1], [0, 0, 1, 1], [], []>} : vector<256x576xbf16>, vector<576x32xbf16>, vector<256x32xf32> -> vector<256x32xf32>
    %c0_79 = arith.constant 0 : index
    %c0_80 = arith.constant 0 : index
    %64 = vector.load %arg7[%c0_79, %c0_80] : memref<1x32xf32, #tpu.memory_space<vmem>>, vector<1x32xf32>
    %65 = vector.broadcast %64 : vector<1x32xf32> to vector<256x32xf32>
    %66 = arith.addf %63, %65 : vector<256x32xf32>
    %cst_81 = arith.constant 0.000000e+00 : f32
    %67 = vector.broadcast %cst_81 : f32 to vector<256x32xf32>
    %68 = arith.maximumf %66, %67 : vector<256x32xf32>
    %69 = vector.shape_cast %68 : vector<256x32xf32> to vector<16x16x32xf32>
    %70 = arith.truncf %69 : vector<16x16x32xf32> to vector<16x16x32xbf16>
    %c1_82 = arith.constant 1 : index
    %c1_83 = arith.constant 1 : index
    %c0_84 = arith.constant 0 : index
    %71 = vector.load %arg13[%c1_82, %c1_83, %c0_84] : memref<18x18x32xbf16, #tpu.memory_space<vmem>>, vector<16x16x32xbf16>
    tpu.vector_store %arg13[%c1_82, %c1_83, %c0_84], %70 {strides = array<i32>} : memref<18x18x32xbf16, #tpu.memory_space<vmem>>, vector<16x16x32xbf16>,
    %c0_85 = arith.constant 0 : index
    %c0_86 = arith.constant 0 : index
    %c0_87 = arith.constant 0 : index
    %72 = vector.load %arg13[%c0_85, %c0_86, %c0_87] : memref<18x18x32xbf16, #tpu.memory_space<vmem>>, vector<18x16x32xbf16>
    %c0_88 = arith.constant 0 : index
    %c1_89 = arith.constant 1 : index
    %c0_90 = arith.constant 0 : index
    %73 = vector.load %arg13[%c0_88, %c1_89, %c0_90] : memref<18x18x32xbf16, #tpu.memory_space<vmem>>, vector<18x16x32xbf16>
    %c0_91 = arith.constant 0 : index
    %c2_92 = arith.constant 2 : index
    %c0_93 = arith.constant 0 : index
    %74 = vector.load %arg13[%c0_91, %c2_92, %c0_93] : memref<18x18x32xbf16, #tpu.memory_space<vmem>>, vector<18x16x32xbf16>
    %75 = tpu.concatenate %72, %73, %74 in 2 : vector<18x16x32xbf16>, vector<18x16x32xbf16>, vector<18x16x32xbf16> -> vector<18x16x96xbf16>
    %76 = vector.extract_strided_slice %75 {offsets = [0, 0, 0], sizes = [16, 16, 96], strides = [1, 1, 1]} : vector<18x16x96xbf16> to vector<16x16x96xbf16>
    %77 = vector.shape_cast %76 : vector<16x16x96xbf16> to vector<256x96xbf16>
    %78 = vector.extract_strided_slice %75 {offsets = [1, 0, 0], sizes = [16, 16, 96], strides = [1, 1, 1]} : vector<18x16x96xbf16> to vector<16x16x96xbf16>
    %79 = vector.shape_cast %78 : vector<16x16x96xbf16> to vector<256x96xbf16>
    %80 = vector.extract_strided_slice %75 {offsets = [2, 0, 0], sizes = [16, 16, 96], strides = [1, 1, 1]} : vector<18x16x96xbf16> to vector<16x16x96xbf16>
    %81 = vector.shape_cast %80 : vector<16x16x96xbf16> to vector<256x96xbf16>
    %82 = tpu.concatenate %77, %79, %81 in 1 : vector<256x96xbf16>, vector<256x96xbf16>, vector<256x96xbf16> -> vector<256x288xbf16>
    %c0_94 = arith.constant 0 : index
    %c0_95 = arith.constant 0 : index
    %83 = vector.load %arg8[%c0_94, %c0_95] : memref<288x3xbf16, #tpu.memory_space<vmem>>, vector<288x3xbf16>
    %cst_96 = arith.constant dense<0.000000e+00> : vector<256x3xf32>
    %84 = tpu.matmul %82, %83, %cst_96 {dimension_numbers = #tpu.dot_dimension_numbers<[1], [0], [0], [1], [0, 0, 1, 1], [], []>} : vector<256x288xbf16>, vector<288x3xbf16>, vector<256x3xf32> -> vector<256x3xf32>
    %c0_97 = arith.constant 0 : index
    %c0_98 = arith.constant 0 : index
    %85 = vector.load %arg9[%c0_97, %c0_98] : memref<1x3xf32, #tpu.memory_space<vmem>>, vector<1x3xf32>
    %86 = vector.broadcast %85 : vector<1x3xf32> to vector<256x3xf32>
    %87 = arith.addf %84, %86 : vector<256x3xf32>
    %cst_99 = arith.constant 0.000000e+00 : f32
    %88 = vector.broadcast %cst_99 : f32 to vector<256x3xf32>
    %89 = arith.maximumf %87, %88 : vector<256x3xf32>
    %90 = tpu.transpose %89, [1, 0] : vector<256x3xf32> -> vector<3x256xf32>
    %91 = vector.shape_cast %90 : vector<3x256xf32> to vector<1x3x256xf32>
    %c0_100 = arith.constant 0 : index
    %c0_101 = arith.constant 0 : index
    %c0_102 = arith.constant 0 : index
    %92 = vector.load %arg10[%c0_100, %c0_101, %c0_102] : memref<1x3x256xf32, #tpu.memory_space<vmem>>, vector<1x3x256xf32>
    tpu.vector_store %arg10[%c0_100, %c0_101, %c0_102], %91 {strides = array<i32>} : memref<1x3x256xf32, #tpu.memory_space<vmem>>, vector<1x3x256xf32>,
    return
  }
  func.func @transform_0(%arg0: i32) -> (i32, i32, i32) {
    %c0_i32 = arith.constant 0 : i32
    %c0_i32_0 = arith.constant 0 : i32
    %c0_i32_1 = arith.constant 0 : i32
    return %arg0, %c0_i32, %c0_i32_0 : i32, i32, i32
  }
  func.func @transform_1(%arg0: i32) -> (i32, i32) {
    %c0_i32 = arith.constant 0 : i32
    %c0_i32_0 = arith.constant 0 : i32
    %c0_i32_1 = arith.constant 0 : i32
    return %c0_i32, %c0_i32_0 : i32, i32
  }
  func.func @transform_2(%arg0: i32) -> (i32, i32) {
    %c0_i32 = arith.constant 0 : i32
    %c0_i32_0 = arith.constant 0 : i32
    %c0_i32_1 = arith.constant 0 : i32
    return %c0_i32, %c0_i32_0 : i32, i32
  }
  func.func @transform_3(%arg0: i32) -> (i32, i32) {
    %c0_i32 = arith.constant 0 : i32
    %c0_i32_0 = arith.constant 0 : i32
    %c0_i32_1 = arith.constant 0 : i32
    return %c0_i32, %c0_i32_0 : i32, i32
  }
  func.func @transform_4(%arg0: i32) -> (i32, i32) {
    %c0_i32 = arith.constant 0 : i32
    %c0_i32_0 = arith.constant 0 : i32
    %c0_i32_1 = arith.constant 0 : i32
    return %c0_i32, %c0_i32_0 : i32, i32
  }
  func.func @transform_5(%arg0: i32) -> (i32, i32) {
    %c0_i32 = arith.constant 0 : i32
    %c0_i32_0 = arith.constant 0 : i32
    %c0_i32_1 = arith.constant 0 : i32
    return %c0_i32, %c0_i32_0 : i32, i32
  }
  func.func @transform_6(%arg0: i32) -> (i32, i32) {
    %c0_i32 = arith.constant 0 : i32
    %c0_i32_0 = arith.constant 0 : i32
    %c0_i32_1 = arith.constant 0 : i32
    return %c0_i32, %c0_i32_0 : i32, i32
  }
  func.func @transform_7(%arg0: i32) -> (i32, i32) {
    %c0_i32 = arith.constant 0 : i32
    %c0_i32_0 = arith.constant 0 : i32
    %c0_i32_1 = arith.constant 0 : i32
    return %c0_i32, %c0_i32_0 : i32, i32
  }
  func.func @transform_8(%arg0: i32) -> (i32, i32) {
    %c0_i32 = arith.constant 0 : i32
    %c0_i32_0 = arith.constant 0 : i32
    %c0_i32_1 = arith.constant 0 : i32
    return %c0_i32, %c0_i32_0 : i32, i32
  }
  func.func @transform_9(%arg0: i32) -> (i32, i32, i32) {
    %c0_i32 = arith.constant 0 : i32
    %c0_i32_0 = arith.constant 0 : i32
    %c0_i32_1 = arith.constant 0 : i32
    return %arg0, %c0_i32, %c0_i32_0 : i32, i32, i32
  }
}

</mosaic_0001>

<bundles_post_ra>
// kernel: encdec_block_forward.1
= control target key start
LH: loop header
LB: loop body
LE: loop exit
PB: predicated region body
PF: predicated region fallthrough
CT: control target
= control target key end

     0   :  { %s7694_s30 = smov 0   ;;  %s10367_s0 = inlined_call_operand.vmem [shape: bf16[2,256,27], index: 0, kind: input, shape index: {}]   ;;  %s10368_s1 = inlined_call_operand.vmem [shape: bf16[27,32], index: 1, kind: input, shape index: {}]   ;;  %s10369_s2 = inlined_call_operand.vmem [shape: f32[1,32], index: 2, kind: input, shape index: {}]   ;;  %s10370_s3 = inlined_call_operand.vmem [shape: bf16[288,64], index: 3, kind: input, shape index: {}]   ;;  %s10371_s4 = inlined_call_operand.vmem [shape: f32[1,64], index: 4, kind: input, shape index: {}]   ;;  %s10372_s5 = inlined_call_operand.vmem [shape: bf16[576,32], index: 5, kind: input, shape index: {}]   ;;  %s10373_s6 = inlined_call_operand.vmem [shape: f32[1,32], index: 6, kind: input, shape index: {}]   ;;  %s10374_s7 = inlined_call_operand.vmem [shape: bf16[288,3], index: 7, kind: input, shape index: {}]   ;;  %s10375_s8 = inlined_call_operand.vmem [shape: f32[1,3], index: 8, kind: input, shape index: {}]   ;;  %s10376_s9 = inlined_call_operand.vmem [shape: f32[2,3,256], index: 9, kind: output, shape index: {}]  }
   0x1 LB: > { %s6785_s10 = sadd.s32 4294967295, %s7637_s30   ;;  %p6789_p0 = scmp.ge.s32.totalorder %s7637_s30, 1  ;;  %s7637_s30 = sphi %s7694_s30, %s19_s30  }
   0x2   : > { %p287_p1 = scmp.lt.s32.totalorder %s7637_s30, 3 }
   0x4   : > { %p288_p2 = pnand %p6789_p0, %p287_p1 }
   0x6   : > { %291 = sbr.rel (%p288_p2) target bundleno = 2214 (0x8a6), region = 56 }
   0xb   : > { %v6864_v0 = vld [vmem:[%s10368_s1 + $0x8] sm:$0xf]  ;;  %v7239_v1 = vld [vmem:[%s10368_s1 + $0x8] sm:$0x30]  ;;  %vm838_vm0 = vcmask 1044480   ;;  %vm839_vm1 = vcmask 1045504  }
   0xc   : > { %v6865_v2 = vor.u32 %v7239_v1, %v6864_v0  ;;  %p323_p3 = scmp.lt.s32.totalorder %s6785_s10, 1  ;;  %v7639_v3 = vmov 65535   ;;  %v7238_v7 = vld [vmem:[%s10368_s1] sm:$0xff]  ;;  %vm789_vm2 = vcmask 220160   ;;  %vm337_vm3 = vcmask 253952   ;;  %s7640_s23 = smov 64  }
   0xd   : > { %v840_v4 = vsel %vm838_vm0, 4294967295, %v7639_v3  ;;  %vm345_vm4 = vsmask.f32 256  ;;  %v347_v12 = vld [vmem:[#allocation2 + $0xc] sm:$0x1]  ;;  %vm334_vm8 = vcmask 257024  }
   0xe   : > { %v841_v5 = vsel %vm839_vm1, %v840_v4, 0  ;;  %s10416_s10 = smov (!%p323_p3, %s6785_s10), 1  ;;  %vm7729_vm5 = vmand %vm337_vm3, %vm345_vm4  ;;  %vm395_vm6 = vsmask.f32 7938  ;;  %v397_v17 = vld [vmem:[#allocation2 + $0x14] sm:$0x1] }
   0xf   : > { %v843_v6 = vand.u32 %v6865_v2, %v841_v5  ;;  %s7220_s15 = sshll.u32 %s10416_s10, 7  ;;  %v348_v14 = vsel %vm7729_vm5, 0, %v347_v12  ;;  %vm7741_vm7 = vmand %vm337_vm3, %vm395_vm6  ;;  %v350_v20 = vld [vmem:[#allocation2 + $0x18] sm:$0x1]  ;;  %v400_v23 = vld [vmem:[#allocation2 + $0x20] sm:$0x1] }
  0x10   : > { %s7717_s20 = scalar_lea.vmem %s10367_s0, %s7220_s15  ;;  %349 = vst [vmem:[#allocation2 + $0xc] sm:$0x1] %v348_v14  ;;  %v398_v19 = vsel %vm7741_vm7, 0, %v397_v17  ;;  %v351_v21 = vsel %vm7729_vm5, 0, %v350_v20  ;;  %v7754_v24 = vld [vmem:[%s10369_s2] ss:$0 sm:$0xff]  ;;  %vm7764_vm9 = vmand %vm334_vm8, %vm395_vm6 }
  0x11   : > { %851 = vmatpush.bf16.msra.mxu0 %v843_v6  ;;  %v7222_v8 = vld [vmem:[%s7717_s20] sm:$0xff]  ;;  %v7223_v9 = vld [vmem:[%s7717_s20 + $0x8] sm:$0xff]  ;;  %v7224_v10 = vld [vmem:[%s7717_s20 + $0x10] sm:$0xff]  ;;  %399 = vst [vmem:[#allocation2 + $0x14] sm:$0x1] %v398_v19  ;;  %v401_v25 = vsel %vm7741_vm7, 0, %v400_v23 }
  0x12   : > { %v7225_v11 = vld [vmem:[%s7717_s20 + $0x18] sm:$0xff]  ;;  %v7226_v15 = vld [vmem:[%s7717_s20 + $0x20] sm:$0xff]  ;;  %v7227_v16 = vld [vmem:[%s7717_s20 + $0x28] sm:$0xff]  ;;  %352 = vst [vmem:[#allocation2 + $0x18] sm:$0x1] %v351_v21  ;;  %vm1957_vm12 = vcmask 1046528  }
  0x13   : > { %v7228_v22 = vld [vmem:[%s7717_s20 + $0x30] sm:$0xff]  ;;  %402 = vst [vmem:[#allocation2 + $0x20] sm:$0x1] %v401_v25  ;;  %v353_v31 = vld [vmem:[#allocation2 + $0x24] sm:$0x1]  ;;  %v7229_v44 = vld [vmem:[%s7717_s20 + $0x38] sm:$0xff] }
  0x14   : > { %v354_v33 = vsel %vm7729_vm5, 0, %v353_v31  ;;  %v403_v43 = vld [vmem:[#allocation2 + $0x2c] sm:$0x1]  ;;  %vm998_vm10 = vsmask.f32 4368  ;;  %s7641_s24 = smov 32  }
  0x15   : > { %852 = vmatpush.bf16.msra.mxu0 %v7238_v7  ;;  %355 = vst [vmem:[#allocation2 + $0x24] sm:$0x1] %v354_v33  ;;  %v404_v46 = vsel %vm7741_vm7, 0, %v403_v43  ;;  %vm7776_vm11 = vmor %vm345_vm4, %vm998_vm10  ;;  %v356_v62 = vld [vmem:[#allocation2 + $0x30] sm:$0x1]  ;;  %vm2048_vm14 = vcmask 261120  }
  0x16   : > { %405 = vst [vmem:[#allocation2 + $0x2c] sm:$0x1] %v404_v46  ;;  %v357_v2 = vsel %vm7729_vm5, 0, %v356_v62  ;;  %vm1650_vm13 = vsmask.f32 7424  ;;  %vm2085_vm15 = vcmask 523264  }
  0x17   : > { %v1322_v38 = vld [vmem:[#allocation2 + $0xc] sm:$0xf]  ;;  %358 = vst [vmem:[#allocation2 + $0x30] sm:$0x1] %v357_v2  ;;  %v359_v46 = vld [vmem:[#allocation2 + $0x3c] sm:$0x1] }
  0x18   : > { %6866 = vmatmul.msk.bf16.vlgmr.msra.gmra.mxu0 %vm789_vm2, %v7222_v8  ;;  %v1326_v52 = vld [vmem:[#allocation2 + $0x14] sm:$0x1]  ;;  %s7643_s25 = smov 96   ;;  %vm2203_vm0 = vcmask 785408   ;;  %vm448_vm1 = vcmask 516096  }
  0x19   : > { %v1329_v3 = vld [vmem:[#allocation2 + $0x18] sm:$0xf] }
  0x28   : > { %6867 = vmatmul.msk.bf16.gmra.mxu0 %vm789_vm2, %v7223_v9 }
  0x38   : > { %6868 = vmatmul.msk.bf16.gmra.mxu0 %vm789_vm2, %v7224_v10 }
  0x48   : > { %6869 = vmatmul.msk.bf16.gmra.mxu0 %vm789_vm2, %v7225_v11  ;;  %v406_v11 = vld [vmem:[#allocation2 + $0x38] sm:$0x1] }
  0x49   : > { %v407_v14 = vsel %vm7741_vm7, 0, %v406_v11  ;;  %v1340_v11 = vld [vmem:[#allocation2 + $0x2c] sm:$0x1] }
  0x4a   : > { %408 = vst [vmem:[#allocation2 + $0x38] sm:$0x1] %v407_v14 }
  0x58   : > { %6870 = vmatmul.msk.bf16.gmra.mxu0 %vm789_vm2, %v7226_v15  ;;  %v7230_v15 = vld [vmem:[%s7717_s20 + $0x40] sm:$0xff] }
  0x68   : > { %6871 = vmatmul.msk.bf16.gmra.mxu0 %vm789_vm2, %v7227_v16 }
  0x78   : > { %6872 = vmatmul.msk.bf16.gmra.mxu0 %vm789_vm2, %v7228_v22 }
  0x88   : > { %6873 = vmatmul.msk.bf16.gmra.mxu0 %vm789_vm2, %v7229_v44 }
  0x95   : > { %v854_v26 = vpop.f32.mrf.mxu0 }
  0x96   : > { %v855_v27 = vadd.f32 %v7754_v24, %v854_v26 }
  0x98   : > { %v934_v28 = vmax.f32 %v855_v27, 0.0  ;;  %6874 = vmatmul.msk.bf16.gmra.mxu0 %vm789_vm2, %v7230_v15  ;;  %v1333_v27 = vld [vmem:[#allocation2 + $0x20] sm:$0x1] }
  0x9a   : > { %v966_v29 = vpack.c.bf16 %v934_v28, %v934_v28 }
  0x9c   : > { %v1001_v30 = vshrl.u32 %v966_v29, 16  ;;  %v1004_v35 = vshll.u32 %v966_v29, 16 }
  0x9d   : > { %v856_v32 = vpop.f32.mrf.mxu0 }
  0x9e   : > { %v1003_v34 = vrot.slane %v1001_v30, 7  ;;  %v857_v36 = vadd.f32 %v7754_v24, %v856_v32 }
  0xa0   : > { %v1006_v39 = vor.u32 %v1004_v35, %v1003_v34  ;;  %v935_v40 = vmax.f32 %v857_v36, 0.0  ;;  %v1007_v53 = vrot.slane %v1003_v34, 4 }
  0xa2   : > { %v1323_v41 = vsel %vm7764_vm9, %v1006_v39, %v1322_v38  ;;  %v967_v42 = vpack.c.bf16 %v935_v40, %v935_v40 }
  0xa3   : > { %1324 = vst [vmem:[#allocation2 + $0xc] sm:$0xf] %v1323_v41 }
  0xa4   : > { %v1009_v45 = vshrl.u32 %v967_v42, 16  ;;  %v1012_v49 = vshll.u32 %v967_v42, 16 }
  0xa5   : > { %v859_v47 = vpop.f32.mrf.mxu0 }
  0xa6   : > { %v1011_v48 = vrot.slane %v1009_v45, 7  ;;  %v860_v50 = vadd.f32 %v7754_v24, %v859_v47 }
  0xa8   : > { %v1014_v54 = vor.u32 %v1012_v49, %v1011_v48  ;;  %v1016_v55 = vrot.slane %v1011_v48, 4  ;;  %v936_v56 = vmax.f32 %v860_v50, 0.0  ;;  %v360_v49 = vsel %vm7729_vm5, 0, %v359_v46  ;;  %v412_v46 = vld [vmem:[#allocation2 + $0x50] sm:$0x1] }
  0xa9   : > { %361 = vst [vmem:[#allocation2 + $0x3c] sm:$0x1] %v360_v49 }
  0xaa   : > { %v1015_v57 = vsel %vm7776_vm11, %v1007_v53, %v1014_v54  ;;  %v1327_v58 = vsel %vm7729_vm5, %v1016_v55, %v1326_v52  ;;  %v968_v59 = vpack.c.bf16 %v936_v56, %v936_v56  ;;  %v7621_v6 = vld [vmem:[#allocation2 + $0xc] sm:$0xe]  ;;  %v1336_v53 = vld [vmem:[#allocation2 + $0x24] sm:$0xf] }
  0xab   : > { %1325 = vst.msk [vmem:[#allocation2 + $0x10] sm:$0xf] %vm334_vm8, %v1015_v57 }
  0xac   : > { %1328 = vst [vmem:[#allocation2 + $0x14] sm:$0x1] %v1327_v58  ;;  %v1018_v60 = vshrl.u32 %v968_v59, 16  ;;  %v1021_v0 = vshll.u32 %v968_v59, 16 }
  0xad   : > { %v861_v61 = vpop.f32.mrf.mxu0 }
  0xae   : > { %v1020_v63 = vrot.slane %v1018_v60, 7  ;;  %v862_v1 = vadd.f32 %v7754_v24, %v861_v61 }
  0xb0   : > { %v1023_v4 = vor.u32 %v1021_v0, %v1020_v63  ;;  %v937_v5 = vmax.f32 %v862_v1, 0.0  ;;  %v1024_v26 = vrot.slane %v1020_v63, 4 }
  0xb2   : > { %v1330_v7 = vsel %vm7764_vm9, %v1023_v4, %v1329_v3  ;;  %v969_v8 = vpack.c.bf16 %v937_v5, %v937_v5  ;;  %v7790_v9 = vld [vmem:[#allocation2 + $0xc] sm:$0xff]   ;;  %v409_v3 = vld [vmem:[#allocation2 + $0x44] sm:$0x1] }
  0xb3   : > { %v7620_v10 = vld [vmem:[#allocation2 + $0xc] sm:$0xf0]  ;;  %1331 = vst [vmem:[#allocation2 + $0x18] sm:$0xf] %v1330_v7  ;;  %v1471_v12 = vld [vmem:[#allocation2 + $0x14] sm:$0x1] }
  0xb4   : > { %v1026_v16 = vshrl.u32 %v969_v8, 16  ;;  %v1615_v17 = vunpack.c.l.b16 %v1471_v12  ;;  %v7622_v20 = vor.u32 %v7621_v6, %v7620_v10  ;;  %v1029_v22 = vshll.u32 %v969_v8, 16 }
  0xb5   : > { %v864_v19 = vpop.f32.mrf.mxu0  ;;  %v1666_v29 = vshll.u32 %v7790_v9, 16  ;;  %v1664_v34 = vshrl.u32 %v7790_v9, 16  ;;  %v410_v5 = vsel %vm7741_vm7, 0, %v409_v3 }
  0xb6   : > { %v1028_v21 = vrot.slane %v1026_v16, 7  ;;  %v865_v23 = vadd.f32 %v7754_v24, %v864_v19  ;;  %v1633_v25 = vpack.c.b16 %v1615_v17, %v1615_v17  ;;  %v1961_v28 = vrot.slane %v7622_v20, 1  ;;  %411 = vst [vmem:[#allocation2 + $0x44] sm:$0x1] %v410_v5 }
  0xb7   : > { %v1668_v35 = vrot.slane %v1666_v29, 1 }
  0xb8   : > { %v1031_v30 = vor.u32 %v1029_v22, %v1028_v21  ;;  %v1033_v31 = vrot.slane %v1028_v21, 4  ;;  %v938_v32 = vmax.f32 %v865_v23, 0.0  ;;  %v1962_v33 = vrot.slane %v1633_v25, 1 }
  0xb9   : > { %v1671_v36 = vshll.u32 %v1633_v25, 16  ;;  %v1669_v42 = vor.u32 %v1668_v35, %v1664_v34 }
  0xba   : > { %v1032_v38 = vsel %vm7776_vm11, %v1024_v26, %v1031_v30  ;;  %v1334_v39 = vsel %vm7729_vm5, %v1033_v31, %v1333_v27  ;;  %v970_v40 = vpack.c.bf16 %v938_v32, %v938_v32  ;;  %v1963_v41 = vsel %vm1957_vm12, %v1961_v28, %v1962_v33  ;;  %v7432_v59 = vld [vmem:[#allocation2 + $0x18] sm:$0xe]  ;;  %v362_v31 = vld [vmem:[#allocation2 + $0x48] sm:$0x1] }
  0xbb   : > { %1332 = vst.msk [vmem:[#allocation2 + $0x1c] sm:$0xf] %vm334_vm8, %v1032_v38  ;;  %2014 = vrot.lane.b32.xlu1 %v1963_v41, %s7640_s23  ;;  %v1673_v43 = vrot.slane %v1671_v36, 1  ;;  %v363_v34 = vsel %vm7729_vm5, 0, %v362_v31  ;;  %v1343_v38 = vld [vmem:[#allocation2 + $0x30] sm:$0xf] }
  0xbc   : > { %1335 = vst [vmem:[#allocation2 + $0x20] sm:$0x1] %v1334_v39  ;;  %v1035_v44 = vshrl.u32 %v970_v40, 16  ;;  %v1038_v45 = vshll.u32 %v970_v40, 16  ;;  %v7642_v39 = vmov 0  }
  0xbd   : > { %v866_v47 = vpop.f32.mrf.mxu0  ;;  %v1674_v48 = vsel %vm1650_vm13, %v1669_v42, %v1673_v43  ;;  %364 = vst [vmem:[#allocation2 + $0x48] sm:$0x1] %v363_v34 }
  0xbe   : > { %v1037_v50 = vrot.slane %v1035_v44, 7  ;;  %v867_v52 = vadd.f32 %v7754_v24, %v866_v47  ;;  %1869 = vrot.lane.b32.xlu0 %v1674_v48, %s7641_s24  ;;  %335 = vst.msk [vmem:[#allocation2] sm:$0xf] %vm334_vm8, %v7642_v39  ;;  %v413_v48 = vsel %vm7741_vm7, 0, %v412_v46 }
  0xbf   : > { %336 = vst.msk [vmem:[#allocation2 + $0x4] sm:$0xf] %vm334_vm8, %v7642_v39 }
  0xc0   : > { %v1040_v54 = vor.u32 %v1038_v45, %v1037_v50  ;;  %v939_v55 = vmax.f32 %v867_v52, 0.0  ;;  %v1041_v6 = vrot.slane %v1037_v50, 4  ;;  %338 = vst.msk [vmem:[#allocation2 + $0x8] sm:$0x1] %vm337_vm3, %v7642_v39 }
  0xc1   : > { %340 = vst.msk [vmem:[#allocation2 + $0xcc] sm:$0xf] %vm334_vm8, %v7642_v39 }
  0xc2   : > { %v1337_v56 = vsel %vm7764_vm9, %v1040_v54, %v1336_v53  ;;  %v971_v57 = vpack.c.bf16 %v939_v55, %v939_v55  ;;  %v7431_v58 = vld [vmem:[#allocation2 + $0x18] sm:$0xf0]  ;;  %414 = vst [vmem:[#allocation2 + $0x50] sm:$0x1] %v413_v48 }
  0xc3   : > { %v7813_v60 = vld [vmem:[#allocation2 + $0x18] sm:$0xff]   ;;  %1338 = vst [vmem:[#allocation2 + $0x24] sm:$0xf] %v1337_v56  ;;  %v1472_v61 = vld [vmem:[#allocation2 + $0x20] sm:$0x1]  ;;  %v7433_v62 = vor.u32 %v7432_v59, %v7431_v58 }
  0xc4   : > { %v1678_v63 = vshll.u32 %v7813_v60, 16  ;;  %v1043_v0 = vshrl.u32 %v971_v57, 16  ;;  %v1046_v1 = vshll.u32 %v971_v57, 16  ;;  %v1616_v2 = vunpack.c.l.b16 %v1472_v61  ;;  %341 = vst.msk [vmem:[#allocation2 + $0xd0] sm:$0xf] %vm334_vm8, %v7642_v39 }
  0xc5   : > { %v869_v4 = vpop.f32.mrf.mxu0  ;;  %v1964_v12 = vrot.slane %v7433_v62, 1  ;;  %v1676_v20 = vshrl.u32 %v7813_v60, 16  ;;  %342 = vst.msk [vmem:[#allocation2 + $0xd4] sm:$0x1] %vm337_vm3, %v7642_v39  ;;  %v1347_v59 = vld [vmem:[#allocation2 + $0x38] sm:$0x1] }
  0xc6   : > { %v1045_v7 = vrot.slane %v1043_v0, 7  ;;  %v870_v8 = vadd.f32 %v7754_v24, %v869_v4  ;;  %v1634_v10 = vpack.c.b16 %v1616_v2, %v1616_v2  ;;  %v1680_v14 = vrot.slane %v1678_v63, 1  ;;  %554 = vst.msk [vmem:[#allocation4] sm:$0xf] %vm334_vm8, %v7642_v39 }
  0xc7   : > { %555 = vst.msk [vmem:[#allocation4 + $0x4] sm:$0xf] %vm334_vm8, %v7642_v39 }
  0xc8   : > { %v1048_v15 = vor.u32 %v1046_v1, %v1045_v7  ;;  %v1050_v16 = vrot.slane %v1045_v7, 4  ;;  %v940_v17 = vmax.f32 %v870_v8, 0.0  ;;  %v1965_v19 = vrot.slane %v1634_v10, 1  ;;  %556 = vst.msk [vmem:[#allocation4 + $0x8] sm:$0x1] %vm337_vm3, %v7642_v39 }
  0xc9   : > { %v1683_v21 = vshll.u32 %v1634_v10, 16  ;;  %v1681_v27 = vor.u32 %v1680_v14, %v1676_v20  ;;  %v7231_v14 = vld [vmem:[%s7717_s20 + $0x48] sm:$0xff]  ;;  %558 = vst.msk [vmem:[#allocation4 + $0xcc] sm:$0xf] %vm334_vm8, %v7642_v39 }
  0xca   : > { %v1049_v22 = vsel %vm7776_vm11, %v1041_v6, %v1048_v15  ;;  %v1341_v23 = vsel %vm7729_vm5, %v1050_v16, %v1340_v11  ;;  %v972_v25 = vpack.c.bf16 %v940_v17, %v940_v17  ;;  %v1966_v26 = vsel %vm1957_vm12, %v1964_v12, %v1965_v19  ;;  %v7551_v53 = vld [vmem:[#allocation2 + $0x24] sm:$0xe]  ;;  %v1470_v20 = vld [vmem:[#allocation2 + $0x8] sm:$0x1]  ;;  %559 = vst.msk [vmem:[#allocation4 + $0xd0] sm:$0xf] %vm334_vm8, %v7642_v39 }
  0xcb   : > { %1339 = vst.msk [vmem:[#allocation2 + $0x28] sm:$0xf] %vm334_vm8, %v1049_v22  ;;  %2016 = vrot.lane.b32.xlu1 %v1966_v26, %s7640_s23  ;;  %v1685_v28 = vrot.slane %v1683_v21, 1  ;;  %6875 = vmatmul.msk.bf16.gmra.mxu0 %vm789_vm2, %v7231_v14  ;;  %v1350_v21 = vld [vmem:[#allocation2 + $0x3c] sm:$0xf] }
  0xcc   : > { %1342 = vst [vmem:[#allocation2 + $0x2c] sm:$0x1] %v1341_v23  ;;  %v1052_v29 = vshrl.u32 %v972_v25, 16  ;;  %v1055_v30 = vshll.u32 %v972_v25, 16 }
  0xcd   : > { %v1686_v32 = vsel %vm1650_vm13, %v1681_v27, %v1685_v28  ;;  %v871_v33 = vpop.f32.mrf.mxu0  ;;  %560 = vst.msk [vmem:[#allocation4 + $0xd4] sm:$0x1] %vm337_vm3, %v7642_v39  ;;  %v1614_v28 = vunpack.c.l.b16 %v1470_v20  ;;  %vm8315_vm3 = vmand %vm448_vm1, %vm345_vm4 }
  0xce   : > { %v1054_v35 = vrot.slane %v1052_v29, 7  ;;  %1871 = vrot.lane.b32.xlu0 %v1686_v32, %s7641_s24  ;;  %v872_v36 = vadd.f32 %v7754_v24, %v871_v33  ;;  %v7879_v33 = vld [vmem:[#allocation2] sm:$0xff]   ;;  %449 = vst.msk [vmem:[#allocation3 + $0x8] sm:$0x1] %vm448_vm1, %v7642_v39  ;;  %vm8340_vm4 = vmand %vm448_vm1, %vm395_vm6 }
  0xcf   : > { %v1654_v48 = vshll.u32 %v7879_v33, 16  ;;  %453 = vst.msk [vmem:[#allocation3 + $0xd4] sm:$0x1] %vm448_vm1, %v7642_v39 }
  0xd0   : > { %v1057_v40 = vor.u32 %v1055_v30, %v1054_v35  ;;  %v941_v41 = vmax.f32 %v872_v36, 0.0  ;;  %v1058_v55 = vrot.slane %v1054_v35, 4 }
  0xd2   : > { %v1344_v42 = vsel %vm7764_vm9, %v1057_v40, %v1343_v38  ;;  %v973_v43 = vpack.c.bf16 %v941_v41, %v941_v41  ;;  %v7840_v44 = vld [vmem:[#allocation2 + $0x24] sm:$0xff]  }
  0xd3   : > { %v7550_v45 = vld [vmem:[#allocation2 + $0x24] sm:$0xf0]  ;;  %1345 = vst [vmem:[#allocation2 + $0x30] sm:$0xf] %v1344_v42  ;;  %v1473_v47 = vld [vmem:[#allocation2 + $0x2c] sm:$0x1] }
  0xd4   : > { %v1060_v49 = vshrl.u32 %v973_v43, 16  ;;  %v1063_v50 = vshll.u32 %v973_v43, 16  ;;  %v1617_v52 = vunpack.c.l.b16 %v1473_v47  ;;  %v1688_v61 = vshrl.u32 %v7840_v44, 16 }
  0xd5   : > { %v874_v54 = vpop.f32.mrf.mxu0  ;;  %v1690_v62 = vshll.u32 %v7840_v44, 16  ;;  %v7552_v10 = vor.u32 %v7551_v53, %v7550_v45  ;;  %v7884_v47 = vpack.c.b16 %v1614_v28, %v1614_v28 }
  0xd6   : > { %v1062_v56 = vrot.slane %v1060_v49, 7  ;;  %v875_v57 = vadd.f32 %v7754_v24, %v874_v54  ;;  %v1635_v58 = vpack.c.b16 %v1617_v52, %v1617_v52  ;;  %v1354_v54 = vld [vmem:[#allocation2 + $0x44] sm:$0x1] }
  0xd7   : > { %v1692_v3 = vrot.slane %v1690_v62, 1  ;;  %v1967_v22 = vrot.slane %v7552_v10, 1 }
  0xd8   : > { %v1065_v63 = vor.u32 %v1063_v50, %v1062_v56  ;;  %v1067_v0 = vrot.slane %v1062_v56, 4  ;;  %v942_v1 = vmax.f32 %v875_v57, 0.0  ;;  %v1695_v2 = vshll.u32 %v1635_v58, 16 }
  0xd9   : > { %v1693_v8 = vor.u32 %v1692_v3, %v1688_v61  ;;  %v1968_v23 = vrot.slane %v1635_v58, 1 }
  0xda   : > { %v1066_v4 = vsel %vm7776_vm11, %v1058_v55, %v1065_v63  ;;  %v1348_v5 = vsel %vm7729_vm5, %v1067_v0, %v1347_v59  ;;  %v974_v6 = vpack.c.bf16 %v942_v1, %v942_v1  ;;  %v1697_v7 = vrot.slane %v1695_v2, 1  ;;  %v7435_v27 = vld [vmem:[#allocation2 + $0x30] sm:$0xe] }
  0xdb   : > { %1346 = vst.msk [vmem:[#allocation2 + $0x34] sm:$0xf] %vm334_vm8, %v1066_v4  ;;  %v1969_v34 = vsel %vm1957_vm12, %v1967_v22, %v1968_v23  ;;  %v1652_v63 = vshrl.u32 %v7879_v33, 16  ;;  %v1656_v0 = vrot.slane %v1654_v48, 1  ;;  %v1659_v1 = vshll.u32 %v7884_v47, 16 }
  0xdc   : > { %1349 = vst [vmem:[#allocation2 + $0x38] sm:$0x1] %v1348_v5  ;;  %v1069_v11 = vshrl.u32 %v974_v6, 16  ;;  %v1072_v12 = vshll.u32 %v974_v6, 16  ;;  %v1698_v16 = vsel %vm1650_vm13, %v1693_v8, %v1697_v7  ;;  %v1357_v22 = vld [vmem:[#allocation2 + $0x48] sm:$0xf] }
  0xdd   : > { %v876_v15 = vpop.f32.mrf.mxu0  ;;  %1873 = vrot.lane.b32.xlu2 %v1698_v16, %s7641_s24  ;;  %v1661_v14 = vrot.slane %v1659_v1, 1  ;;  %v365_v16 = vld [vmem:[#allocation2 + $0x54] sm:$0x1] }
  0xde   : > { %v1071_v17 = vrot.slane %v1069_v11, 7  ;;  %v877_v19 = vadd.f32 %v7754_v24, %v876_v15  ;;  %v7232_v15 = vld [vmem:[%s7717_s20 + $0x50] sm:$0xff] }
  0xdf   : > { %6876 = vmatmul.msk.bf16.gmra.mxu0 %vm789_vm2, %v7232_v15 }
  0xe0   : > { %v1074_v25 = vor.u32 %v1072_v12, %v1071_v17  ;;  %v943_v26 = vmax.f32 %v877_v19, 0.0  ;;  %v1075_v49 = vrot.slane %v1071_v17, 4  ;;  %v1657_v12 = vor.u32 %v1656_v0, %v1652_v63 }
  0xe2   : > { %v1351_v29 = vsel %vm7764_vm9, %v1074_v25, %v1350_v21  ;;  %v975_v30 = vpack.c.bf16 %v943_v26, %v943_v26  ;;  %v7877_v31 = vld [vmem:[#allocation2 + $0x30] sm:$0xff]   ;;  %v366_v21 = vsel %vm7729_vm5, 0, %v365_v16  ;;  %v1662_v26 = vsel %vm1650_vm13, %v1657_v12, %v1661_v14 }
  0xe3   : > { %v7434_v32 = vld [vmem:[#allocation2 + $0x30] sm:$0xf0]  ;;  %1352 = vst [vmem:[#allocation2 + $0x3c] sm:$0xf] %v1351_v29  ;;  %v1474_v35 = vld [vmem:[#allocation2 + $0x38] sm:$0x1] }
  0xe4   : > { %v1700_v36 = vshrl.u32 %v7877_v31, 16  ;;  %v1702_v38 = vshll.u32 %v7877_v31, 16  ;;  %v7436_v40 = vor.u32 %v7435_v27, %v7434_v32  ;;  %v1077_v41 = vshrl.u32 %v975_v30, 16  ;;  %367 = vst [vmem:[#allocation2 + $0x54] sm:$0x1] %v366_v21 }
  0xe5   : > { %v1080_v42 = vshll.u32 %v975_v30, 16  ;;  %v1618_v43 = vunpack.c.l.b16 %v1474_v35  ;;  %v879_v45 = vpop.f32.mrf.mxu0  ;;  %2018 = vrot.lane.b32.xlu2 %v1969_v34, %s7640_s23 }
  0xe6   : > { %v1704_v46 = vrot.slane %v1702_v38, 1  ;;  %v1079_v50 = vrot.slane %v1077_v41, 7  ;;  %v880_v52 = vadd.f32 %v7754_v24, %v879_v45  ;;  %v1970_v56 = vrot.slane %v7436_v40, 1 }
  0xe7   : > { %v1636_v53 = vpack.c.b16 %v1618_v43, %v1618_v43  ;;  %v1361_v43 = vld [vmem:[#allocation2 + $0x50] sm:$0x1] }
  0xe8   : > { %v1705_v55 = vor.u32 %v1704_v46, %v1700_v36  ;;  %v1082_v57 = vor.u32 %v1080_v42, %v1079_v50  ;;  %v1084_v58 = vrot.slane %v1079_v50, 4  ;;  %v944_v59 = vmax.f32 %v880_v52, 0.0 }
  0xe9   : > { %v1707_v61 = vshll.u32 %v1636_v53, 16  ;;  %v1971_v62 = vrot.slane %v1636_v53, 1 }
  0xea   : > { %v1083_v2 = vsel %vm7776_vm11, %v1075_v49, %v1082_v57  ;;  %v1355_v3 = vsel %vm7729_vm5, %v1084_v58, %v1354_v54  ;;  %v976_v4 = vpack.c.bf16 %v944_v59, %v944_v59  ;;  %v7554_v20 = vld [vmem:[#allocation2 + $0x3c] sm:$0xe] }
  0xeb   : > { %v1709_v5 = vrot.slane %v1707_v61, 1  ;;  %1353 = vst.msk [vmem:[#allocation2 + $0x40] sm:$0xf] %vm334_vm8, %v1083_v2  ;;  %v1972_v6 = vsel %vm1957_vm12, %v1970_v56, %v1971_v62  ;;  %v1364_v15 = vld [vmem:[#allocation2 + $0x54] sm:$0xf] }
  0xec   : > { %1356 = vst [vmem:[#allocation2 + $0x44] sm:$0x1] %v1355_v3  ;;  %v1086_v7 = vshrl.u32 %v976_v4, 16  ;;  %v1089_v8 = vshll.u32 %v976_v4, 16  ;;  %2020 = vrot.lane.b32.xlu1 %v1972_v6, %s7640_s23  ;;  %v415_v6 = vld [vmem:[#allocation2 + $0x5c] sm:$0x1] }
  0xed   : > { %v1710_v10 = vsel %vm1650_vm13, %v1705_v55, %v1709_v5  ;;  %v881_v11 = vpop.f32.mrf.mxu0 }
  0xee   : > { %1875 = vrot.lane.b32.xlu0 %v1710_v10, %s7641_s24  ;;  %v1088_v17 = vrot.slane %v1086_v7, 7  ;;  %v882_v19 = vadd.f32 %v7754_v24, %v881_v11  ;;  %v416_v10 = vsel %vm7741_vm7, 0, %v415_v6 }
  0xef   : > { %417 = vst [vmem:[#allocation2 + $0x5c] sm:$0x1] %v416_v10 }
  0xf0   : > { %v1091_v23 = vor.u32 %v1089_v8, %v1088_v17  ;;  %v945_v25 = vmax.f32 %v882_v19, 0.0  ;;  %v1092_v40 = vrot.slane %v1088_v17, 4 }
  0xf2   : > { %v1358_v27 = vsel %vm7764_vm9, %v1091_v23, %v1357_v22  ;;  %v977_v28 = vpack.c.bf16 %v945_v25, %v945_v25  ;;  %v7908_v29 = vld [vmem:[#allocation2 + $0x3c] sm:$0xff]  }
  0xf3   : > { %v7553_v30 = vld [vmem:[#allocation2 + $0x3c] sm:$0xf0]  ;;  %1359 = vst [vmem:[#allocation2 + $0x48] sm:$0xf] %v1358_v27  ;;  %v1475_v32 = vld [vmem:[#allocation2 + $0x44] sm:$0x1] }
  0xf4   : > { %v1094_v34 = vshrl.u32 %v977_v28, 16  ;;  %v1097_v35 = vshll.u32 %v977_v28, 16  ;;  %1867 = vrot.lane.b32.xlu1 %v1662_v26, %s7641_s24  ;;  %v1619_v36 = vunpack.c.l.b16 %v1475_v32  ;;  %v7555_v38 = vor.u32 %v7554_v20, %v7553_v30 }
  0xf5   : > { %v884_v1 = vpop.f32.mrf.mxu0 }
  0xf6   : > { %v1096_v41 = vrot.slane %v1094_v34, 7  ;;  %v7911_v42 = vpack.c.b16 %v1619_v36, %v1619_v36  ;;  %v1973_v45 = vrot.slane %v7555_v38, 1  ;;  %v885_v3 = vadd.f32 %v7754_v24, %v884_v1  ;;  %v1368_v26 = vld [vmem:[#allocation2 + $0x5c] sm:$0x1]  ;;  %v368_v34 = vld [vmem:[#allocation2 + $0x60] sm:$0x1] }
  0xf8   : > { %v1099_v46 = vor.u32 %v1097_v35, %v1096_v41  ;;  %v1101_v48 = vrot.slane %v1096_v41, 4  ;;  %v1974_v49 = vrot.slane %v7911_v42, 1  ;;  %v946_v4 = vmax.f32 %v885_v3, 0.0  ;;  %v418_v41 = vld [vmem:[#allocation2 + $0x68] sm:$0x1] }
  0xf9   : > { %v369_v35 = vsel %vm7729_vm5, 0, %v368_v34 }
  0xfa   : > { %v1100_v50 = vsel %vm7776_vm11, %v1092_v40, %v1099_v46  ;;  %v1362_v52 = vsel %vm7729_vm5, %v1101_v48, %v1361_v43  ;;  %v1975_v53 = vsel %vm1957_vm12, %v1973_v45, %v1974_v49  ;;  %v978_v5 = vpack.c.bf16 %v946_v4, %v946_v4  ;;  %370 = vst [vmem:[#allocation2 + $0x60] sm:$0x1] %v369_v35  ;;  %v7233_v40 = vld [vmem:[%s7717_s20 + $0x58] sm:$0xff] }
  0xfb   : > { %1360 = vst.msk [vmem:[#allocation2 + $0x4c] sm:$0xf] %vm334_vm8, %v1100_v50  ;;  %v419_v43 = vsel %vm7741_vm7, 0, %v418_v41  ;;  %6877 = vmatmul.msk.bf16.gmra.mxu0 %vm789_vm2, %v7233_v40 }
  0xfc   : > { %1363 = vst [vmem:[#allocation2 + $0x50] sm:$0x1] %v1362_v52  ;;  %2022 = vrot.lane.b32.xlu1 %v1975_v53, %s7640_s23  ;;  %v1103_v7 = vshrl.u32 %v978_v5, 16  ;;  %v1106_v8 = vshll.u32 %v978_v5, 16 }
  0xfd   : > { %v886_v11 = vpop.f32.mrf.mxu0  ;;  %420 = vst [vmem:[#allocation2 + $0x68] sm:$0x1] %v419_v43 }
  0xfe   : > { %v1105_v12 = vrot.slane %v1103_v7, 7  ;;  %v887_v14 = vadd.f32 %v7754_v24, %v886_v11 }
 0x100   : > { %v1108_v16 = vor.u32 %v1106_v8, %v1105_v12  ;;  %v947_v17 = vmax.f32 %v887_v14, 0.0  ;;  %v1109_v23 = vrot.slane %v1105_v12, 4 }
 0x102   : > { %v7921_v54 = vld [vmem:[#allocation2 + $0x48] sm:$0xff]   ;;  %v1365_v19 = vsel %vm7764_vm9, %v1108_v16, %v1364_v15  ;;  %v979_v20 = vpack.c.bf16 %v947_v17, %v947_v17  ;;  %v7234_v15 = vld [vmem:[%s7717_s20 + $0x60] sm:$0xff]  ;;  %v421_v16 = vld [vmem:[#allocation2 + $0x74] sm:$0x1] }
 0x103   : > { %v1476_v55 = vld [vmem:[#allocation2 + $0x50] sm:$0x1]  ;;  %v1726_v56 = vshll.u32 %v7921_v54, 16  ;;  %v1724_v58 = vshrl.u32 %v7921_v54, 16  ;;  %1366 = vst [vmem:[#allocation2 + $0x54] sm:$0xf] %v1365_v19 }
 0x104   : > { %v1620_v57 = vunpack.c.l.b16 %v1476_v55  ;;  %v1111_v21 = vshrl.u32 %v979_v20, 16  ;;  %v1114_v22 = vshll.u32 %v979_v20, 16  ;;  %v371_v55 = vld [vmem:[#allocation2 + $0x6c] sm:$0x1]  ;;  %v1959_v19 = vrot.slane %v7884_v47, 1 }
 0x105   : > { %v1728_v59 = vrot.slane %v1726_v56, 1  ;;  %v889_v36 = vpop.f32.mrf.mxu0  ;;  %v7428_v56 = vld [vmem:[#allocation2] sm:$0xf0]  ;;  %v422_v20 = vsel %vm7741_vm7, 0, %v421_v16 }
 0x106   : > { %v7925_v61 = vpack.c.b16 %v1620_v57, %v1620_v57  ;;  %v1113_v25 = vrot.slane %v1111_v21, 7  ;;  %v890_v38 = vadd.f32 %v7754_v24, %v889_v36  ;;  %v1371_v57 = vld [vmem:[#allocation2 + $0x60] sm:$0xf]  ;;  %423 = vst [vmem:[#allocation2 + $0x74] sm:$0x1] %v422_v20 }
 0x107   : > { %v1729_v62 = vor.u32 %v1728_v59, %v1724_v58  ;;  %v372_v58 = vsel %vm7729_vm5, 0, %v371_v55  ;;  %v7429_v59 = vld [vmem:[#allocation2] sm:$0xe] }
 0x108   : > { %v1731_v63 = vshll.u32 %v7925_v61, 16  ;;  %v1116_v27 = vor.u32 %v1114_v22, %v1113_v25  ;;  %v1118_v28 = vrot.slane %v1113_v25, 4  ;;  %v948_v45 = vmax.f32 %v890_v38, 0.0  ;;  %373 = vst [vmem:[#allocation2 + $0x6c] sm:$0x1] %v372_v58 }
 0x109   : > { %v7430_v3 = vor.u32 %v7429_v59, %v7428_v56 }
 0x10a   : > { %v1733_v0 = vrot.slane %v1731_v63, 1  ;;  %v1117_v30 = vsel %vm7776_vm11, %v1109_v23, %v1116_v27  ;;  %v1369_v32 = vsel %vm7729_vm5, %v1118_v28, %v1368_v26  ;;  %v980_v46 = vpack.c.bf16 %v948_v45, %v948_v45 }
 0x10b   : > { %1367 = vst.msk [vmem:[#allocation2 + $0x58] sm:$0xf] %vm334_vm8, %v1117_v30  ;;  %v1958_v17 = vrot.slane %v7430_v3, 1  ;;  %6878 = vmatmul.msk.bf16.gmra.mxu0 %vm789_vm2, %v7234_v15 }
 0x10c   : > { %v1734_v2 = vsel %vm1650_vm13, %v1729_v62, %v1733_v0  ;;  %1370 = vst [vmem:[#allocation2 + $0x5c] sm:$0x1] %v1369_v32  ;;  %v1120_v48 = vshrl.u32 %v980_v46, 16  ;;  %v1123_v49 = vshll.u32 %v980_v46, 16  ;;  %v1714_v46 = vshll.u32 %v7908_v29, 16 }
 0x10d   : > { %1879 = vrot.lane.b32.xlu1 %v1734_v2, %s7641_s24  ;;  %v891_v50 = vpop.f32.mrf.mxu0  ;;  %v1960_v28 = vsel %vm1957_vm12, %v1958_v17, %v1959_v19 }
 0x10e   : > { %v1122_v52 = vrot.slane %v1120_v48, 7  ;;  %v892_v53 = vadd.f32 %v7754_v24, %v891_v50  ;;  %v7437_v48 = vld [vmem:[#allocation2 + $0x48] sm:$0xf0] }
 0x10f   : > { %v1378_v40 = vld [vmem:[#allocation2 + $0x6c] sm:$0xf] }
 0x110   : > { %v1125_v62 = vor.u32 %v1123_v49, %v1122_v52  ;;  %v949_v63 = vmax.f32 %v892_v53, 0.0  ;;  %v1126_v11 = vrot.slane %v1122_v52, 4  ;;  %v7438_v49 = vld [vmem:[#allocation2 + $0x48] sm:$0xe] }
 0x112   : > { %v1372_v0 = vsel %vm7764_vm9, %v1125_v62, %v1371_v57  ;;  %v981_v1 = vpack.c.bf16 %v949_v63, %v949_v63  ;;  %v7972_v32 = vld [vmem:[#allocation2 + $0x54] sm:$0xff]   ;;  %v1716_v63 = vrot.slane %v1714_v46, 1 }
 0x113   : > { %1373 = vst [vmem:[#allocation2 + $0x60] sm:$0xf] %v1372_v0  ;;  %v7974_v34 = vld [vmem:[#allocation2 + $0x54] sm:$0xf0]  ;;  %v1477_v43 = vld [vmem:[#allocation2 + $0x5c] sm:$0x1] }
 0x114   : > { %v1128_v6 = vshrl.u32 %v981_v1, 16  ;;  %v1131_v7 = vshll.u32 %v981_v1, 16  ;;  %v1621_v55 = vunpack.c.l.b16 %v1477_v43  ;;  %v1719_v0 = vshll.u32 %v7911_v42, 16 }
 0x115   : > { %v894_v10 = vpop.f32.mrf.mxu0  ;;  %v7439_v1 = vor.u32 %v7438_v49, %v7437_v48  ;;  %v1977_v42 = vrot.slane %v7925_v61, 1  ;;  %v1736_v17 = vshrl.u32 %v7972_v32, 16 }
 0x116   : > { %v1130_v12 = vrot.slane %v1128_v6, 7  ;;  %v895_v14 = vadd.f32 %v7754_v24, %v894_v10 }
 0x118   : > { %v1133_v21 = vor.u32 %v1131_v7, %v1130_v12  ;;  %v1135_v22 = vrot.slane %v1130_v12, 4  ;;  %v950_v23 = vmax.f32 %v895_v14, 0.0  ;;  %v1721_v12 = vrot.slane %v1719_v0, 1 }
 0x119   : > { %v1976_v14 = vrot.slane %v7439_v1, 1  ;;  %v7244_v1 = vld [vmem:[%s10370_s3 + $0x20] sm:$0xff] }
 0x11a   : > { %v1134_v25 = vsel %vm7776_vm11, %v1126_v11, %v1133_v21  ;;  %v982_v27 = vpack.c.bf16 %v950_v23, %v950_v23 }
 0x11b   : > { %1374 = vst.msk [vmem:[#allocation2 + $0x64] sm:$0xf] %vm334_vm8, %v1134_v25  ;;  %v1978_v21 = vsel %vm1957_vm12, %v1976_v14, %v1977_v42 }
 0x11c   : > { %v1137_v47 = vshrl.u32 %v982_v27, 16  ;;  %v1140_v30 = vshll.u32 %v982_v27, 16  ;;  %v7557_v27 = vld [vmem:[#allocation2 + $0x54] sm:$0xe] }
 0x11d   : > { %v896_v35 = vpop.f32.mrf.mxu0 }
 0x11e   : > { %v1139_v36 = vrot.slane %v1137_v47, 7  ;;  %v897_v38 = vadd.f32 %v7754_v24, %v896_v35  ;;  %v1712_v24 = vshrl.u32 %v7908_v29, 16  ;;  %v7247_v47 = vld [vmem:[%s10370_s3 + $0x38] sm:$0xff]  ;;  %v7558_v35 = vor.u32 %v7557_v27, %v7974_v34  ;;  %v7235_v27 = vld [vmem:[%s7717_s20 + $0x68] sm:$0xff] }
 0x11f   : > { %2480 = vmatpush.bf16.msra.mxu1 %v7247_v47  ;;  %6879 = vmatmul.msk.bf16.gmra.mxu0 %vm789_vm2, %v7235_v27 }
 0x120   : > { %v1142_v41 = vor.u32 %v1140_v30, %v1139_v36  ;;  %v951_v45 = vmax.f32 %v897_v38, 0.0  ;;  %v1717_v11 = vor.u32 %v1716_v63, %v1712_v24  ;;  %v374_v24 = vld [vmem:[#allocation2 + $0x78] sm:$0x1]  ;;  %v8044_v63 = vld [vmem:[%s10369_s2] ss:$0 sm:$0xff] }
 0x122   : > { %v1379_v50 = vsel %vm7764_vm9, %v1142_v41, %v1378_v40  ;;  %v983_v52 = vpack.c.bf16 %v951_v45, %v951_v45  ;;  %v1722_v20 = vsel %vm1650_vm13, %v1717_v11, %v1721_v12  ;;  %v8017_v38 = vld [vmem:[#allocation2 + $0x60] sm:$0xff]   ;;  %v1979_v40 = vrot.slane %v7558_v35, 1  ;;  %v7243_v11 = vld [vmem:[%s10370_s3 + $0x18] sm:$0xff]  ;;  %v7241_v35 = vld [vmem:[%s10370_s3 + $0x8] sm:$0xff] }
 0x123   : > { %1380 = vst [vmem:[#allocation2 + $0x6c] sm:$0xf] %v1379_v50  ;;  %v1750_v45 = vshll.u32 %v8017_v38, 16  ;;  %v1748_v34 = vshrl.u32 %v8017_v38, 16 }
 0x124   : > { %v1145_v58 = vshrl.u32 %v983_v52, 16  ;;  %v1148_v59 = vshll.u32 %v983_v52, 16 }
 0x125   : > { %v1752_v52 = vrot.slane %v1750_v45, 1 }
 0x126   : > { %v1147_v3 = vrot.slane %v1145_v58, 7 }
 0x128   : > { %v1150_v7 = vor.u32 %v1148_v59, %v1147_v3  ;;  %v1152_v10 = vrot.slane %v1147_v3, 4  ;;  %v7441_v3 = vld [vmem:[#allocation2 + $0x60] sm:$0xe] }
 0x12d   : > { %v2015_v4 = vpop.permute.xlu1 %2014 }
 0x130   : > { %v1870_v2 = vpop.permute.xlu0 %1869 }
 0x131   : > { %v2052_v5 = vsel %vm2048_vm14, %v7790_v9, %v1870_v2  ;;  %v1375_v9 = vld [vmem:[#allocation2 + $0x68] sm:$0x1]  ;;  %v1143_v2 = vrot.slane %v1139_v36, 4 }
 0x132   : > { %v7956_v8 = vsel %vm2085_vm15, %v2052_v5, %v2015_v4  ;;  %v1376_v26 = vsel %vm7729_vm5, %v1135_v22, %v1375_v9  ;;  %v1738_v4 = vshll.u32 %v7972_v32, 16  ;;  %v1382_v5 = vld [vmem:[#allocation2 + $0x74] sm:$0x1] }
 0x133   : > { %2138 = vrot.lane.b32.xlu2 %v7956_v8, %s7643_s25  ;;  %1377 = vst [vmem:[#allocation2 + $0x68] sm:$0x1] %v1376_v26  ;;  %v1151_v15 = vsel %vm7776_vm11, %v1143_v2, %v1150_v7  ;;  %v1383_v16 = vsel %vm7729_vm5, %v1152_v10, %v1382_v5  ;;  %v7440_v2 = vld [vmem:[#allocation2 + $0x60] sm:$0xf0] }
 0x134   : > { %v1740_v19 = vrot.slane %v1738_v4, 1  ;;  %1381 = vst.msk [vmem:[#allocation2 + $0x70] sm:$0xf] %vm334_vm8, %v1151_v15  ;;  %v1753_v4 = vor.u32 %v1752_v52, %v1748_v34  ;;  %v7442_v10 = vor.u32 %v7441_v3, %v7440_v2 }
 0x135   : > { %1384 = vst [vmem:[#allocation2 + $0x74] sm:$0x1] %v1383_v16 }
 0x136   : > { %v1741_v61 = vor.u32 %v1740_v19, %v1736_v17 }
 0x137   : > { %v1874_v6 = vpop.permute.xlu2 %1873 }
 0x138   : > { %v2056_v26 = vsel %vm2048_vm14, %v7840_v44, %v1874_v6  ;;  %v7246_v44 = vld [vmem:[%s10370_s3 + $0x30] sm:$0xff] }
 0x139   : > { %2481 = vmatpush.bf16.msra.mxu1 %v7246_v44 }
 0x13a   : > { %v1478_v30 = vld [vmem:[#allocation2 + $0x68] sm:$0x1] }
 0x13b   : > { %2012 = vrot.lane.b32.xlu2 %v1960_v28, %s7640_s23  ;;  %v1622_v36 = vunpack.c.l.b16 %v1478_v30 }
 0x13c   : > { %v1479_v6 = vld [vmem:[#allocation2 + $0x74] sm:$0x1] }
 0x13d   : > { %v2017_v56 = vpop.permute.xlu1 %2016  ;;  %v1640_v43 = vpack.c.b16 %v1622_v36, %v1622_v36  ;;  %v1623_v12 = vunpack.c.l.b16 %v1479_v6 }
 0x13f   : > { %v2019_v23 = vpop.permute.xlu2 %2018  ;;  %v1983_v17 = vrot.slane %v1640_v43, 1 }
 0x140   : > { %v1872_v53 = vpop.permute.xlu0 %1871  ;;  %v8008_v28 = vsel %vm2085_vm15, %v2056_v26, %v2019_v23 }
 0x141   : > { %v2054_v57 = vsel %vm2048_vm14, %v7813_v60, %v1872_v53  ;;  %v1639_v60 = vpack.c.b16 %v1621_v55, %v1621_v55  ;;  %v1755_v53 = vshll.u32 %v1640_v43, 16  ;;  %v8029_v55 = vld [vmem:[#allocation2 + $0x6c] sm:$0xff]  }
 0x142   : > { %v7985_v62 = vsel %vm2085_vm15, %v2054_v57, %v2017_v56  ;;  %v8031_v56 = vld [vmem:[#allocation2 + $0x6c] sm:$0xf0]  ;;  %v7245_v57 = vld [vmem:[%s10370_s3 + $0x28] sm:$0xff]  ;;  %v1760_v44 = vshrl.u32 %v8029_v55, 16 }
 0x143   : > { %2171 = vrot.lane.b32.xlu0 %v7985_v62, %s7640_s23  ;;  %2140 = vrot.lane.b32.xlu2 %v7985_v62, %s7643_s25  ;;  %v1743_v9 = vshll.u32 %v1639_v60, 16  ;;  %v1980_v41 = vrot.slane %v1639_v60, 1  ;;  %v1757_v5 = vrot.slane %v1755_v53, 1 }
 0x144   : > { %2482 = vmatpush.bf16.msra.mxu1 %v7245_v57  ;;  %v377_v57 = vld [vmem:[#allocation2 + $0x84] sm:$0x1] }
 0x145   : > { %v1745_v22 = vrot.slane %v1743_v9, 1  ;;  %v1981_v50 = vsel %vm1957_vm12, %v1979_v40, %v1980_v41  ;;  %v1758_v15 = vsel %vm1650_vm13, %v1753_v4, %v1757_v5  ;;  %v7242_v9 = vld [vmem:[%s10370_s3 + $0x10] sm:$0xff] }
 0x146   : > { %v7254_v4 = vld [vmem:[%s10370_s3 + $0x70] sm:$0xff] }
 0x147   : > { %v1746_v25 = vsel %vm1650_vm13, %v1741_v61, %v1745_v22  ;;  %v1762_v61 = vshll.u32 %v8029_v55, 16 }
 0x148   : > { %v899_v58 = vpop.f32.mrf.mxu0  ;;  %2483 = vmatpush.bf16.msra.mxu1 %v7244_v1  ;;  %v378_v1 = vsel %vm7729_vm5, 0, %v377_v57  ;;  %v7249_v57 = vld [vmem:[%s10370_s3 + $0x48] sm:$0xff] }
 0x149   : > { %v900_v0 = vadd.f32 %v8044_v63, %v899_v58  ;;  %v1764_v40 = vrot.slane %v1762_v61, 1  ;;  %v7255_v58 = vld [vmem:[%s10370_s3 + $0x78] sm:$0xff]  ;;  %379 = vst [vmem:[#allocation2 + $0x84] sm:$0x1] %v378_v1  ;;  %v7252_v61 = vld [vmem:[%s10370_s3 + $0x60] sm:$0xff] }
 0x14a   : > { %2569 = vmatpush.bf16.msra.mxu2 %v7255_v58  ;;  %v7248_v58 = vld [vmem:[%s10370_s3 + $0x40] sm:$0xff] }
 0x14b   : > { %1877 = vrot.lane.b32.xlu0 %v1722_v20, %s7641_s24  ;;  %2024 = vrot.lane.b32.xlu2 %v1978_v21, %s7640_s23  ;;  %v952_v60 = vmax.f32 %v900_v0, 0.0  ;;  %v1982_v20 = vrot.slane %v7442_v10, 1  ;;  %v8063_v21 = vpack.c.b16 %v1623_v12, %v1623_v12 }
 0x14c   : > { %2484 = vmatpush.bf16.msra.mxu1 %v7243_v11 }
 0x14d   : > { %v984_v7 = vpack.c.bf16 %v952_v60, %v952_v60  ;;  %v1984_v36 = vsel %vm1957_vm12, %v1982_v20, %v1983_v17  ;;  %v1767_v41 = vshll.u32 %v8063_v21, 16  ;;  %v7236_v17 = vld [vmem:[%s7717_s20 + $0x70] sm:$0xff] }
 0x14e   : > { %2570 = vmatpush.bf16.msra.mxu2 %v7254_v4  ;;  %6880 = vmatmul.msk.bf16.gmra.mxu0 %vm789_vm2, %v7236_v17 }
 0x14f   : > { %v1154_v14 = vshrl.u32 %v984_v7, 16  ;;  %v1157_v42 = vshll.u32 %v984_v7, 16  ;;  %v1769_v34 = vrot.slane %v1767_v41, 1 }
 0x150   : > { %v901_v26 = vpop.f32.mrf.mxu0  ;;  %2485 = vmatpush.bf16.msra.mxu1 %v7242_v9  ;;  %v1392_v20 = vld [vmem:[#allocation2 + $0x84] sm:$0xf] }
 0x151   : > { %v1156_v16 = vrot.slane %v1154_v14, 7  ;;  %v902_v30 = vadd.f32 %v8044_v63, %v901_v26  ;;  %v427_v14 = vld [vmem:[#allocation2 + $0x8c] sm:$0x1] }
 0x153   : > { %2173 = vrot.lane.b32.xlu0 %v8008_v28, %s7640_s23  ;;  %1881 = vrot.lane.b32.xlu2 %v1746_v25, %s7641_s24  ;;  %v1159_v22 = vor.u32 %v1157_v42, %v1156_v16  ;;  %v424_v25 = vld [vmem:[#allocation2 + $0x80] sm:$0x1]  ;;  %v953_v43 = vmax.f32 %v902_v30, 0.0  ;;  %v1160_v52 = vrot.slane %v1156_v16, 4  ;;  %v7253_v42 = vld [vmem:[%s10370_s3 + $0x68] sm:$0xff] }
 0x154   : > { %v425_v47 = vsel %vm7741_vm7, 0, %v424_v25  ;;  %2486 = vmatpush.bf16.msra.mxu1 %v7241_v35  ;;  %2571 = vmatpush.bf16.msra.mxu2 %v7253_v42  ;;  %v7560_v25 = vld [vmem:[#allocation2 + $0x6c] sm:$0xe] }
 0x155   : > { %426 = vst [vmem:[#allocation2 + $0x80] sm:$0x1] %v425_v47  ;;  %v985_v45 = vpack.c.bf16 %v953_v43, %v953_v43  ;;  %v7561_v47 = vor.u32 %v7560_v25, %v8031_v56  ;;  %v7257_v56 = vld [vmem:[%s10370_s3 + $0x88] sm:$0xff] }
 0x156   : > { %2664 = vmatpush.bf16.msra.mxu3 %v7257_v56 }
 0x158   : > { %2572 = vmatpush.bf16.msra.mxu2 %v7252_v61 }
 0x15b   : > { %2142 = vrot.lane.b32.xlu0 %v8008_v28, %s7643_s25 }
 0x15c   : > { %v1389_v0 = vld [vmem:[#allocation2 + $0x80] sm:$0x1] }
 0x15e   : > { %v2021_v46 = vpop.permute.xlu1 %2020 }
 0x160   : > { %v1876_v48 = vpop.permute.xlu0 %1875 }
 0x161   : > { %v2058_v49 = vsel %vm2048_vm14, %v7877_v31, %v1876_v48  ;;  %v375_v31 = vsel %vm7729_vm5, 0, %v374_v24  ;;  %v1765_v48 = vor.u32 %v1764_v40, %v1760_v44  ;;  %v904_v24 = vpop.f32.mrf.mxu0  ;;  %v1985_v44 = vrot.slane %v7561_v47, 1  ;;  %v430_v47 = vld [vmem:[#allocation2 + $0x98] sm:$0x1] }
 0x162   : > { %v8037_v59 = vsel %vm2085_vm15, %v2058_v49, %v2021_v46  ;;  %376 = vst [vmem:[#allocation2 + $0x78] sm:$0x1] %v375_v31  ;;  %v7240_v46 = vld [vmem:[%s10370_s3] sm:$0xff]  ;;  %v1162_v49 = vshrl.u32 %v985_v45, 16  ;;  %v905_v2 = vadd.f32 %v8044_v63, %v904_v24  ;;  %v1986_v40 = vrot.slane %v8063_v21, 1 }
 0x163   : > { %2175 = vrot.lane.b32.xlu1 %v8037_v59, %s7640_s23  ;;  %2026 = vrot.lane.b32.xlu0 %v1981_v50, %s7640_s23  ;;  %v1165_v50 = vshll.u32 %v985_v45, 16  ;;  %v1770_v31 = vsel %vm1650_vm13, %v1765_v48, %v1769_v34  ;;  %v7256_v24 = vld [vmem:[%s10370_s3 + $0x80] sm:$0xff] }
 0x164   : > { %v1164_v53 = vrot.slane %v1162_v49, 7  ;;  %2487 = vmatpush.bf16.msra.mxu1 %v7240_v46  ;;  %v954_v5 = vmax.f32 %v905_v2, 0.0  ;;  %v7250_v46 = vld [vmem:[%s10370_s3 + $0x50] sm:$0xff]  ;;  %v8124_v48 = vsel %vm1957_vm12, %v1985_v44, %v1986_v40  ;;  %2665 = vmatpush.bf16.msra.mxu3 %v7256_v24 }
 0x166   : > { %v1167_v3 = vor.u32 %v1165_v50, %v1164_v53  ;;  %v1169_v60 = vrot.slane %v1164_v53, 4  ;;  %v986_v10 = vpack.c.bf16 %v954_v5, %v954_v5  ;;  %v1868_v53 = vpop.permute.xlu1 %1867 }
 0x168   : > { %v1168_v6 = vsel %vm7776_vm11, %v1160_v52, %v1167_v3  ;;  %v1390_v7 = vsel %vm7729_vm5, %v1169_v60, %v1389_v0  ;;  %v1171_v11 = vshrl.u32 %v986_v10, 16  ;;  %v1174_v12 = vshll.u32 %v986_v10, 16 }
 0x169   : > { %v1385_v19 = vld [vmem:[#allocation2 + $0x78] sm:$0xf]  ;;  %1388 = vst.msk [vmem:[#allocation2 + $0x7c] sm:$0xf] %vm334_vm8, %v1168_v6  ;;  %v906_v16 = vpop.f32.mrf.mxu0 }
 0x16a   : > { %v1386_v23 = vsel %vm7764_vm9, %v1159_v22, %v1385_v19  ;;  %1391 = vst [vmem:[#allocation2 + $0x80] sm:$0x1] %v1390_v7  ;;  %v1173_v19 = vrot.slane %v1171_v11, 7  ;;  %v907_v9 = vadd.f32 %v8044_v63, %v906_v16  ;;  %v380_v11 = vld [vmem:[#allocation2 + $0x90] sm:$0x1] }
 0x16b   : > { %2144 = vrot.lane.b32.xlu1 %v8037_v59, %s7643_s25  ;;  %1883 = vrot.lane.b32.xlu0 %v1758_v15, %s7641_s24  ;;  %1387 = vst [vmem:[#allocation2 + $0x78] sm:$0xf] %v1386_v23  ;;  %v428_v15 = vsel %vm7741_vm7, 0, %v427_v14  ;;  %v381_v42 = vsel %vm7729_vm5, 0, %v380_v11 }
 0x16c   : > { %429 = vst [vmem:[#allocation2 + $0x8c] sm:$0x1] %v428_v15  ;;  %v1176_v22 = vor.u32 %v1174_v12, %v1173_v19  ;;  %v955_v23 = vmax.f32 %v907_v9, 0.0  ;;  %v1177_v41 = vrot.slane %v1173_v19, 4 }
 0x16d   : > { %382 = vst [vmem:[#allocation2 + $0x90] sm:$0x1] %v381_v42 }
 0x16e   : > { %v1393_v26 = vsel %vm7764_vm9, %v1176_v22, %v1392_v20  ;;  %v987_v27 = vpack.c.bf16 %v955_v23, %v955_v23  ;;  %v8147_v3 = vpop.permute.xlu1 %2022 }
 0x16f   : > { %1394 = vst [vmem:[#allocation2 + $0x84] sm:$0xf] %v1393_v26 }
 0x170   : > { %v1179_v30 = vshrl.u32 %v987_v27, 16  ;;  %v1182_v35 = vshll.u32 %v987_v27, 16  ;;  %v7443_v16 = vld [vmem:[#allocation2 + $0x78] sm:$0xf0] }
 0x171   : > { %v1480_v5 = vld [vmem:[#allocation2 + $0x80] sm:$0x1] }
 0x172   : > { %v1181_v43 = vrot.slane %v1179_v30, 7  ;;  %v1624_v17 = vunpack.c.l.b16 %v1480_v5  ;;  %v7444_v19 = vld [vmem:[#allocation2 + $0x78] sm:$0xe] }
 0x173   : > { %2028 = vrot.lane.b32.xlu1 %v1984_v36, %s7640_s23  ;;  %v7251_v36 = vld [vmem:[%s10370_s3 + $0x58] sm:$0xff]  ;;  %v1396_v45 = vld [vmem:[#allocation2 + $0x8c] sm:$0x1]  ;;  %v7445_v23 = vor.u32 %v7444_v19, %v7443_v16 }
 0x174   : > { %2573 = vmatpush.bf16.msra.mxu2 %v7251_v36  ;;  %v1184_v34 = vor.u32 %v1182_v35, %v1181_v43  ;;  %v1186_v49 = vrot.slane %v1181_v43, 4  ;;  %v8168_v22 = vpack.c.b16 %v1624_v17, %v1624_v17  ;;  %v7237_v35 = vld [vmem:[%s7717_s20 + $0x78] sm:$0xff] }
 0x175   : > { %v1988_v40 = vrot.slane %v7445_v23, 1  ;;  %6881 = vmatmul.msk.bf16.gmra.mxu0 %vm789_vm2, %v7237_v35  ;;  %vm445_vm2 = vcmask 519168  }
 0x176   : > { %v1185_v21 = vsel %vm7776_vm11, %v1177_v41, %v1184_v34  ;;  %v1397_v50 = vsel %vm7729_vm5, %v1186_v49, %v1396_v45  ;;  %v1989_v41 = vrot.slane %v8168_v22, 1  ;;  %v1399_v45 = vld [vmem:[#allocation2 + $0x90] sm:$0xf]  ;;  %446 = vst.msk [vmem:[#allocation3] sm:$0xf] %vm445_vm2, %v7642_v39  ;;  %vm8417_vm10 = vmand %vm445_vm2, %vm395_vm6 }
 0x177   : > { %1395 = vst.msk [vmem:[#allocation2 + $0x88] sm:$0xf] %vm334_vm8, %v1185_v21 }
 0x178   : > { %2574 = vmatpush.bf16.msra.mxu2 %v7250_v46  ;;  %1398 = vst [vmem:[#allocation2 + $0x8c] sm:$0x1] %v1397_v50  ;;  %v909_v12 = vpop.f32.mrf.mxu0  ;;  %v1990_v50 = vsel %vm1957_vm12, %v1988_v40, %v1989_v41 }
 0x179   : > { %v910_v15 = vadd.f32 %v8044_v63, %v909_v12  ;;  %447 = vst.msk [vmem:[#allocation3 + $0x4] sm:$0xf] %vm445_vm2, %v7642_v39 }
 0x17a   : > { %451 = vst.msk [vmem:[#allocation3 + $0xcc] sm:$0xf] %vm445_vm2, %v7642_v39 }
 0x17b   : > { %1885 = vrot.lane.b32.xlu1 %v1770_v31, %s7641_s24  ;;  %v2050_v31 = vsel %vm2048_vm14, %v7879_v33, %v1868_v53  ;;  %v956_v20 = vmax.f32 %v910_v15, 0.0  ;;  %452 = vst.msk [vmem:[#allocation3 + $0xd0] sm:$0xf] %vm445_vm2, %v7642_v39 }
 0x17c   : > { %2575 = vmatpush.bf16.msra.mxu2 %v7249_v57 }
 0x17d   : > { %v988_v61 = vpack.c.bf16 %v956_v20, %v956_v20 }
 0x17e   : > { %v8153_v33 = vld [vmem:[#allocation2 + $0x84] sm:$0xff]  }
 0x17f   : > { %v1880_v4 = vpop.permute.xlu1 %1879  ;;  %v8155_v10 = vld [vmem:[#allocation2 + $0x84] sm:$0xf0]  ;;  %v1481_v9 = vld [vmem:[#allocation2 + $0x8c] sm:$0x1]  ;;  %v1188_v26 = vshrl.u32 %v988_v61, 16  ;;  %v1191_v27 = vshll.u32 %v988_v61, 16 }
 0x180   : > { %2576 = vmatpush.bf16.msra.mxu2 %v7248_v58  ;;  %v2062_v6 = vsel %vm2048_vm14, %v7921_v54, %v1880_v4  ;;  %v1625_v25 = vunpack.c.l.b16 %v1481_v9  ;;  %v911_v30 = vpop.f32.mrf.mxu0  ;;  %v1786_v46 = vshll.u32 %v8153_v33, 16  ;;  %v1784_v57 = vshrl.u32 %v8153_v33, 16 }
 0x181   : > { %v1190_v36 = vrot.slane %v1188_v26, 7  ;;  %v912_v44 = vadd.f32 %v8044_v63, %v911_v30 }
 0x182   : > { %v8177_v43 = vpack.c.b16 %v1625_v25, %v1625_v25  ;;  %v1788_v24 = vrot.slane %v1786_v46, 1 }
 0x183   : > { %v1193_v56 = vor.u32 %v1191_v27, %v1190_v36  ;;  %v957_v34 = vmax.f32 %v912_v44, 0.0 }
 0x184   : > { %v1791_v53 = vshll.u32 %v8177_v43, 16  ;;  %v1789_v15 = vor.u32 %v1788_v24, %v1784_v57 }
 0x185   : > { %v1400_v49 = vsel %vm7764_vm9, %v1193_v56, %v1399_v45  ;;  %v989_v21 = vpack.c.bf16 %v957_v34, %v957_v34 }
 0x186   : > { %1401 = vst [vmem:[#allocation2 + $0x90] sm:$0xf] %v1400_v49  ;;  %v1793_v12 = vrot.slane %v1791_v53, 1 }
 0x187   : > { %v1196_v58 = vshrl.u32 %v989_v21, 16 }
 0x188   : > { %v914_v4 = vpop.f32.mrf.mxu0  ;;  %v1794_v20 = vsel %vm1650_vm13, %v1789_v15, %v1793_v12 }
 0x189   : > { %v915_v11 = vadd.f32 %v8044_v63, %v914_v4 }
 0x18b   : > { %v958_v17 = vmax.f32 %v915_v11, 0.0 }
 0x18d   : > { %v8131_v52 = vpop.permute.xlu2 %2138  ;;  %v990_v9 = vpack.c.bf16 %v958_v17, %v958_v17 }
 0x18f   : > { %v1205_v61 = vshrl.u32 %v990_v9, 16  ;;  %v1208_v23 = vshll.u32 %v990_v9, 16 }
 0x190   : > { %v916_v30 = vpop.f32.mrf.mxu0 }
 0x191   : > { %v1207_v27 = vrot.slane %v1205_v61, 7  ;;  %v917_v44 = vadd.f32 %v8044_v63, %v916_v30 }
 0x193   : > { %v1210_v40 = vor.u32 %v1208_v23, %v1207_v27  ;;  %v1211_v49 = vrot.slane %v1207_v27, 4  ;;  %v1992_v23 = vrot.slane %v8177_v43, 1 }
 0x195   : > { %v2013_v0 = vpop.permute.xlu2 %2012 }
 0x196   : > { %v2087_v1 = vsel %vm2085_vm15, %v2050_v31, %v2013_v0  ;;  %v1199_v31 = vshll.u32 %v989_v21, 16 }
 0x197   : > { %v2205_v2 = vsel %vm2203_vm0, %v2087_v1, %v8131_v52  ;;  %v1194_v1 = vrot.slane %v1190_v36, 4 }
 0x198   : > { %2488 = vmatmul.bf16.vlgmr.msra.gmra.mxu1 %v2205_v2  ;;  %v383_v2 = vld [vmem:[#allocation2 + $0x9c] sm:$0x1] }
 0x19d   : > { %v8149_v60 = vpop.permute.xlu2 %2140 }
 0x19e   : > { %v2208_v54 = vsel %vm2203_vm0, %v7956_v8, %v8149_v60  ;;  %v431_v8 = vsel %vm7741_vm7, 0, %v430_v47  ;;  %v433_v47 = vld [vmem:[#allocation2 + $0xa4] sm:$0x1] }
 0x19f   : > { %432 = vst [vmem:[#allocation2 + $0x98] sm:$0x1] %v431_v8  ;;  %v434_v8 = vsel %vm7741_vm7, 0, %v433_v47 }
 0x1a0   : > { %435 = vst [vmem:[#allocation2 + $0xa4] sm:$0x1] %v434_v8 }
 0x1a5   : > { %v2025_v7 = vpop.permute.xlu2 %2024 }
 0x1a6   : > { %v8158_v14 = vsel %vm2085_vm15, %v2062_v6, %v2025_v7  ;;  %v1198_v6 = vrot.slane %v1196_v58, 7  ;;  %v384_v7 = vsel %vm7729_vm5, 0, %v383_v2  ;;  %v1403_v42 = vld [vmem:[#allocation2 + $0x98] sm:$0x1] }
 0x1a7   : > { %2179 = vrot.lane.b32.xlu0 %v8158_v14, %s7640_s23  ;;  %385 = vst [vmem:[#allocation2 + $0x9c] sm:$0x1] %v384_v7  ;;  %v1410_v53 = vld [vmem:[#allocation2 + $0xa4] sm:$0x1] }
 0x1a8   : > { %2493 = vmatmul.bf16.gmra.mxu1 %v2208_v54  ;;  %v1201_v54 = vor.u32 %v1199_v31, %v1198_v6  ;;  %v1203_v16 = vrot.slane %v1198_v6, 4 }
 0x1aa   : > { %v1202_v19 = vsel %vm7776_vm11, %v1194_v1, %v1201_v54 }
 0x1ab   : > { %1402 = vst.msk [vmem:[#allocation2 + $0x94] sm:$0xf] %vm334_vm8, %v1202_v19 }
 0x1ad   : > { %v1882_v6 = vpop.permute.xlu2 %1881 }
 0x1ae   : > { %v1406_v36 = vld [vmem:[#allocation2 + $0x9c] sm:$0xf]  ;;  %v2064_v15 = vsel %vm2048_vm14, %v7972_v32, %v1882_v6 }
 0x1af   : > { %2148 = vrot.lane.b32.xlu0 %v8158_v14, %s7643_s25  ;;  %v1407_v41 = vsel %vm7764_vm9, %v1210_v40, %v1406_v36 }
 0x1b0   : > { %1408 = vst [vmem:[#allocation2 + $0x9c] sm:$0xf] %v1407_v41 }
 0x1b2   : > { %v8249_v9 = vld [vmem:[#allocation2 + $0x90] sm:$0xff]  }
 0x1b3   : > { %v1796_v36 = vshrl.u32 %v8249_v9, 16  ;;  %v7446_v41 = vld [vmem:[#allocation2 + $0x90] sm:$0xf0] }
 0x1b5   : > { %v2172_v0 = vpop.permute.xlu0 %2171 }
 0x1b6   : > { %6954 = vmatmul.msk.bf16.vlgmr.msra.gmra.mxu3 %vm2048_vm14, %v2172_v0  ;;  %v2253_v5 = vsel %vm2085_vm15, %v8131_v52, %v2172_v0  ;;  %v1404_v52 = vsel %vm7729_vm5, %v1203_v16, %v1403_v42  ;;  %v7563_v42 = vld [vmem:[#allocation2 + $0x84] sm:$0xe] }
 0x1b7   : > { %2577 = vmatmul.bf16.vlgmr.msra.gmra.mxu2 %v2253_v5  ;;  %2032 = vrot.lane.b32.xlu0 %v1990_v50, %s7640_s23  ;;  %1405 = vst [vmem:[#allocation2 + $0x98] sm:$0x1] %v1404_v52  ;;  %v8218_v50 = vld [vmem:[#allocation2 + $0x78] sm:$0xff]   ;;  %v1779_v5 = vshll.u32 %v8168_v22, 16  ;;  %v7564_v17 = vor.u32 %v7563_v42, %v8155_v10 }
 0x1b8   : > { %v1774_v58 = vshll.u32 %v8218_v50, 16  ;;  %v1772_v2 = vshrl.u32 %v8218_v50, 16 }
 0x1b9   : > { %v1781_v11 = vrot.slane %v1779_v5, 1  ;;  %v1991_v61 = vrot.slane %v7564_v17, 1 }
 0x1ba   : > { %v1776_v4 = vrot.slane %v1774_v58, 1 }
 0x1bc   : > { %v1777_v7 = vor.u32 %v1776_v4, %v1772_v2 }
 0x1bd   : > { %v1878_v25 = vpop.permute.xlu0 %1877 }
 0x1be   : > { %v2060_v26 = vsel %vm2048_vm14, %v7908_v29, %v1878_v25  ;;  %v959_v29 = vmax.f32 %v917_v44, 0.0  ;;  %v1482_v22 = vld [vmem:[#allocation2 + $0x98] sm:$0x1] }
 0x1bf   : > { %v8203_v35 = vsel %vm2085_vm15, %v2060_v26, %v8147_v3  ;;  %1889 = vrot.lane.b32.xlu0 %v1794_v20, %s7641_s24  ;;  %v1626_v19 = vunpack.c.l.b16 %v1482_v22  ;;  %v386_v20 = vld [vmem:[#allocation2 + $0xa8] sm:$0x1]  ;;  %v1798_v26 = vshll.u32 %v8249_v9, 16  ;;  %v436_v22 = vld [vmem:[#allocation2 + $0xb0] sm:$0x1] }
 0x1c0   : > { %2177 = vrot.lane.b32.xlu2 %v8203_v35, %s7640_s23  ;;  %v991_v3 = vpack.c.bf16 %v959_v29, %v959_v29  ;;  %v387_v10 = vsel %vm7729_vm5, 0, %v386_v20 }
 0x1c1   : > { %v1644_v25 = vpack.c.b16 %v1626_v19, %v1626_v19  ;;  %388 = vst [vmem:[#allocation2 + $0xa8] sm:$0x1] %v387_v10  ;;  %v1800_v8 = vrot.slane %v1798_v26, 1  ;;  %v437_v19 = vsel %vm7741_vm7, 0, %v436_v22  ;;  %v457_v22 = vld [vmem:[#allocation3 + $0xc] sm:$0x1] }
 0x1c2   : > { %v1213_v46 = vshrl.u32 %v991_v3, 16  ;;  %v1216_v56 = vshll.u32 %v991_v3, 16  ;;  %v7447_v3 = vld [vmem:[#allocation2 + $0x90] sm:$0xe]  ;;  %438 = vst [vmem:[#allocation2 + $0xb0] sm:$0x1] %v437_v19 }
 0x1c3   : > { %v1803_v44 = vshll.u32 %v1644_v25, 16 }
 0x1c4   : > { %v1215_v21 = vrot.slane %v1213_v46, 7 }
 0x1c5   : > { %v2174_v45 = vpop.permute.xlu0 %2173 }
 0x1c6   : > { %6955 = vmatmul.msk.bf16.gmra.mxu3 %vm2048_vm14, %v2174_v45  ;;  %v2256_v34 = vsel %vm2085_vm15, %v8149_v60, %v2174_v45  ;;  %v1218_v57 = vor.u32 %v1216_v56, %v1215_v21  ;;  %v1220_v24 = vrot.slane %v1215_v21, 4  ;;  %v1805_v45 = vrot.slane %v1803_v44, 1  ;;  %v919_v21 = vpop.f32.mrf.mxu0 }
 0x1c7   : > { %2582 = vmatmul.bf16.gmra.mxu2 %v2256_v34  ;;  %v7448_v56 = vor.u32 %v7447_v3, %v7446_v41 }
 0x1c8   : > { %2146 = vrot.lane.b32.xlu2 %v8203_v35, %s7643_s25  ;;  %v1219_v31 = vsel %vm7776_vm11, %v1211_v49, %v1218_v57  ;;  %v1411_v0 = vsel %vm7729_vm5, %v1220_v24, %v1410_v53  ;;  %v920_v53 = vadd.f32 %v8044_v63, %v919_v21  ;;  %v1995_v24 = vrot.slane %v1644_v25, 1  ;;  %v389_v25 = vld [vmem:[#allocation2 + $0xb4] sm:$0x1] }
 0x1c9   : > { %1409 = vst.msk [vmem:[#allocation2 + $0xa0] sm:$0xf] %vm334_vm8, %v1219_v31  ;;  %v1994_v57 = vrot.slane %v7448_v56, 1  ;;  %v390_v26 = vsel %vm7729_vm5, 0, %v389_v25  ;;  %v506_v25 = vld [vmem:[#allocation3 + $0x14] sm:$0x1] }
 0x1ca   : > { %1412 = vst [vmem:[#allocation2 + $0xa4] sm:$0x1] %v1411_v0  ;;  %v960_v0 = vmax.f32 %v920_v53, 0.0 }
 0x1cb   : > { %391 = vst [vmem:[#allocation2 + $0xb4] sm:$0x1] %v390_v26 }
 0x1cd   : > { %v2143_v60 = vpop.permute.xlu0 %2142 }
 0x1ce   : > { %v2211_v1 = vsel %vm2203_vm0, %v7985_v62, %v2143_v60  ;;  %v921_v17 = vpop.f32.mrf.mxu0 }
 0x1cf   : > { %2498 = vmatmul.bf16.gmra.mxu1 %v2211_v1  ;;  %v1996_v1 = vsel %vm1957_vm12, %v1994_v57, %v1995_v24 }
 0x1d0   : > { %2030 = vrot.lane.b32.xlu2 %v8124_v48, %s7640_s23  ;;  %v1782_v48 = vsel %vm1650_vm13, %v1777_v7, %v1781_v11  ;;  %v8261_v40 = vld [vmem:[#allocation2 + $0x9c] sm:$0xff]  }
 0x1d1   : > { %v8263_v43 = vld [vmem:[#allocation2 + $0x9c] sm:$0xf0]  ;;  %v1483_v46 = vld [vmem:[#allocation2 + $0xa4] sm:$0x1]  ;;  %v1810_v31 = vshll.u32 %v8261_v40, 16  ;;  %v1808_v2 = vshrl.u32 %v8261_v40, 16 }
 0x1d2   : > { %v1627_v34 = vunpack.c.l.b16 %v1483_v46 }
 0x1d3   : > { %v1812_v4 = vrot.slane %v1810_v31, 1  ;;  %v1420_v31 = vld [vmem:[#allocation2 + $0xb4] sm:$0xf] }
 0x1d4   : > { %v8276_v58 = vpack.c.b16 %v1627_v34, %v1627_v34  ;;  %v7566_v34 = vld [vmem:[#allocation2 + $0x9c] sm:$0xe] }
 0x1d5   : > { %v2176_v12 = vpop.permute.xlu1 %2175  ;;  %v2027_v54 = vpop.permute.xlu0 %2026  ;;  %v1813_v42 = vor.u32 %v1812_v4, %v1808_v2 }
 0x1d6   : > { %v2259_v62 = vsel %vm2085_vm15, %v2143_v60, %v2176_v12  ;;  %6956 = vmatmul.msk.bf16.gmra.mxu3 %vm2048_vm14, %v2176_v12  ;;  %v8237_v16 = vsel %vm2085_vm15, %v2064_v15, %v2027_v54  ;;  %v992_v60 = vpack.c.bf16 %v960_v0, %v960_v0  ;;  %v1815_v5 = vshll.u32 %v8276_v58, 16  ;;  %v1413_v12 = vld [vmem:[#allocation2 + $0xa8] sm:$0xf] }
 0x1d7   : > { %2587 = vmatmul.bf16.gmra.mxu2 %v2259_v62  ;;  %2181 = vrot.lane.b32.xlu1 %v8237_v16, %s7640_s23  ;;  %v7567_v0 = vor.u32 %v7566_v34, %v8263_v43  ;;  %v1998_v4 = vrot.slane %v8276_v58, 1 }
 0x1d8   : > { %1887 = vrot.lane.b32.xlu2 %v1782_v48, %s7641_s24  ;;  %v1222_v6 = vshrl.u32 %v992_v60, 16  ;;  %v1225_v7 = vshll.u32 %v992_v60, 16  ;;  %v1817_v15 = vrot.slane %v1815_v5, 1 }
 0x1d9   : > { %v1997_v2 = vrot.slane %v7567_v0, 1 }
 0x1da   : > { %v1224_v11 = vrot.slane %v1222_v6, 7  ;;  %v1818_v48 = vsel %vm1650_vm13, %v1813_v42, %v1817_v15 }
 0x1dc   : > { %v1227_v54 = vor.u32 %v1225_v7, %v1224_v11  ;;  %v8306_v7 = vsel %vm1957_vm12, %v1997_v2, %v1998_v4 }
 0x1dd   : > { %v8244_v32 = vpop.permute.xlu1 %2144  ;;  %v1884_v27 = vpop.permute.xlu0 %1883 }
 0x1de   : > { %v2214_v52 = vsel %vm2203_vm0, %v8008_v28, %v8244_v32  ;;  %v1993_v28 = vsel %vm1957_vm12, %v1991_v61, %v1992_v23  ;;  %v2066_v47 = vsel %vm2048_vm14, %v8017_v38, %v1884_v27  ;;  %v1801_v38 = vor.u32 %v1800_v8, %v1796_v36  ;;  %v924_v27 = vpop.f32.mrf.mxu0  ;;  %v1417_v36 = vld [vmem:[#allocation2 + $0xb0] sm:$0x1] }
 0x1df   : > { %2503 = vmatmul.bf16.gmra.mxu1 %v2214_v52  ;;  %2150 = vrot.lane.b32.xlu1 %v8237_v16, %s7643_s25  ;;  %v1414_v62 = vsel %vm7764_vm9, %v1227_v54, %v1413_v12  ;;  %v922_v52 = vadd.f32 %v8044_v63, %v921_v17 }
 0x1e0   : > { %v1806_v49 = vsel %vm1650_vm13, %v1801_v38, %v1805_v45  ;;  %1415 = vst [vmem:[#allocation2 + $0xa8] sm:$0xf] %v1414_v62 }
 0x1e1   : > { %v961_v20 = vmax.f32 %v922_v52, 0.0 }
 0x1e3   : > { %v993_v61 = vpack.c.bf16 %v961_v20, %v961_v20  ;;  %v458_v20 = vsel %vm8315_vm3, 0, %v457_v22 }
 0x1e4   : > { %459 = vst [vmem:[#allocation3 + $0xc] sm:$0x1] %v458_v20 }
 0x1e5   : > { %v2029_v30 = vpop.permute.xlu1 %2028  ;;  %v1230_v23 = vshrl.u32 %v993_v61, 16  ;;  %v1233_v10 = vshll.u32 %v993_v61, 16 }
 0x1e6   : > { %v8266_v29 = vsel %vm2085_vm15, %v2066_v47, %v2029_v30  ;;  %v925_v30 = vadd.f32 %v8044_v63, %v924_v27  ;;  %v926_v21 = vpop.f32.mrf.mxu0 }
 0x1e7   : > { %2183 = vrot.lane.b32.xlu2 %v8266_v29, %s7640_s23  ;;  %2034 = vrot.lane.b32.xlu1 %v1993_v28, %s7640_s23  ;;  %v1228_v28 = vrot.slane %v1224_v11, 4  ;;  %v1232_v47 = vrot.slane %v1230_v23, 7  ;;  %v927_v24 = vadd.f32 %v8044_v63, %v926_v21 }
 0x1e8   : > { %v962_v41 = vmax.f32 %v925_v30, 0.0 }
 0x1e9   : > { %v1235_v8 = vor.u32 %v1233_v10, %v1232_v47  ;;  %v1237_v44 = vrot.slane %v1232_v47, 4 }
 0x1ea   : > { %v994_v45 = vpack.c.bf16 %v962_v41, %v962_v41 }
 0x1eb   : > { %v1236_v3 = vsel %vm7776_vm11, %v1228_v28, %v1235_v8  ;;  %v1418_v38 = vsel %vm7729_vm5, %v1237_v44, %v1417_v36  ;;  %v507_v28 = vsel %vm8340_vm4, 0, %v506_v25 }
 0x1ec   : > { %1416 = vst.msk [vmem:[#allocation2 + $0xac] sm:$0xf] %vm334_vm8, %v1236_v3  ;;  %v1239_v46 = vshrl.u32 %v994_v45, 16  ;;  %v1242_v56 = vshll.u32 %v994_v45, 16 }
 0x1ed   : > { %1419 = vst [vmem:[#allocation2 + $0xb0] sm:$0x1] %v1418_v38  ;;  %v1886_v10 = vpop.permute.xlu1 %1885 }
 0x1ee   : > { %v1241_v53 = vrot.slane %v1239_v46, 7  ;;  %v2068_v39 = vsel %vm2048_vm14, %v8029_v55, %v1886_v10  ;;  %508 = vst [vmem:[#allocation3 + $0x14] sm:$0x1] %v507_v28  ;;  %v460_v55 = vld [vmem:[#allocation3 + $0x18] sm:$0x1] }
 0x1ef   : > { %2152 = vrot.lane.b32.xlu2 %v8266_v29, %s7643_s25  ;;  %1891 = vrot.lane.b32.xlu1 %v1806_v49, %s7641_s24  ;;  %v439_v49 = vld [vmem:[#allocation2 + $0xbc] sm:$0x1]  ;;  %v461_v38 = vsel %vm8315_vm3, 0, %v460_v55 }
 0x1f0   : > { %v440_v57 = vsel %vm7741_vm7, 0, %v439_v49  ;;  %v1244_v60 = vor.u32 %v1242_v56, %v1241_v53  ;;  %v1245_v42 = vrot.slane %v1241_v53, 4  ;;  %462 = vst [vmem:[#allocation3 + $0x18] sm:$0x1] %v461_v38 }
 0x1f1   : > { %441 = vst [vmem:[#allocation2 + $0xbc] sm:$0x1] %v440_v57 }
 0x1f2   : > { %v1421_v5 = vsel %vm7764_vm9, %v1244_v60, %v1420_v31  ;;  %v929_v8 = vpop.f32.mrf.mxu0  ;;  %v7450_v31 = vld [vmem:[#allocation2 + $0xa8] sm:$0xe] }
 0x1f3   : > { %1422 = vst [vmem:[#allocation2 + $0xb4] sm:$0xf] %v1421_v5  ;;  %v8357_v3 = vld [vmem:[#allocation2 + $0xa8] sm:$0xff]  }
 0x1f4   : > { %v1484_v36 = vld [vmem:[#allocation2 + $0xb0] sm:$0x1]  ;;  %v1822_v21 = vshll.u32 %v8357_v3, 16  ;;  %v1820_v2 = vshrl.u32 %v8357_v3, 16 }
 0x1f5   : > { %v1628_v41 = vunpack.c.l.b16 %v1484_v36 }
 0x1f6   : > { %v1824_v4 = vrot.slane %v1822_v21, 1  ;;  %v463_v21 = vld [vmem:[#allocation3 + $0x24] sm:$0x1] }
 0x1f7   : > { %2036 = vrot.lane.b32.xlu2 %v1996_v1, %s7640_s23  ;;  %v963_v1 = vmax.f32 %v927_v24, 0.0  ;;  %v1646_v49 = vpack.c.b16 %v1628_v41, %v1628_v41 }
 0x1f8   : > { %v1424_v54 = vld [vmem:[#allocation2 + $0xbc] sm:$0x1] }
 0x1f9   : > { %v995_v6 = vpack.c.bf16 %v963_v1, %v963_v1  ;;  %v1827_v5 = vshll.u32 %v1646_v49, 16  ;;  %v2001_v28 = vrot.slane %v1646_v49, 1 }
 0x1fa   : > { %v931_v0 = vpop.f32.mrf.mxu0 }
 0x1fb   : > { %v1247_v11 = vshrl.u32 %v995_v6, 16  ;;  %v1250_v12 = vshll.u32 %v995_v6, 16  ;;  %v932_v1 = vadd.f32 %v8044_v63, %v931_v0 }
 0x1fd   : > { %v1249_v15 = vrot.slane %v1247_v11, 7 }
 0x1ff   : > { %1893 = vrot.lane.b32.xlu2 %v1818_v48, %s7641_s24  ;;  %v1252_v62 = vor.u32 %v1250_v12, %v1249_v15  ;;  %v1254_v43 = vrot.slane %v1249_v15, 4  ;;  %v930_v12 = vadd.f32 %v8044_v63, %v929_v8  ;;  %v442_v15 = vld [vmem:[#allocation2 + $0xc8] sm:$0x1]  ;;  %v1825_v63 = vor.u32 %v1824_v4, %v1820_v2 }
 0x200   : > { %v443_v22 = vsel %vm7741_vm7, 0, %v442_v15 }
 0x201   : > { %v1253_v48 = vsel %vm7776_vm11, %v1245_v42, %v1252_v62  ;;  %v1425_v58 = vsel %vm7729_vm5, %v1254_v43, %v1424_v54  ;;  %v509_v42 = vld [vmem:[#allocation3 + $0x20] sm:$0x1]  ;;  %v965_v54 = vmax.f32 %v932_v1, 0.0  ;;  %v964_v20 = vmax.f32 %v930_v12, 0.0  ;;  %444 = vst [vmem:[#allocation2 + $0xc8] sm:$0x1] %v443_v22 }
 0x202   : > { %1423 = vst.msk [vmem:[#allocation2 + $0xb8] sm:$0xf] %vm334_vm8, %v1253_v48  ;;  %v464_v1 = vsel %vm8315_vm3, 0, %v463_v21 }
 0x203   : > { %1426 = vst [vmem:[#allocation2 + $0xbc] sm:$0x1] %v1425_v58  ;;  %v510_v58 = vsel %vm8340_vm4, 0, %v509_v42 }
 0x204   : > { %511 = vst [vmem:[#allocation3 + $0x20] sm:$0x1] %v510_v58 }
 0x205   : > { %465 = vst [vmem:[#allocation3 + $0x24] sm:$0x1] %v464_v1 }
 0x208   : > { %v1431_v42 = vld [vmem:[#allocation2 + $0xc8] sm:$0x1] }
 0x209   : > { %v8367_v53 = vld [vmem:[#allocation2 + $0xb4] sm:$0xff]  }
 0x20a   : > { %v8369_v57 = vld [vmem:[#allocation2 + $0xb4] sm:$0xf0]  ;;  %v1485_v60 = vld [vmem:[#allocation2 + $0xbc] sm:$0x1]  ;;  %v1834_v41 = vshll.u32 %v8367_v53, 16  ;;  %v1832_v0 = vshrl.u32 %v8367_v53, 16 }
 0x20b   : > { %v1629_v48 = vunpack.c.l.b16 %v1485_v60 }
 0x20d   : > { %v8397_v36 = vpack.c.b16 %v1629_v48, %v1629_v48 }
 0x20f   : > { %v1839_v60 = vshll.u32 %v8397_v36, 16 }
 0x215   : > { %v2489_v44 = vpop.f32.mrf.mxu1 }
 0x219   : > { %v2180_v61 = vpop.permute.xlu0 %2179 }
 0x21a   : > { %v2178_v17 = vpop.permute.xlu2 %2177 }
 0x21b   : > { %6957 = vmatmul.msk.bf16.gmra.mxu3 %vm2048_vm14, %v2178_v17  ;;  %v2262_v52 = vsel %vm2085_vm15, %v8244_v32, %v2178_v17 }
 0x21c   : > { %2592 = vmatmul.bf16.gmra.mxu2 %v2262_v52  ;;  %v392_v52 = vld [vmem:[#allocation2 + $0xc0] sm:$0x1] }
 0x21d   : > { %v2491_v6 = vpop.f32.mrf.mxu1  ;;  %v393_v10 = vsel %vm7729_vm5, 0, %v392_v52 }
 0x21e   : > { %394 = vst [vmem:[#allocation2 + $0xc0] sm:$0x1] %v393_v10 }
 0x221   : > { %v8344_v27 = vpop.permute.xlu0 %2148 }
 0x222   : > { %v2147_v32 = vpop.permute.xlu2 %2146  ;;  %v2220_v34 = vsel %vm2203_vm0, %v8203_v35, %v8344_v27  ;;  %v7449_v35 = vld [vmem:[#allocation2 + $0xa8] sm:$0xf0] }
 0x223   : > { %v2217_v23 = vsel %vm2203_vm0, %v8037_v59, %v2147_v32  ;;  %v2265_v30 = vsel %vm2085_vm15, %v2147_v32, %v2180_v61  ;;  %v7451_v11 = vor.u32 %v7450_v31, %v7449_v35 }
 0x224   : > { %2508 = vmatmul.bf16.gmra.mxu1 %v2217_v23  ;;  %v1829_v23 = vrot.slane %v1827_v5, 1 }
 0x225   : > { %v2000_v25 = vrot.slane %v7451_v11, 1  ;;  %v2494_v2 = vpop.f32.mrf.mxu1  ;;  %v1836_v11 = vrot.slane %v1834_v41, 1 }
 0x229   : > { %v2033_v46 = vpop.permute.xlu0 %2032 }
 0x22a   : > { %v2031_v47 = vpop.permute.xlu2 %2030 }
 0x22b   : > { %6958 = vmatmul.msk.bf16.gmra.mxu3 %vm2048_vm14, %v2180_v61  ;;  %v8352_v59 = vsel %vm2085_vm15, %v2068_v39, %v2031_v47  ;;  %v997_v61 = vpack.c.bf16 %v965_v54, %v965_v54  ;;  %v996_v39 = vpack.c.bf16 %v964_v20, %v964_v20 }
 0x22c   : > { %2185 = vrot.lane.b32.xlu0 %v8352_v59, %s7640_s23  ;;  %2597 = vmatmul.bf16.gmra.mxu2 %v2265_v30 }
 0x22d   : > { %v1264_v47 = vshrl.u32 %v997_v61, 16  ;;  %v1256_v8 = vshrl.u32 %v996_v39, 16 }
 0x22f   : > { %v1266_v55 = vrot.slane %v1264_v47, 7 }
 0x231   : > { %v1271_v49 = vrot.slane %v1266_v55, 4 }
 0x232   : > { %v1888_v45 = vpop.permute.xlu2 %1887 }
 0x233   : > { %v2070_v56 = vsel %vm2048_vm14, %v8218_v50, %v1888_v45  ;;  %v8379_v50 = vld [vmem:[%s10371_s4] ss:$0 sm:$0xff] }
 0x234   : > { %2154 = vrot.lane.b32.xlu0 %v8352_v59, %s7643_s25  ;;  %2513 = vmatmul.bf16.gmra.mxu1 %v2220_v34  ;;  %v8374_v24 = vsel %vm2085_vm15, %v2070_v56, %v2033_v46  ;;  %v2490_v62 = vadd.f32 %v8379_v50, %v2489_v44  ;;  %v1259_v44 = vshll.u32 %v996_v39, 16  ;;  %v2492_v38 = vadd.f32 %v8379_v50, %v2491_v6 }
 0x235   : > { %2187 = vrot.lane.b32.xlu1 %v8374_v24, %s7640_s23  ;;  %v2002_v46 = vsel %vm1957_vm12, %v2000_v25, %v2001_v28  ;;  %v1258_v56 = vrot.slane %v1256_v8, 7  ;;  %v1267_v34 = vshll.u32 %v997_v61, 16  ;;  %v3133_v61 = vld [vmem:[#allocation3 + $0xc] sm:$0xf]  ;;  %v2495_v28 = vadd.f32 %v8379_v50, %v2494_v2 }
 0x236   : > { %v512_v25 = vld [vmem:[#allocation3 + $0x2c] sm:$0x1] }
 0x237   : > { %v1261_v5 = vor.u32 %v1259_v44, %v1258_v56  ;;  %v1262_v6 = vrot.slane %v1258_v56, 4  ;;  %v1269_v12 = vor.u32 %v1267_v34, %v1266_v55  ;;  %v513_v44 = vsel %vm8340_vm4, 0, %v512_v25 }
 0x238   : > { %514 = vst [vmem:[#allocation3 + $0x2c] sm:$0x1] %v513_v44 }
 0x239   : > { %v2667_v43 = vpop.f32.mrf.mxu3  ;;  %v1270_v58 = vsel %vm7776_vm11, %v1262_v6, %v1269_v12 }
 0x23a   : > { %v2578_v17 = vpop.f32.mrf.mxu2  ;;  %1430 = vst.msk [vmem:[#allocation2 + $0xc4] sm:$0xf] %vm334_vm8, %v1270_v58 }
 0x23b   : > { %v2579_v32 = vadd.f32 %v2578_v17, %v2490_v62  ;;  %v1427_v62 = vld [vmem:[#allocation2 + $0xc0] sm:$0xf] }
 0x23c   : > { %2038 = vrot.lane.b32.xlu0 %v8306_v7, %s7640_s23  ;;  %v1830_v7 = vsel %vm1650_vm13, %v1825_v63, %v1829_v23  ;;  %v1428_v48 = vsel %vm7764_vm9, %v1261_v5, %v1427_v62  ;;  %v1841_v63 = vrot.slane %v1839_v60, 1 }
 0x23d   : > { %v2668_v30 = vadd.f32 %v2667_v43, %v2579_v32  ;;  %2156 = vrot.lane.b32.xlu1 %v8374_v24, %s7643_s25  ;;  %v1432_v43 = vsel %vm7729_vm5, %v1271_v49, %v1431_v42  ;;  %1429 = vst [vmem:[#allocation2 + $0xc0] sm:$0xf] %v1428_v48  ;;  %v1837_v32 = vor.u32 %v1836_v11, %v1832_v0 }
 0x23e   : > { %1433 = vst [vmem:[#allocation2 + $0xc8] sm:$0x1] %v1432_v43  ;;  %v1890_v43 = vpop.permute.xlu0 %1889 }
 0x23f   : > { %v2747_v45 = vmax.f32 %v2668_v30, 0.0 }
 0x241   : > { %v2779_v35 = vpack.c.bf16 %v2747_v45, %v2747_v45  ;;  %v2669_v31 = vpop.f32.mrf.mxu3  ;;  %v2184_v21 = vpop.permute.xlu2 %2183 }
 0x242   : > { %v2580_v4 = vpop.f32.mrf.mxu2 }
 0x243   : > { %v2812_v15 = vshrl.u32 %v2779_v35, 16  ;;  %v2581_v54 = vadd.f32 %v2580_v4, %v2492_v38  ;;  %v2815_v17 = vshll.u32 %v2779_v35, 16  ;;  %v1842_v38 = vsel %vm1650_vm13, %v1837_v32, %v1841_v63  ;;  %v3137_v35 = vld [vmem:[#allocation3 + $0x14] sm:$0x1] }
 0x244   : > { %1895 = vrot.lane.b32.xlu0 %v1830_v7, %s7641_s24 }
 0x245   : > { %v2814_v22 = vrot.slane %v2812_v15, 7  ;;  %v2670_v52 = vadd.f32 %v2669_v31, %v2581_v54  ;;  %2040 = vrot.lane.b32.xlu1 %v2002_v46, %s7640_s23  ;;  %v2496_v46 = vpop.f32.mrf.mxu1 }
 0x247   : > { %v2817_v23 = vor.u32 %v2815_v17, %v2814_v22  ;;  %v2748_v10 = vmax.f32 %v2670_v52, 0.0  ;;  %v2818_v31 = vrot.slane %v2814_v22, 4  ;;  %v3140_v17 = vld [vmem:[#allocation3 + $0x18] sm:$0xf]  ;;  %v7569_v52 = vld [vmem:[#allocation2 + $0xb4] sm:$0xe] }
 0x249   : > { %v3134_v39 = vsel %vm8417_vm10, %v2817_v23, %v3133_v61  ;;  %v2780_v47 = vpack.c.bf16 %v2748_v10, %v2748_v10  ;;  %v2672_v30 = vpop.f32.mrf.mxu3  ;;  %v2182_v8 = vpop.permute.xlu1 %2181  ;;  %v2072_v23 = vsel %vm2048_vm14, %v8153_v33, %v1890_v43 }
 0x24a   : > { %3135 = vst [vmem:[#allocation3 + $0xc] sm:$0xf] %v3134_v39  ;;  %v2583_v41 = vpop.f32.mrf.mxu2  ;;  %6959 = vmatmul.msk.bf16.gmra.mxu3 %vm2048_vm14, %v2182_v8  ;;  %v2268_v55 = vsel %vm2085_vm15, %v8344_v27, %v2182_v8  ;;  %v2497_v27 = vadd.f32 %v8379_v50, %v2496_v46  ;;  %v8442_v10 = vpop.permute.xlu2 %2152 }
 0x24b   : > { %v2820_v45 = vshrl.u32 %v2780_v47, 16  ;;  %v2584_v7 = vadd.f32 %v2583_v41, %v2495_v28  ;;  %2602 = vmatmul.bf16.gmra.mxu2 %v2268_v55  ;;  %v2823_v34 = vshll.u32 %v2780_v47, 16 }
 0x24d   : > { %v2822_v56 = vrot.slane %v2820_v45, 7  ;;  %v2673_v49 = vadd.f32 %v2672_v30, %v2584_v7  ;;  %1897 = vrot.lane.b32.xlu1 %v1842_v38, %s7641_s24  ;;  %v2499_v62 = vpop.f32.mrf.mxu1 }
 0x24e   : > { %v2500_v25 = vadd.f32 %v8379_v50, %v2499_v62  ;;  %v8465_v62 = vld [vmem:[#allocation2 + $0xc0] sm:$0xff]  }
 0x24f   : > { %v2825_v0 = vor.u32 %v2823_v34, %v2822_v56  ;;  %v2827_v60 = vrot.slane %v2822_v56, 4  ;;  %v2749_v1 = vmax.f32 %v2673_v49, 0.0 }
 0x251   : > { %v2826_v2 = vsel %vm7776_vm11, %v2818_v31, %v2825_v0  ;;  %v3138_v4 = vsel %vm8315_vm3, %v2827_v60, %v3137_v35  ;;  %v2781_v5 = vpack.c.bf16 %v2749_v1, %v2749_v1  ;;  %v2674_v6 = vpop.f32.mrf.mxu3  ;;  %v2151_v11 = vpop.permute.xlu1 %2150  ;;  %v7624_v63 = vld [vmem:[#allocation3 + $0xc] sm:$0xe]  ;;  %v1486_v35 = vld [vmem:[#allocation2 + $0xc8] sm:$0x1]  ;;  %v3144_v31 = vld [vmem:[#allocation3 + $0x20] sm:$0x1] }
 0x252   : > { %3136 = vst.msk [vmem:[#allocation3 + $0x10] sm:$0xf] %vm445_vm2, %v2826_v2  ;;  %v2585_v12 = vpop.f32.mrf.mxu2  ;;  %v2223_v42 = vsel %vm2203_vm0, %v8158_v14, %v2151_v11  ;;  %v2271_v41 = vsel %vm2085_vm15, %v2151_v11, %v2184_v21  ;;  %v2037_v43 = vpop.permute.xlu2 %2036 }
 0x253   : > { %3139 = vst [vmem:[#allocation3 + $0x14] sm:$0x1] %v3138_v4  ;;  %v2829_v15 = vshrl.u32 %v2781_v5, 16  ;;  %v2586_v54 = vadd.f32 %v2585_v12, %v2497_v27  ;;  %2518 = vmatmul.bf16.gmra.mxu1 %v2223_v42  ;;  %v2832_v58 = vshll.u32 %v2781_v5, 16 }
 0x255   : > { %v2831_v48 = vrot.slane %v2829_v15, 7  ;;  %v2675_v22 = vadd.f32 %v2674_v6, %v2586_v54  ;;  %v2501_v0 = vpop.f32.mrf.mxu1  ;;  %v1630_v6 = vunpack.c.l.b16 %v1486_v35 }
 0x256   : > { %v2502_v15 = vadd.f32 %v8379_v50, %v2501_v0 }
 0x257   : > { %v2834_v61 = vor.u32 %v2832_v58, %v2831_v48  ;;  %v2750_v32 = vmax.f32 %v2675_v22, 0.0  ;;  %v2835_v27 = vrot.slane %v2831_v48, 4  ;;  %v2226_v22 = vsel %vm2203_vm0, %v8237_v16, %v8442_v10 }
 0x258   : > { %v1648_v16 = vpack.c.b16 %v1630_v6, %v1630_v6 }
 0x259   : > { %v3141_v14 = vsel %vm8417_vm10, %v2834_v61, %v3140_v17  ;;  %v2782_v28 = vpack.c.bf16 %v2750_v32, %v2750_v32  ;;  %v2035_v39 = vpop.permute.xlu1 %2034  ;;  %v8447_v47 = vld [vmem:[#allocation3 + $0xc] sm:$0xff]   ;;  %v2677_v8 = vpop.f32.mrf.mxu3 }
 0x25a   : > { %v7623_v30 = vld [vmem:[#allocation3 + $0xc] sm:$0xf0]  ;;  %3142 = vst [vmem:[#allocation3 + $0x18] sm:$0xf] %v3141_v14  ;;  %v2588_v44 = vpop.f32.mrf.mxu2  ;;  %6960 = vmatmul.msk.bf16.gmra.mxu3 %vm2048_vm14, %v2184_v21  ;;  %v8452_v33 = vsel %vm2085_vm15, %v2072_v23, %v2035_v39  ;;  %v3282_v55 = vld [vmem:[#allocation3 + $0x14] sm:$0x1]  ;;  %v7570_v21 = vor.u32 %v7569_v52, %v8369_v57 }
 0x25b   : > { %v2837_v38 = vshrl.u32 %v2782_v28, 16  ;;  %v2589_v45 = vadd.f32 %v2588_v44, %v2500_v25  ;;  %2607 = vmatmul.bf16.gmra.mxu2 %v2271_v41  ;;  %2189 = vrot.lane.b32.xlu2 %v8452_v33, %s7640_s23  ;;  %v3426_v7 = vunpack.c.l.b16 %v3282_v55  ;;  %v7625_v46 = vor.u32 %v7624_v63, %v7623_v30  ;;  %v7452_v30 = vld [vmem:[#allocation2 + $0xc0] sm:$0xf0]  ;;  %v3147_v44 = vld [vmem:[#allocation3 + $0x24] sm:$0xf] }
 0x25c   : > { %v2840_v34 = vshll.u32 %v2782_v28, 16  ;;  %v2003_v17 = vrot.slane %v7570_v21, 1  ;;  %v1846_v14 = vshll.u32 %v8465_v62, 16  ;;  %v3281_v41 = vld [vmem:[#allocation3 + $0x8] sm:$0x1] }
 0x25d   : > { %v2839_v56 = vrot.slane %v2837_v38, 7  ;;  %v2678_v49 = vadd.f32 %v2677_v8, %v2589_v45  ;;  %v8457_v60 = vpack.c.b16 %v3426_v7, %v3426_v7  ;;  %v3770_v1 = vrot.slane %v7625_v46, 1  ;;  %v7453_v8 = vld [vmem:[#allocation2 + $0xc0] sm:$0xe] }
 0x25e   : > { %v1848_v7 = vrot.slane %v1846_v14, 1  ;;  %v1851_v46 = vshll.u32 %v1648_v16, 16  ;;  %v3425_v35 = vunpack.c.l.b16 %v3281_v41 }
 0x25f   : > { %v2842_v2 = vor.u32 %v2840_v34, %v2839_v56  ;;  %v2844_v4 = vrot.slane %v2839_v56, 4  ;;  %v2751_v5 = vmax.f32 %v2678_v49, 0.0  ;;  %v3771_v11 = vrot.slane %v8457_v60, 1 }
 0x260   : > { %v7454_v56 = vor.u32 %v7453_v8, %v7452_v30 }
 0x261   : > { %v2843_v12 = vsel %vm7776_vm11, %v2835_v27, %v2842_v2  ;;  %v3145_v42 = vsel %vm8315_vm3, %v2844_v4, %v3144_v31  ;;  %v2783_v54 = vpack.c.bf16 %v2751_v5, %v2751_v5  ;;  %v1892_v57 = vpop.permute.xlu1 %1891  ;;  %v8474_v52 = vsel %vm1957_vm12, %v3770_v1, %v3771_v11  ;;  %v2679_v23 = vpop.f32.mrf.mxu3  ;;  %v8489_v31 = vld [vmem:[#allocation3] sm:$0xff]  }
 0x262   : > { %3143 = vst.msk [vmem:[#allocation3 + $0x1c] sm:$0xf] %vm445_vm2, %v2843_v12  ;;  %v2074_v48 = vsel %vm2048_vm14, %v8249_v9, %v1892_v57  ;;  %v2590_v58 = vpop.f32.mrf.mxu2  ;;  %v2004_v9 = vrot.slane %v8397_v36, 1  ;;  %v1844_v36 = vshrl.u32 %v8465_v62, 16  ;;  %v1853_v1 = vrot.slane %v1851_v46, 1  ;;  %v7265_v4 = vld [vmem:[%s10372_s5 + $0x38] sm:$0xff] }
 0x263   : > { %3146 = vst [vmem:[#allocation3 + $0x20] sm:$0x1] %v3145_v42  ;;  %v2846_v61 = vshrl.u32 %v2783_v54, 16  ;;  %v2591_v32 = vadd.f32 %v2590_v58, %v2502_v15  ;;  %2523 = vmatmul.bf16.gmra.mxu1 %v2226_v22  ;;  %2158 = vrot.lane.b32.xlu2 %v8452_v33, %s7643_s25  ;;  %v8479_v63 = vsel %vm2085_vm15, %v2074_v48, %v2037_v43  ;;  %v2849_v28 = vshll.u32 %v2783_v54, 16  ;;  %v3151_v42 = vld [vmem:[#allocation3 + $0x2c] sm:$0x1] }
 0x264   : > { %2191 = vrot.lane.b32.xlu0 %v8479_v63, %s7640_s23  ;;  %v2005_v45 = vsel %vm1957_vm12, %v2003_v17, %v2004_v9  ;;  %v1849_v21 = vor.u32 %v1848_v7, %v1844_v36  ;;  %v2006_v27 = vrot.slane %v7454_v56, 1  ;;  %v2007_v2 = vrot.slane %v1648_v16, 1  ;;  %4378 = vmatpush.bf16.msrb.mxu0 %v7265_v4  ;;  %v466_v56 = vld [vmem:[#allocation3 + $0x30] sm:$0x1] }
 0x265   : > { %v2848_v25 = vrot.slane %v2846_v61, 7  ;;  %v2680_v39 = vadd.f32 %v2679_v23, %v2591_v32  ;;  %v8497_v11 = vpack.c.b16 %v3425_v35, %v3425_v35  ;;  %v3464_v12 = vshll.u32 %v8489_v31, 16 }
 0x266   : > { %v1854_v43 = vsel %vm1650_vm13, %v1849_v21, %v1853_v1  ;;  %v2008_v48 = vsel %vm1957_vm12, %v2006_v27, %v2007_v2  ;;  %v3462_v58 = vshrl.u32 %v8489_v31, 16  ;;  %v3476_v16 = vshll.u32 %v8447_v47, 16 }
 0x267   : > { %v2851_v55 = vor.u32 %v2849_v28, %v2848_v25  ;;  %v2752_v38 = vmax.f32 %v2680_v39, 0.0  ;;  %v2852_v15 = vrot.slane %v2848_v25, 4  ;;  %v3466_v61 = vrot.slane %v3464_v12, 1 }
 0x268   : > { %v3469_v32 = vshll.u32 %v8497_v11, 16  ;;  %v3481_v36 = vshll.u32 %v8457_v60, 16 }
 0x269   : > { %v3148_v34 = vsel %vm8417_vm10, %v2851_v55, %v3147_v44  ;;  %v2784_v49 = vpack.c.bf16 %v2752_v38, %v2752_v38  ;;  %v3467_v9 = vor.u32 %v3466_v61, %v3462_v58  ;;  %v3478_v44 = vrot.slane %v3476_v16, 1  ;;  %v8520_v46 = vld [vmem:[#allocation3 + $0x18] sm:$0xff]  }
 0x26a   : > { %3149 = vst [vmem:[#allocation3 + $0x24] sm:$0xf] %v3148_v34  ;;  %v3471_v23 = vrot.slane %v3469_v32, 1  ;;  %v3283_v25 = vld [vmem:[#allocation3 + $0x20] sm:$0x1]  ;;  %v3483_v1 = vrot.slane %v3481_v36, 1 }
 0x26b   : > { %v2854_v0 = vshrl.u32 %v2784_v49, 16  ;;  %2042 = vrot.lane.b32.xlu2 %v2005_v45, %s7640_s23  ;;  %v2857_v6 = vshll.u32 %v2784_v49, 16  ;;  %v3427_v41 = vunpack.c.l.b16 %v3283_v25  ;;  %v3474_v45 = vshrl.u32 %v8447_v47, 16  ;;  %v518_v32 = vld [vmem:[#allocation3 + $0x44] sm:$0x1]  ;;  %v7264_v16 = vld [vmem:[%s10372_s5 + $0x30] sm:$0xff] }
 0x26c   : > { %2160 = vrot.lane.b32.xlu0 %v8479_v63, %s7643_s25  ;;  %v3472_v28 = vsel %vm1650_vm13, %v3467_v9, %v3471_v23  ;;  %v3488_v27 = vshll.u32 %v8520_v46, 16  ;;  %4379 = vmatpush.bf16.msrb.mxu0 %v7264_v16 }
 0x26d   : > { %v2856_v5 = vrot.slane %v2854_v0, 7  ;;  %v3479_v49 = vor.u32 %v3478_v44, %v3474_v45  ;;  %v8522_v35 = vpack.c.b16 %v3427_v41, %v3427_v41  ;;  %v467_v0 = vsel %vm8315_vm3, 0, %v466_v56 }
 0x26e   : > { %468 = vst [vmem:[#allocation3 + $0x30] sm:$0x1] %v467_v0 }
 0x26f   : > { %v2859_v54 = vor.u32 %v2857_v6, %v2856_v5  ;;  %v2861_v57 = vrot.slane %v2856_v5, 4  ;;  %v3484_v2 = vsel %vm1650_vm13, %v3479_v49, %v3483_v1  ;;  %v3493_v4 = vshll.u32 %v8522_v35, 16 }
 0x270   : > { %v3490_v5 = vrot.slane %v3488_v27, 1  ;;  %v3486_v6 = vshrl.u32 %v8520_v46, 16  ;;  %v1894_v27 = vpop.permute.xlu2 %1893 }
 0x271   : > { %v2860_v22 = vsel %vm7776_vm11, %v2852_v15, %v2859_v54  ;;  %v3152_v17 = vsel %vm8315_vm3, %v2861_v57, %v3151_v42  ;;  %v7627_v14 = vld [vmem:[#allocation3 + $0x24] sm:$0xe]  ;;  %v3495_v12 = vrot.slane %v3493_v4, 1  ;;  %v515_v54 = vld [vmem:[#allocation3 + $0x38] sm:$0x1] }
 0x272   : > { %3150 = vst.msk [vmem:[#allocation3 + $0x28] sm:$0xf] %vm445_vm2, %v2860_v22  ;;  %v3491_v42 = vor.u32 %v3490_v5, %v3486_v6  ;;  %v516_v57 = vsel %vm8340_vm4, 0, %v515_v54  ;;  %v2076_v6 = vsel %vm2048_vm14, %v8261_v40, %v1894_v27 }
 0x273   : > { %3153 = vst [vmem:[#allocation3 + $0x2c] sm:$0x1] %v3152_v17  ;;  %1899 = vrot.lane.b32.xlu2 %v1854_v43, %s7641_s24  ;;  %v469_v43 = vld [vmem:[#allocation3 + $0x3c] sm:$0x1] }
 0x274   : > { %2044 = vrot.lane.b32.xlu0 %v2008_v48, %s7640_s23  ;;  %v3496_v15 = vsel %vm1650_vm13, %v3491_v42, %v3495_v12  ;;  %517 = vst [vmem:[#allocation3 + $0x38] sm:$0x1] %v516_v57  ;;  %v2504_v48 = vpop.f32.mrf.mxu1  ;;  %v470_v58 = vsel %vm8315_vm3, 0, %v469_v43  ;;  %v472_v57 = vld [vmem:[#allocation3 + $0x48] sm:$0x1] }
 0x275   : > { %471 = vst [vmem:[#allocation3 + $0x3c] sm:$0x1] %v470_v58  ;;  %v2505_v22 = vadd.f32 %v8379_v50, %v2504_v48  ;;  %v473_v40 = vsel %vm8315_vm3, 0, %v472_v57 }
 0x276   : > { %474 = vst [vmem:[#allocation3 + $0x48] sm:$0x1] %v473_v40 }
 0x279   : > { %v8513_v39 = vld [vmem:[#allocation3 + $0x24] sm:$0xff]  }
 0x27a   : > { %v7626_v30 = vld [vmem:[#allocation3 + $0x24] sm:$0xf0]  ;;  %v3284_v8 = vld [vmem:[#allocation3 + $0x2c] sm:$0x1] }
 0x27b   : > { %v3428_v55 = vunpack.c.l.b16 %v3284_v8  ;;  %v7628_v38 = vor.u32 %v7627_v14, %v7626_v30  ;;  %v519_v14 = vsel %vm8340_vm4, 0, %v518_v32  ;;  %v3158_v16 = vld [vmem:[#allocation3 + $0x38] sm:$0x1] }
 0x27c   : > { %3677 = vrot.lane.b32.xlu0 %v3472_v28, %s7640_s23  ;;  %520 = vst [vmem:[#allocation3 + $0x44] sm:$0x1] %v519_v14  ;;  %v2506_v28 = vpop.f32.mrf.mxu1 }
 0x27d   : > { %v8518_v7 = vpack.c.b16 %v3428_v55, %v3428_v55  ;;  %v3776_v34 = vrot.slane %v7628_v38, 1  ;;  %v2507_v44 = vadd.f32 %v8379_v50, %v2506_v28 }
 0x27f   : > { %v3777_v21 = vrot.slane %v8518_v7, 1 }
 0x281   : > { %v8529_v60 = vsel %vm1957_vm12, %v3776_v34, %v3777_v21 }
 0x284   : > { %3679 = vrot.lane.b32.xlu0 %v3484_v2, %s7640_s23  ;;  %v3154_v2 = vld [vmem:[#allocation3 + $0x30] sm:$0xf] }
 0x28c   : > { %3681 = vrot.lane.b32.xlu0 %v3496_v15, %s7640_s23 }
 0x29e   : > { %v2682_v17 = vpop.f32.mrf.mxu3  ;;  %v2186_v61 = vpop.permute.xlu0 %2185 }
 0x29f   : > { %v2593_v9 = vpop.f32.mrf.mxu2  ;;  %6961 = vmatmul.msk.bf16.gmra.mxu3 %vm2048_vm14, %v2186_v61  ;;  %v2274_v23 = vsel %vm2085_vm15, %v8442_v10, %v2186_v61 }
 0x2a0   : > { %v2594_v25 = vadd.f32 %v2593_v9, %v2505_v22  ;;  %2612 = vmatmul.bf16.gmra.mxu2 %v2274_v23 }
 0x2a1   : > { %v2509_v49 = vpop.f32.mrf.mxu1 }
 0x2a2   : > { %v2683_v30 = vadd.f32 %v2682_v17, %v2594_v25  ;;  %v2510_v42 = vadd.f32 %v8379_v50, %v2509_v49 }
 0x2a4   : > { %v2753_v8 = vmax.f32 %v2683_v30, 0.0 }
 0x2a6   : > { %v2785_v41 = vpack.c.bf16 %v2753_v8, %v2753_v8  ;;  %v2684_v55 = vpop.f32.mrf.mxu3  ;;  %v2155_v38 = vpop.permute.xlu0 %2154 }
 0x2a7   : > { %v2595_v10 = vpop.f32.mrf.mxu2  ;;  %v2188_v45 = vpop.permute.xlu1 %2187  ;;  %v2229_v36 = vsel %vm2203_vm0, %v8266_v29, %v2155_v38 }
 0x2a8   : > { %v2863_v56 = vshrl.u32 %v2785_v41, 16  ;;  %v2596_v34 = vadd.f32 %v2595_v10, %v2507_v44  ;;  %2528 = vmatmul.bf16.gmra.mxu1 %v2229_v36  ;;  %v2866_v21 = vshll.u32 %v2785_v41, 16  ;;  %v2277_v58 = vsel %vm2085_vm15, %v2155_v38, %v2188_v45 }
 0x2a9   : > { %v2511_v14 = vpop.f32.mrf.mxu1 }
 0x2aa   : > { %v2865_v0 = vrot.slane %v2863_v56, 7  ;;  %v2685_v1 = vadd.f32 %v2684_v55, %v2596_v34  ;;  %v2512_v38 = vadd.f32 %v8379_v50, %v2511_v14 }
 0x2ac   : > { %v2868_v4 = vor.u32 %v2866_v21, %v2865_v0  ;;  %v2754_v5 = vmax.f32 %v2685_v1, 0.0  ;;  %v2869_v25 = vrot.slane %v2865_v0, 4 }
 0x2ae   : > { %v3155_v12 = vsel %vm8417_vm10, %v2868_v4, %v3154_v2  ;;  %v2786_v29 = vpack.c.bf16 %v2754_v5, %v2754_v5  ;;  %v2687_v15 = vpop.f32.mrf.mxu3  ;;  %v2039_v54 = vpop.permute.xlu0 %2038  ;;  %v3161_v5 = vld [vmem:[#allocation3 + $0x3c] sm:$0xf] }
 0x2af   : > { %3156 = vst [vmem:[#allocation3 + $0x30] sm:$0xf] %v3155_v12  ;;  %v2598_v43 = vpop.f32.mrf.mxu2  ;;  %v2157_v48 = vpop.permute.xlu1 %2156  ;;  %6962 = vmatmul.msk.bf16.gmra.mxu3 %vm2048_vm14, %v2188_v45  ;;  %v8561_v22 = vsel %vm2085_vm15, %v2076_v6, %v2039_v54 }
 0x2b0   : > { %v2871_v17 = vshrl.u32 %v2786_v29, 16  ;;  %v2599_v61 = vadd.f32 %v2598_v43, %v2510_v42  ;;  %2617 = vmatmul.bf16.gmra.mxu2 %v2277_v58  ;;  %2193 = vrot.lane.b32.xlu1 %v8561_v22, %s7640_s23  ;;  %v2874_v9 = vshll.u32 %v2786_v29, 16  ;;  %v2232_v49 = vsel %vm2203_vm0, %v8352_v59, %v2157_v48  ;;  %v521_v29 = vld [vmem:[#allocation3 + $0x50] sm:$0x1] }
 0x2b1   : > { %v522_v43 = vsel %vm8340_vm4, 0, %v521_v29 }
 0x2b2   : > { %v2873_v32 = vrot.slane %v2871_v17, 7  ;;  %v2688_v23 = vadd.f32 %v2687_v15, %v2599_v61  ;;  %v7262_v15 = vld [vmem:[%s10372_s5 + $0x20] sm:$0xff]  ;;  %523 = vst [vmem:[#allocation3 + $0x50] sm:$0x1] %v522_v43  ;;  %v3500_v17 = vshll.u32 %v8513_v39, 16  ;;  %v7261_v61 = vld [vmem:[%s10372_s5 + $0x18] sm:$0xff] }
 0x2b4   : > { %v2876_v28 = vor.u32 %v2874_v9, %v2873_v32  ;;  %v2878_v30 = vrot.slane %v2873_v32, 4  ;;  %v2755_v8 = vmax.f32 %v2688_v23, 0.0 }
 0x2b5   : > { %v2190_v44 = vpop.permute.xlu2 %2189 }
 0x2b6   : > { %v2877_v41 = vsel %vm7776_vm11, %v2869_v25, %v2876_v28  ;;  %v3159_v55 = vsel %vm8315_vm3, %v2878_v30, %v3158_v16  ;;  %v2787_v10 = vpack.c.bf16 %v2755_v8, %v2755_v8  ;;  %v1896_v45 = vpop.permute.xlu0 %1895  ;;  %v2689_v27 = vpop.f32.mrf.mxu3  ;;  %v2280_v58 = vsel %vm2085_vm15, %v2157_v48, %v2190_v44  ;;  %v3165_v16 = vld [vmem:[#allocation3 + $0x44] sm:$0x1] }
 0x2b7   : > { %3157 = vst.msk [vmem:[#allocation3 + $0x34] sm:$0xf] %vm445_vm2, %v2877_v41  ;;  %v2078_v36 = vsel %vm2048_vm14, %v8357_v3, %v1896_v45  ;;  %v2600_v56 = vpop.f32.mrf.mxu2  ;;  %v2041_v34 = vpop.permute.xlu1 %2040  ;;  %v7263_v3 = vld [vmem:[%s10372_s5 + $0x28] sm:$0xff]  ;;  %v3502_v8 = vrot.slane %v3500_v17, 1  ;;  %v7260_v41 = vld [vmem:[%s10372_s5 + $0x10] sm:$0xff] }
 0x2b8   : > { %3160 = vst [vmem:[#allocation3 + $0x38] sm:$0x1] %v3159_v55  ;;  %v2880_v0 = vshrl.u32 %v2787_v10, 16  ;;  %v2601_v21 = vadd.f32 %v2600_v56, %v2512_v38  ;;  %2533 = vmatmul.bf16.gmra.mxu1 %v2232_v49  ;;  %2162 = vrot.lane.b32.xlu1 %v8561_v22, %s7643_s25  ;;  %v8580_v1 = vsel %vm2085_vm15, %v2078_v36, %v2041_v34  ;;  %v2883_v59 = vshll.u32 %v2787_v10, 16  ;;  %v2514_v55 = vpop.f32.mrf.mxu1  ;;  %v7259_v49 = vld [vmem:[%s10372_s5 + $0x8] sm:$0xff] }
 0x2b9   : > { %2195 = vrot.lane.b32.xlu2 %v8580_v1, %s7640_s23  ;;  %4380 = vmatpush.bf16.msrb.mxu0 %v7263_v3  ;;  %v3498_v56 = vshrl.u32 %v8513_v39, 16  ;;  %v3505_v34 = vshll.u32 %v8518_v7, 16 }
 0x2ba   : > { %v2882_v2 = vrot.slane %v2880_v0, 7  ;;  %v2690_v4 = vadd.f32 %v2689_v27, %v2601_v21 }
 0x2bb   : > { %v3503_v0 = vor.u32 %v3502_v8, %v3498_v56  ;;  %v3507_v21 = vrot.slane %v3505_v34, 1 }
 0x2bc   : > { %v2885_v6 = vor.u32 %v2883_v59, %v2882_v2  ;;  %v2756_v12 = vmax.f32 %v2690_v4, 0.0  ;;  %v2886_v14 = vrot.slane %v2882_v2, 4  ;;  %v524_v2 = vld [vmem:[#allocation3 + $0x5c] sm:$0x1]  ;;  %v7258_v59 = vld [vmem:[%s10372_s5] sm:$0xff] }
 0x2bd   : > { %v8587_v42 = vpop.permute.xlu2 %2158  ;;  %4381 = vmatpush.bf16.msrb.mxu0 %v7262_v15  ;;  %v3508_v7 = vsel %vm1650_vm13, %v3503_v0, %v3507_v21  ;;  %v3168_v0 = vld [vmem:[#allocation3 + $0x48] sm:$0xf] }
 0x2be   : > { %v3162_v54 = vsel %vm8417_vm10, %v2885_v6, %v3161_v5  ;;  %v2788_v57 = vpack.c.bf16 %v2756_v12, %v2756_v12  ;;  %v2235_v36 = vsel %vm2203_vm0, %v8374_v24, %v8587_v42  ;;  %v2515_v24 = vadd.f32 %v8379_v50, %v2514_v55 }
 0x2bf   : > { %3163 = vst [vmem:[#allocation3 + $0x3c] sm:$0xf] %v3162_v54  ;;  %6963 = vmatmul.msk.bf16.gmra.mxu3 %vm2048_vm14, %v2190_v44  ;;  %v1898_v23 = vpop.permute.xlu1 %1897  ;;  %v475_v44 = vld [vmem:[#allocation3 + $0x54] sm:$0x1]  ;;  %v525_v12 = vsel %vm8340_vm4, 0, %v524_v2 }
 0x2c0   : > { %v2888_v40 = vshrl.u32 %v2788_v57, 16  ;;  %2622 = vmatmul.bf16.gmra.mxu2 %v2280_v58  ;;  %2164 = vrot.lane.b32.xlu1 %v8580_v1, %s7643_s25  ;;  %v2891_v9 = vshll.u32 %v2788_v57, 16  ;;  %v2080_v28 = vsel %vm2048_vm14, %v8367_v53, %v1898_v23  ;;  %v476_v53 = vsel %vm8315_vm3, 0, %v475_v44  ;;  %526 = vst [vmem:[#allocation3 + $0x5c] sm:$0x1] %v525_v12  ;;  %v2516_v54 = vpop.f32.mrf.mxu1 }
 0x2c1   : > { %4382 = vmatpush.bf16.msrb.mxu0 %v7261_v61  ;;  %477 = vst [vmem:[#allocation3 + $0x54] sm:$0x1] %v476_v53 }
 0x2c2   : > { %v2890_v32 = vrot.slane %v2888_v40, 7 }
 0x2c4   : > { %v2893_v48 = vor.u32 %v2891_v9, %v2890_v32  ;;  %v2895_v25 = vrot.slane %v2890_v32, 4 }
 0x2c5   : > { %v2043_v30 = vpop.permute.xlu2 %2042  ;;  %4383 = vmatpush.bf16.msrb.mxu0 %v7260_v41 }
 0x2c6   : > { %v2894_v38 = vsel %vm7776_vm11, %v2886_v14, %v2893_v48  ;;  %v3166_v10 = vsel %vm8315_vm3, %v2895_v25, %v3165_v16  ;;  %v8614_v45 = vsel %vm2085_vm15, %v2080_v28, %v2043_v30  ;;  %v7572_v27 = vld [vmem:[#allocation3 + $0x3c] sm:$0xe]  ;;  %v2517_v16 = vadd.f32 %v8379_v50, %v2516_v54 }
 0x2c7   : > { %3164 = vst.msk [vmem:[#allocation3 + $0x40] sm:$0xf] %vm445_vm2, %v2894_v38  ;;  %2197 = vrot.lane.b32.xlu2 %v8614_v45, %s7640_s23 }
 0x2c8   : > { %3167 = vst [vmem:[#allocation3 + $0x44] sm:$0x1] %v3166_v10  ;;  %2538 = vmatmul.bf16.gmra.mxu1 %v2235_v36  ;;  %2166 = vrot.lane.b32.xlu1 %v8614_v45, %s7643_s25 }
 0x2c9   : > { %4384 = vmatpush.bf16.msrb.mxu0 %v7259_v49 }
 0x2cd   : > { %v2692_v3 = vpop.f32.mrf.mxu3  ;;  %4385 = vmatpush.bf16.msrb.mxu0 %v7258_v59 }
 0x2ce   : > { %v2603_v4 = vpop.f32.mrf.mxu2  ;;  %v8636_v5 = vld [vmem:[#allocation3 + $0x3c] sm:$0xff]  }
 0x2cf   : > { %v7571_v6 = vld [vmem:[#allocation3 + $0x3c] sm:$0xf0]  ;;  %v2604_v29 = vadd.f32 %v2603_v4, %v2515_v24  ;;  %v3286_v15 = vld [vmem:[#allocation3 + $0x44] sm:$0x1]  ;;  %v3524_v61 = vshll.u32 %v8636_v5, 16  ;;  %v3522_v8 = vshrl.u32 %v8636_v5, 16 }
 0x2d0   : > { %3683 = vrot.lane.b32.xlu1 %v3508_v7, %s7640_s23  ;;  %v3430_v57 = vunpack.c.l.b16 %v3286_v15  ;;  %v7573_v58 = vor.u32 %v7572_v27, %v7571_v6  ;;  %v2519_v10 = vpop.f32.mrf.mxu1 }
 0x2d1   : > { %v2693_v43 = vadd.f32 %v2692_v3, %v2604_v29  ;;  %v3526_v25 = vrot.slane %v3524_v61, 1  ;;  %v3285_v3 = vld [vmem:[#allocation3 + $0x38] sm:$0x1] }
 0x2d2   : > { %v3448_v40 = vpack.c.b16 %v3430_v57, %v3430_v57  ;;  %v3782_v32 = vrot.slane %v7573_v58, 1  ;;  %v3429_v12 = vunpack.c.l.b16 %v3285_v3 }
 0x2d3   : > { %v2757_v17 = vmax.f32 %v2693_v43, 0.0  ;;  %v3527_v53 = vor.u32 %v3526_v25, %v3522_v8 }
 0x2d4   : > { %v3529_v9 = vshll.u32 %v3448_v40, 16  ;;  %v3783_v23 = vrot.slane %v3448_v40, 1  ;;  %v8660_v40 = vld [vmem:[#allocation3 + $0x30] sm:$0xff]   ;;  %v8662_v61 = vpack.c.b16 %v3429_v12, %v3429_v12 }
 0x2d5   : > { %v2789_v14 = vpack.c.bf16 %v2757_v17, %v2757_v17  ;;  %v2694_v48 = vpop.f32.mrf.mxu3 }
 0x2d6   : > { %v2605_v28 = vpop.f32.mrf.mxu2  ;;  %v2192_v30 = vpop.permute.xlu0 %2191  ;;  %v8645_v44 = vsel %vm1957_vm12, %v3782_v32, %v3783_v23  ;;  %v3531_v36 = vrot.slane %v3529_v9, 1 }
 0x2d7   : > { %v2897_v41 = vshrl.u32 %v2789_v14, 16  ;;  %v2606_v55 = vadd.f32 %v2605_v28, %v2517_v16  ;;  %6964 = vmatmul.msk.bf16.gmra.mxu3 %vm2048_vm14, %v2192_v30  ;;  %v2283_v38 = vsel %vm2085_vm15, %v8587_v42, %v2192_v30  ;;  %v2900_v34 = vshll.u32 %v2789_v14, 16  ;;  %v1900_v32 = vpop.permute.xlu2 %1899  ;;  %v8672_v28 = vld [vmem:[%s10371_s4] ss:$0 sm:$0xff] }
 0x2d8   : > { %2627 = vmatmul.bf16.gmra.mxu2 %v2283_v38  ;;  %v3532_v21 = vsel %vm1650_vm13, %v3527_v53, %v3531_v36  ;;  %v2520_v42 = vadd.f32 %v8379_v50, %v2519_v10  ;;  %v3172_v50 = vld [vmem:[#allocation3 + $0x50] sm:$0x1]  ;;  %v2521_v17 = vpop.f32.mrf.mxu1 }
 0x2d9   : > { %v2899_v56 = vrot.slane %v2897_v41, 7  ;;  %v2695_v49 = vadd.f32 %v2694_v48, %v2606_v55  ;;  %3687 = vrot.lane.b32.xlu0 %v3532_v21, %s7640_s23  ;;  %v3512_v48 = vshll.u32 %v8660_v40, 16  ;;  %v2522_v30 = vadd.f32 %v8672_v28, %v2521_v17 }
 0x2da   : > { %v2082_v41 = vsel %vm2048_vm14, %v8465_v62, %v1900_v32 }
 0x2db   : > { %v2902_v27 = vor.u32 %v2900_v34, %v2899_v56  ;;  %v2758_v24 = vmax.f32 %v2695_v49, 0.0  ;;  %v2903_v9 = vrot.slane %v2899_v56, 4  ;;  %v3517_v56 = vshll.u32 %v8662_v61, 16 }
 0x2dc   : > { %v3514_v62 = vrot.slane %v3512_v48, 1 }
 0x2dd   : > { %v3169_v2 = vsel %vm8417_vm10, %v2902_v27, %v3168_v0  ;;  %v2790_v59 = vpack.c.bf16 %v2758_v24, %v2758_v24  ;;  %v2697_v4 = vpop.f32.mrf.mxu3  ;;  %v3175_v27 = vld [vmem:[#allocation3 + $0x54] sm:$0xf] }
 0x2de   : > { %3170 = vst [vmem:[#allocation3 + $0x48] sm:$0xf] %v3169_v2  ;;  %v2608_v7 = vpop.f32.mrf.mxu2  ;;  %v8655_v6 = vpop.permute.xlu0 %2160  ;;  %v3510_v2 = vshrl.u32 %v8660_v40, 16 }
 0x2df   : > { %v2905_v29 = vshrl.u32 %v2790_v59, 16  ;;  %v2609_v15 = vadd.f32 %v2608_v7, %v2520_v42  ;;  %v2238_v54 = vsel %vm2203_vm0, %v8452_v33, %v8655_v6  ;;  %v2908_v43 = vshll.u32 %v2790_v59, 16 }
 0x2e0   : > { %2543 = vmatmul.bf16.gmra.mxu1 %v2238_v54  ;;  %v3519_v42 = vrot.slane %v3517_v56, 1  ;;  %v3515_v7 = vor.u32 %v3514_v62, %v3510_v2 }
 0x2e1   : > { %v2907_v57 = vrot.slane %v2905_v29, 7  ;;  %v2698_v58 = vadd.f32 %v2697_v4, %v2609_v15 }
 0x2e3   : > { %v2910_v23 = vor.u32 %v2908_v43, %v2907_v57  ;;  %v2912_v16 = vrot.slane %v2907_v57, 4  ;;  %v2759_v14 = vmax.f32 %v2698_v58, 0.0  ;;  %v3520_v58 = vsel %vm1650_vm13, %v3515_v7, %v3519_v42 }
 0x2e5   : > { %v2911_v33 = vsel %vm7776_vm11, %v2903_v9, %v2910_v23  ;;  %v3173_v25 = vsel %vm8315_vm3, %v2912_v16, %v3172_v50  ;;  %v2791_v8 = vpack.c.bf16 %v2759_v14, %v2759_v14  ;;  %v2699_v34 = vpop.f32.mrf.mxu3  ;;  %v3179_v14 = vld [vmem:[#allocation3 + $0x5c] sm:$0x1] }
 0x2e6   : > { %3171 = vst.msk [vmem:[#allocation3 + $0x4c] sm:$0xf] %vm445_vm2, %v2911_v33  ;;  %v2610_v55 = vpop.f32.mrf.mxu2  ;;  %v2045_v38 = vpop.permute.xlu0 %2044 }
 0x2e7   : > { %3174 = vst [vmem:[#allocation3 + $0x50] sm:$0x1] %v3173_v25  ;;  %v2914_v10 = vshrl.u32 %v2791_v8, 16  ;;  %v2611_v53 = vadd.f32 %v2610_v55, %v2522_v30  ;;  %v8679_v36 = vsel %vm2085_vm15, %v2082_v41, %v2045_v38  ;;  %v2917_v0 = vshll.u32 %v2791_v8, 16 }
 0x2e8   : > { %2199 = vrot.lane.b32.xlu2 %v8679_v36, %s7640_s23 }
 0x2e9   : > { %v2916_v49 = vrot.slane %v2914_v10, 7  ;;  %v2700_v21 = vadd.f32 %v2699_v34, %v2611_v53 }
 0x2eb   : > { %v2919_v24 = vor.u32 %v2917_v0, %v2916_v49  ;;  %v2760_v3 = vmax.f32 %v2700_v21, 0.0  ;;  %v2920_v16 = vrot.slane %v2916_v49, 4 }
 0x2ed   : > { %v3176_v59 = vsel %vm8417_vm10, %v2919_v24, %v3175_v27  ;;  %v2792_v4 = vpack.c.bf16 %v2760_v3, %v2760_v3  ;;  %v8687_v12 = vld [vmem:[#allocation3 + $0x48] sm:$0xff]   ;;  %v478_v3 = vld [vmem:[#allocation3 + $0x60] sm:$0x1] }
 0x2ee   : > { %3177 = vst [vmem:[#allocation3 + $0x54] sm:$0xf] %v3176_v59  ;;  %v3678_v29 = vpop.permute.xlu0 %3677  ;;  %v3287_v15 = vld [vmem:[#allocation3 + $0x50] sm:$0x1]  ;;  %v3536_v54 = vshll.u32 %v8687_v12, 16  ;;  %v3534_v25 = vshrl.u32 %v8687_v12, 16 }
 0x2ef   : > { %v2922_v57 = vshrl.u32 %v2792_v4, 16  ;;  %v3822_v43 = vsel %vm2085_vm15, %v8489_v31, %v3678_v29  ;;  %v3431_v50 = vunpack.c.l.b16 %v3287_v15  ;;  %v2925_v32 = vshll.u32 %v2792_v4, 16 }
 0x2f0   : > { %3685 = vrot.lane.b32.xlu2 %v3520_v58, %s7640_s23  ;;  %4386 = vmatmul.bf16.vlgmr.msrb.gmra.mxu0 %v3822_v43  ;;  %v3538_v23 = vrot.slane %v3536_v54, 1  ;;  %v479_v59 = vsel %vm8315_vm3, 0, %v478_v3 }
 0x2f1   : > { %v2924_v17 = vrot.slane %v2922_v57, 7  ;;  %v8694_v9 = vpack.c.b16 %v3431_v50, %v3431_v50  ;;  %480 = vst [vmem:[#allocation3 + $0x60] sm:$0x1] %v479_v59  ;;  %v527_v50 = vld [vmem:[#allocation3 + $0x68] sm:$0x1] }
 0x2f2   : > { %v3539_v41 = vor.u32 %v3538_v23, %v3534_v25  ;;  %v481_v23 = vld [vmem:[#allocation3 + $0x6c] sm:$0x1] }
 0x2f3   : > { %v2927_v48 = vor.u32 %v2925_v32, %v2924_v17  ;;  %v2929_v33 = vrot.slane %v2924_v17, 4  ;;  %v3541_v30 = vshll.u32 %v8694_v9, 16  ;;  %v528_v17 = vsel %vm8340_vm4, 0, %v527_v50  ;;  %v2524_v32 = vpop.f32.mrf.mxu1 }
 0x2f4   : > { %529 = vst [vmem:[#allocation3 + $0x68] sm:$0x1] %v528_v17 }
 0x2f5   : > { %v2928_v31 = vsel %vm7776_vm11, %v2920_v16, %v2927_v48  ;;  %v3180_v8 = vsel %vm8315_vm3, %v2929_v33, %v3179_v14  ;;  %v3543_v55 = vrot.slane %v3541_v30, 1  ;;  %v7575_v10 = vld [vmem:[#allocation3 + $0x54] sm:$0xe]  ;;  %v482_v16 = vsel %vm8315_vm3, 0, %v481_v23  ;;  %v533_v23 = vld [vmem:[#allocation3 + $0x80] sm:$0x1] }
 0x2f6   : > { %3178 = vst.msk [vmem:[#allocation3 + $0x58] sm:$0xf] %vm445_vm2, %v2928_v31  ;;  %v3680_v53 = vpop.permute.xlu0 %3679  ;;  %v2525_v48 = vadd.f32 %v8672_v28, %v2524_v32 }
 0x2f7   : > { %3181 = vst [vmem:[#allocation3 + $0x5c] sm:$0x1] %v3180_v8  ;;  %v3544_v38 = vsel %vm1650_vm13, %v3539_v41, %v3543_v55  ;;  %v8709_v0 = vsel %vm2085_vm15, %v8447_v47, %v3680_v53 }
 0x2f8   : > { %3689 = vrot.lane.b32.xlu1 %v3544_v38, %s7640_s23  ;;  %483 = vst [vmem:[#allocation3 + $0x6c] sm:$0x1] %v482_v16 }
 0x2fb   : > { %v2526_v14 = vpop.f32.mrf.mxu1 }
 0x2fc   : > { %v2527_v53 = vadd.f32 %v8672_v28, %v2526_v14 }
 0x2fd   : > { %v8705_v56 = vld [vmem:[#allocation3 + $0x54] sm:$0xff]  }
 0x2fe   : > { %v7574_v34 = vld [vmem:[#allocation3 + $0x54] sm:$0xf0]  ;;  %v3288_v49 = vld [vmem:[#allocation3 + $0x5c] sm:$0x1]  ;;  %v3548_v24 = vshll.u32 %v8705_v56, 16  ;;  %v3546_v7 = vshrl.u32 %v8705_v56, 16  ;;  %v3682_v43 = vpop.permute.xlu0 %3681 }
 0x2ff   : > { %v3432_v21 = vunpack.c.l.b16 %v3288_v49  ;;  %v7576_v62 = vor.u32 %v7575_v10, %v7574_v34  ;;  %v8723_v58 = vsel %vm2085_vm15, %v8520_v46, %v3682_v43  ;;  %v530_v46 = vld [vmem:[#allocation3 + $0x74] sm:$0x1] }
 0x300   : > { %4391 = vmatmul.bf16.gmra.mxu0 %v8709_v0  ;;  %v3550_v29 = vrot.slane %v3548_v24, 1  ;;  %v531_v8 = vsel %vm8340_vm4, 0, %v530_v46 }
 0x301   : > { %v3450_v27 = vpack.c.b16 %v3432_v21, %v3432_v21  ;;  %v3788_v2 = vrot.slane %v7576_v62, 1  ;;  %532 = vst [vmem:[#allocation3 + $0x74] sm:$0x1] %v531_v8  ;;  %v484_v62 = vld [vmem:[#allocation3 + $0x78] sm:$0x1] }
 0x302   : > { %v3551_v15 = vor.u32 %v3550_v29, %v3546_v7  ;;  %v3182_v7 = vld [vmem:[#allocation3 + $0x60] sm:$0xf]  ;;  %v3186_v8 = vld [vmem:[#allocation3 + $0x68] sm:$0x1] }
 0x303   : > { %v3553_v42 = vshll.u32 %v3450_v27, 16  ;;  %v3789_v4 = vrot.slane %v3450_v27, 1 }
 0x305   : > { %v8717_v47 = vsel %vm1957_vm12, %v3788_v2, %v3789_v4  ;;  %v3555_v54 = vrot.slane %v3553_v42, 1 }
 0x307   : > { %v3556_v57 = vsel %vm1650_vm13, %v3551_v15, %v3555_v54 }
 0x308   : > { %3691 = vrot.lane.b32.xlu2 %v3556_v57, %s7640_s23 }
 0x310   : > { %4396 = vmatmul.bf16.gmra.mxu0 %v8723_v58 }
 0x313   : > { %v2196_v54 = vpop.permute.xlu2 %2195 }
 0x322   : > { %v2702_v33 = vpop.f32.mrf.mxu3  ;;  %v2194_v25 = vpop.permute.xlu1 %2193 }
 0x323   : > { %v2613_v30 = vpop.f32.mrf.mxu2  ;;  %6965 = vmatmul.msk.bf16.gmra.mxu3 %vm2048_vm14, %v2194_v25  ;;  %v2286_v31 = vsel %vm2085_vm15, %v8655_v6, %v2194_v25  ;;  %v485_v6 = vsel %vm8315_vm3, 0, %v484_v62 }
 0x324   : > { %v2614_v41 = vadd.f32 %v2613_v30, %v2525_v48  ;;  %2632 = vmatmul.bf16.gmra.mxu2 %v2286_v31  ;;  %486 = vst [vmem:[#allocation3 + $0x78] sm:$0x1] %v485_v6  ;;  %v534_v48 = vsel %vm8340_vm4, 0, %v533_v23 }
 0x325   : > { %v2529_v38 = vpop.f32.mrf.mxu1  ;;  %535 = vst [vmem:[#allocation3 + $0x80] sm:$0x1] %v534_v48 }
 0x326   : > { %v2703_v55 = vadd.f32 %v2702_v33, %v2614_v41 }
 0x328   : > { %v2761_v10 = vmax.f32 %v2703_v55, 0.0 }
 0x32a   : > { %v2793_v34 = vpack.c.bf16 %v2761_v10, %v2761_v10  ;;  %v2704_v49 = vpop.f32.mrf.mxu3  ;;  %v2163_v21 = vpop.permute.xlu1 %2162 }
 0x32b   : > { %v2615_v27 = vpop.f32.mrf.mxu2  ;;  %v2241_v24 = vsel %vm2203_vm0, %v8479_v63, %v2163_v21  ;;  %v2530_v63 = vadd.f32 %v8672_v28, %v2529_v38  ;;  %v2289_v14 = vsel %vm2085_vm15, %v2163_v21, %v2196_v54 }
 0x32c   : > { %v2931_v3 = vshrl.u32 %v2793_v34, 16  ;;  %v2616_v2 = vadd.f32 %v2615_v27, %v2527_v53  ;;  %2548 = vmatmul.bf16.gmra.mxu1 %v2241_v24  ;;  %v2934_v59 = vshll.u32 %v2793_v34, 16 }
 0x32d   : > { %v2531_v57 = vpop.f32.mrf.mxu1 }
 0x32e   : > { %v2933_v42 = vrot.slane %v2931_v3, 7  ;;  %v2705_v4 = vadd.f32 %v2704_v49, %v2616_v2  ;;  %v2532_v49 = vadd.f32 %v8672_v28, %v2531_v57  ;;  %v3189_v57 = vld [vmem:[#allocation3 + $0x6c] sm:$0xf] }
 0x330   : > { %v2936_v29 = vor.u32 %v2934_v59, %v2933_v42  ;;  %v2762_v15 = vmax.f32 %v2705_v4, 0.0  ;;  %v2937_v41 = vrot.slane %v2933_v42, 4  ;;  %v487_v59 = vld [vmem:[#allocation3 + $0x84] sm:$0x1] }
 0x331   : > { %v488_v4 = vsel %vm8315_vm3, 0, %v487_v59 }
 0x332   : > { %v3183_v43 = vsel %vm8417_vm10, %v2936_v29, %v3182_v7  ;;  %v2794_v50 = vpack.c.bf16 %v2762_v15, %v2762_v15  ;;  %v2707_v17 = vpop.f32.mrf.mxu3  ;;  %v2165_v32 = vpop.permute.xlu1 %2164  ;;  %489 = vst [vmem:[#allocation3 + $0x84] sm:$0x1] %v488_v4 }
 0x333   : > { %3184 = vst [vmem:[#allocation3 + $0x60] sm:$0xf] %v3183_v43  ;;  %v2618_v16 = vpop.f32.mrf.mxu2  ;;  %6966 = vmatmul.msk.bf16.gmra.mxu3 %vm2048_vm14, %v2196_v54  ;;  %v2244_v6 = vsel %vm2203_vm0, %v8561_v22, %v2165_v32  ;;  %v2198_v7 = vpop.permute.xlu2 %2197 }
 0x334   : > { %v2939_v33 = vshrl.u32 %v2794_v50, 16  ;;  %v2619_v25 = vadd.f32 %v2618_v16, %v2530_v63  ;;  %2637 = vmatmul.bf16.gmra.mxu2 %v2289_v14  ;;  %v2942_v30 = vshll.u32 %v2794_v50, 16 }
 0x335   : > { %v2534_v2 = vpop.f32.mrf.mxu1 }
 0x336   : > { %v2941_v46 = vrot.slane %v2939_v33, 7  ;;  %v2708_v31 = vadd.f32 %v2707_v17, %v2619_v25  ;;  %v2535_v50 = vadd.f32 %v8672_v28, %v2534_v2  ;;  %v2292_v33 = vsel %vm2085_vm15, %v2165_v32, %v2198_v7 }
 0x338   : > { %v2944_v55 = vor.u32 %v2942_v30, %v2941_v46  ;;  %v2946_v38 = vrot.slane %v2941_v46, 4  ;;  %v2763_v10 = vmax.f32 %v2708_v31, 0.0 }
 0x33a   : > { %v2945_v53 = vsel %vm7776_vm11, %v2937_v41, %v2944_v55  ;;  %v3187_v34 = vsel %vm8315_vm3, %v2946_v38, %v3186_v8  ;;  %v2795_v21 = vpack.c.bf16 %v2763_v10, %v2763_v10  ;;  %v2709_v62 = vpop.f32.mrf.mxu3  ;;  %v8753_v27 = vpop.permute.xlu1 %2166 }
 0x33b   : > { %3185 = vst.msk [vmem:[#allocation3 + $0x64] sm:$0xf] %vm445_vm2, %v2945_v53  ;;  %v2620_v24 = vpop.f32.mrf.mxu2 }
 0x33c   : > { %3188 = vst [vmem:[#allocation3 + $0x68] sm:$0x1] %v3187_v34  ;;  %v2948_v3 = vshrl.u32 %v2795_v21, 16  ;;  %v2621_v42 = vadd.f32 %v2620_v24, %v2532_v49  ;;  %2553 = vmatmul.bf16.gmra.mxu1 %v2244_v6  ;;  %v2951_v15 = vshll.u32 %v2795_v21, 16 }
 0x33d   : > { %v2536_v53 = vpop.f32.mrf.mxu1 }
 0x33e   : > { %v2950_v29 = vrot.slane %v2948_v3, 7  ;;  %v2710_v54 = vadd.f32 %v2709_v62, %v2621_v42  ;;  %v2537_v42 = vadd.f32 %v8672_v28, %v2536_v53 }
 0x340   : > { %v2953_v43 = vor.u32 %v2951_v15, %v2950_v29  ;;  %v2764_v63 = vmax.f32 %v2710_v54, 0.0  ;;  %v2954_v21 = vrot.slane %v2950_v29, 4  ;;  %v536_v29 = vld [vmem:[#allocation3 + $0x8c] sm:$0x1] }
 0x342   : > { %v3190_v22 = vsel %vm8417_vm10, %v2953_v43, %v3189_v57  ;;  %v2796_v17 = vpack.c.bf16 %v2764_v63, %v2764_v63  ;;  %v3684_v23 = vpop.permute.xlu1 %3683  ;;  %v8763_v16 = vld [vmem:[#allocation3 + $0x60] sm:$0xff]   ;;  %v2712_v14 = vpop.f32.mrf.mxu3  ;;  %v8782_v57 = vld [vmem:[#allocation2 + $0xcc] sm:$0xff]  }
 0x343   : > { %3191 = vst [vmem:[#allocation3 + $0x6c] sm:$0xf] %v3190_v22  ;;  %v2623_v48 = vpop.f32.mrf.mxu2  ;;  %6967 = vmatmul.msk.bf16.gmra.mxu3 %vm2048_vm14, %v2198_v7  ;;  %v8769_v25 = vsel %vm2085_vm15, %v8513_v39, %v3684_v23  ;;  %v3289_v46 = vld [vmem:[#allocation3 + $0x68] sm:$0x1]  ;;  %v3560_v30 = vshll.u32 %v8763_v16, 16  ;;  %v2200_v34 = vpop.permute.xlu2 %2199  ;;  %v3558_v62 = vshrl.u32 %v8763_v16, 16  ;;  %v2247_v22 = vsel %vm2203_vm0, %v8580_v1, %v8753_v27 }
 0x344   : > { %v2956_v31 = vshrl.u32 %v2796_v17, 16  ;;  %v2624_v8 = vadd.f32 %v2623_v48, %v2535_v50  ;;  %2642 = vmatmul.bf16.gmra.mxu2 %v2292_v33  ;;  %4401 = vmatmul.bf16.gmra.mxu0 %v8769_v25  ;;  %v3433_v41 = vunpack.c.l.b16 %v3289_v46  ;;  %v2959_v10 = vshll.u32 %v2796_v17, 16  ;;  %v3193_v39 = vld [vmem:[#allocation3 + $0x74] sm:$0x1]  ;;  %v8784_v43 = vld [vmem:[#allocation2 + $0xcc] sm:$0xf0] }
 0x345   : > { %v3562_v55 = vrot.slane %v3560_v30, 1  ;;  %v537_v50 = vsel %vm8340_vm4, 0, %v536_v29  ;;  %v3200_v29 = vld [vmem:[#allocation3 + $0x80] sm:$0x1] }
 0x346   : > { %v2958_v38 = vrot.slane %v2956_v31, 7  ;;  %v2713_v49 = vadd.f32 %v2712_v14, %v2624_v8  ;;  %v8773_v32 = vpack.c.b16 %v3433_v41, %v3433_v41  ;;  %538 = vst [vmem:[#allocation3 + $0x8c] sm:$0x1] %v537_v50  ;;  %v1487_v31 = vld [vmem:[#allocation2 + $0xd4] sm:$0x1] }
 0x347   : > { %v3563_v59 = vor.u32 %v3562_v55, %v3558_v62  ;;  %v3196_v8 = vld [vmem:[#allocation3 + $0x78] sm:$0xf] }
 0x348   : > { %v2961_v24 = vor.u32 %v2959_v10, %v2958_v38  ;;  %v2963_v6 = vrot.slane %v2958_v38, 4  ;;  %v2765_v3 = vmax.f32 %v2713_v49, 0.0  ;;  %v3565_v2 = vshll.u32 %v8773_v32, 16 }
 0x349   : > { %v1631_v10 = vunpack.c.l.b16 %v1487_v31 }
 0x34a   : > { %v2962_v4 = vsel %vm7776_vm11, %v2954_v21, %v2961_v24  ;;  %v3194_v7 = vsel %vm8315_vm3, %v2963_v6, %v3193_v39  ;;  %v2797_v15 = vpack.c.bf16 %v2765_v3, %v2765_v3  ;;  %v3567_v54 = vrot.slane %v3565_v2, 1  ;;  %v2714_v48 = vpop.f32.mrf.mxu3  ;;  %v7578_v38 = vld [vmem:[#allocation3 + $0x6c] sm:$0xe] }
 0x34b   : > { %3192 = vst.msk [vmem:[#allocation3 + $0x70] sm:$0xf] %vm445_vm2, %v2962_v4  ;;  %v2625_v63 = vpop.f32.mrf.mxu2  ;;  %v3686_v1 = vpop.permute.xlu2 %3685  ;;  %v2295_v21 = vsel %vm2085_vm15, %v8753_v27, %v2200_v34 }
 0x34c   : > { %3195 = vst [vmem:[#allocation3 + $0x74] sm:$0x1] %v3194_v7  ;;  %v2965_v17 = vshrl.u32 %v2797_v15, 16  ;;  %v2626_v23 = vadd.f32 %v2625_v63, %v2537_v42  ;;  %v3568_v14 = vsel %vm1650_vm13, %v3563_v59, %v3567_v54  ;;  %2558 = vmatmul.bf16.gmra.mxu1 %v2247_v22  ;;  %v2968_v46 = vshll.u32 %v2797_v15, 16  ;;  %v2539_v42 = vpop.f32.mrf.mxu1 }
 0x34d   : > { %3693 = vrot.lane.b32.xlu0 %v3568_v14, %s7640_s23  ;;  %v8803_v24 = vsel %vm2085_vm15, %v8660_v40, %v3686_v1  ;;  %v1858_v15 = vshll.u32 %v8782_v57, 16  ;;  %v8808_v63 = vpack.c.b16 %v1631_v10, %v1631_v10 }
 0x34e   : > { %v2967_v33 = vrot.slane %v2965_v17, 7  ;;  %v2715_v30 = vadd.f32 %v2714_v48, %v2626_v23 }
 0x34f   : > { %v1863_v10 = vshll.u32 %v8808_v63, 16 }
 0x350   : > { %v2970_v41 = vor.u32 %v2968_v46, %v2967_v33  ;;  %v2766_v55 = vmax.f32 %v2715_v30, 0.0  ;;  %v2971_v54 = vrot.slane %v2967_v33, 4  ;;  %v1856_v46 = vshrl.u32 %v8782_v57, 16 }
 0x351   : > { %v2540_v30 = vadd.f32 %v8672_v28, %v2539_v42  ;;  %v3688_v42 = vpop.permute.xlu0 %3687 }
 0x352   : > { %v3197_v53 = vsel %vm8417_vm10, %v2970_v41, %v3196_v8  ;;  %v2798_v49 = vpack.c.bf16 %v2766_v55, %v2766_v55  ;;  %v8798_v39 = vld [vmem:[#allocation3 + $0x6c] sm:$0xff]   ;;  %v1860_v8 = vrot.slane %v1858_v15, 1  ;;  %v7581_v15 = vld [vmem:[#allocation2 + $0xcc] sm:$0xe] }
 0x353   : > { %v7577_v62 = vld [vmem:[#allocation3 + $0x6c] sm:$0xf0]  ;;  %3198 = vst [vmem:[#allocation3 + $0x78] sm:$0xf] %v3197_v53  ;;  %6968 = vmatmul.msk.bf16.gmra.mxu3 %vm2048_vm14, %v2200_v34  ;;  %v3290_v6 = vld [vmem:[#allocation3 + $0x74] sm:$0x1] }
 0x354   : > { %v2973_v3 = vshrl.u32 %v2798_v49, 16  ;;  %2647 = vmatmul.bf16.gmra.mxu2 %v2295_v21  ;;  %4406 = vmatmul.bf16.gmra.mxu0 %v8803_v24  ;;  %v3434_v2 = vunpack.c.l.b16 %v3290_v6  ;;  %v7579_v59 = vor.u32 %v7578_v38, %v7577_v62  ;;  %v2976_v27 = vshll.u32 %v2798_v49, 16  ;;  %v2541_v6 = vpop.f32.mrf.mxu1 }
 0x355   : > { %v3572_v34 = vshll.u32 %v8798_v39, 16  ;;  %v3570_v14 = vshrl.u32 %v8798_v39, 16 }
 0x356   : > { %v2975_v4 = vrot.slane %v2973_v3, 7  ;;  %v3452_v7 = vpack.c.b16 %v3434_v2, %v3434_v2  ;;  %v3794_v40 = vrot.slane %v7579_v59, 1  ;;  %v1861_v3 = vor.u32 %v1860_v8, %v1856_v46  ;;  %v7289_v8 = vld [vmem:[%s10372_s5 + $0xf8] sm:$0xff] }
 0x357   : > { %v3574_v48 = vrot.slane %v3572_v34, 1  ;;  %v1865_v2 = vrot.slane %v1863_v10, 1  ;;  %4645 = vmatpush.bf16.msrb.mxu2 %v7289_v8 }
 0x358   : > { %v2978_v22 = vor.u32 %v2976_v27, %v2975_v4  ;;  %v2980_v50 = vrot.slane %v2975_v4, 4  ;;  %v3577_v17 = vshll.u32 %v3452_v7, 16  ;;  %v3795_v23 = vrot.slane %v3452_v7, 1 }
 0x359   : > { %v3575_v55 = vor.u32 %v3574_v48, %v3570_v14  ;;  %v2542_v4 = vadd.f32 %v8672_v28, %v2541_v6  ;;  %v1866_v34 = vsel %vm1650_vm13, %v1861_v3, %v1865_v2 }
 0x35a   : > { %v2979_v33 = vsel %vm7776_vm11, %v2971_v54, %v2978_v22  ;;  %v3201_v31 = vsel %vm8315_vm3, %v2980_v50, %v3200_v29  ;;  %v2717_v41 = vpop.f32.mrf.mxu3  ;;  %v3579_v38 = vrot.slane %v3577_v17, 1  ;;  %v8820_v53 = vsel %vm1957_vm12, %v3794_v40, %v3795_v23 }
 0x35b   : > { %3199 = vst.msk [vmem:[#allocation3 + $0x7c] sm:$0xf] %vm445_vm2, %v2979_v33  ;;  %v2628_v1 = vpop.f32.mrf.mxu2  ;;  %v8829_v29 = vsel %vm2085_vm15, %v8636_v5, %v3688_v42 }
 0x35c   : > { %3202 = vst [vmem:[#allocation3 + $0x80] sm:$0x1] %v3201_v31  ;;  %v2629_v49 = vadd.f32 %v2628_v1, %v2540_v30  ;;  %v3580_v21 = vsel %vm1650_vm13, %v3575_v55, %v3579_v38  ;;  %v7273_v31 = vld [vmem:[%s10372_s5 + $0x78] sm:$0xff] }
 0x35d   : > { %3695 = vrot.lane.b32.xlu1 %v3580_v21, %s7640_s23  ;;  %4467 = vmatpush.bf16.msrb.mxu3 %v7273_v31 }
 0x35e   : > { %v2718_v62 = vadd.f32 %v2717_v41, %v2629_v49  ;;  %v3203_v41 = vld [vmem:[#allocation3 + $0x84] sm:$0xf]  ;;  %v7582_v49 = vor.u32 %v7581_v15, %v8784_v43 }
 0x35f   : > { %v7281_v43 = vld [vmem:[%s10372_s5 + $0xb8] sm:$0xff] }
 0x360   : > { %v2767_v59 = vmax.f32 %v2718_v62, 0.0  ;;  %v7293_v15 = vld [vmem:[%s10372_s5 + $0x118] sm:$0xff]  ;;  %4556 = vmatpush.bf16.msrb.mxu1 %v7281_v43  ;;  %v2544_v43 = vpop.f32.mrf.mxu1 }
 0x361   : > { %4738 = vmatpush.bf16.msra.mxu0 %v7293_v15  ;;  %v7288_v15 = vld [vmem:[%s10372_s5 + $0xf0] sm:$0xff] }
 0x362   : > { %v2799_v27 = vpack.c.bf16 %v2767_v59, %v2767_v59  ;;  %v8825_v7 = vld [vmem:[#allocation3 + $0x78] sm:$0xff]   ;;  %v2719_v48 = vpop.f32.mrf.mxu3  ;;  %4646 = vmatpush.bf16.msrb.mxu2 %v7288_v15 }
 0x363   : > { %v2630_v54 = vpop.f32.mrf.mxu2  ;;  %v3291_v40 = vld [vmem:[#allocation3 + $0x80] sm:$0x1]  ;;  %v3584_v22 = vshll.u32 %v8825_v7, 16  ;;  %v3582_v38 = vshrl.u32 %v8825_v7, 16 }
 0x364   : > { %v2982_v50 = vshrl.u32 %v2799_v27, 16  ;;  %v2631_v17 = vadd.f32 %v2630_v54, %v2542_v4  ;;  %4411 = vmatmul.bf16.gmra.mxu0 %v8829_v29  ;;  %v3435_v23 = vunpack.c.l.b16 %v3291_v40  ;;  %v2985_v14 = vshll.u32 %v2799_v27, 16 }
 0x365   : > { %1901 = vrot.lane.b32.xlu1 %v1866_v34, %s7641_s24  ;;  %v3586_v5 = vrot.slane %v3584_v22, 1  ;;  %v2009_v27 = vrot.slane %v7582_v49, 1  ;;  %v2010_v54 = vrot.slane %v8808_v63, 1  ;;  %v3207_v34 = vld [vmem:[#allocation3 + $0x8c] sm:$0x1] }
 0x366   : > { %v2984_v46 = vrot.slane %v2982_v50, 7  ;;  %v2720_v30 = vadd.f32 %v2719_v48, %v2631_v17  ;;  %v8835_v33 = vpack.c.b16 %v3435_v23, %v3435_v23 }
 0x367   : > { %v3587_v6 = vor.u32 %v3586_v5, %v3582_v38 }
 0x368   : > { %v2987_v1 = vor.u32 %v2985_v14, %v2984_v46  ;;  %v2768_v55 = vmax.f32 %v2720_v30, 0.0  ;;  %v3589_v10 = vshll.u32 %v8835_v33, 16  ;;  %v2988_v40 = vrot.slane %v2984_v46, 4 }
 0x369   : > { %v2011_v14 = vsel %vm1957_vm12, %v2009_v27, %v2010_v54  ;;  %v490_v27 = vld [vmem:[#allocation3 + $0x90] sm:$0x1] }
 0x36a   : > { %v3204_v21 = vsel %vm8417_vm10, %v2987_v1, %v3203_v41  ;;  %v2800_v62 = vpack.c.bf16 %v2768_v55, %v2768_v55  ;;  %v3591_v3 = vrot.slane %v3589_v10, 1  ;;  %v3690_v17 = vpop.permute.xlu1 %3689  ;;  %v3692_v10 = vpop.permute.xlu2 %3691  ;;  %v491_v54 = vsel %vm8315_vm3, 0, %v490_v27 }
 0x36b   : > { %3205 = vst [vmem:[#allocation3 + $0x84] sm:$0xf] %v3204_v21  ;;  %v8865_v48 = vsel %vm2085_vm15, %v8687_v12, %v3690_v17  ;;  %v2546_v17 = vpop.f32.mrf.mxu1 }
 0x36c   : > { %v2990_v2 = vshrl.u32 %v2800_v62, 16  ;;  %v3592_v42 = vsel %vm1650_vm13, %v3587_v6, %v3591_v3  ;;  %v2993_v4 = vshll.u32 %v2800_v62, 16  ;;  %v8878_v3 = vsel %vm2085_vm15, %v8705_v56, %v3692_v10  ;;  %492 = vst [vmem:[#allocation3 + $0x90] sm:$0x1] %v491_v54  ;;  %v539_v56 = vld [vmem:[#allocation3 + $0x98] sm:$0x1] }
 0x36d   : > { %3697 = vrot.lane.b32.xlu2 %v3592_v42, %s7640_s23 }
 0x36e   : > { %v2992_v59 = vrot.slane %v2990_v2, 7 }
 0x370   : > { %v2995_v22 = vor.u32 %v2993_v4, %v2992_v59  ;;  %v2997_v50 = vrot.slane %v2992_v59, 4  ;;  %v7272_v4 = vld [vmem:[%s10372_s5 + $0x70] sm:$0xff] }
 0x371   : > { %4468 = vmatpush.bf16.msrb.mxu3 %v7272_v4 }
 0x372   : > { %v2996_v23 = vsel %vm7776_vm11, %v2988_v40, %v2995_v22  ;;  %v3208_v63 = vsel %vm8315_vm3, %v2997_v50, %v3207_v34  ;;  %v7584_v46 = vld [vmem:[#allocation3 + $0x84] sm:$0xe]  ;;  %v7280_v34 = vld [vmem:[%s10372_s5 + $0xb0] sm:$0xff]  ;;  %v540_v40 = vsel %vm8340_vm4, 0, %v539_v56 }
 0x373   : > { %3206 = vst.msk [vmem:[#allocation3 + $0x88] sm:$0xf] %vm445_vm2, %v2996_v23  ;;  %4557 = vmatpush.bf16.msrb.mxu1 %v7280_v34  ;;  %v493_v22 = vld [vmem:[#allocation3 + $0x9c] sm:$0x1]  ;;  %v2545_v23 = vadd.f32 %v8672_v28, %v2544_v43  ;;  %v3210_v54 = vld [vmem:[#allocation3 + $0x90] sm:$0xf] }
 0x374   : > { %3209 = vst [vmem:[#allocation3 + $0x8c] sm:$0x1] %v3208_v63  ;;  %4416 = vmatmul.bf16.gmra.mxu0 %v8865_v48  ;;  %v494_v50 = vsel %vm8315_vm3, 0, %v493_v22 }
 0x375   : > { %2046 = vrot.lane.b32.xlu2 %v2011_v14, %s7640_s23  ;;  %541 = vst [vmem:[#allocation3 + $0x98] sm:$0x1] %v540_v40  ;;  %v542_v14 = vld [vmem:[#allocation3 + $0xa4] sm:$0x1] }
 0x376   : > { %495 = vst [vmem:[#allocation3 + $0x9c] sm:$0x1] %v494_v50 }
 0x37a   : > { %v8869_v30 = vld [vmem:[#allocation3 + $0x84] sm:$0xff]  }
 0x37b   : > { %v7583_v5 = vld [vmem:[#allocation3 + $0x84] sm:$0xf0]  ;;  %v3292_v31 = vld [vmem:[#allocation3 + $0x8c] sm:$0x1]  ;;  %v3596_v55 = vshll.u32 %v8869_v30, 16  ;;  %v3594_v21 = vshrl.u32 %v8869_v30, 16 }
 0x37c   : > { %v3436_v8 = vunpack.c.l.b16 %v3292_v31  ;;  %v7585_v41 = vor.u32 %v7584_v46, %v7583_v5  ;;  %v543_v5 = vsel %vm8340_vm4, 0, %v542_v14  ;;  %v7279_v14 = vld [vmem:[%s10372_s5 + $0xa8] sm:$0xff] }
 0x37d   : > { %v3598_v62 = vrot.slane %v3596_v55, 1  ;;  %544 = vst [vmem:[#allocation3 + $0xa4] sm:$0x1] %v543_v5  ;;  %v2547_v55 = vadd.f32 %v8672_v28, %v2546_v17  ;;  %v545_v17 = vld [vmem:[#allocation3 + $0xb0] sm:$0x1]  ;;  %4558 = vmatpush.bf16.msrb.mxu1 %v7279_v14 }
 0x37e   : > { %v3454_v1 = vpack.c.b16 %v3436_v8, %v3436_v8  ;;  %v3800_v38 = vrot.slane %v7585_v41, 1 }
 0x37f   : > { %v3599_v2 = vor.u32 %v3598_v62, %v3594_v21 }
 0x380   : > { %v3601_v49 = vshll.u32 %v3454_v1, 16  ;;  %v3801_v12 = vrot.slane %v3454_v1, 1 }
 0x382   : > { %v8874_v6 = vsel %vm1957_vm12, %v3800_v38, %v3801_v12  ;;  %v3603_v42 = vrot.slane %v3601_v49, 1  ;;  %v496_v49 = vld [vmem:[#allocation3 + $0xa8] sm:$0x1] }
 0x383   : > { %v497_v21 = vsel %vm8315_vm3, 0, %v496_v49 }
 0x384   : > { %4421 = vmatmul.bf16.gmra.mxu0 %v8878_v3  ;;  %v3604_v59 = vsel %vm1650_vm13, %v3599_v2, %v3603_v42  ;;  %v7271_v42 = vld [vmem:[%s10372_s5 + $0x68] sm:$0xff]  ;;  %498 = vst [vmem:[#allocation3 + $0xa8] sm:$0x1] %v497_v21 }
 0x385   : > { %3699 = vrot.lane.b32.xlu0 %v3604_v59, %s7640_s23  ;;  %4469 = vmatpush.bf16.msrb.mxu3 %v7271_v42 }
 0x3a6   : > { %v2722_v63 = vpop.f32.mrf.mxu3 }
 0x3a7   : > { %v2633_v46 = vpop.f32.mrf.mxu2 }
 0x3a8   : > { %v2634_v31 = vadd.f32 %v2633_v46, %v2545_v23 }
 0x3a9   : > { %v2549_v8 = vpop.f32.mrf.mxu1 }
 0x3aa   : > { %v2723_v41 = vadd.f32 %v2722_v63, %v2634_v31  ;;  %v2550_v40 = vadd.f32 %v8672_v28, %v2549_v8  ;;  %v7287_v63 = vld [vmem:[%s10372_s5 + $0xe8] sm:$0xff]  ;;  %v546_v31 = vsel %vm8340_vm4, 0, %v545_v17 }
 0x3ab   : > { %4647 = vmatpush.bf16.msrb.mxu2 %v7287_v63  ;;  %547 = vst [vmem:[#allocation3 + $0xb0] sm:$0x1] %v546_v31  ;;  %v3217_v63 = vld [vmem:[#allocation3 + $0x9c] sm:$0xf] }
 0x3ac   : > { %v2769_v1 = vmax.f32 %v2723_v41, 0.0 }
 0x3ae   : > { %v2801_v38 = vpack.c.bf16 %v2769_v1, %v2769_v1  ;;  %v2724_v10 = vpop.f32.mrf.mxu3 }
 0x3af   : > { %v2635_v12 = vpop.f32.mrf.mxu2 }
 0x3b0   : > { %v2999_v62 = vshrl.u32 %v2801_v38, 16  ;;  %v2636_v2 = vadd.f32 %v2635_v12, %v2547_v55  ;;  %v3002_v4 = vshll.u32 %v2801_v38, 16  ;;  %v3214_v55 = vld [vmem:[#allocation3 + $0x98] sm:$0x1] }
 0x3b1   : > { %v2551_v56 = vpop.f32.mrf.mxu1 }
 0x3b2   : > { %v3001_v59 = vrot.slane %v2999_v62, 7  ;;  %v2725_v27 = vadd.f32 %v2724_v10, %v2636_v2  ;;  %v2552_v42 = vadd.f32 %v8672_v28, %v2551_v56  ;;  %v7292_v56 = vld [vmem:[%s10372_s5 + $0x110] sm:$0xff] }
 0x3b3   : > { %4739 = vmatpush.bf16.msra.mxu0 %v7292_v56 }
 0x3b4   : > { %v3004_v43 = vor.u32 %v3002_v4, %v3001_v59  ;;  %v2770_v15 = vmax.f32 %v2725_v27, 0.0  ;;  %v3005_v38 = vrot.slane %v3001_v59, 4 }
 0x3b6   : > { %v3211_v34 = vsel %vm8417_vm10, %v3004_v43, %v3210_v54  ;;  %v2802_v22 = vpack.c.bf16 %v2770_v15, %v2770_v15  ;;  %v2727_v50 = vpop.f32.mrf.mxu3  ;;  %v499_v54 = vld [vmem:[#allocation3 + $0xb4] sm:$0x1] }
 0x3b7   : > { %3212 = vst [vmem:[#allocation3 + $0x90] sm:$0xf] %v3211_v34  ;;  %v2638_v23 = vpop.f32.mrf.mxu2  ;;  %v500_v59 = vsel %vm8315_vm3, 0, %v499_v54  ;;  %v3221_v54 = vld [vmem:[#allocation3 + $0xa4] sm:$0x1] }
 0x3b8   : > { %v3007_v46 = vshrl.u32 %v2802_v22, 16  ;;  %v2639_v5 = vadd.f32 %v2638_v23, %v2550_v40  ;;  %v3010_v41 = vshll.u32 %v2802_v22, 16  ;;  %501 = vst [vmem:[#allocation3 + $0xb4] sm:$0x1] %v500_v59 }
 0x3b9   : > { %v2554_v21 = vpop.f32.mrf.mxu1 }
 0x3ba   : > { %v3009_v8 = vrot.slane %v3007_v46, 7  ;;  %v2728_v1 = vadd.f32 %v2727_v50, %v2639_v5 }
 0x3bc   : > { %v3012_v10 = vor.u32 %v3010_v41, %v3009_v8  ;;  %v3014_v49 = vrot.slane %v3009_v8, 4  ;;  %v2771_v12 = vmax.f32 %v2728_v1, 0.0  ;;  %v548_v1 = vld [vmem:[#allocation3 + $0xbc] sm:$0x1] }
 0x3be   : > { %v3013_v62 = vsel %vm7776_vm11, %v3005_v38, %v3012_v10  ;;  %v3215_v2 = vsel %vm8315_vm3, %v3014_v49, %v3214_v55  ;;  %v2803_v4 = vpack.c.bf16 %v2771_v12, %v2771_v12  ;;  %v2729_v27 = vpop.f32.mrf.mxu3 }
 0x3bf   : > { %3213 = vst.msk [vmem:[#allocation3 + $0x94] sm:$0xf] %vm445_vm2, %v3013_v62  ;;  %v3694_v43 = vpop.permute.xlu0 %3693  ;;  %v2640_v15 = vpop.f32.mrf.mxu2 }
 0x3c0   : > { %3216 = vst [vmem:[#allocation3 + $0x98] sm:$0x1] %v3215_v2  ;;  %v3016_v34 = vshrl.u32 %v2803_v4, 16  ;;  %v2641_v40 = vadd.f32 %v2640_v15, %v2552_v42  ;;  %v8928_v22 = vsel %vm2085_vm15, %v8763_v16, %v3694_v43  ;;  %v3019_v17 = vshll.u32 %v2803_v4, 16 }
 0x3c1   : > { %4426 = vmatmul.bf16.gmra.mxu0 %v8928_v22  ;;  %v2555_v16 = vadd.f32 %v8672_v28, %v2554_v21  ;;  %v2556_v55 = vpop.f32.mrf.mxu1  ;;  %v549_v42 = vsel %vm8340_vm4, 0, %v548_v1 }
 0x3c2   : > { %v3018_v50 = vrot.slane %v3016_v34, 7  ;;  %v2730_v23 = vadd.f32 %v2729_v27, %v2641_v40  ;;  %550 = vst [vmem:[#allocation3 + $0xbc] sm:$0x1] %v549_v42  ;;  %v7278_v42 = vld [vmem:[%s10372_s5 + $0xa0] sm:$0xff] }
 0x3c3   : > { %4559 = vmatpush.bf16.msrb.mxu1 %v7278_v42  ;;  %v3228_v42 = vld [vmem:[#allocation3 + $0xb0] sm:$0x1] }
 0x3c4   : > { %v3021_v14 = vor.u32 %v3019_v17, %v3018_v50  ;;  %v2772_v46 = vmax.f32 %v2730_v23, 0.0  ;;  %v3022_v59 = vrot.slane %v3018_v50, 4 }
 0x3c6   : > { %v3218_v5 = vsel %vm8417_vm10, %v3021_v14, %v3217_v63  ;;  %v2804_v31 = vpack.c.bf16 %v2772_v46, %v2772_v46  ;;  %v2732_v8 = vpop.f32.mrf.mxu3  ;;  %v8937_v41 = vld [vmem:[#allocation3 + $0x90] sm:$0xff]   ;;  %v2557_v46 = vadd.f32 %v8672_v28, %v2556_v55  ;;  %v7286_v28 = vld [vmem:[%s10372_s5 + $0xe0] sm:$0xff] }
 0x3c7   : > { %3219 = vst [vmem:[#allocation3 + $0x9c] sm:$0xf] %v3218_v5  ;;  %v2643_v38 = vpop.f32.mrf.mxu2  ;;  %v3293_v10 = vld [vmem:[#allocation3 + $0x98] sm:$0x1]  ;;  %v3608_v49 = vshll.u32 %v8937_v41, 16  ;;  %v3606_v17 = vshrl.u32 %v8937_v41, 16  ;;  %v8951_v5 = vpop.permute.xlu2 %3697  ;;  %4648 = vmatpush.bf16.msrb.mxu2 %v7286_v28 }
 0x3c8   : > { %v3024_v12 = vshrl.u32 %v2804_v31, 16  ;;  %v2644_v62 = vadd.f32 %v2643_v38, %v2555_v16  ;;  %v3437_v2 = vunpack.c.l.b16 %v3293_v10  ;;  %v3027_v27 = vshll.u32 %v2804_v31, 16 }
 0x3c9   : > { %v3610_v15 = vrot.slane %v3608_v49, 1  ;;  %v2559_v55 = vpop.f32.mrf.mxu1 }
 0x3ca   : > { %v3026_v4 = vrot.slane %v3024_v12, 7  ;;  %v2733_v21 = vadd.f32 %v2732_v8, %v2644_v62  ;;  %v8942_v43 = vpack.c.b16 %v3437_v2, %v3437_v2  ;;  %v7270_v12 = vld [vmem:[%s10372_s5 + $0x60] sm:$0xff] }
 0x3cb   : > { %v3611_v8 = vor.u32 %v3610_v15, %v3606_v17  ;;  %4470 = vmatpush.bf16.msrb.mxu3 %v7270_v12 }
 0x3cc   : > { %v3029_v34 = vor.u32 %v3027_v27, %v3026_v4  ;;  %v3031_v40 = vrot.slane %v3026_v4, 4  ;;  %v2773_v56 = vmax.f32 %v2733_v21, 0.0  ;;  %v3613_v23 = vshll.u32 %v8942_v43, 16 }
 0x3ce   : > { %v3030_v63 = vsel %vm7776_vm11, %v3022_v59, %v3029_v34  ;;  %v3222_v14 = vsel %vm8315_vm3, %v3031_v40, %v3221_v54  ;;  %v2805_v16 = vpack.c.bf16 %v2773_v56, %v2773_v56  ;;  %v2734_v31 = vpop.f32.mrf.mxu3  ;;  %v3615_v1 = vrot.slane %v3613_v23, 1  ;;  %v3224_v54 = vld [vmem:[#allocation3 + $0xa8] sm:$0xf]  ;;  %v7587_v34 = vld [vmem:[#allocation3 + $0x9c] sm:$0xe] }
 0x3cf   : > { %3220 = vst.msk [vmem:[#allocation3 + $0xa0] sm:$0xf] %vm445_vm2, %v3030_v63  ;;  %v2645_v50 = vpop.f32.mrf.mxu2  ;;  %v3696_v49 = vpop.permute.xlu1 %3695  ;;  %v8975_v40 = vld [vmem:[%s10371_s4] ss:$0 sm:$0xff] }
 0x3d0   : > { %3223 = vst [vmem:[#allocation3 + $0xa4] sm:$0x1] %v3222_v14  ;;  %v3033_v38 = vshrl.u32 %v2805_v16, 16  ;;  %v2646_v10 = vadd.f32 %v2645_v50, %v2557_v46  ;;  %v3616_v62 = vsel %vm1650_vm13, %v3611_v8, %v3615_v1  ;;  %v8963_v2 = vsel %vm2085_vm15, %v8798_v39, %v3696_v49  ;;  %v2047_v23 = vpop.permute.xlu2 %2046 }
 0x3d1   : > { %v3036_v27 = vshll.u32 %v2805_v16, 16  ;;  %3701 = vrot.lane.b32.xlu0 %v3616_v62, %s7640_s23  ;;  %4431 = vmatmul.bf16.gmra.mxu0 %v8963_v2  ;;  %v2560_v56 = vadd.f32 %v8975_v40, %v2559_v55 }
 0x3d2   : > { %v3035_v4 = vrot.slane %v3033_v38, 7  ;;  %v2735_v21 = vadd.f32 %v2734_v31, %v2646_v10 }
 0x3d4   : > { %v3038_v15 = vor.u32 %v3036_v27, %v3035_v4  ;;  %v2774_v59 = vmax.f32 %v2735_v21, 0.0  ;;  %v2561_v27 = vpop.f32.mrf.mxu1 }
 0x3d6   : > { %v3225_v39 = vsel %vm8417_vm10, %v3038_v15, %v3224_v54  ;;  %v2806_v17 = vpack.c.bf16 %v2774_v59, %v2774_v59  ;;  %v8978_v63 = vld [vmem:[#allocation3 + $0x9c] sm:$0xff]   ;;  %v2737_v46 = vpop.f32.mrf.mxu3  ;;  %v3039_v59 = vrot.slane %v3035_v4, 4 }
 0x3d7   : > { %v7586_v14 = vld [vmem:[#allocation3 + $0x9c] sm:$0xf0]  ;;  %3226 = vst [vmem:[#allocation3 + $0xa8] sm:$0xf] %v3225_v39  ;;  %v2648_v16 = vpop.f32.mrf.mxu2  ;;  %v3294_v31 = vld [vmem:[#allocation3 + $0xa4] sm:$0x1]  ;;  %v1902_v1 = vpop.permute.xlu1 %1901 }
 0x3d8   : > { %v3041_v50 = vshrl.u32 %v2806_v17, 16  ;;  %v2649_v8 = vadd.f32 %v2648_v16, %v2560_v56  ;;  %v3438_v38 = vunpack.c.l.b16 %v3294_v31  ;;  %v2084_v10 = vsel %vm2048_vm14, %v8782_v57, %v1902_v1  ;;  %v8985_v31 = vpop.f32.mrf.mxu0 }
 0x3d9   : > { %v7588_v49 = vor.u32 %v7587_v34, %v7586_v14  ;;  %v3044_v28 = vshll.u32 %v2806_v17, 16  ;;  %v2121_v62 = vsel %vm2085_vm15, %v2084_v10, %v2047_v23  ;;  %v3620_v54 = vshll.u32 %v8978_v63, 16 }
 0x3da   : > { %v3043_v12 = vrot.slane %v3041_v50, 7  ;;  %v2738_v55 = vadd.f32 %v2737_v46, %v2649_v8  ;;  %2201 = vrot.lane.b32.xlu0 %v2121_v62, %s7640_s23  ;;  %v3456_v21 = vpack.c.b16 %v3438_v38, %v3438_v38  ;;  %v3618_v57 = vshrl.u32 %v8978_v63, 16 }
 0x3db   : > { %v3806_v15 = vrot.slane %v7588_v49, 1  ;;  %v3622_v34 = vrot.slane %v3620_v54, 1  ;;  %v2562_v50 = vadd.f32 %v8975_v40, %v2561_v27 }
 0x3dc   : > { %v3046_v39 = vor.u32 %v3044_v28, %v3043_v12  ;;  %v3048_v56 = vrot.slane %v3043_v12, 4  ;;  %v2775_v16 = vmax.f32 %v2738_v55, 0.0  ;;  %v3625_v17 = vshll.u32 %v3456_v21, 16  ;;  %v7466_v28 = vld [vmem:[#allocation3 + $0x18] sm:$0xf0] }
 0x3dd   : > { %v3807_v14 = vrot.slane %v3456_v21, 1  ;;  %v3623_v1 = vor.u32 %v3622_v34, %v3618_v57 }
 0x3de   : > { %v3047_v23 = vsel %vm7776_vm11, %v3039_v59, %v3046_v39  ;;  %v3229_v46 = vsel %vm8315_vm3, %v3048_v56, %v3228_v42  ;;  %v2807_v8 = vpack.c.bf16 %v2775_v16, %v2775_v16  ;;  %v3627_v38 = vrot.slane %v3625_v17, 1  ;;  %v2739_v55 = vpop.f32.mrf.mxu3  ;;  %v3231_v59 = vld [vmem:[#allocation3 + $0xb4] sm:$0xf]  ;;  %v7269_v56 = vld [vmem:[%s10372_s5 + $0x58] sm:$0xff] }
 0x3df   : > { %3227 = vst.msk [vmem:[#allocation3 + $0xac] sm:$0xf] %vm445_vm2, %v3047_v23  ;;  %v2650_v4 = vpop.f32.mrf.mxu2  ;;  %v8995_v10 = vsel %vm1957_vm12, %v3806_v15, %v3807_v14  ;;  %v9001_v42 = vsel %vm2085_vm15, %v8825_v7, %v8951_v5  ;;  %v7467_v15 = vld [vmem:[#allocation3 + $0x18] sm:$0xe]  ;;  %v3774_v5 = vrot.slane %v8522_v35, 1  ;;  %4471 = vmatpush.bf16.msrb.mxu3 %v7269_v56 }
 0x3e0   : > { %3230 = vst [vmem:[#allocation3 + $0xb0] sm:$0x1] %v3229_v46  ;;  %v3050_v49 = vshrl.u32 %v2807_v8, 16  ;;  %v2651_v12 = vadd.f32 %v2650_v4, %v2562_v50  ;;  %v3628_v62 = vsel %vm1650_vm13, %v3623_v1, %v3627_v38  ;;  %v3053_v21 = vshll.u32 %v2807_v8, 16  ;;  %v9015_v14 = vpop.f32.mrf.mxu0 }
 0x3e1   : > { %3703 = vrot.lane.b32.xlu1 %v3628_v62, %s7640_s23  ;;  %4436 = vmatmul.bf16.gmra.mxu0 %v9001_v42  ;;  %v7468_v39 = vor.u32 %v7467_v15, %v7466_v28  ;;  %v7277_v62 = vld [vmem:[%s10372_s5 + $0x98] sm:$0xff] }
 0x3e2   : > { %v3052_v27 = vrot.slane %v3050_v49, 7  ;;  %v2740_v54 = vadd.f32 %v2739_v55, %v2651_v12  ;;  %3891 = vrot.lane.b32.xlu0 %v8709_v0, %s7640_s23  ;;  %v7285_v12 = vld [vmem:[%s10372_s5 + $0xd8] sm:$0xff]  ;;  %v3235_v55 = vld [vmem:[#allocation3 + $0xbc] sm:$0x1]  ;;  %4560 = vmatpush.bf16.msrb.mxu1 %v7277_v62 }
 0x3e3   : > { %v3773_v0 = vrot.slane %v7468_v39, 1  ;;  %4649 = vmatpush.bf16.msrb.mxu2 %v7285_v12 }
 0x3e4   : > { %v3055_v16 = vor.u32 %v3053_v21, %v3052_v27  ;;  %v2776_v7 = vmax.f32 %v2740_v54, 0.0  ;;  %v3056_v28 = vrot.slane %v3052_v27, 4 }
 0x3e5   : > { %v9019_v4 = vsel %vm1957_vm12, %v3773_v0, %v3774_v5 }
 0x3e6   : > { %v3232_v57 = vsel %vm8417_vm10, %v3055_v16, %v3231_v59  ;;  %v2808_v34 = vpack.c.bf16 %v2776_v7, %v2776_v7  ;;  %v9013_v17 = vld [vmem:[#allocation3 + $0xa8] sm:$0xff]  }
 0x3e7   : > { %3233 = vst [vmem:[#allocation3 + $0xb4] sm:$0xf] %v3232_v57  ;;  %v3295_v23 = vld [vmem:[#allocation3 + $0xb0] sm:$0x1]  ;;  %v3632_v46 = vshll.u32 %v9013_v17, 16  ;;  %v3630_v15 = vshrl.u32 %v9013_v17, 16 }
 0x3e8   : > { %v3058_v50 = vshrl.u32 %v2808_v34, 16  ;;  %v3439_v8 = vunpack.c.l.b16 %v3295_v23  ;;  %v3061_v1 = vshll.u32 %v2808_v34, 16  ;;  %v9044_v5 = vpop.f32.mrf.mxu0 }
 0x3e9   : > { %2168 = vrot.lane.b32.xlu1 %v8679_v36, %s7643_s25  ;;  %v3634_v49 = vrot.slane %v3632_v46, 1  ;;  %v7291_v36 = vld [vmem:[%s10372_s5 + $0x108] sm:$0xff] }
 0x3ea   : > { %v3060_v35 = vrot.slane %v3058_v50, 7  ;;  %v9023_v38 = vpack.c.b16 %v3439_v8, %v3439_v8  ;;  %3897 = vrot.lane.b32.xlu0 %v9019_v4, %s7640_s23  ;;  %4740 = vmatpush.bf16.msra.mxu0 %v7291_v36  ;;  %v7469_v50 = vld [vmem:[#allocation3 + $0x30] sm:$0xf0] }
 0x3eb   : > { %v3635_v56 = vor.u32 %v3634_v49, %v3630_v15  ;;  %v7470_v49 = vld [vmem:[#allocation3 + $0x30] sm:$0xe] }
 0x3ec   : > { %v3063_v21 = vor.u32 %v3061_v1, %v3060_v35  ;;  %v3065_v54 = vrot.slane %v3060_v35, 4  ;;  %v3637_v59 = vshll.u32 %v9023_v38, 16 }
 0x3ee   : > { %v3064_v27 = vsel %vm7776_vm11, %v3056_v28, %v3063_v21  ;;  %v3236_v39 = vsel %vm8315_vm3, %v3065_v54, %v3235_v55  ;;  %v3639_v16 = vrot.slane %v3637_v59, 1  ;;  %v7590_v57 = vld [vmem:[#allocation3 + $0xb4] sm:$0xe]  ;;  %v7471_v55 = vor.u32 %v7470_v49, %v7469_v50 }
 0x3ef   : > { %3234 = vst.msk [vmem:[#allocation3 + $0xb8] sm:$0xf] %vm445_vm2, %v3064_v27  ;;  %v3780_v54 = vrot.slane %v8662_v61, 1  ;;  %v7268_v61 = vld [vmem:[%s10372_s5 + $0x50] sm:$0xff] }
 0x3f0   : > { %3237 = vst [vmem:[#allocation3 + $0xbc] sm:$0x1] %v3236_v39  ;;  %v3640_v7 = vsel %vm1650_vm13, %v3635_v56, %v3639_v16  ;;  %v9060_v28 = vpop.f32.mrf.mxu0  ;;  %v3779_v39 = vrot.slane %v7471_v55, 1  ;;  %4472 = vmatpush.bf16.msrb.mxu3 %v7268_v61  ;;  %v7276_v55 = vld [vmem:[%s10372_s5 + $0x90] sm:$0xff] }
 0x3f1   : > { %3705 = vrot.lane.b32.xlu2 %v3640_v7, %s7640_s23  ;;  %3893 = vrot.lane.b32.xlu1 %v8474_v52, %s7640_s23 }
 0x3f2   : > { %3903 = vrot.lane.b32.xlu0 %v8803_v24, %s7640_s23  ;;  %v9071_v7 = vsel %vm1957_vm12, %v3779_v39, %v3780_v54  ;;  %4561 = vmatpush.bf16.msrb.mxu1 %v7276_v55  ;;  %v7473_v54 = vld [vmem:[#allocation3 + $0x48] sm:$0xe]  ;;  %v3798_v39 = vrot.slane %v8835_v33, 1  ;;  %v7283_v33 = vld [vmem:[%s10372_s5 + $0xc8] sm:$0xff] }
 0x3f3   : > { %v7481_v55 = vld [vmem:[#allocation3 + $0x90] sm:$0xf0] }
 0x3f6   : > { %v9051_v34 = vld [vmem:[#allocation3 + $0xb4] sm:$0xff]  }
 0x3f7   : > { %v7589_v0 = vld [vmem:[#allocation3 + $0xb4] sm:$0xf0]  ;;  %v3296_v23 = vld [vmem:[#allocation3 + $0xbc] sm:$0x1]  ;;  %v3700_v46 = vpop.permute.xlu0 %3699  ;;  %v3644_v62 = vshll.u32 %v9051_v34, 16  ;;  %v3642_v15 = vshrl.u32 %v9051_v34, 16 }
 0x3f8   : > { %v3440_v8 = vunpack.c.l.b16 %v3296_v23  ;;  %v9055_v35 = vsel %vm2085_vm15, %v8869_v30, %v3700_v46  ;;  %v7591_v1 = vor.u32 %v7590_v57, %v7589_v0  ;;  %v7475_v0 = vld [vmem:[#allocation3 + $0x60] sm:$0xf0]  ;;  %v7284_v23 = vld [vmem:[%s10372_s5 + $0xd0] sm:$0xff]  ;;  %v7476_v46 = vld [vmem:[#allocation3 + $0x60] sm:$0xe] }
 0x3f9   : > { %3899 = vrot.lane.b32.xlu1 %v8769_v25, %s7640_s23  ;;  %4441 = vmatmul.bf16.gmra.mxu0 %v9055_v35  ;;  %v3646_v59 = vrot.slane %v3644_v62, 1  ;;  %v7477_v50 = vor.u32 %v7476_v46, %v7475_v0 }
 0x3fa   : > { %v3458_v12 = vpack.c.b16 %v3440_v8, %v3440_v8  ;;  %3909 = vrot.lane.b32.xlu0 %v8645_v44, %s7640_s23  ;;  %v3812_v36 = vrot.slane %v7591_v1, 1  ;;  %4650 = vmatpush.bf16.msrb.mxu2 %v7284_v23  ;;  %v9085_v8 = vpop.f32.mrf.mxu0  ;;  %v3792_v1 = vrot.slane %v8773_v32, 1 }
 0x3fb   : > { %v3647_v56 = vor.u32 %v3646_v59, %v3642_v15  ;;  %v3791_v49 = vrot.slane %v7477_v50, 1  ;;  %v7275_v50 = vld [vmem:[%s10372_s5 + $0x88] sm:$0xff] }
 0x3fc   : > { %v3649_v21 = vshll.u32 %v3458_v12, 16  ;;  %v3813_v30 = vrot.slane %v3458_v12, 1  ;;  %4562 = vmatpush.bf16.msrb.mxu1 %v7275_v50  ;;  %v7485_v50 = vld [vmem:[#allocation3 + $0xa8] sm:$0xe] }
 0x3fd   : > { %v9093_v12 = vsel %vm1957_vm12, %v3791_v49, %v3792_v1  ;;  %v7290_v1 = vld [vmem:[%s10372_s5 + $0x100] sm:$0xff] }
 0x3fe   : > { %v9068_v27 = vsel %vm1957_vm12, %v3812_v36, %v3813_v30  ;;  %v3651_v16 = vrot.slane %v3649_v21, 1  ;;  %v7478_v36 = vld [vmem:[#allocation3 + $0x78] sm:$0xf0]  ;;  %v7472_v21 = vld [vmem:[#allocation3 + $0x48] sm:$0xf0]  ;;  %4651 = vmatpush.bf16.msrb.mxu2 %v7283_v33  ;;  %4741 = vmatpush.bf16.msra.mxu0 %v7290_v1 }
 0x3ff   : > { %v7479_v30 = vld [vmem:[#allocation3 + $0x78] sm:$0xe]  ;;  %v7474_v59 = vor.u32 %v7473_v54, %v7472_v21  ;;  %v7482_v21 = vld [vmem:[#allocation3 + $0x90] sm:$0xe]  ;;  %v3804_v54 = vrot.slane %v8942_v43, 1  ;;  %v7282_v43 = vld [vmem:[%s10372_s5 + $0xc0] sm:$0xff] }
 0x400   : > { %v3652_v57 = vsel %vm1650_vm13, %v3647_v56, %v3651_v16  ;;  %v7480_v15 = vor.u32 %v7479_v30, %v7478_v36  ;;  %v3786_v56 = vrot.slane %v8694_v9, 1  ;;  %v7267_v9 = vld [vmem:[%s10372_s5 + $0x48] sm:$0xff]  ;;  %v7266_v36 = vld [vmem:[%s10372_s5 + $0x40] sm:$0xff]  ;;  %v7483_v30 = vor.u32 %v7482_v21, %v7481_v55  ;;  %v7463_v55 = vld [vmem:[#allocation3] sm:$0xf0] }
 0x401   : > { %3905 = vrot.lane.b32.xlu1 %v9071_v7, %s7640_s23  ;;  %3707 = vrot.lane.b32.xlu2 %v3652_v57, %s7640_s23  ;;  %v3785_v57 = vrot.slane %v7474_v59, 1  ;;  %v7484_v33 = vld [vmem:[#allocation3 + $0xa8] sm:$0xf0]  ;;  %v3810_v21 = vrot.slane %v9023_v38, 1  ;;  %v3768_v38 = vrot.slane %v8497_v11, 1 }
 0x402   : > { %3915 = vrot.lane.b32.xlu0 %v8878_v3, %s7640_s23  ;;  %v9100_v62 = vpop.f32.mrf.mxu0  ;;  %v3797_v16 = vrot.slane %v7480_v15, 1  ;;  %4473 = vmatpush.bf16.msrb.mxu3 %v7267_v9  ;;  %v3803_v59 = vrot.slane %v7483_v30, 1  ;;  %v7486_v1 = vor.u32 %v7485_v50, %v7484_v33 }
 0x403   : > { %v9124_v23 = vsel %vm1957_vm12, %v3785_v57, %v3786_v56  ;;  %v7274_v57 = vld [vmem:[%s10372_s5 + $0x80] sm:$0xff]  ;;  %4652 = vmatpush.bf16.msrb.mxu2 %v7282_v43 }
 0x404   : > { %v9121_v61 = vsel %vm1957_vm12, %v3797_v16, %v3798_v39  ;;  %v9159_v39 = vsel %vm1957_vm12, %v3803_v59, %v3804_v54  ;;  %4563 = vmatpush.bf16.msrb.mxu1 %v7274_v57  ;;  %v3809_v54 = vrot.slane %v7486_v1, 1 }
 0x406   : > { %4474 = vmatpush.bf16.msrb.mxu3 %v7266_v36  ;;  %v7464_v36 = vld [vmem:[#allocation3] sm:$0xe]  ;;  %v9185_v43 = vsel %vm1957_vm12, %v3809_v54, %v3810_v21 }
 0x407   : > { %v7465_v59 = vor.u32 %v7464_v36, %v7463_v55 }
 0x409   : > { %3911 = vrot.lane.b32.xlu1 %v8865_v48, %s7640_s23  ;;  %3895 = vrot.lane.b32.xlu2 %v8723_v58, %s7640_s23  ;;  %v3767_v33 = vrot.slane %v7465_v59, 1 }
 0x40a   : > { %3921 = vrot.lane.b32.xlu0 %v9093_v12, %s7640_s23  ;;  %v9108_v32 = vpop.f32.mrf.mxu0 }
 0x40b   : > { %v3769_v1 = vsel %vm1957_vm12, %v3767_v33, %v3768_v38 }
 0x411   : > { %3917 = vrot.lane.b32.xlu1 %v8717_v47, %s7640_s23  ;;  %3901 = vrot.lane.b32.xlu2 %v8529_v60, %s7640_s23 }
 0x412   : > { %3927 = vrot.lane.b32.xlu0 %v9001_v42, %s7640_s23  ;;  %v9118_v0 = vpop.f32.mrf.mxu0 }
 0x419   : > { %3923 = vrot.lane.b32.xlu1 %v8963_v2, %s7640_s23  ;;  %3907 = vrot.lane.b32.xlu2 %v8829_v29, %s7640_s23 }
 0x41a   : > { %3933 = vrot.lane.b32.xlu0 %v8874_v6, %s7640_s23  ;;  %v9138_v46 = vpop.f32.mrf.mxu0 }
 0x421   : > { %3929 = vrot.lane.b32.xlu1 %v9121_v61, %s7640_s23  ;;  %3913 = vrot.lane.b32.xlu2 %v9124_v23, %s7640_s23 }
 0x422   : > { %v9148_v49 = vpop.f32.mrf.mxu0 }
 0x429   : > { %3919 = vrot.lane.b32.xlu2 %v8928_v22, %s7640_s23 }
 0x42a   : > { %v9156_v15 = vpop.f32.mrf.mxu0 }
 0x431   : > { %3925 = vrot.lane.b32.xlu2 %v8820_v53, %s7640_s23 }
 0x432   : > { %v9176_v9 = vpop.f32.mrf.mxu0 }
 0x439   : > { %3931 = vrot.lane.b32.xlu2 %v9055_v35, %s7640_s23 }
 0x43a   : > { %v9182_v30 = vpop.f32.mrf.mxu0 }
 0x441   : > { %3937 = vrot.lane.b32.xlu2 %v9159_v39, %s7640_s23 }
 0x442   : > { %v9198_v21 = vpop.f32.mrf.mxu0 }
 0x443   : > { %v3702_v56 = vpop.permute.xlu0 %3701 }
 0x444   : > { %v9165_v16 = vsel %vm2085_vm15, %v8937_v41, %v3702_v56 }
 0x445   : > { %3935 = vrot.lane.b32.xlu1 %v9165_v16, %s7640_s23  ;;  %4446 = vmatmul.bf16.gmra.mxu0 %v9165_v16 }
 0x44a   : > { %v9210_v33 = vpop.f32.mrf.mxu0 }
 0x44b   : > { %v3706_v50 = vpop.permute.xlu2 %3705 }
 0x44c   : > { %v2202_v41 = vpop.permute.xlu0 %2201  ;;  %v9204_v54 = vsel %vm2085_vm15, %v9013_v17, %v3706_v50 }
 0x44d   : > { %3941 = vrot.lane.b32.xlu1 %v8995_v10, %s7640_s23  ;;  %6969 = vmatmul.msk.bf16.gmra.mxu3 %vm2048_vm14, %v2202_v41 }
 0x452   : > { %v9217_v50 = vpop.f32.mrf.mxu0 }
 0x453   : > { %v3704_v56 = vpop.permute.xlu1 %3703 }
 0x454   : > { %v9189_v57 = vsel %vm2085_vm15, %v8978_v63, %v3704_v56  ;;  %v3892_v55 = vpop.permute.xlu0 %3891 }
 0x455   : > { %3945 = vrot.lane.b32.xlu1 %v9185_v43, %s7640_s23  ;;  %3939 = vrot.lane.b32.xlu0 %v9189_v57, %s7640_s23  ;;  %v3990_v11 = vsel %vm2085_vm15, %v3769_v1, %v3892_v55 }
 0x456   : > { %4451 = vmatmul.bf16.gmra.mxu0 %v9189_v57 }
 0x45b   : > { %v2169_v36 = vpop.permute.xlu1 %2168  ;;  %v3708_v56 = vpop.permute.xlu2 %3707 }
 0x45c   : > { %v2250_v63 = vsel %vm2203_vm0, %v8614_v45, %v2169_v36  ;;  %v2298_v59 = vsel %vm2085_vm15, %v2169_v36, %v2202_v41  ;;  %v9221_v1 = vsel %vm2085_vm15, %v9051_v34, %v3708_v56  ;;  %v9224_v36 = vpop.f32.mrf.mxu0 }
 0x45d   : > { %2563 = vmatmul.bf16.gmra.mxu1 %v2250_v63  ;;  %3943 = vrot.lane.b32.xlu0 %v9204_v54, %s7640_s23 }
 0x45e   : > { %2652 = vmatmul.bf16.gmra.mxu2 %v2298_v59  ;;  %4475 = vmatmul.bf16.vlgmr.msrb.gmra.mxu3 %v3990_v11  ;;  %v3898_v59 = vpop.permute.xlu0 %3897 }
 0x463   : > { %v3894_v45 = vpop.permute.xlu1 %3893  ;;  %v3896_v38 = vpop.permute.xlu2 %3895 }
 0x464   : > { %v3956_v17 = vsel %vm2085_vm15, %v3892_v55, %v3894_v45  ;;  %v3994_v41 = vsel %vm2085_vm15, %v8474_v52, %v3896_v38  ;;  %v3957_v55 = vsel %vm2085_vm15, %v3896_v38, %v3898_v59 }
 0x466   : > { %4456 = vmatmul.bf16.gmra.mxu0 %v9204_v54  ;;  %v3904_v56 = vpop.permute.xlu0 %3903 }
 0x467   : > { %v4002_v38 = vsel %vm2085_vm15, %v8529_v60, %v3904_v56 }
 0x46b   : > { %v3900_v63 = vpop.permute.xlu1 %3899  ;;  %v3902_v34 = vpop.permute.xlu2 %3901 }
 0x46c   : > { %v3998_v52 = vsel %vm2085_vm15, %v9019_v4, %v3900_v63  ;;  %v3958_v45 = vsel %vm2085_vm15, %v3900_v63, %v3902_v34 }
 0x46d   : > { %4564 = vmatmul.bf16.vlgmr.msrb.gmra.mxu1 %v3956_v17 }
 0x46e   : > { %4480 = vmatmul.bf16.gmra.mxu3 %v3994_v41  ;;  %4653 = vmatmul.bf16.vlgmr.msrb.gmra.mxu2 %v8723_v58  ;;  %v9230_v58 = vpop.f32.mrf.mxu0 }
 0x476   : > { %4461 = vmatmul.bf16.gmra.mxu0 %v9221_v1  ;;  %v9234_v11 = vpop.f32.mrf.mxu0 }
 0x47d   : > { %4569 = vmatmul.bf16.gmra.mxu1 %v3957_v55 }
 0x47e   : > { %4485 = vmatmul.bf16.gmra.mxu3 %v3998_v52  ;;  %4658 = vmatmul.bf16.gmra.mxu2 %v8769_v25  ;;  %v9240_v17 = vpop.f32.mrf.mxu0  ;;  %v3906_v25 = vpop.permute.xlu1 %3905 }
 0x47f   : > { %v3959_v41 = vsel %vm2085_vm15, %v3904_v56, %v3906_v25 }
 0x486   : > { %7114 = vmatmul.msk.bf16.vlgmr.msra.gmra.mxu0 %vm2085_vm15, %v9019_v4  ;;  %v3908_v4 = vpop.permute.xlu2 %3907  ;;  %v9247_v63 = vpop.f32.mrf.mxu0 }
 0x487   : > { %v4006_v59 = vsel %vm2085_vm15, %v9071_v7, %v3908_v4  ;;  %v3912_v55 = vpop.permute.xlu1 %3911 }
 0x488   : > { %v4010_v34 = vsel %vm2085_vm15, %v8645_v44, %v3912_v55 }
 0x48d   : > { %4574 = vmatmul.bf16.gmra.mxu1 %v3958_v45 }
 0x48e   : > { %4490 = vmatmul.bf16.gmra.mxu3 %v4002_v38  ;;  %4663 = vmatmul.bf16.gmra.mxu2 %v8803_v24  ;;  %v9252_v24 = vpop.f32.mrf.mxu0 }
 0x48f   : > { %10391 = vst [vmem:[#allocation5_spill] sm:$0xff] %v9252_v24 }
 0x496   : > { %7115 = vmatmul.msk.bf16.gmra.mxu0 %vm2085_vm15, %v8529_v60  ;;  %v3910_v60 = vpop.permute.xlu0 %3909  ;;  %v9258_v56 = vpop.f32.mrf.mxu0 }
 0x497   : > { %v3960_v52 = vsel %vm2085_vm15, %v3908_v4, %v3910_v60  ;;  %10392 = vst [vmem:[#allocation6_spill] sm:$0xff] %v9258_v56  ;;  %v502_v4 = vld [vmem:[#allocation3 + $0xc0] sm:$0x1] }
 0x49d   : > { %4579 = vmatmul.bf16.gmra.mxu1 %v3959_v41 }
 0x49e   : > { %4495 = vmatmul.bf16.gmra.mxu3 %v4006_v59  ;;  %4668 = vmatmul.bf16.gmra.mxu2 %v8829_v29  ;;  %v3914_v29 = vpop.permute.xlu2 %3913  ;;  %v9262_v45 = vpop.f32.mrf.mxu0 }
 0x49f   : > { %10393 = vst [vmem:[#allocation7_spill] sm:$0xff] %v9262_v45  ;;  %v3961_v38 = vsel %vm2085_vm15, %v3912_v55, %v3914_v29 }
 0x4a6   : > { %7116 = vmatmul.msk.bf16.gmra.mxu0 %vm2085_vm15, %v9071_v7  ;;  %v3916_v7 = vpop.permute.xlu0 %3915  ;;  %v3920_v59 = vpop.permute.xlu2 %3919 }
 0x4a7   : > { %v4014_v25 = vsel %vm2085_vm15, %v9124_v23, %v3916_v7 }
 0x4ad   : > { %4584 = vmatmul.bf16.gmra.mxu1 %v3960_v52  ;;  %v4018_v52 = vsel %vm2085_vm15, %v8717_v47, %v3920_v59 }
 0x4ae   : > { %4500 = vmatmul.bf16.gmra.mxu3 %v4010_v34  ;;  %4673 = vmatmul.bf16.gmra.mxu2 %v8865_v48  ;;  %v503_v48 = vsel %vm8315_vm3, 0, %v502_v4  ;;  %v3922_v4 = vpop.permute.xlu0 %3921 }
 0x4af   : > { %504 = vst [vmem:[#allocation3 + $0xc0] sm:$0x1] %v503_v48 }
 0x4b6   : > { %7117 = vmatmul.msk.bf16.gmra.mxu0 %vm2085_vm15, %v8645_v44  ;;  %v3918_v44 = vpop.permute.xlu1 %3917  ;;  %v3238_v45 = vld [vmem:[#allocation3 + $0xc0] sm:$0xf] }
 0x4b7   : > { %v3962_v60 = vsel %vm2085_vm15, %v3916_v7, %v3918_v44  ;;  %v3963_v44 = vsel %vm2085_vm15, %v3920_v59, %v3922_v4 }
 0x4bd   : > { %4589 = vmatmul.bf16.gmra.mxu1 %v3961_v38 }
 0x4be   : > { %4505 = vmatmul.bf16.gmra.mxu3 %v4014_v25  ;;  %4678 = vmatmul.bf16.gmra.mxu2 %v8878_v3  ;;  %v551_v3 = vld [vmem:[#allocation3 + $0xc8] sm:$0x1]  ;;  %v3924_v7 = vpop.permute.xlu1 %3923 }
 0x4bf   : > { %v552_v29 = vsel %vm8340_vm4, 0, %v551_v3 }
 0x4c0   : > { %553 = vst [vmem:[#allocation3 + $0xc8] sm:$0x1] %v552_v29 }
 0x4c2   : > { %v9270_v41 = vpop.f32.mrf.mxu0 }
 0x4c3   : > { %10394 = vst [vmem:[#allocation8_spill] sm:$0xff] %v9270_v41 }
 0x4c6   : > { %7118 = vmatmul.msk.bf16.gmra.mxu0 %vm2085_vm15, %v9124_v23 }
 0x4ca   : > { %v9274_v55 = vpop.f32.mrf.mxu0 }
 0x4cb   : > { %10395 = vst [vmem:[#allocation9_spill] sm:$0xff] %v9274_v55 }
 0x4cd   : > { %4594 = vmatmul.bf16.gmra.mxu1 %v3962_v60 }
 0x4ce   : > { %4510 = vmatmul.bf16.gmra.mxu3 %v4018_v52  ;;  %4683 = vmatmul.bf16.gmra.mxu2 %v8928_v22  ;;  %v4022_v22 = vsel %vm2085_vm15, %v9093_v12, %v3924_v7 }
 0x4d0   : > { %v2742_v34 = vpop.f32.mrf.mxu3 }
 0x4d3   : > { %v9282_v23 = vpop.f32.mrf.mxu0 }
 0x4d4   : > { %10396 = vst [vmem:[#allocation10_spill] sm:$0xff] %v9282_v23  ;;  %v562_v23 = vld [vmem:[#allocation4 + $0xc] sm:$0x1] }
 0x4d5   : > { %v563_v59 = vsel %vm7729_vm5, 0, %v562_v23 }
 0x4d6   : > { %7119 = vmatmul.msk.bf16.gmra.mxu0 %vm2085_vm15, %v8717_v47  ;;  %564 = vst [vmem:[#allocation4 + $0xc] sm:$0x1] %v563_v59 }
 0x4d8   : > { %v2744_v38 = vpop.f32.mrf.mxu3 }
 0x4da   : > { %v2564_v25 = vpop.f32.mrf.mxu1 }
 0x4db   : > { %v9286_v48 = vpop.f32.mrf.mxu0  ;;  %v2565_v26 = vadd.f32 %v8975_v40, %v2564_v25 }
 0x4dc   : > { %10397 = vst [vmem:[#allocation11_spill] sm:$0xff] %v9286_v48 }
 0x4dd   : > { %4599 = vmatmul.bf16.gmra.mxu1 %v3963_v44 }
 0x4de   : > { %4515 = vmatmul.bf16.gmra.mxu3 %v4022_v22  ;;  %4688 = vmatmul.bf16.gmra.mxu2 %v8963_v2  ;;  %v3926_v2 = vpop.permute.xlu2 %3925 }
 0x4e1   : > { %v2653_v60 = vpop.f32.mrf.mxu2  ;;  %v9293_v52 = vpop.f32.mrf.mxu3 }
 0x4e2   : > { %v2654_v47 = vadd.f32 %v2653_v60, %v2565_v26  ;;  %v2566_v3 = vpop.f32.mrf.mxu1  ;;  %v3928_v26 = vpop.permute.xlu0 %3927 }
 0x4e3   : > { %v9295_v29 = vpop.f32.mrf.mxu0  ;;  %v2567_v25 = vadd.f32 %v8975_v40, %v2566_v3 }
 0x4e4   : > { %10398 = vst [vmem:[#allocation12_spill] sm:$0xff] %v9295_v29  ;;  %v2743_v48 = vadd.f32 %v2742_v34, %v2654_v47 }
 0x4e6   : > { %v2777_v4 = vmax.f32 %v2743_v48, 0.0  ;;  %7120 = vmatmul.msk.bf16.gmra.mxu0 %vm2085_vm15, %v9093_v12  ;;  %v3964_v48 = vsel %vm2085_vm15, %v3924_v7, %v3926_v2  ;;  %v4026_v12 = vsel %vm2085_vm15, %v8820_v53, %v3928_v26 }
 0x4e8   : > { %v2809_v44 = vpack.c.bf16 %v2777_v4, %v2777_v4 }
 0x4e9   : > { %v2655_v22 = vpop.f32.mrf.mxu2  ;;  %v9302_v55 = vpop.f32.mrf.mxu3 }
 0x4ea   : > { %v3067_v60 = vshrl.u32 %v2809_v44, 16  ;;  %v2656_v29 = vadd.f32 %v2655_v22, %v2567_v25  ;;  %v4565_v41 = vpop.f32.mrf.mxu1  ;;  %v3070_v23 = vshll.u32 %v2809_v44, 16  ;;  %v610_v22 = vld [vmem:[#allocation4 + $0x14] sm:$0x1] }
 0x4eb   : > { %v9304_v34 = vpop.f32.mrf.mxu0  ;;  %v611_v7 = vsel %vm7741_vm7, 0, %v610_v22 }
 0x4ec   : > { %10399 = vst [vmem:[#allocation13_spill] sm:$0xff] %v9304_v34  ;;  %v3069_v47 = vrot.slane %v3067_v60, 7  ;;  %v2745_v59 = vadd.f32 %v2744_v38, %v2656_v29  ;;  %v568_v34 = vld [vmem:[#allocation4 + $0x24] sm:$0x1] }
 0x4ed   : > { %4604 = vmatmul.bf16.gmra.mxu1 %v3964_v48  ;;  %612 = vst [vmem:[#allocation4 + $0x14] sm:$0x1] %v611_v7  ;;  %v3932_v7 = vpop.permute.xlu2 %3931 }
 0x4ee   : > { %v3072_v40 = vor.u32 %v3070_v23, %v3069_v47  ;;  %v2778_v3 = vmax.f32 %v2745_v59, 0.0  ;;  %4520 = vmatmul.bf16.gmra.mxu3 %v4026_v12  ;;  %4693 = vmatmul.bf16.gmra.mxu2 %v9001_v42  ;;  %v3242_v42 = vld [vmem:[#allocation3 + $0xc8] sm:$0x1]  ;;  %v3073_v48 = vrot.slane %v3069_v47, 4  ;;  %v3930_v12 = vpop.permute.xlu1 %3929 }
 0x4f0   : > { %v3239_v4 = vsel %vm8417_vm10, %v3072_v40, %v3238_v45  ;;  %v2810_v25 = vpack.c.bf16 %v2778_v3, %v2778_v3 }
 0x4f1   : > { %3240 = vst [vmem:[#allocation3 + $0xc0] sm:$0xf] %v3239_v4  ;;  %v9312_v44 = vpop.f32.mrf.mxu3  ;;  %v4654_v38 = vpop.f32.mrf.mxu2  ;;  %v565_v4 = vld [vmem:[#allocation4 + $0x18] sm:$0x1] }
 0x4f2   : > { %v3075_v29 = vshrl.u32 %v2810_v25, 16  ;;  %v4567_v2 = vpop.f32.mrf.mxu1  ;;  %v3078_v59 = vshll.u32 %v2810_v25, 16  ;;  %v566_v47 = vsel %vm7729_vm5, 0, %v565_v4 }
 0x4f3   : > { %v9316_v60 = vpop.f32.mrf.mxu0  ;;  %567 = vst [vmem:[#allocation4 + $0x18] sm:$0x1] %v566_v47 }
 0x4f4   : > { %10400 = vst [vmem:[#allocation14_spill] sm:$0xff] %v9316_v60  ;;  %v3077_v23 = vrot.slane %v3075_v29, 7 }
 0x4f6   : > { %v3080_v20 = vor.u32 %v3078_v59, %v3077_v23  ;;  %v3082_v45 = vrot.slane %v3077_v23, 4  ;;  %7121 = vmatmul.msk.bf16.gmra.mxu0 %vm2085_vm15, %v8820_v53  ;;  %v9332_v53 = vld [vmem:[%s10373_s6] ss:$0 sm:$0xff]  ;;  %v3965_v59 = vsel %vm2085_vm15, %v3928_v26, %v3930_v12 }
 0x4f7   : > { %v4388_v19 = vadd.f32 %v9332_v53, %v8985_v31 }
 0x4f8   : > { %v3081_v40 = vsel %vm7776_vm11, %v3073_v48, %v3080_v20  ;;  %v3243_v3 = vsel %vm8315_vm3, %v3082_v45, %v3242_v42  ;;  %v4030_v42 = vsel %vm2085_vm15, %v9121_v61, %v3932_v7 }
 0x4f9   : > { %3241 = vst.msk [vmem:[#allocation3 + $0xc4] sm:$0xf] %vm445_vm2, %v3081_v40  ;;  %v9325_v22 = vpop.f32.mrf.mxu3  ;;  %v4656_v25 = vpop.f32.mrf.mxu2  ;;  %v4477_v48 = vadd.f32 %v9293_v52, %v4388_v19  ;;  %v613_v40 = vld [vmem:[#allocation4 + $0x20] sm:$0x1] }
 0x4fa   : > { %3244 = vst [vmem:[#allocation3 + $0xc8] sm:$0x1] %v3243_v3  ;;  %v4570_v29 = vpop.f32.mrf.mxu1  ;;  %v614_v26 = vsel %vm7741_vm7, 0, %v613_v40 }
 0x4fb   : > { %v9334_v23 = vpop.f32.mrf.mxu0  ;;  %v4566_v20 = vadd.f32 %v4565_v41, %v4477_v48  ;;  %615 = vst [vmem:[#allocation4 + $0x20] sm:$0x1] %v614_v26 }
 0x4fc   : > { %10401 = vst [vmem:[#allocation15_spill] sm:$0xff] %v9334_v23 }
 0x4fd   : > { %4609 = vmatmul.bf16.gmra.mxu1 %v3965_v59  ;;  %v4655_v12 = vadd.f32 %v4654_v38, %v4566_v20 }
 0x4fe   : > { %4525 = vmatmul.bf16.gmra.mxu3 %v4030_v42  ;;  %4698 = vmatmul.bf16.gmra.mxu2 %v9055_v35  ;;  %v4390_v35 = vadd.f32 %v9332_v53, %v9015_v14 }
 0x500   : > { %v9343_v45 = vld [vmem:[#allocation3 + $0xc0] sm:$0xff]   ;;  %v4479_v23 = vadd.f32 %v9302_v55, %v4390_v35  ;;  %v9365_v55 = vpop.permute.xlu1 %3935 }
 0x501   : > { %v9345_v3 = vpop.f32.mrf.mxu3  ;;  %v4659_v4 = vpop.f32.mrf.mxu2  ;;  %v3297_v47 = vld [vmem:[#allocation3 + $0xc8] sm:$0x1]  ;;  %v3656_v31 = vshll.u32 %v9343_v45, 16  ;;  %v3654_v20 = vshrl.u32 %v9343_v45, 16 }
 0x502   : > { %v9350_v59 = vpop.f32.mrf.mxu1  ;;  %v3441_v52 = vunpack.c.l.b16 %v3297_v47  ;;  %v4568_v40 = vadd.f32 %v4567_v2, %v4479_v23  ;;  %v4393_v2 = vadd.f32 %v9332_v53, %v9044_v5 }
 0x503   : > { %v4743_v19 = vpop.f32.mrf.mxu0  ;;  %v3658_v48 = vrot.slane %v3656_v31, 1  ;;  %v569_v31 = vsel %vm7729_vm5, 0, %v568_v34 }
 0x504   : > { %v4744_v41 = vadd.f32 %v4743_v19, %v4655_v12  ;;  %v9354_v42 = vpack.c.b16 %v3441_v52, %v3441_v52  ;;  %v4657_v52 = vadd.f32 %v4656_v25, %v4568_v40  ;;  %570 = vst [vmem:[#allocation4 + $0x24] sm:$0x1] %v569_v31  ;;  %v4034_v25 = vsel %vm2085_vm15, %v8874_v6, %v9365_v55 }
 0x505   : > { %v3659_v12 = vor.u32 %v3658_v48, %v3654_v20  ;;  %v5207_v20 = vld [vmem:[#allocation4 + $0xc] sm:$0xf]  ;;  %v4482_v40 = vadd.f32 %v9312_v44, %v4393_v2 }
 0x506   : > { %v4823_v60 = vmax.f32 %v4744_v41, 0.0  ;;  %7122 = vmatmul.msk.bf16.gmra.mxu0 %vm2085_vm15, %v9121_v61  ;;  %v3661_v38 = vshll.u32 %v9354_v42, 16 }
 0x508   : > { %v4855_v47 = vpack.c.bf16 %v4823_v60, %v4823_v60  ;;  %v3663_v26 = vrot.slane %v3661_v38, 1  ;;  %v3934_v60 = vpop.permute.xlu0 %3933 }
 0x509   : > { %v9361_v56 = vpop.f32.mrf.mxu3  ;;  %v4661_v14 = vpop.f32.mrf.mxu2  ;;  %v3966_v34 = vsel %vm2085_vm15, %v3932_v7, %v3934_v60 }
 0x50a   : > { %v4888_v19 = vshrl.u32 %v4855_v47, 16  ;;  %v9367_v61 = vpop.f32.mrf.mxu1  ;;  %v3664_v23 = vsel %vm1650_vm13, %v3659_v12, %v3663_v26  ;;  %v4891_v38 = vshll.u32 %v4855_v47, 16  ;;  %v4571_v26 = vadd.f32 %v4570_v29, %v4482_v40 }
 0x50b   : > { %v4745_v35 = vpop.f32.mrf.mxu0  ;;  %3709 = vrot.lane.b32.xlu2 %v3664_v23, %s7640_s23 }
 0x50c   : > { %v4890_v41 = vrot.slane %v4888_v19, 7  ;;  %v4746_v48 = vadd.f32 %v4745_v35, %v4657_v52  ;;  %v616_v52 = vld [vmem:[#allocation4 + $0x2c] sm:$0x1]  ;;  %v4660_v44 = vadd.f32 %v4659_v4, %v4571_v26 }
 0x50d   : > { %4614 = vmatmul.bf16.gmra.mxu1 %v3966_v34  ;;  %v617_v60 = vsel %vm7741_vm7, 0, %v616_v52 }
 0x50e   : > { %v4893_v5 = vor.u32 %v4891_v38, %v4890_v41  ;;  %v4824_v31 = vmax.f32 %v4746_v48, 0.0  ;;  %4530 = vmatmul.bf16.gmra.mxu3 %v4034_v25  ;;  %4703 = vmatmul.bf16.gmra.mxu2 %v9165_v16  ;;  %618 = vst [vmem:[#allocation4 + $0x2c] sm:$0x1] %v617_v60  ;;  %v4395_v16 = vadd.f32 %v9332_v53, %v9060_v28  ;;  %v4894_v25 = vrot.slane %v4890_v41, 4 }
 0x510   : > { %v5208_v47 = vsel %vm7764_vm9, %v4893_v5, %v5207_v20  ;;  %v4856_v12 = vpack.c.bf16 %v4824_v31, %v4824_v31  ;;  %v4484_v34 = vadd.f32 %v9325_v22, %v4395_v16  ;;  %v5211_v20 = vld [vmem:[#allocation4 + $0x14] sm:$0x1]  ;;  %v3938_v16 = vpop.permute.xlu2 %3937 }
 0x511   : > { %5209 = vst [vmem:[#allocation4 + $0xc] sm:$0xf] %v5208_v47  ;;  %v9381_v7 = vpop.f32.mrf.mxu3  ;;  %v9383_v19 = vpop.f32.mrf.mxu2 }
 0x512   : > { %v4896_v2 = vshrl.u32 %v4856_v12, 16  ;;  %v9387_v23 = vpop.f32.mrf.mxu1  ;;  %v4899_v38 = vshll.u32 %v4856_v12, 16  ;;  %v4573_v31 = vadd.f32 %v9350_v59, %v4484_v34  ;;  %v571_v12 = vld [vmem:[#allocation4 + $0x30] sm:$0x1]  ;;  %v3967_v34 = vsel %vm2085_vm15, %v9365_v55, %v3938_v16  ;;  %v9440_v16 = vld [vmem:[#allocation3 + $0xcc] sm:$0xff]  }
 0x513   : > { %v4748_v29 = vpop.f32.mrf.mxu0  ;;  %3947 = vrot.lane.b32.xlu2 %v9221_v1, %s7640_s23  ;;  %v572_v52 = vsel %vm7729_vm5, 0, %v571_v12  ;;  %v619_v12 = vld [vmem:[#allocation4 + $0x38] sm:$0x1] }
 0x514   : > { %v4898_v35 = vrot.slane %v4896_v2, 7  ;;  %v4749_v48 = vadd.f32 %v4748_v29, %v4660_v44  ;;  %v4662_v59 = vadd.f32 %v4661_v14, %v4573_v31  ;;  %v4398_v2 = vadd.f32 %v9332_v53, %v9085_v8  ;;  %573 = vst [vmem:[#allocation4 + $0x30] sm:$0x1] %v572_v52  ;;  %v5214_v14 = vld [vmem:[#allocation4 + $0x18] sm:$0xf] }
 0x516   : > { %v4901_v40 = vor.u32 %v4899_v38, %v4898_v35  ;;  %v4903_v4 = vrot.slane %v4898_v35, 4  ;;  %v4825_v5 = vmax.f32 %v4749_v48, 0.0  ;;  %7123 = vmatmul.msk.bf16.gmra.mxu0 %vm2085_vm15, %v8874_v6  ;;  %v9408_v6 = vpop.permute.xlu0 %3939  ;;  %v4487_v8 = vadd.f32 %v9345_v3, %v4398_v2 }
 0x518   : > { %v4902_v28 = vsel %vm7776_vm11, %v4894_v25, %v4901_v40  ;;  %v5212_v26 = vsel %vm7729_vm5, %v4903_v4, %v5211_v20  ;;  %v4857_v47 = vpack.c.bf16 %v4825_v5, %v4825_v5  ;;  %v4038_v20 = vsel %vm2085_vm15, %v9159_v39, %v9408_v6  ;;  %v7630_v4 = vld [vmem:[#allocation4 + $0xc] sm:$0xe] }
 0x519   : > { %5210 = vst.msk [vmem:[#allocation4 + $0x10] sm:$0xf] %vm334_vm8, %v4902_v28  ;;  %v9402_v22 = vpop.f32.mrf.mxu3  ;;  %v9404_v41 = vpop.f32.mrf.mxu2  ;;  %v4400_v5 = vadd.f32 %v9332_v53, %v9100_v62  ;;  %v4576_v31 = vadd.f32 %v9367_v61, %v4487_v8 }
 0x51a   : > { %5213 = vst [vmem:[#allocation4 + $0x14] sm:$0x1] %v5212_v26  ;;  %v4905_v60 = vshrl.u32 %v4857_v47, 16  ;;  %v9410_v44 = vpop.f32.mrf.mxu1  ;;  %v4908_v38 = vshll.u32 %v4857_v47, 16 }
 0x51b   : > { %v4750_v29 = vpop.f32.mrf.mxu0  ;;  %3949 = vrot.lane.b32.xlu2 %v9068_v27, %s7640_s23  ;;  %v4489_v62 = vadd.f32 %v9361_v56, %v4400_v5  ;;  %v4665_v61 = vadd.f32 %v9383_v19, %v4576_v31 }
 0x51c   : > { %v4907_v35 = vrot.slane %v4905_v60, 7  ;;  %v4751_v48 = vadd.f32 %v4750_v29, %v4662_v59  ;;  %v620_v59 = vsel %vm7741_vm7, 0, %v619_v12  ;;  %v9442_v29 = vld [vmem:[#allocation3 + $0xcc] sm:$0xf0] }
 0x51d   : > { %4619 = vmatmul.bf16.gmra.mxu1 %v3967_v34  ;;  %621 = vst [vmem:[#allocation4 + $0x38] sm:$0x1] %v620_v59 }
 0x51e   : > { %v4910_v25 = vor.u32 %v4908_v38, %v4907_v35  ;;  %v4826_v40 = vmax.f32 %v4751_v48, 0.0  ;;  %4535 = vmatmul.bf16.gmra.mxu3 %v4038_v20  ;;  %4708 = vmatmul.bf16.gmra.mxu2 %v9189_v57  ;;  %10402 = vst [vmem:[#allocation16_spill] sm:$0xff] %v9442_v29  ;;  %v4911_v31 = vrot.slane %v4907_v35, 4 }
 0x520   : > { %v5215_v55 = vsel %vm7764_vm9, %v4910_v25, %v5214_v14  ;;  %v4858_v28 = vpack.c.bf16 %v4826_v40, %v4826_v40  ;;  %v9428_v26 = vld [vmem:[#allocation4 + $0xc] sm:$0xff]   ;;  %v4578_v14 = vadd.f32 %v9387_v23, %v4489_v62  ;;  %v5218_v40 = vld [vmem:[#allocation4 + $0x20] sm:$0x1] }
 0x521   : > { %v7629_v47 = vld [vmem:[#allocation4 + $0xc] sm:$0xf0]  ;;  %5216 = vst [vmem:[#allocation4 + $0x18] sm:$0xf] %v5215_v55  ;;  %v9430_v3 = vpop.f32.mrf.mxu3  ;;  %v9432_v52 = vpop.f32.mrf.mxu2  ;;  %v5356_v57 = vld [vmem:[#allocation4 + $0x14] sm:$0x1] }
 0x522   : > { %v4913_v60 = vshrl.u32 %v4858_v28, 16  ;;  %v9438_v2 = vpop.f32.mrf.mxu1  ;;  %v5500_v48 = vunpack.c.l.b16 %v5356_v57  ;;  %v7631_v34 = vor.u32 %v7630_v4, %v7629_v47  ;;  %v4916_v8 = vshll.u32 %v4858_v28, 16 }
 0x523   : > { %v4753_v38 = vpop.f32.mrf.mxu0  ;;  %v5550_v19 = vshll.u32 %v9428_v26, 16  ;;  %v5548_v4 = vshrl.u32 %v9428_v26, 16 }
 0x524   : > { %v4915_v20 = vrot.slane %v4913_v60, 7  ;;  %v4754_v25 = vadd.f32 %v4753_v38, %v4665_v61  ;;  %v5518_v56 = vpack.c.b16 %v5500_v48, %v5500_v48  ;;  %v5844_v5 = vrot.slane %v7631_v34, 1  ;;  %v574_v61 = vld [vmem:[#allocation4 + $0x3c] sm:$0x1] }
 0x525   : > { %v5552_v47 = vrot.slane %v5550_v19, 1  ;;  %v575_v34 = vsel %vm7729_vm5, 0, %v574_v61 }
 0x526   : > { %v4918_v55 = vor.u32 %v4916_v8, %v4915_v20  ;;  %v4920_v12 = vrot.slane %v4915_v20, 4  ;;  %v4827_v59 = vmax.f32 %v4754_v25, 0.0  ;;  %7124 = vmatmul.msk.bf16.gmra.mxu0 %vm2085_vm15, %v9159_v39  ;;  %v5845_v29 = vrot.slane %v5518_v56, 1  ;;  %v9461_v20 = vpop.permute.xlu0 %3943  ;;  %576 = vst [vmem:[#allocation4 + $0x3c] sm:$0x1] %v575_v34 }
 0x527   : > { %v5555_v23 = vshll.u32 %v5518_v56, 16  ;;  %v5553_v38 = vor.u32 %v5552_v47, %v5548_v4  ;;  %v4667_v8 = vadd.f32 %v9404_v41, %v4578_v14  ;;  %v4403_v56 = vadd.f32 %v9332_v53, %v9108_v32  ;;  %v5221_v14 = vld [vmem:[#allocation4 + $0x24] sm:$0xf] }
 0x528   : > { %v4919_v28 = vsel %vm7776_vm11, %v4911_v31, %v4918_v55  ;;  %v5219_v57 = vsel %vm7729_vm5, %v4920_v12, %v5218_v40  ;;  %v4859_v62 = vpack.c.bf16 %v4827_v59, %v4827_v59  ;;  %v5846_v35 = vsel %vm1957_vm12, %v5844_v5, %v5845_v29  ;;  %v3298_v29 = vld [vmem:[#allocation3 + $0xd4] sm:$0x1]  ;;  %v3942_v5 = vpop.permute.xlu1 %3941 }
 0x529   : > { %5217 = vst.msk [vmem:[#allocation4 + $0x1c] sm:$0xf] %vm334_vm8, %v4919_v28  ;;  %v9455_v60 = vpop.f32.mrf.mxu3  ;;  %v9457_v39 = vpop.f32.mrf.mxu2  ;;  %v5557_v48 = vrot.slane %v5555_v23, 1  ;;  %5897 = vrot.lane.b32.xlu1 %v5846_v35, %s7640_s23  ;;  %v3968_v41 = vsel %vm2085_vm15, %v9408_v6, %v3942_v5  ;;  %v4042_v4 = vsel %vm2085_vm15, %v8995_v10, %v9461_v20  ;;  %v3442_v32 = vunpack.c.l.b16 %v3298_v29 }
 0x52a   : > { %5220 = vst [vmem:[#allocation4 + $0x20] sm:$0x1] %v5219_v57  ;;  %v4922_v25 = vshrl.u32 %v4859_v62, 16  ;;  %v9465_v40 = vpop.f32.mrf.mxu1  ;;  %v4925_v12 = vshll.u32 %v4859_v62, 16  ;;  %v4492_v47 = vadd.f32 %v9381_v7, %v4403_v56 }
 0x52b   : > { %v4755_v19 = vpop.f32.mrf.mxu0  ;;  %v5558_v31 = vsel %vm1650_vm13, %v5553_v38, %v5557_v48  ;;  %v622_v38 = vld [vmem:[#allocation4 + $0x44] sm:$0x1]  ;;  %v4405_v48 = vadd.f32 %v9332_v53, %v9118_v0 }
 0x52c   : > { %v4924_v55 = vrot.slane %v4922_v25, 7  ;;  %v4756_v59 = vadd.f32 %v4755_v19, %v4667_v8  ;;  %5753 = vrot.lane.b32.xlu0 %v5558_v31, %s7641_s24  ;;  %v4581_v57 = vadd.f32 %v9410_v44, %v4492_v47  ;;  %v3668_v44 = vshll.u32 %v9440_v16, 16  ;;  %v7502_v19 = vld [vmem:[#allocation4 + $0x18] sm:$0xe]  ;;  %v5225_v47 = vld [vmem:[#allocation4 + $0x2c] sm:$0x1] }
 0x52d   : > { %4624 = vmatmul.bf16.gmra.mxu1 %v3968_v41  ;;  %v4494_v31 = vadd.f32 %v9402_v22, %v4405_v48  ;;  %v3666_v41 = vshrl.u32 %v9440_v16, 16 }
 0x52e   : > { %v4927_v23 = vor.u32 %v4925_v12, %v4924_v55  ;;  %v4828_v28 = vmax.f32 %v4756_v59, 0.0  ;;  %4540 = vmatmul.bf16.gmra.mxu3 %v4042_v4  ;;  %4713 = vmatmul.bf16.gmra.mxu2 %v9204_v54  ;;  %v9487_v54 = vpack.c.b16 %v3442_v32, %v3442_v32  ;;  %v4670_v29 = vadd.f32 %v9432_v52, %v4581_v57 }
 0x52f   : > { %v3670_v57 = vrot.slane %v3668_v44, 1  ;;  %v4928_v24 = vrot.slane %v4924_v55, 4 }
 0x530   : > { %v5222_v62 = vsel %vm7764_vm9, %v4927_v23, %v5221_v14  ;;  %v4860_v6 = vpack.c.bf16 %v4828_v28, %v4828_v28  ;;  %v7501_v61 = vld [vmem:[#allocation4 + $0x18] sm:$0xf0]  ;;  %v623_v23 = vsel %vm7741_vm7, 0, %v622_v38  ;;  %v4583_v38 = vadd.f32 %v9438_v2, %v4494_v31 }
 0x531   : > { %v7490_v35 = vld [vmem:[#allocation4 + $0x18] sm:$0xff]   ;;  %5223 = vst [vmem:[#allocation4 + $0x24] sm:$0xf] %v5222_v62  ;;  %v9483_v34 = vpop.f32.mrf.mxu3  ;;  %v9485_v7 = vpop.f32.mrf.mxu2  ;;  %v5357_v8 = vld [vmem:[#allocation4 + $0x20] sm:$0x1]  ;;  %v7503_v59 = vor.u32 %v7502_v19, %v7501_v61  ;;  %v3673_v62 = vshll.u32 %v9487_v54, 16 }
 0x532   : > { %v5562_v25 = vshll.u32 %v7490_v35, 16  ;;  %v4930_v56 = vshrl.u32 %v4860_v6, 16  ;;  %v9491_v5 = vpop.f32.mrf.mxu1  ;;  %v5501_v12 = vunpack.c.l.b16 %v5357_v8  ;;  %v4933_v4 = vshll.u32 %v4860_v6, 16  ;;  %624 = vst [vmem:[#allocation4 + $0x44] sm:$0x1] %v623_v23 }
 0x533   : > { %v4758_v0 = vpop.f32.mrf.mxu0  ;;  %v5847_v61 = vrot.slane %v7503_v59, 1  ;;  %v7487_v19 = vld [vmem:[#allocation3 + $0xc0] sm:$0xf0]  ;;  %v4672_v31 = vadd.f32 %v9457_v39, %v4583_v38 }
 0x534   : > { %v4932_v14 = vrot.slane %v4930_v56, 7  ;;  %v4759_v32 = vadd.f32 %v4758_v0, %v4670_v29  ;;  %v5519_v28 = vpack.c.b16 %v5501_v12, %v5501_v12  ;;  %v5564_v52 = vrot.slane %v5562_v25, 1  ;;  %v577_v0 = vld [vmem:[#allocation4 + $0x48] sm:$0x1] }
 0x535   : > { %v5560_v56 = vshrl.u32 %v7490_v35, 16  ;;  %v578_v2 = vsel %vm7729_vm5, 0, %v577_v0 }
 0x536   : > { %v4935_v22 = vor.u32 %v4933_v4, %v4932_v14  ;;  %v4937_v48 = vrot.slane %v4932_v14, 4  ;;  %v4829_v8 = vmax.f32 %v4759_v32, 0.0  ;;  %7125 = vmatmul.msk.bf16.gmra.mxu0 %vm2085_vm15, %v8995_v10  ;;  %v5848_v6 = vrot.slane %v5519_v28, 1  ;;  %v7488_v4 = vld [vmem:[#allocation3 + $0xc0] sm:$0xe] }
 0x537   : > { %v5567_v29 = vshll.u32 %v5519_v28, 16  ;;  %v5565_v35 = vor.u32 %v5564_v52, %v5560_v56  ;;  %v7489_v23 = vor.u32 %v7488_v4, %v7487_v19  ;;  %v4408_v28 = vadd.f32 %v9332_v53, %v9138_v46  ;;  %579 = vst [vmem:[#allocation4 + $0x48] sm:$0x1] %v578_v2  ;;  %v5228_v56 = vld [vmem:[#allocation4 + $0x30] sm:$0xf] }
 0x538   : > { %v4936_v25 = vsel %vm7776_vm11, %v4928_v24, %v4935_v22  ;;  %v5226_v44 = vsel %vm7729_vm5, %v4937_v48, %v5225_v47  ;;  %v4861_v55 = vpack.c.bf16 %v4829_v8, %v4829_v8  ;;  %v5849_v12 = vsel %vm1957_vm12, %v5847_v61, %v5848_v6  ;;  %v3946_v24 = vpop.permute.xlu1 %3945 }
 0x539   : > { %5224 = vst.msk [vmem:[#allocation4 + $0x28] sm:$0xf] %vm334_vm8, %v4936_v25  ;;  %v9507_v10 = vpop.f32.mrf.mxu3  ;;  %v9509_v59 = vpop.f32.mrf.mxu2  ;;  %v5569_v14 = vrot.slane %v5567_v29, 1  ;;  %5899 = vrot.lane.b32.xlu1 %v5849_v12, %s7640_s23  ;;  %v3969_v48 = vsel %vm2085_vm15, %v9461_v20, %v3946_v24  ;;  %v3816_v6 = vrot.slane %v9354_v42, 1  ;;  %v3671_v29 = vor.u32 %v3670_v57, %v3666_v41  ;;  %v7633_v20 = vld [vmem:[#allocation4 + $0x24] sm:$0xe] }
 0x53a   : > { %5227 = vst [vmem:[#allocation4 + $0x2c] sm:$0x1] %v5226_v44  ;;  %v4939_v47 = vshrl.u32 %v4861_v55, 16  ;;  %v9515_v32 = vpop.f32.mrf.mxu1  ;;  %v4942_v61 = vshll.u32 %v4861_v55, 16  ;;  %v3675_v19 = vrot.slane %v3673_v62, 1  ;;  %v4497_v46 = vadd.f32 %v9430_v3, %v4408_v28 }
 0x53b   : > { %v5570_v52 = vsel %vm1650_vm13, %v5565_v35, %v5569_v14  ;;  %v4760_v22 = vpop.f32.mrf.mxu0  ;;  %v3815_v44 = vrot.slane %v7489_v23, 1  ;;  %v625_v57 = vld [vmem:[#allocation4 + $0x50] sm:$0x1] }
 0x53c   : > { %v4941_v8 = vrot.slane %v4939_v47, 7  ;;  %5755 = vrot.lane.b32.xlu0 %v5570_v52, %s7641_s24  ;;  %v4761_v39 = vadd.f32 %v4760_v22, %v4672_v31  ;;  %v4586_v0 = vadd.f32 %v9465_v40, %v4497_v46  ;;  %v626_v40 = vsel %vm7741_vm7, 0, %v625_v57 }
 0x53d   : > { %4629 = vmatmul.bf16.gmra.mxu1 %v3969_v48  ;;  %v9530_v42 = vsel %vm1957_vm12, %v3815_v44, %v3816_v6  ;;  %627 = vst [vmem:[#allocation4 + $0x50] sm:$0x1] %v626_v40  ;;  %v4410_v31 = vadd.f32 %v9332_v53, %v9148_v49 }
 0x53e   : > { %v4944_v38 = vor.u32 %v4942_v61, %v4941_v8  ;;  %v4830_v25 = vmax.f32 %v4761_v39, 0.0  ;;  %4718 = vmatmul.bf16.gmra.mxu2 %v9221_v1  ;;  %v3676_v1 = vsel %vm1650_vm13, %v3671_v29, %v3675_v19  ;;  %v4675_v4 = vadd.f32 %v9485_v7, %v4586_v0  ;;  %v5232_v61 = vld [vmem:[#allocation4 + $0x38] sm:$0x1] }
 0x53f   : > { %v4499_v7 = vadd.f32 %v9455_v60, %v4410_v31  ;;  %v4945_v6 = vrot.slane %v4941_v8, 4  ;;  %v5235_v31 = vld [vmem:[#allocation4 + $0x3c] sm:$0xf] }
 0x540   : > { %v5229_v55 = vsel %vm7764_vm9, %v4944_v38, %v5228_v56  ;;  %v4862_v12 = vpack.c.bf16 %v4830_v25, %v4830_v25  ;;  %v9532_v35 = vld [vmem:[#allocation4 + $0x24] sm:$0xff]  }
 0x541   : > { %v7632_v41 = vld [vmem:[#allocation4 + $0x24] sm:$0xf0]  ;;  %5230 = vst [vmem:[#allocation4 + $0x30] sm:$0xf] %v5229_v55  ;;  %v9534_v3 = vpop.f32.mrf.mxu3  ;;  %v9536_v62 = vpop.f32.mrf.mxu2  ;;  %v5358_v14 = vld [vmem:[#allocation4 + $0x2c] sm:$0x1]  ;;  %3953 = vrot.lane.b32.xlu1 %v9530_v42, %s7640_s23  ;;  %v4588_v38 = vadd.f32 %v9491_v5, %v4499_v7 }
 0x542   : > { %v4947_v2 = vshrl.u32 %v4862_v12, 16  ;;  %v9544_v24 = vpop.f32.mrf.mxu1  ;;  %v5502_v23 = vunpack.c.l.b16 %v5358_v14  ;;  %v7634_v28 = vor.u32 %v7633_v20, %v7632_v41  ;;  %v4950_v22 = vshll.u32 %v4862_v12, 16  ;;  %v580_v20 = vld [vmem:[#allocation4 + $0x54] sm:$0x1]  ;;  %v5355_v7 = vld [vmem:[#allocation4 + $0x8] sm:$0x1] }
 0x543   : > { %v4763_v47 = vpop.f32.mrf.mxu0  ;;  %v581_v55 = vsel %vm7729_vm5, 0, %v580_v20  ;;  %v4677_v12 = vadd.f32 %v9509_v59, %v4588_v38  ;;  %v4413_v14 = vadd.f32 %v9332_v53, %v9156_v15 }
 0x544   : > { %v4949_v52 = vrot.slane %v4947_v2, 7  ;;  %3711 = vrot.lane.b32.xlu0 %v3676_v1, %s7640_s23  ;;  %v4764_v48 = vadd.f32 %v4763_v47, %v4675_v4  ;;  %v9550_v39 = vpack.c.b16 %v5502_v23, %v5502_v23  ;;  %v5850_v49 = vrot.slane %v7634_v28, 1  ;;  %582 = vst [vmem:[#allocation4 + $0x54] sm:$0x1] %v581_v55 }
 0x545   : > { %v4502_v47 = vadd.f32 %v9483_v34, %v4413_v14  ;;  %v4415_v34 = vadd.f32 %v9332_v53, %v9176_v9 }
 0x546   : > { %v4952_v56 = vor.u32 %v4950_v22, %v4949_v52  ;;  %v4954_v29 = vrot.slane %v4949_v52, 4  ;;  %v4831_v19 = vmax.f32 %v4764_v48, 0.0  ;;  %7126 = vmatmul.msk.bf16.gmra.mxu0 %vm2085_vm15, %v9185_v43  ;;  %v5851_v46 = vrot.slane %v9550_v39, 1 }
 0x547   : > { %v4591_v28 = vadd.f32 %v9515_v32, %v4502_v47 }
 0x548   : > { %v4953_v25 = vsel %vm7776_vm11, %v4945_v6, %v4952_v56  ;;  %v5233_v60 = vsel %vm7729_vm5, %v4954_v29, %v5232_v61  ;;  %v4863_v44 = vpack.c.bf16 %v4831_v19, %v4831_v19  ;;  %v5852_v57 = vsel %vm1957_vm12, %v5850_v49, %v5851_v46  ;;  %v628_v61 = vld [vmem:[#allocation4 + $0x5c] sm:$0x1] }
 0x549   : > { %5231 = vst.msk [vmem:[#allocation4 + $0x34] sm:$0xf] %vm334_vm8, %v4953_v25  ;;  %v9561_v8 = vpop.f32.mrf.mxu3  ;;  %v9563_v0 = vpop.f32.mrf.mxu2  ;;  %v4680_v19 = vadd.f32 %v9536_v62, %v4591_v28  ;;  %v5499_v25 = vunpack.c.l.b16 %v5355_v7  ;;  %v7498_v62 = vld [vmem:[#allocation4] sm:$0xf0] }
 0x54a   : > { %5234 = vst [vmem:[#allocation4 + $0x38] sm:$0x1] %v5233_v60  ;;  %v4956_v5 = vshrl.u32 %v4863_v44, 16  ;;  %v9568_v41 = vpop.f32.mrf.mxu1  ;;  %v4959_v4 = vshll.u32 %v4863_v44, 16  ;;  %v629_v60 = vsel %vm7741_vm7, 0, %v628_v61 }
 0x54b   : > { %v4765_v1 = vpop.f32.mrf.mxu0  ;;  %630 = vst [vmem:[#allocation4 + $0x5c] sm:$0x1] %v629_v60  ;;  %v4418_v60 = vadd.f32 %v9332_v53, %v9182_v30  ;;  %v5579_v30 = vshll.u32 %v9550_v39, 16 }
 0x54c   : > { %v4958_v40 = vrot.slane %v4956_v5, 7  ;;  %5901 = vrot.lane.b32.xlu0 %v5852_v57, %s7640_s23  ;;  %v4766_v2 = vadd.f32 %v4765_v1, %v4677_v12  ;;  %v4504_v12 = vadd.f32 %v9507_v10, %v4415_v34  ;;  %v5239_v5 = vld [vmem:[#allocation4 + $0x44] sm:$0x1] }
 0x54e   : > { %v4961_v59 = vor.u32 %v4959_v4, %v4958_v40  ;;  %v4832_v23 = vmax.f32 %v4766_v2, 0.0  ;;  %v4962_v1 = vrot.slane %v4958_v40, 4  ;;  %v4593_v10 = vadd.f32 %v9544_v24, %v4504_v12 }
 0x550   : > { %v5236_v52 = vsel %vm7764_vm9, %v4961_v59, %v5235_v31  ;;  %v4864_v22 = vpack.c.bf16 %v4832_v23, %v4832_v23  ;;  %v7491_v48 = vld [vmem:[#allocation4 + $0x30] sm:$0xff]   ;;  %v7499_v31 = vld [vmem:[#allocation4] sm:$0xe]  ;;  %v9595_v23 = vpack.c.b16 %v5499_v25, %v5499_v25  ;;  %v4682_v24 = vadd.f32 %v9563_v0, %v4593_v10 }
 0x551   : > { %5237 = vst [vmem:[#allocation4 + $0x3c] sm:$0xf] %v5236_v52  ;;  %v9578_v15 = vpop.f32.mrf.mxu3  ;;  %v9580_v6 = vpop.f32.mrf.mxu2  ;;  %v5359_v56 = vld [vmem:[#allocation4 + $0x38] sm:$0x1]  ;;  %v5586_v29 = vshll.u32 %v7491_v48, 16  ;;  %v5584_v47 = vshrl.u32 %v7491_v48, 16 }
 0x552   : > { %v4964_v32 = vshrl.u32 %v4864_v22, 16  ;;  %v9585_v49 = vpop.f32.mrf.mxu1  ;;  %v5503_v38 = vunpack.c.l.b16 %v5359_v56  ;;  %v4967_v20 = vshll.u32 %v4864_v22, 16  ;;  %v583_v22 = vld [vmem:[#allocation4 + $0x60] sm:$0x1]  ;;  %v7500_v56 = vor.u32 %v7499_v31, %v7498_v62 }
 0x553   : > { %v4768_v46 = vpop.f32.mrf.mxu0  ;;  %v5588_v9 = vrot.slane %v5586_v29, 1  ;;  %v584_v29 = vsel %vm7729_vm5, 0, %v583_v22  ;;  %v5574_v25 = vshll.u32 %v9532_v35, 16  ;;  %v4507_v62 = vadd.f32 %v9534_v3, %v4418_v60  ;;  %v631_v3 = vld [vmem:[#allocation4 + $0x68] sm:$0x1] }
 0x554   : > { %v4966_v44 = vrot.slane %v4964_v32, 7  ;;  %v4769_v55 = vadd.f32 %v4768_v46, %v4680_v19  ;;  %v9590_v57 = vpack.c.b16 %v5503_v38, %v5503_v38  ;;  %585 = vst [vmem:[#allocation4 + $0x60] sm:$0x1] %v584_v29  ;;  %v5841_v12 = vrot.slane %v7500_v56, 1 }
 0x555   : > { %v5589_v61 = vor.u32 %v5588_v9, %v5584_v47  ;;  %v4420_v9 = vadd.f32 %v9332_v53, %v9198_v21  ;;  %v4596_v47 = vadd.f32 %v9568_v41, %v4507_v62 }
 0x556   : > { %v4969_v14 = vor.u32 %v4967_v20, %v4966_v44  ;;  %v4971_v4 = vrot.slane %v4966_v44, 4  ;;  %v4833_v2 = vmax.f32 %v4769_v55, 0.0  ;;  %7127 = vmatmul.msk.bf16.gmra.mxu0 %vm2085_vm15, %v9068_v27  ;;  %v5591_v59 = vshll.u32 %v9590_v57, 16  ;;  %v5242_v55 = vld [vmem:[#allocation4 + $0x48] sm:$0xf] }
 0x557   : > { %v4509_v31 = vadd.f32 %v9561_v8, %v4420_v9  ;;  %v632_v8 = vsel %vm7741_vm7, 0, %v631_v3  ;;  %v4685_v41 = vadd.f32 %v9580_v6, %v4596_v47  ;;  %v5543_v6 = vshll.u32 %v9595_v23, 16 }
 0x558   : > { %v4970_v28 = vsel %vm7776_vm11, %v4962_v1, %v4969_v14  ;;  %v5240_v40 = vsel %vm7729_vm5, %v4971_v4, %v5239_v5  ;;  %v4865_v52 = vpack.c.bf16 %v4833_v2, %v4833_v2  ;;  %v5593_v48 = vrot.slane %v5591_v59, 1  ;;  %633 = vst [vmem:[#allocation4 + $0x68] sm:$0x1] %v632_v8  ;;  %v7593_v62 = vld [vmem:[#allocation4 + $0x3c] sm:$0xe] }
 0x559   : > { %5238 = vst.msk [vmem:[#allocation4 + $0x40] sm:$0xf] %vm334_vm8, %v4970_v28  ;;  %v9603_v7 = vpop.f32.mrf.mxu2  ;;  %v9608_v19 = vpop.f32.mrf.mxu3  ;;  %v5842_v5 = vrot.slane %v9595_v23, 1  ;;  %v5572_v4 = vshrl.u32 %v9532_v35, 16  ;;  %v9622_v2 = vrot.slane %v5574_v25, 1 }
 0x55a   : > { %5241 = vst [vmem:[#allocation4 + $0x44] sm:$0x1] %v5240_v40  ;;  %v4973_v34 = vshrl.u32 %v4865_v52, 16  ;;  %v9610_v32 = vpop.f32.mrf.mxu1  ;;  %v5594_v46 = vsel %vm1650_vm13, %v5589_v61, %v5593_v48  ;;  %v4976_v20 = vshll.u32 %v4865_v52, 16  ;;  %v7385_v61 = vld [vmem:[#allocation4] sm:$0xff]   ;;  %v4598_v48 = vadd.f32 %v9585_v49, %v4509_v31 }
 0x55b   : > { %v4770_v38 = vpop.f32.mrf.mxu0  ;;  %5759 = vrot.lane.b32.xlu1 %v5594_v46, %s7641_s24  ;;  %v5843_v52 = vsel %vm1957_vm12, %v5841_v12, %v5842_v5  ;;  %v5538_v25 = vshll.u32 %v7385_v61, 16  ;;  %v5536_v12 = vshrl.u32 %v7385_v61, 16 }
 0x55c   : > { %v4975_v44 = vrot.slane %v4973_v34, 7  ;;  %v4771_v0 = vadd.f32 %v4770_v38, %v4682_v24 }
 0x55d   : > { %v5540_v9 = vrot.slane %v5538_v25, 1 }
 0x55e   : > { %v4978_v1 = vor.u32 %v4976_v20, %v4975_v44  ;;  %v4834_v14 = vmax.f32 %v4771_v0, 0.0  ;;  %v4979_v56 = vrot.slane %v4975_v44, 4  ;;  %v5246_v20 = vld [vmem:[#allocation4 + $0x50] sm:$0x1] }
 0x560   : > { %v5243_v59 = vsel %vm7764_vm9, %v4978_v1, %v5242_v55  ;;  %v4866_v10 = vpack.c.bf16 %v4834_v14, %v4834_v14  ;;  %v9629_v28 = vld [vmem:[#allocation4 + $0x3c] sm:$0xff]  }
 0x561   : > { %v9631_v21 = vld [vmem:[#allocation4 + $0x3c] sm:$0xf0]  ;;  %5244 = vst [vmem:[#allocation4 + $0x48] sm:$0xf] %v5243_v59  ;;  %v9633_v40 = vpop.f32.mrf.mxu2  ;;  %v5360_v22 = vld [vmem:[#allocation4 + $0x44] sm:$0x1]  ;;  %v9642_v0 = vpop.f32.mrf.mxu3 }
 0x562   : > { %v4981_v29 = vshrl.u32 %v4866_v10, 16  ;;  %v9640_v24 = vpop.f32.mrf.mxu1  ;;  %v4984_v34 = vshll.u32 %v4866_v10, 16  ;;  %v5504_v38 = vunpack.c.l.b16 %v5360_v22  ;;  %v5596_v44 = vshrl.u32 %v9629_v28, 16 }
 0x563   : > { %v4773_v46 = vpop.f32.mrf.mxu0  ;;  %5895 = vrot.lane.b32.xlu1 %v5843_v52, %s7640_s23  ;;  %v5598_v5 = vshll.u32 %v9629_v28, 16  ;;  %v5545_v59 = vrot.slane %v5543_v6, 1  ;;  %v5541_v52 = vor.u32 %v5540_v9, %v5536_v12  ;;  %v7594_v12 = vor.u32 %v7593_v62, %v9631_v21  ;;  %v5249_v9 = vld [vmem:[#allocation4 + $0x54] sm:$0xf] }
 0x564   : > { %v4983_v60 = vrot.slane %v4981_v29, 7  ;;  %v4774_v55 = vadd.f32 %v4773_v46, %v4685_v41  ;;  %v5522_v49 = vpack.c.b16 %v5504_v38, %v5504_v38  ;;  %v586_v41 = vld [vmem:[#allocation4 + $0x6c] sm:$0x1]  ;;  %v7504_v62 = vld [vmem:[#allocation4 + $0x30] sm:$0xf0] }
 0x565   : > { %v3710_v47 = vpop.permute.xlu2 %3709  ;;  %v5600_v3 = vrot.slane %v5598_v5, 1  ;;  %v5546_v46 = vsel %vm1650_vm13, %v5541_v52, %v5545_v59  ;;  %v7505_v59 = vld [vmem:[#allocation4 + $0x30] sm:$0xe] }
 0x566   : > { %v4986_v1 = vor.u32 %v4984_v34, %v4983_v60  ;;  %v4988_v14 = vrot.slane %v4983_v60, 4  ;;  %v4835_v31 = vmax.f32 %v4774_v55, 0.0  ;;  %7128 = vmatmul.msk.bf16.gmra.mxu0 %vm2085_vm15, %v9530_v42  ;;  %v3870_v10 = vsel %vm2085_vm15, %v9343_v45, %v3710_v47  ;;  %5751 = vrot.lane.b32.xlu0 %v5546_v46, %s7641_s24 }
 0x567   : > { %v5603_v23 = vshll.u32 %v5522_v49, 16  ;;  %3951 = vrot.lane.b32.xlu2 %v3870_v10, %s7640_s23  ;;  %4723 = vmatmul.bf16.gmra.mxu2 %v3870_v10  ;;  %v5601_v29 = vor.u32 %v5600_v3, %v5596_v44  ;;  %v587_v34 = vsel %vm7729_vm5, 0, %v586_v41  ;;  %v5577_v55 = vor.u32 %v9622_v2, %v5572_v4  ;;  %v634_v10 = vld [vmem:[#allocation4 + $0x74] sm:$0x1] }
 0x568   : > { %v4987_v22 = vsel %vm7776_vm11, %v4979_v56, %v4986_v1  ;;  %v5247_v8 = vsel %vm7729_vm5, %v4988_v14, %v5246_v20  ;;  %v4867_v61 = vpack.c.bf16 %v4835_v31, %v4835_v31  ;;  %v4687_v56 = vadd.f32 %v9603_v7, %v4598_v48  ;;  %588 = vst [vmem:[#allocation4 + $0x6c] sm:$0x1] %v587_v34 }
 0x569   : > { %5245 = vst.msk [vmem:[#allocation4 + $0x4c] sm:$0xf] %vm334_vm8, %v4987_v22  ;;  %v9658_v42 = vpop.f32.mrf.mxu2  ;;  %v5605_v45 = vrot.slane %v5603_v23, 1  ;;  %v5857_v6 = vrot.slane %v5522_v49, 1  ;;  %v4423_v7 = vadd.f32 %v9332_v53, %v9210_v33  ;;  %v5581_v1 = vrot.slane %v5579_v30, 1  ;;  %v9678_v2 = vpop.f32.mrf.mxu3 }
 0x56a   : > { %5248 = vst [vmem:[#allocation4 + $0x50] sm:$0x1] %v5247_v8  ;;  %v4990_v38 = vshrl.u32 %v4867_v61, 16  ;;  %v9664_v25 = vpop.f32.mrf.mxu1  ;;  %v4993_v44 = vshll.u32 %v4867_v61, 16  ;;  %v5856_v14 = vrot.slane %v7594_v12, 1  ;;  %v7506_v23 = vor.u32 %v7505_v59, %v7504_v62 }
 0x56b   : > { %v4775_v60 = vpop.f32.mrf.mxu0  ;;  %v5606_v20 = vsel %vm1650_vm13, %v5601_v29, %v5605_v45  ;;  %v4512_v31 = vadd.f32 %v9578_v15, %v4423_v7  ;;  %v5582_v33 = vsel %vm1650_vm13, %v5577_v55, %v5581_v1  ;;  %v5854_v29 = vrot.slane %v9590_v57, 1 }
 0x56c   : > { %v4992_v48 = vrot.slane %v4990_v38, 7  ;;  %v4776_v5 = vadd.f32 %v4775_v60, %v4687_v56  ;;  %5761 = vrot.lane.b32.xlu1 %v5606_v20, %s7641_s24  ;;  %v9684_v47 = vsel %vm1957_vm12, %v5856_v14, %v5857_v6  ;;  %v5253_v56 = vld [vmem:[#allocation4 + $0x5c] sm:$0x1]  ;;  %v5853_v38 = vrot.slane %v7506_v23, 1 }
 0x56d   : > { %v3948_v49 = vpop.permute.xlu2 %3947  ;;  %v4601_v39 = vadd.f32 %v9610_v32, %v4512_v31  ;;  %v9698_v32 = vld [vmem:[%s10373_s6] ss:$0 sm:$0xff] }
 0x56e   : > { %v4995_v4 = vor.u32 %v4993_v44, %v4992_v48  ;;  %v4836_v21 = vmax.f32 %v4776_v5, 0.0  ;;  %v4046_v53 = vsel %vm2085_vm15, %v9185_v43, %v3948_v49  ;;  %v635_v43 = vsel %vm7741_vm7, 0, %v634_v10 }
 0x56f   : > { %5757 = vrot.lane.b32.xlu2 %v5582_v33, %s7641_s24  ;;  %4545 = vmatmul.bf16.gmra.mxu3 %v4046_v53  ;;  %v4690_v52 = vadd.f32 %v9633_v40, %v4601_v39  ;;  %636 = vst [vmem:[#allocation4 + $0x74] sm:$0x1] %v635_v43  ;;  %v4425_v61 = vadd.f32 %v9698_v32, %v9217_v50  ;;  %v4996_v60 = vrot.slane %v4992_v48, 4  ;;  %v589_v48 = vld [vmem:[#allocation4 + $0x78] sm:$0x1] }
 0x570   : > { %v5250_v30 = vsel %vm7764_vm9, %v4995_v4, %v5249_v9  ;;  %v4868_v15 = vpack.c.bf16 %v4836_v21, %v4836_v21  ;;  %v5855_v44 = vsel %vm1957_vm12, %v5853_v38, %v5854_v29  ;;  %v590_v1 = vsel %vm7729_vm5, 0, %v589_v48  ;;  %v5256_v39 = vld [vmem:[#allocation4 + $0x60] sm:$0xf] }
 0x571   : > { %5251 = vst [vmem:[#allocation4 + $0x54] sm:$0xf] %v5250_v30  ;;  %v4694_v3 = vpop.f32.mrf.mxu2  ;;  %v4514_v40 = vadd.f32 %v9608_v19, %v4425_v61  ;;  %v9711_v19 = vpop.f32.mrf.mxu3  ;;  %v637_v43 = vld [vmem:[#allocation4 + $0x80] sm:$0x1] }
 0x572   : > { %v4998_v22 = vshrl.u32 %v4868_v15, 16  ;;  %v9693_v8 = vpop.f32.mrf.mxu1  ;;  %v5001_v34 = vshll.u32 %v4868_v15, 16  ;;  %591 = vst [vmem:[#allocation4 + $0x78] sm:$0x1] %v590_v1 }
 0x573   : > { %v4778_v41 = vpop.f32.mrf.mxu0  ;;  %v4603_v7 = vadd.f32 %v9640_v24, %v4514_v40 }
 0x574   : > { %v5000_v45 = vrot.slane %v4998_v22, 7  ;;  %v4779_v46 = vadd.f32 %v4778_v41, %v4690_v52 }
 0x575   : > { %v3950_v6 = vpop.permute.xlu2 %3949  ;;  %v4692_v14 = vadd.f32 %v9658_v42, %v4603_v7  ;;  %v592_v7 = vld [vmem:[#allocation4 + $0x84] sm:$0x1] }
 0x576   : > { %v5003_v20 = vor.u32 %v5001_v34, %v5000_v45  ;;  %v5005_v55 = vrot.slane %v5000_v45, 4  ;;  %v4837_v12 = vmax.f32 %v4779_v46, 0.0  ;;  %v3970_v50 = vsel %vm2085_vm15, %v3948_v49, %v3950_v6 }
 0x577   : > { %5903 = vrot.lane.b32.xlu2 %v5855_v44, %s7640_s23  ;;  %4634 = vmatmul.bf16.gmra.mxu1 %v3970_v50  ;;  %v4428_v49 = vadd.f32 %v9698_v32, %v9224_v36  ;;  %v638_v36 = vsel %vm7741_vm7, 0, %v637_v43 }
 0x578   : > { %v5004_v57 = vsel %vm7776_vm11, %v4996_v60, %v5003_v20  ;;  %v5254_v5 = vsel %vm7729_vm5, %v5005_v55, %v5253_v56  ;;  %v4869_v9 = vpack.c.bf16 %v4837_v12, %v4837_v12  ;;  %639 = vst [vmem:[#allocation4 + $0x80] sm:$0x1] %v638_v36  ;;  %v5260_v56 = vld [vmem:[#allocation4 + $0x68] sm:$0x1] }
 0x579   : > { %5252 = vst.msk [vmem:[#allocation4 + $0x58] sm:$0xf] %vm334_vm8, %v5004_v57  ;;  %v4696_v24 = vpop.f32.mrf.mxu2  ;;  %v4517_v30 = vadd.f32 %v9642_v0, %v4428_v49  ;;  %v4523_v61 = vpop.f32.mrf.mxu3  ;;  %v4430_v0 = vadd.f32 %v9698_v32, %v9230_v58 }
 0x57a   : > { %5255 = vst [vmem:[#allocation4 + $0x5c] sm:$0x1] %v5254_v5  ;;  %v5007_v31 = vshrl.u32 %v4869_v9, 16  ;;  %v4610_v4 = vpop.f32.mrf.mxu1  ;;  %v5010_v33 = vshll.u32 %v4869_v9, 16 }
 0x57b   : > { %v4780_v21 = vpop.f32.mrf.mxu0  ;;  %v4606_v10 = vadd.f32 %v9664_v25, %v4517_v30  ;;  %v4519_v40 = vadd.f32 %v9678_v2, %v4430_v0  ;;  %v593_v2 = vsel %vm7729_vm5, 0, %v592_v7  ;;  %v5361_v7 = vld [vmem:[#allocation4 + $0x50] sm:$0x1] }
 0x57c   : > { %v5009_v62 = vrot.slane %v5007_v31, 7  ;;  %v4781_v53 = vadd.f32 %v4780_v21, %v4692_v14  ;;  %594 = vst [vmem:[#allocation4 + $0x84] sm:$0x1] %v593_v2  ;;  %v5263_v31 = vld [vmem:[#allocation4 + $0x6c] sm:$0xf] }
 0x57d   : > { %v4695_v22 = vadd.f32 %v4694_v3, %v4606_v10  ;;  %v4608_v3 = vadd.f32 %v9693_v8, %v4519_v40  ;;  %v4433_v8 = vadd.f32 %v9698_v32, %v9234_v11  ;;  %v4435_v10 = vadd.f32 %v9698_v32, %v9240_v17  ;;  %v5270_v2 = vld [vmem:[#allocation4 + $0x78] sm:$0xf] }
 0x57e   : > { %v5012_v15 = vor.u32 %v5010_v33, %v5009_v62  ;;  %v4838_v59 = vmax.f32 %v4781_v53, 0.0  ;;  %v5013_v38 = vrot.slane %v5009_v62, 4 }
 0x57f   : > { %v4697_v50 = vadd.f32 %v4696_v24, %v4608_v3  ;;  %v4522_v21 = vadd.f32 %v9711_v19, %v4433_v8 }
 0x580   : > { %v5257_v42 = vsel %vm7764_vm9, %v5012_v15, %v5256_v39  ;;  %v4870_v23 = vpack.c.bf16 %v4838_v59, %v4838_v59  ;;  %v640_v15 = vld [vmem:[#allocation4 + $0x8c] sm:$0x1] }
 0x581   : > { %5258 = vst [vmem:[#allocation4 + $0x60] sm:$0xf] %v5257_v42  ;;  %v4699_v52 = vpop.f32.mrf.mxu2  ;;  %v4526_v9 = vpop.f32.mrf.mxu3  ;;  %v4611_v53 = vadd.f32 %v4610_v4, %v4522_v21  ;;  %v641_v19 = vsel %vm7741_vm7, 0, %v640_v15  ;;  %v4524_v4 = vadd.f32 %v4523_v61, %v4435_v10 }
 0x582   : > { %v5015_v41 = vshrl.u32 %v4870_v23, 16  ;;  %v5018_v25 = vshll.u32 %v4870_v23, 16  ;;  %v4612_v34 = vpop.f32.mrf.mxu1  ;;  %642 = vst [vmem:[#allocation4 + $0x8c] sm:$0x1] %v641_v19 }
 0x583   : > { %v4783_v29 = vpop.f32.mrf.mxu0  ;;  %v4700_v59 = vadd.f32 %v4699_v52, %v4611_v53  ;;  %v4613_v52 = vadd.f32 %v4612_v34, %v4524_v4  ;;  %v4438_v34 = vadd.f32 %v9698_v32, %v9247_v63 }
 0x584   : > { %v5017_v45 = vrot.slane %v5015_v41, 7  ;;  %v4784_v46 = vadd.f32 %v4783_v29, %v4695_v22  ;;  %v5267_v22 = vld [vmem:[#allocation4 + $0x74] sm:$0x1] }
 0x586   : > { %v5020_v60 = vor.u32 %v5018_v25, %v5017_v45  ;;  %v5022_v20 = vrot.slane %v5017_v45, 4  ;;  %v4839_v55 = vmax.f32 %v4784_v46, 0.0 }
 0x588   : > { %v5021_v12 = vsel %vm7776_vm11, %v5013_v38, %v5020_v60  ;;  %v5261_v58 = vsel %vm7729_vm5, %v5022_v20, %v5260_v56  ;;  %v4871_v6 = vpack.c.bf16 %v4839_v55, %v4839_v55  ;;  %v595_v60 = vld [vmem:[#allocation4 + $0x90] sm:$0x1] }
 0x589   : > { %5259 = vst.msk [vmem:[#allocation4 + $0x64] sm:$0xf] %vm334_vm8, %v5021_v12  ;;  %v4701_v44 = vpop.f32.mrf.mxu2  ;;  %v4528_v0 = vpop.f32.mrf.mxu3  ;;  %v596_v3 = vsel %vm7729_vm5, 0, %v595_v60  ;;  %v598_v60 = vld [vmem:[#allocation4 + $0x9c] sm:$0x1] }
 0x58a   : > { %5262 = vst [vmem:[#allocation4 + $0x68] sm:$0x1] %v5261_v58  ;;  %v5024_v57 = vshrl.u32 %v4871_v6, 16  ;;  %v5027_v1 = vshll.u32 %v4871_v6, 16  ;;  %v4615_v62 = vpop.f32.mrf.mxu1  ;;  %v4702_v38 = vadd.f32 %v4701_v44, %v4613_v52 }
 0x58b   : > { %v4785_v5 = vpop.f32.mrf.mxu0  ;;  %597 = vst [vmem:[#allocation4 + $0x90] sm:$0x1] %v596_v3 }
 0x58c   : > { %v5026_v48 = vrot.slane %v5024_v57, 7  ;;  %v4786_v14 = vadd.f32 %v4785_v5, %v4697_v50  ;;  %v4527_v50 = vadd.f32 %v4526_v9, %v4438_v34  ;;  %v643_v9 = vld [vmem:[#allocation4 + $0x98] sm:$0x1]  ;;  %v599_v34 = vsel %vm7729_vm5, 0, %v598_v60 }
 0x58d   : > { %600 = vst [vmem:[#allocation4 + $0x9c] sm:$0x1] %v599_v34  ;;  %v7507_v34 = vld [vmem:[#allocation4 + $0x48] sm:$0xf0] }
 0x58e   : > { %v5029_v49 = vor.u32 %v5027_v1, %v5026_v48  ;;  %v4840_v33 = vmax.f32 %v4786_v14, 0.0  ;;  %v5030_v41 = vrot.slane %v5026_v48, 4  ;;  %v5505_v1 = vunpack.c.l.b16 %v5361_v7 }
 0x58f   : > { %v4616_v14 = vadd.f32 %v4615_v62, %v4527_v50  ;;  %v5277_v50 = vld [vmem:[#allocation4 + $0x84] sm:$0xf] }
 0x590   : > { %v5264_v24 = vsel %vm7764_vm9, %v5029_v49, %v5263_v31  ;;  %v4872_v39 = vpack.c.bf16 %v4840_v33, %v4840_v33 }
 0x591   : > { %5265 = vst [vmem:[#allocation4 + $0x6c] sm:$0xf] %v5264_v24  ;;  %v4704_v30 = vpop.f32.mrf.mxu2  ;;  %v4531_v31 = vpop.f32.mrf.mxu3 }
 0x592   : > { %v5032_v11 = vshrl.u32 %v4872_v39, 16  ;;  %v5035_v43 = vshll.u32 %v4872_v39, 16  ;;  %v4617_v40 = vpop.f32.mrf.mxu1  ;;  %v4705_v33 = vadd.f32 %v4704_v30, %v4616_v14  ;;  %v9764_v39 = vld [vmem:[#allocation4 + $0x48] sm:$0xff]  }
 0x593   : > { %v4788_v42 = vpop.f32.mrf.mxu0 }
 0x594   : > { %v5034_v23 = vrot.slane %v5032_v11, 7  ;;  %v4789_v36 = vadd.f32 %v4788_v42, %v4700_v59  ;;  %v9768_v59 = vpack.c.b16 %v5505_v1, %v5505_v1  ;;  %v644_v11 = vsel %vm7741_vm7, 0, %v643_v9 }
 0x595   : > { %645 = vst [vmem:[#allocation4 + $0x98] sm:$0x1] %v644_v11  ;;  %v646_v11 = vld [vmem:[#allocation4 + $0xa4] sm:$0x1] }
 0x596   : > { %v5037_v29 = vor.u32 %v5035_v43, %v5034_v23  ;;  %v5039_v45 = vrot.slane %v5034_v23, 4  ;;  %v4841_v25 = vmax.f32 %v4789_v36, 0.0  ;;  %v5274_v43 = vld [vmem:[#allocation4 + $0x80] sm:$0x1]  ;;  %v5610_v36 = vshll.u32 %v9764_v39, 16 }
 0x598   : > { %v5038_v46 = vsel %vm7776_vm11, %v5030_v41, %v5037_v29  ;;  %v5268_v17 = vsel %vm7729_vm5, %v5039_v45, %v5267_v22  ;;  %v4873_v56 = vpack.c.bf16 %v4841_v25, %v4841_v25  ;;  %v5615_v45 = vshll.u32 %v9768_v59, 16 }
 0x599   : > { %5266 = vst.msk [vmem:[#allocation4 + $0x70] sm:$0xf] %vm334_vm8, %v5038_v46  ;;  %v4706_v20 = vpop.f32.mrf.mxu2 }
 0x59a   : > { %5269 = vst [vmem:[#allocation4 + $0x74] sm:$0x1] %v5268_v17  ;;  %v5041_v61 = vshrl.u32 %v4873_v56, 16  ;;  %v5044_v58 = vshll.u32 %v4873_v56, 16  ;;  %v4620_v53 = vpop.f32.mrf.mxu1  ;;  %v4533_v56 = vpop.f32.mrf.mxu3  ;;  %v5617_v3 = vrot.slane %v5615_v45, 1 }
 0x59b   : > { %v4790_v55 = vpop.f32.mrf.mxu0  ;;  %v5898_v8 = vpop.permute.xlu1 %5897 }
 0x59c   : > { %v5043_v12 = vrot.slane %v5041_v61, 7  ;;  %v4791_v6 = vadd.f32 %v4790_v55, %v4702_v38 }
 0x59e   : > { %v5046_v57 = vor.u32 %v5044_v58, %v5043_v12  ;;  %v4842_v44 = vmax.f32 %v4791_v6, 0.0  ;;  %v5754_v5 = vpop.permute.xlu0 %5753  ;;  %v5047_v4 = vrot.slane %v5043_v12, 4  ;;  %v10404_v12 = vld [vmem:[#allocation6_spill] sm:$0xff] }
 0x59f   : > { %v5934_v48 = vsel %vm2048_vm14, %v9428_v26, %v5754_v5  ;;  %v10403_v26 = vld [vmem:[#allocation5_spill] sm:$0xff]  ;;  %v4443_v58 = vadd.f32 %v9698_v32, %v10404_v12 }
 0x5a0   : > { %v5271_v63 = vsel %vm7764_vm9, %v5046_v57, %v5270_v2  ;;  %v4874_v21 = vpack.c.bf16 %v4842_v44, %v4842_v44  ;;  %v9760_v49 = vsel %vm2085_vm15, %v5934_v48, %v5898_v8  ;;  %v4440_v62 = vadd.f32 %v9698_v32, %v10403_v26  ;;  %v7596_v48 = vld [vmem:[#allocation3 + $0xcc] sm:$0xe] }
 0x5a1   : > { %5272 = vst [vmem:[#allocation4 + $0x78] sm:$0xf] %v5271_v63  ;;  %6019 = vrot.lane.b32.xlu2 %v9760_v49, %s7643_s25  ;;  %v4709_v30 = vpop.f32.mrf.mxu2  ;;  %v4532_v57 = vadd.f32 %v4531_v31, %v4443_v58  ;;  %v7546_v63 = vld [vmem:[#allocation4 + $0x18] sm:$0xff]  }
 0x5a2   : > { %v5049_v24 = vshrl.u32 %v4874_v21, 16  ;;  %v5052_v42 = vshll.u32 %v4874_v21, 16  ;;  %v4529_v23 = vadd.f32 %v4528_v0, %v4440_v62  ;;  %v5612_v0 = vrot.slane %v5610_v36, 1  ;;  %v4622_v6 = vpop.f32.mrf.mxu1 }
 0x5a3   : > { %v4793_v15 = vpop.f32.mrf.mxu0  ;;  %v4621_v26 = vadd.f32 %v4620_v53, %v4532_v57  ;;  %v601_v57 = vld [vmem:[#allocation4 + $0xa8] sm:$0x1] }
 0x5a4   : > { %v5051_v10 = vrot.slane %v5049_v24, 7  ;;  %v4794_v19 = vadd.f32 %v4793_v15, %v4705_v33  ;;  %v4618_v25 = vadd.f32 %v4617_v40, %v4529_v23  ;;  %v5608_v40 = vshrl.u32 %v9764_v39, 16  ;;  %v9788_v33 = vld [vmem:[#allocation4 + $0x54] sm:$0xff]  }
 0x5a5   : > { %v9790_v24 = vld [vmem:[#allocation4 + $0x54] sm:$0xf0]  ;;  %v4710_v53 = vadd.f32 %v4709_v30, %v4621_v26  ;;  %v5860_v26 = vrot.slane %v9768_v59, 1  ;;  %v5620_v59 = vshrl.u32 %v9788_v33, 16 }
 0x5a6   : > { %v5054_v22 = vor.u32 %v5052_v42, %v5051_v10  ;;  %v5056_v41 = vrot.slane %v5051_v10, 4  ;;  %v4843_v29 = vmax.f32 %v4794_v19, 0.0  ;;  %v4707_v38 = vadd.f32 %v4706_v20, %v4618_v25  ;;  %v10405_v10 = vld [vmem:[#allocation16_spill] sm:$0xff]  ;;  %v10406_v19 = vld [vmem:[#allocation7_spill] sm:$0xff] }
 0x5a7   : > { %v5613_v20 = vor.u32 %v5612_v0, %v5608_v40  ;;  %v7597_v42 = vor.u32 %v7596_v48, %v10405_v10  ;;  %v4445_v23 = vadd.f32 %v9698_v32, %v10406_v19  ;;  %v5622_v48 = vshll.u32 %v9788_v33, 16 }
 0x5a8   : > { %v5055_v52 = vsel %vm7776_vm11, %v5047_v4, %v5054_v22  ;;  %v5275_v46 = vsel %vm7729_vm5, %v5056_v41, %v5274_v43  ;;  %v4875_v17 = vpack.c.bf16 %v4843_v29, %v4843_v29  ;;  %v647_v4 = vsel %vm7741_vm7, 0, %v646_v11  ;;  %v4536_v29 = vpop.f32.mrf.mxu3 }
 0x5a9   : > { %5273 = vst.msk [vmem:[#allocation4 + $0x7c] sm:$0xf] %vm334_vm8, %v5055_v52  ;;  %5905 = vrot.lane.b32.xlu2 %v9684_v47, %s7640_s23  ;;  %v4711_v1 = vpop.f32.mrf.mxu2  ;;  %v5618_v9 = vsel %vm1650_vm13, %v5613_v20, %v5617_v3  ;;  %v3818_v22 = vrot.slane %v7597_v42, 1  ;;  %v3819_v41 = vrot.slane %v9487_v54, 1  ;;  %v5362_v3 = vld [vmem:[#allocation4 + $0x5c] sm:$0x1] }
 0x5aa   : > { %5276 = vst [vmem:[#allocation4 + $0x80] sm:$0x1] %v5275_v46  ;;  %v5058_v61 = vshrl.u32 %v4875_v17, 16  ;;  %v5061_v2 = vshll.u32 %v4875_v17, 16  ;;  %v4534_v46 = vadd.f32 %v4533_v56, %v4445_v23  ;;  %v5281_v17 = vld [vmem:[#allocation4 + $0x8c] sm:$0x1] }
 0x5ab   : > { %v4795_v55 = vpop.f32.mrf.mxu0  ;;  %v5900_v14 = vpop.permute.xlu1 %5899  ;;  %648 = vst [vmem:[#allocation4 + $0xa4] sm:$0x1] %v647_v4  ;;  %v3820_v0 = vsel %vm1957_vm12, %v3818_v22, %v3819_v41  ;;  %v5624_v23 = vrot.slane %v5622_v48, 1 }
 0x5ac   : > { %v5060_v7 = vrot.slane %v5058_v61, 7  ;;  %v4796_v47 = vadd.f32 %v4795_v55, %v4707_v38  ;;  %v4625_v61 = vpop.f32.mrf.mxu1  ;;  %7129 = vmatmul.msk.bf16.gmra.mxu0 %vm2085_vm15, %v3820_v0  ;;  %v4623_v12 = vadd.f32 %v4622_v6, %v4534_v46  ;;  %v10408_v0 = vld [vmem:[#allocation9_spill] sm:$0xff] }
 0x5ae   : > { %v5063_v44 = vor.u32 %v5061_v2, %v5060_v7  ;;  %v4844_v5 = vmax.f32 %v4796_v47, 0.0  ;;  %v5756_v8 = vpop.permute.xlu0 %5755  ;;  %v5064_v38 = vrot.slane %v5060_v7, 4  ;;  %v7508_v47 = vld [vmem:[#allocation4 + $0x48] sm:$0xe]  ;;  %v4712_v20 = vadd.f32 %v4711_v1, %v4623_v12  ;;  %v5284_v1 = vld [vmem:[#allocation4 + $0x90] sm:$0xf] }
 0x5af   : > { %v5936_v21 = vsel %vm2048_vm14, %v7546_v63, %v5756_v8  ;;  %v7509_v6 = vor.u32 %v7508_v47, %v7507_v34  ;;  %v7301_v12 = vld [vmem:[%s10374_s7 + $0x38] sm:$0xff] }
 0x5b0   : > { %v5278_v62 = vsel %vm7764_vm9, %v5063_v44, %v5277_v50  ;;  %v4876_v31 = vpack.c.bf16 %v4844_v5, %v4844_v5  ;;  %v9795_v15 = vsel %vm2085_vm15, %v5936_v21, %v5900_v14  ;;  %v5506_v50 = vunpack.c.l.b16 %v5362_v3  ;;  %v10407_v44 = vld [vmem:[#allocation8_spill] sm:$0xff]  ;;  %v4538_v11 = vpop.f32.mrf.mxu3  ;;  %6360 = vmatpush.bf16.msra.mxu3 %v7301_v12 }
 0x5b1   : > { %5279 = vst [vmem:[#allocation4 + $0x84] sm:$0xf] %v5278_v62  ;;  %6052 = vrot.lane.b32.xlu0 %v9795_v15, %s7640_s23  ;;  %5763 = vrot.lane.b32.xlu2 %v5618_v9, %s7641_s24  ;;  %v4714_v2 = vpop.f32.mrf.mxu2  ;;  %v4448_v5 = vadd.f32 %v9698_v32, %v10407_v44  ;;  %v602_v14 = vsel %vm7729_vm5, 0, %v601_v57  ;;  %v5859_v19 = vrot.slane %v7509_v6, 1 }
 0x5b2   : > { %v5066_v43 = vshrl.u32 %v4876_v31, 16  ;;  %v5069_v25 = vshll.u32 %v4876_v31, 16  ;;  %603 = vst [vmem:[#allocation4 + $0xa8] sm:$0x1] %v602_v14  ;;  %v9823_v62 = vpack.c.b16 %v5506_v50, %v5506_v50 }
 0x5b3   : > { %v4798_v36 = vpop.f32.mrf.mxu0  ;;  %v4537_v31 = vadd.f32 %v4536_v29, %v4448_v5  ;;  %v5861_v22 = vsel %vm1957_vm12, %v5859_v19, %v5860_v26  ;;  %v649_v29 = vld [vmem:[#allocation4 + $0xb0] sm:$0x1] }
 0x5b4   : > { %v5068_v45 = vrot.slane %v5066_v43, 7  ;;  %v4799_v52 = vadd.f32 %v4798_v36, %v4710_v53  ;;  %v4627_v43 = vpop.f32.mrf.mxu1  ;;  %v5627_v41 = vshll.u32 %v9823_v62, 16 }
 0x5b5   : > { %v4626_v53 = vadd.f32 %v4625_v61, %v4537_v31 }
 0x5b6   : > { %v5071_v30 = vor.u32 %v5069_v25, %v5068_v45  ;;  %v5073_v60 = vrot.slane %v5068_v45, 4  ;;  %v4845_v55 = vmax.f32 %v4799_v52, 0.0  ;;  %v3712_v40 = vpop.permute.xlu0 %3711  ;;  %v3954_v25 = vpop.permute.xlu1 %3953 }
 0x5b7   : > { %v3873_v54 = vsel %vm2085_vm15, %v9440_v16, %v3712_v40  ;;  %v4715_v45 = vadd.f32 %v4714_v2, %v4626_v53  ;;  %v5625_v40 = vor.u32 %v5624_v23, %v5620_v59 }
 0x5b8   : > { %v5072_v56 = vsel %vm7776_vm11, %v5064_v38, %v5071_v30  ;;  %v5282_v58 = vsel %vm7729_vm5, %v5073_v60, %v5281_v17  ;;  %v4877_v7 = vpack.c.bf16 %v4845_v55, %v4845_v55  ;;  %4728 = vmatmul.bf16.gmra.mxu2 %v3873_v54  ;;  %v650_v17 = vsel %vm7741_vm7, 0, %v649_v29 }
 0x5b9   : > { %5280 = vst.msk [vmem:[#allocation4 + $0x88] sm:$0xf] %vm334_vm8, %v5072_v56  ;;  %6021 = vrot.lane.b32.xlu0 %v9795_v15, %s7643_s25  ;;  %v4450_v38 = vadd.f32 %v9698_v32, %v10408_v0  ;;  %v4716_v61 = vpop.f32.mrf.mxu2 }
 0x5ba   : > { %5283 = vst [vmem:[#allocation4 + $0x8c] sm:$0x1] %v5282_v58  ;;  %v5075_v16 = vshrl.u32 %v4877_v7, 16  ;;  %v5078_v21 = vshll.u32 %v4877_v7, 16  ;;  %v5288_v58 = vld [vmem:[#allocation4 + $0x98] sm:$0x1] }
 0x5bb   : > { %v4800_v8 = vpop.f32.mrf.mxu0  ;;  %651 = vst [vmem:[#allocation4 + $0xb0] sm:$0x1] %v650_v17  ;;  %v4539_v56 = vadd.f32 %v4538_v11, %v4450_v38  ;;  %v5629_v7 = vrot.slane %v5627_v41, 1  ;;  %v7298_v41 = vld [vmem:[%s10374_s7 + $0x20] sm:$0xff] }
 0x5bc   : > { %v5077_v63 = vrot.slane %v5075_v16, 7  ;;  %v4801_v9 = vadd.f32 %v4800_v8, %v4712_v20  ;;  %v4541_v16 = vpop.f32.mrf.mxu3  ;;  %v7300_v8 = vld [vmem:[%s10374_s7 + $0x30] sm:$0xff]  ;;  %v4630_v14 = vpop.f32.mrf.mxu1 }
 0x5bd   : > { %v5630_v20 = vsel %vm1650_vm13, %v5625_v40, %v5629_v7  ;;  %v4628_v6 = vadd.f32 %v4627_v43, %v4539_v56  ;;  %6361 = vmatpush.bf16.msra.mxu3 %v7300_v8  ;;  %v7599_v43 = vld [vmem:[#allocation4 + $0x54] sm:$0xe]  ;;  %v7297_v40 = vld [vmem:[%s10374_s7 + $0x18] sm:$0xff] }
 0x5be   : > { %v5080_v10 = vor.u32 %v5078_v21, %v5077_v63  ;;  %v4846_v42 = vmax.f32 %v4801_v9, 0.0  ;;  %v5081_v2 = vrot.slane %v5077_v63, 4  ;;  %v10409_v9 = vld [vmem:[#allocation10_spill] sm:$0xff]  ;;  %v7600_v17 = vor.u32 %v7599_v43, %v9790_v24 }
 0x5bf   : > { %v4717_v48 = vadd.f32 %v4716_v61, %v4628_v6  ;;  %v4453_v26 = vadd.f32 %v9698_v32, %v10409_v9 }
 0x5c0   : > { %v5285_v36 = vsel %vm7764_vm9, %v5080_v10, %v5284_v1  ;;  %v4878_v4 = vpack.c.bf16 %v4846_v42, %v4846_v42  ;;  %v5902_v1 = vpop.permute.xlu0 %5901  ;;  %v7299_v10 = vld [vmem:[%s10374_s7 + $0x28] sm:$0xff]  ;;  %v5862_v6 = vrot.slane %v7600_v17, 1 }
 0x5c1   : > { %5286 = vst [vmem:[#allocation4 + $0x90] sm:$0xf] %v5285_v36  ;;  %5907 = vrot.lane.b32.xlu0 %v5861_v22, %s7640_s23  ;;  %v3952_v46 = vpop.permute.xlu2 %3951  ;;  %v4719_v36 = vpop.f32.mrf.mxu2  ;;  %v4542_v22 = vadd.f32 %v4541_v16, %v4453_v26  ;;  %6362 = vmatpush.bf16.msra.mxu3 %v7299_v10  ;;  %v5295_v16 = vld [vmem:[#allocation4 + $0xa4] sm:$0x1] }
 0x5c2   : > { %v5083_v52 = vshrl.u32 %v4878_v4, 16  ;;  %v4050_v30 = vsel %vm2085_vm15, %v9068_v27, %v3952_v46  ;;  %v3971_v60 = vsel %vm2085_vm15, %v3952_v46, %v3954_v25  ;;  %v5086_v54 = vshll.u32 %v4878_v4, 16  ;;  %v5291_v4 = vld [vmem:[#allocation4 + $0x9c] sm:$0xf]  ;;  %v5363_v46 = vld [vmem:[#allocation4 + $0x68] sm:$0x1] }
 0x5c3   : > { %v4803_v55 = vpop.f32.mrf.mxu0  ;;  %4550 = vmatmul.bf16.gmra.mxu3 %v4050_v30  ;;  %4639 = vmatmul.bf16.gmra.mxu1 %v3971_v60  ;;  %v7547_v30 = vld [vmem:[#allocation4 + $0x30] sm:$0xff]   ;;  %v5507_v24 = vunpack.c.l.b16 %v5363_v46  ;;  %v9892_v26 = vld [vmem:[#allocation4 + $0x60] sm:$0xff]  }
 0x5c4   : > { %v5085_v3 = vrot.slane %v5083_v52, 7  ;;  %v4804_v34 = vadd.f32 %v4803_v55, %v4715_v45  ;;  %v4631_v45 = vadd.f32 %v4630_v14, %v4542_v22  ;;  %v4543_v0 = vpop.f32.mrf.mxu3  ;;  %v7296_v14 = vld [vmem:[%s10374_s7 + $0x10] sm:$0xff]  ;;  %v5634_v43 = vshll.u32 %v9892_v26, 16 }
 0x5c5   : > { %6363 = vmatpush.bf16.msra.mxu3 %v7298_v41  ;;  %v5525_v9 = vpack.c.b16 %v5507_v24, %v5507_v24  ;;  %v7511_v41 = vld [vmem:[#allocation4 + $0x60] sm:$0xe] }
 0x5c6   : > { %v5088_v47 = vor.u32 %v5086_v54, %v5085_v3  ;;  %v5090_v27 = vrot.slane %v5085_v3, 4  ;;  %v4847_v50 = vmax.f32 %v4804_v34, 0.0  ;;  %v4720_v38 = vadd.f32 %v4719_v36, %v4631_v45  ;;  %v10410_v3 = vld [vmem:[#allocation11_spill] sm:$0xff]  ;;  %v7295_v45 = vld [vmem:[%s10374_s7 + $0x8] sm:$0xff] }
 0x5c7   : > { %v4455_v54 = vadd.f32 %v9698_v32, %v10410_v3 }
 0x5c8   : > { %v5089_v57 = vsel %vm7776_vm11, %v5081_v2, %v5088_v47  ;;  %v5289_v44 = vsel %vm7729_vm5, %v5090_v27, %v5288_v58  ;;  %v4879_v5 = vpack.c.bf16 %v4847_v50, %v4847_v50  ;;  %v9880_v2 = vld [vmem:[#allocation4 + $0x6c] sm:$0xff]   ;;  %v604_v27 = vld [vmem:[#allocation4 + $0xb4] sm:$0x1] }
 0x5c9   : > { %5287 = vst.msk [vmem:[#allocation4 + $0x94] sm:$0xf] %vm334_vm8, %v5089_v57  ;;  %5765 = vrot.lane.b32.xlu0 %v5630_v20, %s7641_s24  ;;  %v5758_v21 = vpop.permute.xlu2 %5757  ;;  %v9882_v47 = vld [vmem:[#allocation4 + $0x6c] sm:$0xf0]  ;;  %v4544_v50 = vadd.f32 %v4543_v0, %v4455_v54  ;;  %v4632_v20 = vpop.f32.mrf.mxu1  ;;  %v605_v57 = vsel %vm7729_vm5, 0, %v604_v27  ;;  %6364 = vmatpush.bf16.msra.mxu3 %v7297_v40  ;;  %v5632_v40 = vshrl.u32 %v9892_v26, 16 }
 0x5ca   : > { %5290 = vst [vmem:[#allocation4 + $0x98] sm:$0x1] %v5289_v44  ;;  %v5092_v63 = vshrl.u32 %v4879_v5, 16  ;;  %v5938_v31 = vsel %vm2048_vm14, %v9532_v35, %v5758_v21  ;;  %v5095_v19 = vshll.u32 %v4879_v5, 16  ;;  %v5863_v21 = vrot.slane %v9823_v62, 1  ;;  %v7294_v54 = vld [vmem:[%s10374_s7] sm:$0xff] }
 0x5cb   : > { %v4805_v11 = vpop.f32.mrf.mxu0  ;;  %v9859_v53 = vsel %vm2085_vm15, %v5938_v31, %v5902_v1  ;;  %606 = vst [vmem:[#allocation4 + $0xb4] sm:$0x1] %v605_v57  ;;  %v4633_v1 = vadd.f32 %v4632_v20, %v4544_v50  ;;  %v5364_v62 = vld [vmem:[#allocation4 + $0x74] sm:$0x1]  ;;  %v5644_v57 = vshrl.u32 %v9880_v2, 16 }
 0x5cc   : > { %v5094_v42 = vrot.slane %v5092_v63, 7  ;;  %v4806_v23 = vadd.f32 %v4805_v11, %v4717_v48  ;;  %6054 = vrot.lane.b32.xlu1 %v9859_v53, %s7640_s23  ;;  %v4721_v63 = vpop.f32.mrf.mxu2  ;;  %v5508_v46 = vunpack.c.l.b16 %v5364_v62 }
 0x5cd   : > { %v5760_v29 = vpop.permute.xlu1 %5759  ;;  %6365 = vmatpush.bf16.msra.mxu3 %v7296_v14 }
 0x5ce   : > { %v5097_v59 = vor.u32 %v5095_v19, %v5094_v42  ;;  %v4848_v35 = vmax.f32 %v4806_v23, 0.0  ;;  %v5940_v60 = vsel %vm2048_vm14, %v7547_v30, %v5760_v29  ;;  %v5098_v44 = vrot.slane %v5094_v42, 4  ;;  %v7510_v42 = vld [vmem:[#allocation4 + $0x60] sm:$0xf0] }
 0x5cf   : > { %v4722_v19 = vadd.f32 %v4721_v63, %v4633_v1  ;;  %v5639_v29 = vshll.u32 %v5525_v9, 16  ;;  %v5646_v30 = vshll.u32 %v9880_v2, 16  ;;  %v9914_v24 = vpack.c.b16 %v5508_v46, %v5508_v46  ;;  %v7311_v63 = vld [vmem:[%s10374_s7 + $0x88] sm:$0xff] }
 0x5d0   : > { %v5292_v25 = vsel %vm7764_vm9, %v5097_v59, %v5291_v4  ;;  %v4880_v52 = vpack.c.bf16 %v4848_v35, %v4848_v35  ;;  %v5864_v4 = vsel %vm1957_vm12, %v5862_v6, %v5863_v21  ;;  %v5302_v6 = vld [vmem:[#allocation4 + $0xb0] sm:$0x1]  ;;  %v7309_v21 = vld [vmem:[%s10374_s7 + $0x78] sm:$0xff]  ;;  %6544 = vmatpush.bf16.msra.mxu2 %v7311_v63 }
 0x5d1   : > { %5293 = vst [vmem:[#allocation4 + $0x9c] sm:$0xf] %v5292_v25  ;;  %v5904_v55 = vpop.permute.xlu2 %5903  ;;  %v5298_v25 = vld [vmem:[#allocation4 + $0xa8] sm:$0xf]  ;;  %6366 = vmatpush.bf16.msra.mxu3 %v7295_v45  ;;  %v5641_v3 = vrot.slane %v5639_v29, 1  ;;  %v5648_v27 = vrot.slane %v5646_v30, 1  ;;  %6449 = vmatpush.bf16.msra.mxu1 %v7309_v21 }
 0x5d2   : > { %v5100_v61 = vshrl.u32 %v4880_v52, 16  ;;  %v9876_v34 = vsel %vm2085_vm15, %v5940_v60, %v5904_v55  ;;  %v5103_v58 = vshll.u32 %v4880_v52, 16  ;;  %v7512_v52 = vor.u32 %v7511_v41, %v7510_v42  ;;  %v5305_v63 = vld [vmem:[#allocation4 + $0xb4] sm:$0xf] }
 0x5d3   : > { %v4808_v12 = vpop.f32.mrf.mxu0  ;;  %6056 = vrot.lane.b32.xlu2 %v9876_v34, %s7640_s23  ;;  %v5649_v14 = vor.u32 %v5648_v27, %v5644_v57  ;;  %v7303_v57 = vld [vmem:[%s10374_s7 + $0x48] sm:$0xff] }
 0x5d4   : > { %v5102_v56 = vrot.slane %v5100_v61, 7  ;;  %v4809_v7 = vadd.f32 %v4808_v12, %v4720_v38  ;;  %6023 = vrot.lane.b32.xlu1 %v9859_v53, %s7643_s25  ;;  %v5636_v38 = vrot.slane %v5634_v43, 1  ;;  %v5866_v61 = vrot.slane %v5525_v9, 1  ;;  %v652_v9 = vld [vmem:[#allocation4 + $0xbc] sm:$0x1]  ;;  %v10411_v43 = vld [vmem:[#allocation12_spill] sm:$0xff] }
 0x5d5   : > { %v5865_v12 = vrot.slane %v7512_v52, 1  ;;  %6367 = vmatpush.bf16.msra.mxu3 %v7294_v54  ;;  %v4458_v62 = vadd.f32 %v9698_v32, %v10411_v43  ;;  %v5896_v29 = vpop.permute.xlu1 %5895 }
 0x5d6   : > { %v5105_v5 = vor.u32 %v5103_v58, %v5102_v56  ;;  %v5107_v8 = vrot.slane %v5102_v56, 4  ;;  %v4849_v48 = vmax.f32 %v4809_v7, 0.0  ;;  %v5637_v58 = vor.u32 %v5636_v38, %v5632_v40 }
 0x5d7   : > { %v5867_v7 = vsel %vm1957_vm12, %v5865_v12, %v5866_v61  ;;  %v10412_v61 = vld [vmem:[#allocation13_spill] sm:$0xff] }
 0x5d8   : > { %v5106_v31 = vsel %vm7776_vm11, %v5098_v44, %v5105_v5  ;;  %v5296_v11 = vsel %vm7729_vm5, %v5107_v8, %v5295_v16  ;;  %v4881_v10 = vpack.c.bf16 %v4849_v48, %v4849_v48  ;;  %v5642_v16 = vsel %vm1650_vm13, %v5637_v58, %v5641_v3 }
 0x5d9   : > { %5294 = vst.msk [vmem:[#allocation4 + $0xa0] sm:$0xf] %vm334_vm8, %v5106_v31  ;;  %v5651_v44 = vshll.u32 %v9914_v24, 16  ;;  %v4460_v30 = vadd.f32 %v9698_v32, %v10412_v61  ;;  %v7310_v32 = vld [vmem:[%s10374_s7 + $0x80] sm:$0xff] }
 0x5da   : > { %5297 = vst [vmem:[#allocation4 + $0xa4] sm:$0x1] %v5296_v11  ;;  %v5109_v23 = vshrl.u32 %v4881_v10, 16  ;;  %v5112_v59 = vshll.u32 %v4881_v10, 16  ;;  %v653_v11 = vsel %vm7741_vm7, 0, %v652_v9  ;;  %6545 = vmatpush.bf16.msra.mxu2 %v7310_v32 }
 0x5db   : > { %v4810_v36 = vpop.f32.mrf.mxu0  ;;  %6025 = vrot.lane.b32.xlu2 %v9876_v34, %s7643_s25  ;;  %v5653_v10 = vrot.slane %v5651_v44, 1  ;;  %654 = vst [vmem:[#allocation4 + $0xbc] sm:$0x1] %v653_v11  ;;  %v7302_v11 = vld [vmem:[%s10374_s7 + $0x40] sm:$0xff] }
 0x5dc   : > { %v5111_v22 = vrot.slane %v5109_v23, 7  ;;  %v4811_v35 = vadd.f32 %v4810_v36, %v4722_v19  ;;  %5909 = vrot.lane.b32.xlu1 %v5864_v4, %s7640_s23  ;;  %v7308_v19 = vld [vmem:[%s10374_s7 + $0x70] sm:$0xff]  ;;  %v7307_v23 = vld [vmem:[%s10374_s7 + $0x68] sm:$0xff]  ;;  %v5752_v4 = vpop.permute.xlu0 %5751 }
 0x5dd   : > { %v5654_v42 = vsel %vm1650_vm13, %v5649_v14, %v5653_v10  ;;  %6450 = vmatpush.bf16.msra.mxu1 %v7308_v19 }
 0x5de   : > { %v5114_v17 = vor.u32 %v5112_v59, %v5111_v22  ;;  %v4850_v0 = vmax.f32 %v4811_v35, 0.0  ;;  %v5115_v5 = vrot.slane %v5111_v22, 4  ;;  %v7306_v59 = vld [vmem:[%s10374_s7 + $0x60] sm:$0xff] }
 0x5e0   : > { %v5299_v60 = vsel %vm7764_vm9, %v5114_v17, %v5298_v25  ;;  %v4882_v55 = vpack.c.bf16 %v4850_v0, %v4850_v0  ;;  %v7548_v25 = vld [vmem:[#allocation4] sm:$0xff]   ;;  %v7305_v0 = vld [vmem:[%s10374_s7 + $0x58] sm:$0xff] }
 0x5e1   : > { %5300 = vst [vmem:[#allocation4 + $0xa8] sm:$0xf] %v5299_v60  ;;  %6451 = vmatpush.bf16.msra.mxu1 %v7307_v23  ;;  %v5932_v52 = vsel %vm2048_vm14, %v7548_v25, %v5752_v4  ;;  %v5365_v23 = vld [vmem:[#allocation4 + $0x80] sm:$0x1]  ;;  %v9988_v25 = vld [vmem:[#allocation4 + $0x78] sm:$0xff]  }
 0x5e2   : > { %v5117_v56 = vshrl.u32 %v4882_v55, 16  ;;  %v5120_v20 = vshll.u32 %v4882_v55, 16  ;;  %v5968_v38 = vsel %vm2085_vm15, %v5932_v52, %v5896_v29 }
 0x5e3   : > { %5911 = vrot.lane.b32.xlu2 %v5867_v7, %s7640_s23  ;;  %v4813_v46 = vpop.f32.mrf.mxu0 }
 0x5e4   : > { %v5119_v50 = vrot.slane %v5117_v56, 7  ;;  %5767 = vrot.lane.b32.xlu1 %v5642_v16, %s7641_s24  ;;  %v7304_v56 = vld [vmem:[%s10374_s7 + $0x50] sm:$0xff] }
 0x5e5   : > { %6452 = vmatpush.bf16.msra.mxu1 %v7306_v59 }
 0x5e6   : > { %v5122_v8 = vor.u32 %v5120_v20, %v5119_v50  ;;  %v5124_v48 = vrot.slane %v5119_v50, 4  ;;  %v5762_v20 = vpop.permute.xlu1 %5761 }
 0x5e7   : > { %v5942_v14 = vsel %vm2048_vm14, %v9629_v28, %v5762_v20  ;;  %v7602_v28 = vld [vmem:[#allocation4 + $0x6c] sm:$0xe]  ;;  %v10011_v20 = vld [vmem:[#allocation4 + $0x84] sm:$0xff]  }
 0x5e8   : > { %v5123_v1 = vsel %vm7776_vm11, %v5115_v5, %v5122_v8  ;;  %v5303_v31 = vsel %vm7729_vm5, %v5124_v48, %v5302_v6  ;;  %v7603_v4 = vor.u32 %v7602_v28, %v9882_v47  ;;  %v5869_v47 = vrot.slane %v9914_v24, 1  ;;  %v10413_v28 = vld [vmem:[#allocation14_spill] sm:$0xff] }
 0x5e9   : > { %5301 = vst.msk [vmem:[#allocation4 + $0xac] sm:$0xf] %vm334_vm8, %v5123_v1  ;;  %6453 = vmatpush.bf16.msra.mxu1 %v7305_v0 }
 0x5ea   : > { %5304 = vst [vmem:[#allocation4 + $0xb0] sm:$0x1] %v5303_v31  ;;  %v4724_v35 = vpop.f32.mrf.mxu2  ;;  %v5868_v52 = vrot.slane %v7603_v4, 1 }
 0x5eb   : > { %5769 = vrot.lane.b32.xlu2 %v5654_v42, %s7641_s24  ;;  %v4815_v44 = vpop.f32.mrf.mxu0 }
 0x5ec   : > { %v5870_v0 = vsel %vm1957_vm12, %v5868_v52, %v5869_v47 }
 0x5ed   : > { %6454 = vmatpush.bf16.msra.mxu1 %v7304_v56 }
 0x5f1   : > { %6455 = vmatpush.bf16.msra.mxu1 %v7303_v57  ;;  %v5366_v57 = vld [vmem:[#allocation4 + $0x8c] sm:$0x1] }
 0x5f2   : > { %v4546_v36 = vpop.f32.mrf.mxu3  ;;  %v4726_v50 = vpop.f32.mrf.mxu2 }
 0x5f3   : > { %v4547_v22 = vadd.f32 %v4546_v36, %v4458_v62  ;;  %v5309_v36 = vld [vmem:[#allocation4 + $0xbc] sm:$0x1] }
 0x5f4   : > { %v4635_v41 = vpop.f32.mrf.mxu1 }
 0x5f5   : > { %v4636_v45 = vadd.f32 %v4635_v41, %v4547_v22  ;;  %6456 = vmatpush.bf16.msra.mxu1 %v7302_v11  ;;  %v5509_v41 = vunpack.c.l.b16 %v5365_v23 }
 0x5f7   : > { %v4725_v17 = vadd.f32 %v4724_v35, %v4636_v45 }
 0x5f9   : > { %v4814_v60 = vadd.f32 %v4813_v46, %v4725_v17  ;;  %v5527_v46 = vpack.c.b16 %v5509_v41, %v5509_v41  ;;  %v5658_v17 = vshll.u32 %v9988_v25, 16 }
 0x5fa   : > { %v4548_v55 = vpop.f32.mrf.mxu3 }
 0x5fb   : > { %v9955_v40 = vpop.permute.xlu2 %6019  ;;  %v4851_v3 = vmax.f32 %v4814_v60, 0.0  ;;  %v4549_v54 = vadd.f32 %v4548_v55, %v4460_v30  ;;  %v5660_v61 = vrot.slane %v5658_v17, 1  ;;  %v5656_v30 = vshrl.u32 %v9988_v25, 16 }
 0x5fc   : > { %v6085_v12 = vsel %vm2203_vm0, %v5968_v38, %v9955_v40  ;;  %v4637_v58 = vpop.f32.mrf.mxu1  ;;  %v5663_v38 = vshll.u32 %v5527_v46, 16 }
 0x5fd   : > { %6368 = vmatmul.bf16.vlgmr.msra.gmra.mxu3 %v6085_v12  ;;  %v4883_v7 = vpack.c.bf16 %v4851_v3, %v4851_v3  ;;  %v4638_v27 = vadd.f32 %v4637_v58, %v4549_v54  ;;  %v5661_v55 = vor.u32 %v5660_v61, %v5656_v30  ;;  %v607_v12 = vld [vmem:[#allocation4 + $0xc0] sm:$0x1] }
 0x5fe   : > { %v5665_v60 = vrot.slane %v5663_v38, 1  ;;  %v608_v58 = vsel %vm7729_vm5, 0, %v607_v12 }
 0x5ff   : > { %v5126_v16 = vshrl.u32 %v4883_v7, 16  ;;  %v4727_v6 = vadd.f32 %v4726_v50, %v4638_v27  ;;  %v5129_v8 = vshll.u32 %v4883_v7, 16  ;;  %609 = vst [vmem:[#allocation4 + $0xc0] sm:$0x1] %v608_v58 }
 0x600   : > { %v5666_v3 = vsel %vm1650_vm13, %v5661_v55, %v5665_v60 }
 0x601   : > { %v5128_v5 = vrot.slane %v5126_v16, 7  ;;  %v4816_v48 = vadd.f32 %v4815_v44, %v4727_v6  ;;  %v10013_v16 = vld [vmem:[#allocation4 + $0x84] sm:$0xf0]  ;;  %v7513_v6 = vld [vmem:[#allocation4 + $0x78] sm:$0xf0] }
 0x603   : > { %v5906_v21 = vpop.permute.xlu2 %5905  ;;  %v5131_v9 = vor.u32 %v5129_v8, %v5128_v5  ;;  %v4852_v1 = vmax.f32 %v4816_v48, 0.0  ;;  %v5132_v22 = vrot.slane %v5128_v5, 4  ;;  %v5510_v8 = vunpack.c.l.b16 %v5366_v57  ;;  %v5367_v57 = vld [vmem:[#allocation4 + $0x98] sm:$0x1] }
 0x604   : > { %v9971_v31 = vsel %vm2085_vm15, %v5942_v14, %v5906_v21  ;;  %v5670_v21 = vshll.u32 %v10011_v20, 16 }
 0x605   : > { %6058 = vrot.lane.b32.xlu0 %v9971_v31, %s7640_s23  ;;  %v5306_v10 = vsel %vm7764_vm9, %v5131_v9, %v5305_v63  ;;  %v4884_v42 = vpack.c.bf16 %v4852_v1, %v4852_v1  ;;  %v5872_v63 = vrot.slane %v5527_v46, 1  ;;  %v10022_v1 = vpack.c.b16 %v5510_v8, %v5510_v8 }
 0x606   : > { %5307 = vst [vmem:[#allocation4 + $0xb4] sm:$0xf] %v5306_v10  ;;  %v5672_v10 = vrot.slane %v5670_v21, 1 }
 0x607   : > { %v5134_v19 = vshrl.u32 %v4884_v42, 16  ;;  %v5137_v62 = vshll.u32 %v4884_v42, 16  ;;  %v7549_v42 = vld [vmem:[%s10373_s6] ss:$0 sm:$0xff] }
 0x609   : > { %v5136_v43 = vrot.slane %v5134_v19, 7  ;;  %v4463_v19 = vadd.f32 %v7549_v42, %v10413_v28  ;;  %v10063_v28 = vld [vmem:[#allocation4 + $0x9c] sm:$0xff]  }
 0x60a   : > { %v5694_v51 = vshll.u32 %v10063_v28, 16 }
 0x60b   : > { %v5139_v59 = vor.u32 %v5137_v62, %v5136_v43  ;;  %v5141_v35 = vrot.slane %v5136_v43, 4  ;;  %v5764_v7 = vpop.permute.xlu2 %5763  ;;  %v5668_v43 = vshrl.u32 %v10011_v20, 16  ;;  %v5675_v62 = vshll.u32 %v10022_v1, 16 }
 0x60c   : > { %v5944_v27 = vsel %vm2048_vm14, %v9764_v39, %v5764_v7  ;;  %v7514_v39 = vld [vmem:[#allocation4 + $0x78] sm:$0xe]  ;;  %v7605_v7 = vld [vmem:[#allocation4 + $0x84] sm:$0xe] }
 0x60d   : > { %6027 = vrot.lane.b32.xlu0 %v9971_v31, %s7643_s25  ;;  %v5140_v29 = vsel %vm7776_vm11, %v5132_v22, %v5139_v59  ;;  %v5310_v45 = vsel %vm7729_vm5, %v5141_v35, %v5309_v36  ;;  %v7515_v5 = vor.u32 %v7514_v39, %v7513_v6  ;;  %v5673_v35 = vor.u32 %v5672_v10, %v5668_v43 }
 0x60e   : > { %5308 = vst.msk [vmem:[#allocation4 + $0xb8] sm:$0xf] %vm334_vm8, %v5140_v29  ;;  %v5677_v52 = vrot.slane %v5675_v62, 1 }
 0x60f   : > { %5311 = vst [vmem:[#allocation4 + $0xbc] sm:$0x1] %v5310_v45  ;;  %v5871_v9 = vrot.slane %v7515_v5, 1  ;;  %v5312_v5 = vld [vmem:[#allocation4 + $0xc0] sm:$0xf] }
 0x610   : > { %v5678_v17 = vsel %vm1650_vm13, %v5673_v35, %v5677_v52  ;;  %v7516_v35 = vld [vmem:[#allocation4 + $0x90] sm:$0xf0] }
 0x611   : > { %v5873_v11 = vsel %vm1957_vm12, %v5871_v9, %v5872_v63 }
 0x615   : > { %5913 = vrot.lane.b32.xlu0 %v5870_v0, %s7640_s23  ;;  %v10414_v0 = vld [vmem:[#allocation15_spill] sm:$0xff] }
 0x616   : > { %v4465_v38 = vadd.f32 %v7549_v42, %v10414_v0  ;;  %v7517_v0 = vld [vmem:[#allocation4 + $0x90] sm:$0xe] }
 0x61d   : > { %5771 = vrot.lane.b32.xlu0 %v5666_v3, %s7641_s24 }
 0x623   : > { %v6053_v54 = vpop.permute.xlu0 %6052 }
 0x624   : > { %v6133_v24 = vsel %vm2085_vm15, %v9955_v40, %v6053_v54  ;;  %7202 = vmatmul.msk.bf16.vlgmr.msra.gmra.mxu2 %vm2048_vm14, %v6053_v54 }
 0x625   : > { %6457 = vmatmul.bf16.vlgmr.msra.gmra.mxu1 %v6133_v24 }
 0x629   : > { %v4818_v29 = vpop.f32.mrf.mxu0 }
 0x62b   : > { %v6022_v56 = vpop.permute.xlu0 %6021 }
 0x62c   : > { %v6088_v32 = vsel %vm2203_vm0, %v9760_v49, %v6022_v56  ;;  %v655_v49 = vld [vmem:[#allocation4 + $0xc8] sm:$0x1] }
 0x62d   : > { %6373 = vmatmul.bf16.gmra.mxu3 %v6088_v32  ;;  %v656_v44 = vsel %vm7741_vm7, 0, %v655_v49  ;;  %v6057_v18 = vpop.permute.xlu2 %6056 }
 0x62e   : > { %657 = vst [vmem:[#allocation4 + $0xc8] sm:$0x1] %v656_v44 }
 0x633   : > { %v5908_v50 = vpop.permute.xlu0 %5907 }
 0x634   : > { %v10007_v40 = vsel %vm2085_vm15, %v5944_v27, %v5908_v50  ;;  %v4820_v27 = vpop.f32.mrf.mxu0 }
 0x635   : > { %6060 = vrot.lane.b32.xlu1 %v10007_v40, %s7640_s23  ;;  %v10037_v61 = vpop.permute.xlu2 %6025 }
 0x63b   : > { %v4729_v41 = vpop.f32.mrf.mxu2  ;;  %v5766_v47 = vpop.permute.xlu0 %5765 }
 0x63d   : > { %6029 = vrot.lane.b32.xlu1 %v10007_v40, %s7643_s25  ;;  %v5912_v63 = vpop.permute.xlu2 %5911 }
 0x63e   : > { %v6055_v48 = vpop.permute.xlu1 %6054 }
 0x63f   : > { %7203 = vmatmul.msk.bf16.gmra.mxu2 %vm2048_vm14, %v6055_v48  ;;  %v6136_v14 = vsel %vm2085_vm15, %v6022_v56, %v6055_v48  ;;  %v7606_v48 = vor.u32 %v7605_v7, %v10013_v16 }
 0x640   : > { %6462 = vmatmul.bf16.gmra.mxu1 %v6136_v14  ;;  %v4640_v23 = vpop.f32.mrf.mxu1  ;;  %v5511_v14 = vunpack.c.l.b16 %v5367_v57 }
 0x642   : > { %v5529_v62 = vpack.c.b16 %v5511_v14, %v5511_v14  ;;  %v7608_v14 = vld [vmem:[#allocation4 + $0x9c] sm:$0xe] }
 0x644   : > { %v5687_v52 = vshll.u32 %v5529_v62, 16 }
 0x645   : > { %5915 = vrot.lane.b32.xlu1 %v5873_v11, %s7640_s23  ;;  %v6094_v11 = vsel %vm2203_vm0, %v9859_v53, %v10037_v61  ;;  %v5874_v53 = vrot.slane %v7606_v48, 1 }
 0x646   : > { %v4551_v36 = vpop.f32.mrf.mxu3  ;;  %v6024_v4 = vpop.permute.xlu1 %6023 }
 0x647   : > { %v4552_v22 = vadd.f32 %v4551_v36, %v4463_v19  ;;  %v6091_v59 = vsel %vm2203_vm0, %v9795_v15, %v6024_v4  ;;  %v5946_v15 = vsel %vm2048_vm14, %v9788_v33, %v5766_v47  ;;  %v6139_v12 = vsel %vm2085_vm15, %v6024_v4, %v6057_v18  ;;  %v4731_v33 = vpop.f32.mrf.mxu2  ;;  %v5368_v47 = vld [vmem:[#allocation4 + $0xa4] sm:$0x1] }
 0x648   : > { %6378 = vmatmul.bf16.gmra.mxu3 %v6091_v59  ;;  %v4642_v56 = vpop.f32.mrf.mxu1  ;;  %v5875_v19 = vrot.slane %v10022_v1, 1 }
 0x649   : > { %v4641_v45 = vadd.f32 %v4640_v23, %v4552_v22  ;;  %v10068_v23 = vld [vmem:[#allocation4 + $0x90] sm:$0xff]   ;;  %v5316_v22 = vld [vmem:[#allocation4 + $0xc8] sm:$0x1] }
 0x64a   : > { %v5682_v37 = vshll.u32 %v10068_v23, 16  ;;  %v5876_v59 = vsel %vm1957_vm12, %v5874_v53, %v5875_v19 }
 0x64b   : > { %v4730_v46 = vadd.f32 %v4729_v41, %v4641_v45 }
 0x64d   : > { %5773 = vrot.lane.b32.xlu1 %v5678_v17, %s7641_s24  ;;  %v4819_v30 = vadd.f32 %v4818_v29, %v4730_v46  ;;  %v5684_v17 = vrot.slane %v5682_v37, 1 }
 0x64e   : > { %v4553_v60 = vpop.f32.mrf.mxu3  ;;  %v5910_v55 = vpop.permute.xlu1 %5909 }
 0x64f   : > { %v4853_v3 = vmax.f32 %v4819_v30, 0.0  ;;  %v4554_v54 = vadd.f32 %v4553_v60, %v4465_v38  ;;  %v10042_v24 = vsel %vm2085_vm15, %v5946_v15, %v5910_v55  ;;  %7204 = vmatmul.msk.bf16.gmra.mxu2 %vm2048_vm14, %v6057_v18  ;;  %v7518_v38 = vor.u32 %v7517_v0, %v7516_v35 }
 0x650   : > { %6467 = vmatmul.bf16.gmra.mxu1 %v6139_v12  ;;  %6062 = vrot.lane.b32.xlu2 %v10042_v24, %s7640_s23  ;;  %v5512_v30 = vunpack.c.l.b16 %v5368_v47  ;;  %v5680_v15 = vshrl.u32 %v10068_v23, 16  ;;  %v5689_v60 = vrot.slane %v5687_v52, 1  ;;  %v5878_v55 = vrot.slane %v5529_v62, 1 }
 0x651   : > { %v4885_v58 = vpack.c.bf16 %v4853_v3, %v4853_v3  ;;  %v4643_v32 = vadd.f32 %v4642_v56, %v4554_v54  ;;  %v5877_v54 = vrot.slane %v7518_v38, 1 }
 0x652   : > { %v5685_v3 = vor.u32 %v5684_v17, %v5680_v15  ;;  %v5530_v13 = vpack.c.b16 %v5512_v30, %v5512_v30 }
 0x653   : > { %v5143_v50 = vshrl.u32 %v4885_v58, 16  ;;  %v4732_v6 = vadd.f32 %v4731_v33, %v4643_v32  ;;  %v5146_v44 = vshll.u32 %v4885_v58, 16  ;;  %v5879_v56 = vsel %vm1957_vm12, %v5877_v54, %v5878_v55 }
 0x654   : > { %v5690_v12 = vsel %vm1650_vm13, %v5685_v3, %v5689_v60  ;;  %v5696_v58 = vrot.slane %v5694_v51, 1  ;;  %v5692_v32 = vshrl.u32 %v10063_v28, 16  ;;  %v5699_v7 = vshll.u32 %v5530_v13, 16  ;;  %v7610_v51 = vld [vmem:[#allocation4 + $0xb4] sm:$0xf0] }
 0x655   : > { %v5145_v49 = vrot.slane %v5143_v50, 7  ;;  %v4821_v39 = vadd.f32 %v4820_v27, %v4732_v6 }
 0x656   : > { %v5768_v8 = vpop.permute.xlu1 %5767  ;;  %v5697_v33 = vor.u32 %v5696_v58, %v5692_v32  ;;  %v5701_v27 = vrot.slane %v5699_v7, 1  ;;  %v7519_v58 = vld [vmem:[#allocation4 + $0xa8] sm:$0xf0]  ;;  %v5370_v32 = vld [vmem:[#allocation4 + $0xbc] sm:$0x1] }
 0x657   : > { %v5148_v21 = vor.u32 %v5146_v44, %v5145_v49  ;;  %v4854_v9 = vmax.f32 %v4821_v39, 0.0  ;;  %v5948_v18 = vsel %vm2048_vm14, %v9892_v26, %v5768_v8  ;;  %v10065_v26 = vld [vmem:[#allocation4 + $0x9c] sm:$0xf0]  ;;  %v5149_v41 = vrot.slane %v5145_v49, 4  ;;  %v5770_v39 = vpop.permute.xlu2 %5769 }
 0x658   : > { %6383 = vmatmul.bf16.gmra.mxu3 %v6094_v11  ;;  %6031 = vrot.lane.b32.xlu2 %v10042_v24, %s7643_s25  ;;  %v10057_v10 = vsel %vm2085_vm15, %v5948_v18, %v5912_v63  ;;  %v5702_v50 = vsel %vm1650_vm13, %v5697_v33, %v5701_v27  ;;  %v5369_v63 = vld [vmem:[#allocation4 + $0xb0] sm:$0x1]  ;;  %v5881_v18 = vrot.slane %v5530_v13, 1 }
 0x659   : > { %v5313_v16 = vsel %vm7764_vm9, %v5148_v21, %v5312_v5  ;;  %v4886_v42 = vpack.c.bf16 %v4854_v9, %v4854_v9  ;;  %6064 = vrot.lane.b32.xlu0 %v10057_v10, %s7640_s23  ;;  %v5950_v5 = vsel %vm2048_vm14, %v9880_v2, %v5770_v39  ;;  %v5513_v21 = vunpack.c.l.b16 %v5369_v63  ;;  %v7611_v39 = vld [vmem:[#allocation4 + $0xb4] sm:$0xe] }
 0x65a   : > { %5314 = vst [vmem:[#allocation4 + $0xc0] sm:$0xf] %v5313_v16 }
 0x65b   : > { %v5151_v43 = vshrl.u32 %v4886_v42, 16  ;;  %v5154_v4 = vshll.u32 %v4886_v42, 16  ;;  %v10106_v2 = vpack.c.b16 %v5513_v21, %v5513_v21 }
 0x65d   : > { %v5153_v36 = vrot.slane %v5151_v43, 7  ;;  %v5711_v42 = vshll.u32 %v10106_v2, 16  ;;  %v10116_v43 = vld [vmem:[%s10375_s8] ss:$0 sm:$0xff] }
 0x65f   : > { %v5156_v29 = vor.u32 %v5154_v4, %v5153_v36  ;;  %v5158_v45 = vrot.slane %v5153_v36, 4  ;;  %v5713_v19 = vrot.slane %v5711_v42, 1 }
 0x660   : > { %5917 = vrot.lane.b32.xlu2 %v5876_v59, %s7640_s23 }
 0x661   : > { %v5157_v1 = vsel %vm7776_vm11, %v5149_v41, %v5156_v29  ;;  %v5317_v46 = vsel %vm7729_vm5, %v5158_v45, %v5316_v22  ;;  %6033 = vrot.lane.b32.xlu0 %v10057_v10, %s7643_s25  ;;  %vm6726_vm5 = vcmask 1043456  }
 0x662   : > { %5315 = vst.msk [vmem:[#allocation4 + $0xc4] sm:$0xf] %vm334_vm8, %v5157_v1 }
 0x663   : > { %5318 = vst [vmem:[#allocation4 + $0xc8] sm:$0x1] %v5317_v46 }
 0x668   : > { %5775 = vrot.lane.b32.xlu2 %v5690_v12, %s7641_s24 }
 0x669   : > { %5919 = vrot.lane.b32.xlu0 %v5879_v56, %s7640_s23 }
 0x66a   : > { %v5371_v21 = vld [vmem:[#allocation4 + $0xc8] sm:$0x1] }
 0x671   : > { %5777 = vrot.lane.b32.xlu0 %v5702_v50, %s7641_s24 }
 0x677   : > { %v6059_v6 = vpop.permute.xlu0 %6058 }
 0x678   : > { %7205 = vmatmul.msk.bf16.gmra.mxu2 %vm2048_vm14, %v6059_v6  ;;  %v6142_v57 = vsel %vm2085_vm15, %v10037_v61, %v6059_v6  ;;  %v7609_v61 = vor.u32 %v7608_v14, %v10065_v26  ;;  %v7520_v6 = vld [vmem:[#allocation4 + $0xa8] sm:$0xe] }
 0x679   : > { %6472 = vmatmul.bf16.gmra.mxu1 %v6142_v57  ;;  %v7521_v57 = vor.u32 %v7520_v6, %v7519_v58  ;;  %v5372_v6 = vld [vmem:[#allocation4 + $0xd4] sm:$0x1] }
 0x67a   : > { %v5880_v9 = vrot.slane %v7609_v61, 1 }
 0x67b   : > { %v5883_v63 = vrot.slane %v7521_v57, 1  ;;  %v5516_v57 = vunpack.c.l.b16 %v5372_v6 }
 0x67c   : > { %v5882_v16 = vsel %vm1957_vm12, %v5880_v9, %v5881_v18 }
 0x67f   : > { %v6028_v49 = vpop.permute.xlu0 %6027 }
 0x680   : > { %v6097_v44 = vsel %vm2203_vm0, %v9876_v34, %v6028_v49  ;;  %v10104_v34 = vld [vmem:[#allocation4 + $0xa8] sm:$0xff]   ;;  %v6369_v62 = vpop.f32.mrf.mxu3 }
 0x681   : > { %6388 = vmatmul.bf16.gmra.mxu3 %v6097_v44  ;;  %v5706_v11 = vshll.u32 %v10104_v34, 16  ;;  %v5704_v26 = vshrl.u32 %v10104_v34, 16  ;;  %v6370_v37 = vadd.f32 %v10116_v43, %v6369_v62 }
 0x683   : > { %v5708_v53 = vrot.slane %v5706_v11, 1  ;;  %v7612_v11 = vor.u32 %v7611_v39, %v7610_v51 }
 0x685   : > { %v5709_v36 = vor.u32 %v5708_v53, %v5704_v26 }
 0x687   : > { %v5914_v8 = vpop.permute.xlu0 %5913  ;;  %v5714_v4 = vsel %vm1650_vm13, %v5709_v36, %v5713_v19  ;;  %v5886_v36 = vrot.slane %v7612_v11, 1 }
 0x688   : > { %v10097_v48 = vsel %vm2085_vm15, %v5950_v5, %v5914_v8  ;;  %v10127_v46 = vpop.f32.mrf.mxu3 }
 0x689   : > { %6066 = vrot.lane.b32.xlu1 %v10097_v48, %s7640_s23 }
 0x68f   : > { %v5772_v17 = vpop.permute.xlu0 %5771 }
 0x690   : > { %v5952_v30 = vsel %vm2048_vm14, %v9988_v25, %v5772_v17 }
 0x691   : > { %6035 = vrot.lane.b32.xlu1 %v10097_v48, %s7643_s25 }
 0x699   : > { %5921 = vrot.lane.b32.xlu1 %v5882_v16, %s7640_s23  ;;  %v5515_v16 = vunpack.c.l.b16 %v5371_v21 }
 0x6a1   : > { %5779 = vrot.lane.b32.xlu1 %v5714_v4, %s7641_s24  ;;  %v10171_v4 = vld [vmem:[#allocation4 + $0xc0] sm:$0xff]  }
 0x6a2   : > { %v6458_v22 = vpop.f32.mrf.mxu1 }
 0x6a3   : > { %v6459_v59 = vadd.f32 %v6458_v22, %v6370_v37 }
 0x6a7   : > { %v6547_v35 = vpop.f32.mrf.mxu2  ;;  %v6061_v41 = vpop.permute.xlu1 %6060 }
 0x6a8   : > { %v10121_v29 = vadd.f32 %v6547_v35, %v6459_v59  ;;  %7206 = vmatmul.msk.bf16.gmra.mxu2 %vm2048_vm14, %v6061_v41  ;;  %v6145_v45 = vsel %vm2085_vm15, %v6028_v49, %v6061_v41  ;;  %v5514_v49 = vunpack.c.l.b16 %v5370_v32  ;;  %v5533_v35 = vpack.c.b16 %v5515_v16, %v5515_v16 }
 0x6a9   : > { %6477 = vmatmul.bf16.gmra.mxu1 %v6145_v45 }
 0x6aa   : > { %v6063_v52 = vpop.permute.xlu2 %6062  ;;  %v10129_v0 = vpop.f32.mrf.mxu1  ;;  %v5532_v61 = vpack.c.b16 %v5514_v49, %v5514_v49  ;;  %v7522_v49 = vld [vmem:[#allocation4 + $0xc0] sm:$0xf0] }
 0x6ac   : > { %v5887_v59 = vrot.slane %v5532_v61, 1 }
 0x6ae   : > { %v5888_v17 = vsel %vm1957_vm12, %v5886_v36, %v5887_v59 }
 0x6af   : > { %v6030_v47 = vpop.permute.xlu1 %6029  ;;  %v10142_v54 = vpop.f32.mrf.mxu2 }
 0x6b0   : > { %v6100_v1 = vsel %vm2203_vm0, %v9971_v31, %v6030_v47  ;;  %v6148_v55 = vsel %vm2085_vm15, %v6030_v47, %v6063_v52  ;;  %v10140_v31 = vld [vmem:[#allocation4 + $0xb4] sm:$0xff]   ;;  %v6374_v3 = vpop.f32.mrf.mxu3  ;;  %v5730_v47 = vshll.u32 %v10171_v4, 16 }
 0x6b1   : > { %6393 = vmatmul.bf16.gmra.mxu3 %v6100_v1  ;;  %v6375_v25 = vadd.f32 %v10116_v43, %v6374_v3  ;;  %v5718_v8 = vshll.u32 %v10140_v31, 16  ;;  %v5716_v42 = vshrl.u32 %v10140_v31, 16 }
 0x6b2   : > { %v6032_v38 = vpop.permute.xlu2 %6031 }
 0x6b3   : > { %v6103_v27 = vsel %vm2203_vm0, %v10007_v40, %v6032_v38  ;;  %v5884_v40 = vrot.slane %v10106_v2, 1  ;;  %v5720_v18 = vrot.slane %v5718_v8, 1  ;;  %v5723_v2 = vshll.u32 %v5532_v61, 16 }
 0x6b5   : > { %v5885_v9 = vsel %vm1957_vm12, %v5883_v63, %v5884_v40  ;;  %v5721_v62 = vor.u32 %v5720_v18, %v5716_v42  ;;  %v5725_v45 = vrot.slane %v5723_v2, 1  ;;  %v5534_v40 = vpack.c.b16 %v5516_v57, %v5516_v57 }
 0x6b6   : > { %v5890_v63 = vrot.slane %v5533_v35, 1 }
 0x6b7   : > { %v5916_v15 = vpop.permute.xlu1 %5915  ;;  %v5726_v1 = vsel %vm1650_vm13, %v5721_v62, %v5725_v45  ;;  %v5747_v18 = vshll.u32 %v5534_v40, 16 }
 0x6b8   : > { %v10134_v60 = vsel %vm2085_vm15, %v5952_v30, %v5916_v15  ;;  %7207 = vmatmul.msk.bf16.gmra.mxu2 %vm2048_vm14, %v6063_v52  ;;  %v10156_v5 = vpop.f32.mrf.mxu3  ;;  %v5735_v30 = vshll.u32 %v5533_v35, 16 }
 0x6b9   : > { %6482 = vmatmul.bf16.gmra.mxu1 %v6148_v55  ;;  %6068 = vrot.lane.b32.xlu2 %v10134_v60, %s7640_s23  ;;  %v5732_v55 = vrot.slane %v5730_v47, 1  ;;  %v5749_v2 = vrot.slane %v5747_v18, 1 }
 0x6ba   : > { %v5918_v7 = vpop.permute.xlu2 %5917 }
 0x6bd   : > { %v6463_v13 = vpop.f32.mrf.mxu1 }
 0x6be   : > { %v6464_v12 = vadd.f32 %v6463_v13, %v6375_v25  ;;  %v5728_v25 = vshrl.u32 %v10171_v4, 16  ;;  %v5737_v13 = vrot.slane %v5735_v30, 1 }
 0x6bf   : > { %v5774_v56 = vpop.permute.xlu1 %5773 }
 0x6c0   : > { %v5954_v33 = vsel %vm2048_vm14, %v10011_v20, %v5774_v56 }
 0x6c1   : > { %6398 = vmatmul.bf16.gmra.mxu3 %v6103_v27  ;;  %6037 = vrot.lane.b32.xlu2 %v10134_v60, %s7643_s25  ;;  %v10152_v50 = vsel %vm2085_vm15, %v5954_v33, %v5918_v7  ;;  %v7613_v27 = vld [vmem:[#allocation4 + $0xcc] sm:$0xf0] }
 0x6c2   : > { %6070 = vrot.lane.b32.xlu0 %v10152_v50, %s7640_s23  ;;  %v6552_v44 = vpop.f32.mrf.mxu2  ;;  %v5776_v56 = vpop.permute.xlu2 %5775 }
 0x6c3   : > { %v10158_v20 = vadd.f32 %v6552_v44, %v6464_v12  ;;  %v5733_v12 = vor.u32 %v5732_v55, %v5728_v25  ;;  %v5956_v32 = vsel %vm2048_vm14, %v10068_v23, %v5776_v56  ;;  %v7523_v44 = vld [vmem:[#allocation4 + $0xc0] sm:$0xe] }
 0x6c4   : > { %v7524_v39 = vor.u32 %v7523_v44, %v7522_v49 }
 0x6c5   : > { %v10162_v14 = vpop.f32.mrf.mxu1  ;;  %v5738_v58 = vsel %vm1650_vm13, %v5733_v12, %v5737_v13 }
 0x6c6   : > { %v5889_v61 = vrot.slane %v7524_v39, 1 }
 0x6c8   : > { %v5891_v11 = vsel %vm1957_vm12, %v5889_v61, %v5890_v63 }
 0x6c9   : > { %5923 = vrot.lane.b32.xlu2 %v5885_v9, %s7640_s23 }
 0x6ca   : > { %6039 = vrot.lane.b32.xlu0 %v10152_v50, %s7643_s25  ;;  %v10169_v53 = vpop.f32.mrf.mxu2 }
 0x6cb   : > { %v6379_v26 = vpop.f32.mrf.mxu3  ;;  %v6065_v19 = vpop.permute.xlu0 %6064 }
 0x6cc   : > { %v6380_v37 = vadd.f32 %v10116_v43, %v6379_v26  ;;  %7208 = vmatmul.msk.bf16.gmra.mxu2 %vm2048_vm14, %v6065_v19  ;;  %v6151_v22 = vsel %vm2085_vm15, %v6032_v38, %v6065_v19 }
 0x6cd   : > { %v6468_v41 = vpop.f32.mrf.mxu1  ;;  %6487 = vmatmul.bf16.gmra.mxu1 %v6151_v22 }
 0x6ce   : > { %v6469_v52 = vadd.f32 %v6468_v41, %v6380_v37 }
 0x6d1   : > { %5781 = vrot.lane.b32.xlu2 %v5726_v1, %s7641_s24 }
 0x6d2   : > { %5925 = vrot.lane.b32.xlu0 %v5888_v17, %s7640_s23  ;;  %v6557_v15 = vpop.f32.mrf.mxu2 }
 0x6d3   : > { %v10181_v38 = vadd.f32 %v6557_v15, %v6469_v52  ;;  %v6034_v51 = vpop.permute.xlu0 %6033  ;;  %v10200_v8 = vpop.f32.mrf.mxu3  ;;  %v7614_v15 = vld [vmem:[#allocation4 + $0xcc] sm:$0xe] }
 0x6d4   : > { %v6106_v3 = vsel %vm2203_vm0, %v10042_v24, %v6034_v51  ;;  %v10195_v24 = vld [vmem:[#allocation4 + $0xcc] sm:$0xff]  }
 0x6d5   : > { %6403 = vmatmul.bf16.gmra.mxu3 %v6106_v3  ;;  %v5742_v23 = vshll.u32 %v10195_v24, 16  ;;  %v5740_v21 = vshrl.u32 %v10195_v24, 16  ;;  %v10204_v16 = vpop.f32.mrf.mxu1  ;;  %v7615_v3 = vor.u32 %v7614_v15, %v7613_v27 }
 0x6d7   : > { %v5744_v9 = vrot.slane %v5742_v23, 1 }
 0x6d9   : > { %v5745_v42 = vor.u32 %v5744_v9, %v5740_v21 }
 0x6da   : > { %5783 = vrot.lane.b32.xlu0 %v5738_v58, %s7641_s24  ;;  %v10207_v19 = vpop.f32.mrf.mxu2 }
 0x6db   : > { %v5920_v7 = vpop.permute.xlu0 %5919  ;;  %v6384_v26 = vpop.f32.mrf.mxu3  ;;  %v5750_v62 = vsel %vm1650_vm13, %v5745_v42, %v5749_v2 }
 0x6dc   : > { %v10191_v33 = vsel %vm2085_vm15, %v5956_v32, %v5920_v7  ;;  %v6385_v36 = vadd.f32 %v10116_v43, %v6384_v26 }
 0x6dd   : > { %6072 = vrot.lane.b32.xlu1 %v10191_v33, %s7640_s23 }
 0x6e3   : > { %v5778_v1 = vpop.permute.xlu0 %5777  ;;  %v10229_v13 = vpop.f32.mrf.mxu3 }
 0x6e4   : > { %v5958_v17 = vsel %vm2048_vm14, %v10063_v28, %v5778_v1  ;;  %v5893_v28 = vrot.slane %v5534_v40, 1 }
 0x6e5   : > { %6041 = vrot.lane.b32.xlu1 %v10191_v33, %s7643_s25 }
 0x6ed   : > { %5927 = vrot.lane.b32.xlu1 %v5891_v11, %s7640_s23 }
 0x6f5   : > { %5785 = vrot.lane.b32.xlu1 %v5750_v62, %s7641_s24 }
 0x6f6   : > { %v6473_v37 = vpop.f32.mrf.mxu1 }
 0x6f7   : > { %v6474_v22 = vadd.f32 %v6473_v37, %v6385_v36 }
 0x6fb   : > { %v6562_v59 = vpop.f32.mrf.mxu2  ;;  %v6067_v35 = vpop.permute.xlu1 %6066 }
 0x6fc   : > { %v10212_v41 = vadd.f32 %v6562_v59, %v6474_v22  ;;  %7209 = vmatmul.msk.bf16.gmra.mxu2 %vm2048_vm14, %v6067_v35  ;;  %v6154_v45 = vsel %vm2085_vm15, %v6034_v51, %v6067_v35 }
 0x6fd   : > { %6492 = vmatmul.bf16.gmra.mxu1 %v6154_v45 }
 0x6fe   : > { %v10235_v32 = vpop.f32.mrf.mxu1 }
 0x703   : > { %v6036_v52 = vpop.permute.xlu1 %6035  ;;  %v10237_v6 = vpop.f32.mrf.mxu2 }
 0x704   : > { %v6109_v47 = vsel %vm2203_vm0, %v10057_v10, %v6036_v52  ;;  %v5892_v10 = vrot.slane %v7615_v3, 1  ;;  %v6389_v7 = vpop.f32.mrf.mxu3 }
 0x705   : > { %6408 = vmatmul.bf16.gmra.mxu3 %v6109_v47  ;;  %v6390_v39 = vadd.f32 %v10116_v43, %v6389_v7 }
 0x706   : > { %v5894_v12 = vsel %vm1957_vm12, %v5892_v10, %v5893_v28 }
 0x70b   : > { %v5922_v30 = vpop.permute.xlu1 %5921 }
 0x70c   : > { %v10221_v55 = vsel %vm2085_vm15, %v5958_v17, %v5922_v30  ;;  %v6391_v23 = vpop.f32.mrf.mxu3 }
 0x70d   : > { %6074 = vrot.lane.b32.xlu2 %v10221_v55, %s7640_s23  ;;  %v6392_v21 = vadd.f32 %v10116_v43, %v6391_v23 }
 0x713   : > { %v6069_v51 = vpop.permute.xlu2 %6068  ;;  %v5780_v27 = vpop.permute.xlu1 %5779 }
 0x714   : > { %7210 = vmatmul.msk.bf16.gmra.mxu2 %vm2048_vm14, %v6069_v51  ;;  %v6157_v25 = vsel %vm2085_vm15, %v6036_v52, %v6069_v51  ;;  %v5960_v57 = vsel %vm2048_vm14, %v10104_v34, %v5780_v27 }
 0x715   : > { %6497 = vmatmul.bf16.gmra.mxu1 %v6157_v25  ;;  %6043 = vrot.lane.b32.xlu2 %v10221_v55, %s7643_s25 }
 0x71b   : > { %v6038_v56 = vpop.permute.xlu2 %6037 }
 0x71c   : > { %v6112_v58 = vsel %vm2203_vm0, %v10097_v48, %v6038_v56 }
 0x71d   : > { %6413 = vmatmul.bf16.gmra.mxu3 %v6112_v58  ;;  %5929 = vrot.lane.b32.xlu2 %v5894_v12, %s7640_s23 }
 0x723   : > { %v5924_v49 = vpop.permute.xlu2 %5923 }
 0x724   : > { %v10242_v44 = vsel %vm2085_vm15, %v5960_v57, %v5924_v49 }
 0x725   : > { %6076 = vrot.lane.b32.xlu0 %v10242_v44, %s7640_s23 }
 0x726   : > { %v6478_v48 = vpop.f32.mrf.mxu1 }
 0x727   : > { %v6479_v40 = vadd.f32 %v6478_v48, %v6390_v39 }
 0x72b   : > { %v6567_v63 = vpop.f32.mrf.mxu2  ;;  %v5782_v30 = vpop.permute.xlu2 %5781 }
 0x72c   : > { %v10247_v61 = vadd.f32 %v6567_v63, %v6479_v40  ;;  %v5962_v3 = vsel %vm2048_vm14, %v10140_v31, %v5782_v30 }
 0x72d   : > { %6045 = vrot.lane.b32.xlu0 %v10242_v44, %s7643_s25 }
 0x72e   : > { %v6480_v34 = vpop.f32.mrf.mxu1 }
 0x72f   : > { %v6481_v9 = vadd.f32 %v6480_v34, %v6392_v21 }
 0x733   : > { %v6569_v18 = vpop.f32.mrf.mxu2 }
 0x734   : > { %v10252_v11 = vadd.f32 %v6569_v18, %v6481_v9  ;;  %v6394_v42 = vpop.f32.mrf.mxu3  ;;  %v6071_v2 = vpop.permute.xlu0 %6070 }
 0x735   : > { %v6395_v26 = vadd.f32 %v10116_v43, %v6394_v42  ;;  %7211 = vmatmul.msk.bf16.gmra.mxu2 %vm2048_vm14, %v6071_v2  ;;  %v6160_v62 = vsel %vm2085_vm15, %v6038_v56, %v6071_v2 }
 0x736   : > { %v6483_v36 = vpop.f32.mrf.mxu1  ;;  %6502 = vmatmul.bf16.gmra.mxu1 %v6160_v62 }
 0x737   : > { %v6484_v37 = vadd.f32 %v6483_v36, %v6395_v26 }
 0x73b   : > { %v6572_v22 = vpop.f32.mrf.mxu2 }
 0x73c   : > { %v10257_v59 = vadd.f32 %v6572_v22, %v6484_v37  ;;  %v6396_v35 = vpop.f32.mrf.mxu3  ;;  %v6040_v45 = vpop.permute.xlu0 %6039 }
 0x73d   : > { %v6397_v52 = vadd.f32 %v10116_v43, %v6396_v35  ;;  %v6115_v47 = vsel %vm2203_vm0, %v10134_v60, %v6040_v45 }
 0x73e   : > { %6418 = vmatmul.bf16.gmra.mxu3 %v6115_v47  ;;  %v6485_v1 = vpop.f32.mrf.mxu1 }
 0x73f   : > { %v6486_v17 = vadd.f32 %v6485_v1, %v6397_v52 }
 0x743   : > { %v6574_v15 = vpop.f32.mrf.mxu2 }
 0x744   : > { %v10264_v51 = vadd.f32 %v6574_v15, %v6486_v17  ;;  %v5926_v25 = vpop.permute.xlu0 %5925  ;;  %v6399_v10 = vpop.f32.mrf.mxu3  ;;  %v6372_v15 = vadd.f32 %v10116_v43, %v10127_v46  ;;  %v6629_v46 = vmax.f32 %v10158_v20, 0.0 }
 0x745   : > { %v10267_v28 = vsel %vm2085_vm15, %v5962_v3, %v5926_v25  ;;  %v6400_v60 = vadd.f32 %v10116_v43, %v6399_v10 }
 0x746   : > { %6047 = vrot.lane.b32.xlu2 %v10267_v28, %s7643_s25  ;;  %6078 = vrot.lane.b32.xlu1 %v10267_v28, %s7640_s23  ;;  %v6461_v10 = vadd.f32 %v10129_v0, %v6372_v15 }
 0x74a   : > { %v6488_v12 = vpop.f32.mrf.mxu1 }
 0x74b   : > { %v6489_v56 = vadd.f32 %v6488_v12, %v6400_v60  ;;  %v6550_v60 = vadd.f32 %v10142_v54, %v6461_v10  ;;  %v6635_v10 = vmax.f32 %v10247_v61, 0.0 }
 0x74c   : > { %v6401_v58 = vpop.f32.mrf.mxu3  ;;  %v5784_v34 = vpop.permute.xlu0 %5783 }
 0x74d   : > { %v6402_v49 = vadd.f32 %v10116_v43, %v6401_v58  ;;  %v5964_v9 = vsel %vm2048_vm14, %v10171_v4, %v5784_v34  ;;  %v6628_v58 = vmax.f32 %v6550_v60, 0.0 }
 0x74f   : > { %v6577_v7 = vpop.f32.mrf.mxu2  ;;  %v6073_v31 = vpop.permute.xlu1 %6072 }
 0x750   : > { %v10274_v27 = vadd.f32 %v6577_v7, %v6489_v56  ;;  %7212 = vmatmul.msk.bf16.gmra.mxu2 %vm2048_vm14, %v6073_v31  ;;  %v6163_v57 = vsel %vm2085_vm15, %v6040_v45, %v6073_v31  ;;  %v6377_v31 = vadd.f32 %v10116_v43, %v10156_v5 }
 0x751   : > { %6507 = vmatmul.bf16.gmra.mxu1 %v6163_v57 }
 0x752   : > { %v6490_v39 = vpop.f32.mrf.mxu1 }
 0x753   : > { %v6491_v48 = vadd.f32 %v6490_v39, %v6402_v49 }
 0x757   : > { %v6579_v40 = vpop.f32.mrf.mxu2  ;;  %v6042_v23 = vpop.permute.xlu1 %6041 }
 0x758   : > { %v10279_v63 = vadd.f32 %v6579_v40, %v6491_v48  ;;  %v6118_v21 = vsel %vm2203_vm0, %v10152_v50, %v6042_v23  ;;  %v6404_v4 = vpop.f32.mrf.mxu3 }
 0x759   : > { %6423 = vmatmul.bf16.gmra.mxu3 %v6118_v21  ;;  %v6405_v45 = vadd.f32 %v10116_v43, %v6404_v4 }
 0x75f   : > { %v5928_v18 = vpop.permute.xlu1 %5927 }
 0x760   : > { %v6000_v42 = vsel %vm2085_vm15, %v5964_v9, %v5928_v18  ;;  %v6406_v1 = vpop.f32.mrf.mxu3 }
 0x761   : > { %6049 = vrot.lane.b32.xlu1 %v6000_v42, %s7643_s25  ;;  %6080 = vrot.lane.b32.xlu0 %v6000_v42, %s7640_s23  ;;  %v6382_v42 = vadd.f32 %v10116_v43, %v10200_v8 }
 0x767   : > { %v6075_v2 = vpop.permute.xlu2 %6074  ;;  %v5786_v36 = vpop.permute.xlu1 %5785 }
 0x768   : > { %7213 = vmatmul.msk.bf16.gmra.mxu2 %vm2048_vm14, %v6075_v2  ;;  %v6166_v26 = vsel %vm2085_vm15, %v6042_v23, %v6075_v2  ;;  %v5966_v37 = vsel %vm2048_vm14, %v10195_v24, %v5786_v36  ;;  %v6627_v24 = vmax.f32 %v10121_v29, 0.0  ;;  %v6466_v29 = vadd.f32 %v10162_v14, %v6377_v31 }
 0x769   : > { %6512 = vmatmul.bf16.gmra.mxu1 %v6166_v26  ;;  %v6471_v36 = vadd.f32 %v10204_v16, %v6382_v42 }
 0x76a   : > { %v6555_v0 = vadd.f32 %v10169_v53, %v6466_v29 }
 0x76b   : > { %v6560_v4 = vadd.f32 %v10207_v19, %v6471_v36 }
 0x76c   : > { %v6630_v5 = vmax.f32 %v6555_v0, 0.0 }
 0x76f   : > { %v6044_v62 = vpop.permute.xlu2 %6043 }
 0x770   : > { %v6121_v50 = vsel %vm2203_vm0, %v10191_v33, %v6044_v62  ;;  %v6407_v33 = vadd.f32 %v10116_v43, %v6406_v1 }
 0x771   : > { %6428 = vmatmul.bf16.gmra.mxu3 %v6121_v50 }
 0x777   : > { %v5930_v22 = vpop.permute.xlu2 %5929 }
 0x778   : > { %v6002_v35 = vsel %vm2085_vm15, %v5966_v37, %v5930_v22  ;;  %v6632_v37 = vmax.f32 %v6560_v4, 0.0 }
 0x779   : > { %6082 = vrot.lane.b32.xlu2 %v6002_v35, %s7640_s23  ;;  %s7221_s23 = sshll.u32 %s10416_s10, 3 }
 0x77a   : > { %v6493_v52 = vpop.f32.mrf.mxu1  ;;  %s332_s28 = scalar_lea.vmem %s10376_s9, %s7221_s23 }
 0x77b   : > { %v6494_v47 = vadd.f32 %v6493_v52, %v6405_v45 }
 0x77f   : > { %v6582_v17 = vpop.f32.mrf.mxu2 }
 0x780   : > { %v10297_v30 = vadd.f32 %v6582_v17, %v6494_v47 }
 0x782   : > { %v6495_v3 = vpop.f32.mrf.mxu1 }
 0x783   : > { %v6496_v25 = vadd.f32 %v6495_v3, %v6407_v33  ;;  %6659 = vxpose.xlu0.b32.start [1/16] (narrow) %v6627_v24, 8 }
 0x787   : > { %v6584_v12 = vpop.f32.mrf.mxu2 }
 0x788   : > { %v10305_v56 = vadd.f32 %v6584_v12, %v6496_v25  ;;  %v6409_v7 = vpop.f32.mrf.mxu3  ;;  %v6636_v12 = vmax.f32 %v10252_v11, 0.0 }
 0x789   : > { %v6410_v49 = vadd.f32 %v10116_v43, %v6409_v7 }
 0x78b   : > { %6660 = vxpose.xlu0.b32.cont [2/16] (narrow) %v6628_v58, 8 }
 0x790   : > { %v6411_v21 = vpop.f32.mrf.mxu3 }
 0x791   : > { %v6412_v14 = vadd.f32 %v10116_v43, %v6411_v21 }
 0x792   : > { %v6498_v57 = vpop.f32.mrf.mxu1 }
 0x793   : > { %6661 = vxpose.xlu0.b32.cont [3/16] (narrow) %v6629_v46, 8  ;;  %v6499_v54 = vadd.f32 %v6498_v57, %v6410_v49  ;;  %v6637_v46 = vmax.f32 %v10257_v59, 0.0 }
 0x797   : > { %v6587_v39 = vpop.f32.mrf.mxu2  ;;  %v6077_v48 = vpop.permute.xlu0 %6076 }
 0x798   : > { %v6588_v40 = vadd.f32 %v6587_v39, %v6499_v54  ;;  %7214 = vmatmul.msk.bf16.gmra.mxu2 %vm2048_vm14, %v6077_v48  ;;  %v6169_v23 = vsel %vm2085_vm15, %v6044_v62, %v6077_v48  ;;  %v6631_v62 = vmax.f32 %v10181_v38, 0.0  ;;  %v6633_v38 = vmax.f32 %v10212_v41, 0.0 }
 0x799   : > { %6517 = vmatmul.bf16.gmra.mxu1 %v6169_v23  ;;  %v6638_v23 = vmax.f32 %v10264_v51, 0.0  ;;  %v6640_v51 = vmax.f32 %v10279_v63, 0.0  ;;  %v6642_v63 = vmax.f32 %v10305_v56, 0.0 }
 0x79a   : > { %v6643_v20 = vmax.f32 %v6588_v40, 0.0  ;;  %v6500_v34 = vpop.f32.mrf.mxu1 }
 0x79b   : > { %6662 = vxpose.xlu0.b32.cont [4/16] (narrow) %v6630_v5, 8  ;;  %v6501_v9 = vadd.f32 %v6500_v34, %v6412_v14 }
 0x79c   : > { %6691 = vxpose.xlu1.b32.start [1/16] (narrow) %v6643_v20, 8 }
 0x79f   : > { %v6589_v18 = vpop.f32.mrf.mxu2  ;;  %v6046_v53 = vpop.permute.xlu0 %6045 }
 0x7a0   : > { %v6590_v2 = vadd.f32 %v6589_v18, %v6501_v9  ;;  %v6124_v26 = vsel %vm2203_vm0, %v10221_v55, %v6046_v53  ;;  %v6048_v22 = vpop.permute.xlu2 %6047  ;;  %v6414_v35 = vpop.f32.mrf.mxu3  ;;  %v6387_v55 = vadd.f32 %v10116_v43, %v10229_v13 }
 0x7a1   : > { %6433 = vmatmul.bf16.gmra.mxu3 %v6124_v26  ;;  %v6127_v8 = vsel %vm2203_vm0, %v10242_v44, %v6048_v22  ;;  %v6415_v52 = vadd.f32 %v10116_v43, %v6414_v35 }
 0x7a2   : > { %v6644_v50 = vmax.f32 %v6590_v2, 0.0  ;;  %v6476_v16 = vadd.f32 %v10235_v32, %v6387_v55 }
 0x7a3   : > { %6663 = vxpose.xlu0.b32.cont [5/16] (narrow) %v6631_v62, 8 }
 0x7a4   : > { %6692 = vxpose.xlu1.b32.cont [2/16] (narrow) %v6644_v50, 8  ;;  %v6565_v19 = vadd.f32 %v10237_v6, %v6476_v16 }
 0x7a6   : > { %v6634_v15 = vmax.f32 %v6565_v19, 0.0 }
 0x7a8   : > { %v6416_v13 = vpop.f32.mrf.mxu3 }
 0x7a9   : > { %v6417_v32 = vadd.f32 %v10116_v43, %v6416_v13 }
 0x7ab   : > { %6664 = vxpose.xlu0.b32.cont [6/16] (narrow) %v6632_v37, 8  ;;  %v6641_v37 = vmax.f32 %v10297_v30, 0.0 }
 0x7b1   : > { %6438 = vmatmul.bf16.gmra.mxu3 %v6127_v8 }
 0x7b3   : > { %v6503_v45 = vpop.f32.mrf.mxu1  ;;  %6665 = vxpose.xlu0.b32.cont [7/16] (narrow) %v6633_v38, 8 }
 0x7b4   : > { %v6504_v47 = vadd.f32 %v6503_v45, %v6415_v52 }
 0x7b8   : > { %v6592_v1 = vpop.f32.mrf.mxu2  ;;  %v6079_v17 = vpop.permute.xlu1 %6078 }
 0x7b9   : > { %v6593_v33 = vadd.f32 %v6592_v1, %v6504_v47  ;;  %7215 = vmatmul.msk.bf16.gmra.mxu2 %vm2048_vm14, %v6079_v17  ;;  %v6172_v44 = vsel %vm2085_vm15, %v6046_v53, %v6079_v17 }
 0x7ba   : > { %6522 = vmatmul.bf16.gmra.mxu1 %v6172_v44 }
 0x7bb   : > { %v6645_v41 = vmax.f32 %v6593_v33, 0.0  ;;  %v6505_v24 = vpop.f32.mrf.mxu1  ;;  %6666 = vxpose.xlu0.b32.cont [8/16] (narrow) %v6634_v15, 8 }
 0x7bc   : > { %v6506_v3 = vadd.f32 %v6505_v24, %v6417_v32 }
 0x7bd   : > { %6693 = vxpose.xlu1.b32.cont [3/16] (narrow) %v6645_v41, 8 }
 0x7c0   : > { %v6594_v25 = vpop.f32.mrf.mxu2 }
 0x7c1   : > { %v6595_v6 = vadd.f32 %v6594_v25, %v6506_v3  ;;  %v6419_v58 = vpop.f32.mrf.mxu3 }
 0x7c2   : > { %v6420_v31 = vadd.f32 %v10116_v43, %v6419_v58 }
 0x7c3   : > { %v6646_v60 = vmax.f32 %v6595_v6, 0.0  ;;  %6667 = vxpose.xlu0.b32.cont [9/16] (narrow) %v6635_v10, 8 }
 0x7c5   : > { %6694 = vxpose.xlu1.b32.cont [4/16] (narrow) %v6646_v60, 8 }
 0x7c9   : > { %v6421_v39 = vpop.f32.mrf.mxu3 }
 0x7ca   : > { %v6422_v59 = vadd.f32 %v10116_v43, %v6421_v39 }
 0x7cb   : > { %6668 = vxpose.xlu0.b32.cont [10/16] (narrow) %v6636_v12, 8 }
 0x7ce   : > { %v6508_v7 = vpop.f32.mrf.mxu1 }
 0x7cf   : > { %v6509_v57 = vadd.f32 %v6508_v7, %v6420_v31 }
 0x7d3   : > { %v6597_v29 = vpop.f32.mrf.mxu2  ;;  %v6050_v49 = vpop.permute.xlu1 %6049  ;;  %6669 = vxpose.xlu0.b32.cont [11/16] (narrow) %v6637_v46, 8 }
 0x7d4   : > { %v6598_v0 = vadd.f32 %v6597_v29, %v6509_v57  ;;  %v6081_v54 = vpop.permute.xlu0 %6080  ;;  %v6130_v61 = vsel %vm2203_vm0, %v10267_v28, %v6050_v49  ;;  %v6639_v28 = vmax.f32 %v10274_v27, 0.0  ;;  %v6083_v14 = vpop.permute.xlu2 %6082 }
 0x7d5   : > { %7216 = vmatmul.msk.bf16.gmra.mxu2 %vm2048_vm14, %v6081_v54  ;;  %6443 = vmatmul.bf16.gmra.mxu3 %v6130_v61  ;;  %v6175_v11 = vsel %vm2085_vm15, %v6048_v22, %v6081_v54  ;;  %v6178_v18 = vsel %vm2085_vm15, %v6050_v49, %v6083_v14 }
 0x7d6   : > { %v6647_v48 = vmax.f32 %v6598_v0, 0.0  ;;  %6527 = vmatmul.bf16.gmra.mxu1 %v6175_v11  ;;  %v6510_v40 = vpop.f32.mrf.mxu1 }
 0x7d7   : > { %v6511_v21 = vadd.f32 %v6510_v40, %v6422_v59 }
 0x7d8   : > { %6695 = vxpose.xlu1.b32.cont [5/16] (narrow) %v6647_v48, 8 }
 0x7db   : > { %v6599_v5 = vpop.f32.mrf.mxu2  ;;  %6670 = vxpose.xlu0.b32.cont [12/16] (narrow) %v6638_v23, 8 }
 0x7dc   : > { %v6600_v20 = vadd.f32 %v6599_v5, %v6511_v21  ;;  %v6424_v9 = vpop.f32.mrf.mxu3 }
 0x7dd   : > { %v6425_v42 = vadd.f32 %v10116_v43, %v6424_v9 }
 0x7de   : > { %v6648_v34 = vmax.f32 %v6600_v20, 0.0 }
 0x7e0   : > { %6696 = vxpose.xlu1.b32.cont [6/16] (narrow) %v6648_v34, 8 }
 0x7e3   : > { %6671 = vxpose.xlu0.b32.cont [13/16] (narrow) %v6639_v28, 8 }
 0x7e4   : > { %v6426_v50 = vpop.f32.mrf.mxu3 }
 0x7e5   : > { %7217 = vmatmul.msk.bf16.gmra.mxu2 %vm2048_vm14, %v6083_v14  ;;  %v6427_v4 = vadd.f32 %v10116_v43, %v6426_v50 }
 0x7e6   : > { %v6513_v53 = vpop.f32.mrf.mxu1  ;;  %6532 = vmatmul.bf16.gmra.mxu1 %v6178_v18 }
 0x7e7   : > { %v6514_v2 = vadd.f32 %v6513_v53, %v6425_v42 }
 0x7eb   : > { %v6602_v26 = vpop.f32.mrf.mxu2  ;;  %6672 = vxpose.xlu0.b32.cont [14/16] (narrow) %v6640_v51, 8 }
 0x7ec   : > { %v6603_v62 = vadd.f32 %v6602_v26, %v6514_v2 }
 0x7ee   : > { %v6649_v36 = vmax.f32 %v6603_v62, 0.0  ;;  %v6515_v27 = vpop.f32.mrf.mxu1 }
 0x7ef   : > { %v6516_v22 = vadd.f32 %v6515_v27, %v6427_v4 }
 0x7f0   : > { %6697 = vxpose.xlu1.b32.cont [7/16] (narrow) %v6649_v36, 8 }
 0x7f3   : > { %v6604_v35 = vpop.f32.mrf.mxu2  ;;  %6673 = vxpose.xlu0.b32.cont [15/16] (narrow) %v6641_v37, 8 }
 0x7f4   : > { %v6605_v8 = vadd.f32 %v6604_v35, %v6516_v22  ;;  %v6429_v38 = vpop.f32.mrf.mxu3 }
 0x7f5   : > { %v6430_v16 = vadd.f32 %v10116_v43, %v6429_v38 }
 0x7f6   : > { %v6650_v55 = vmax.f32 %v6605_v8, 0.0 }
 0x7f8   : > { %6698 = vxpose.xlu1.b32.cont [8/16] (narrow) %v6650_v55, 8 }
 0x7fb   : > { %6674 = vxpose.xlu0.b32.end [16/16] (narrow) %v6642_v63, 8 }
 0x7fc   : > { %v6431_v1 = vpop.f32.mrf.mxu3 }
 0x7fd   : > { %v6432_v30 = vadd.f32 %v10116_v43, %v6431_v1 }
 0x816   : > { %v6518_v45 = vpop.f32.mrf.mxu1 }
 0x817   : > { %v6519_v52 = vadd.f32 %v6518_v45, %v6430_v16 }
 0x81b   : > { %v6607_v19 = vpop.f32.mrf.mxu2 }
 0x81c   : > { %v6608_v47 = vadd.f32 %v6607_v19, %v6519_v52 }
 0x81e   : > { %v6651_v17 = vmax.f32 %v6608_v47, 0.0  ;;  %v6520_v33 = vpop.f32.mrf.mxu1 }
 0x81f   : > { %v6521_v44 = vadd.f32 %v6520_v33, %v6432_v30 }
 0x820   : > { %6699 = vxpose.xlu1.b32.cont [9/16] (narrow) %v6651_v17, 8 }
 0x823   : > { %v6609_v15 = vpop.f32.mrf.mxu2 }
 0x824   : > { %v6610_v13 = vadd.f32 %v6609_v15, %v6521_v44  ;;  %v6434_v56 = vpop.f32.mrf.mxu3 }
 0x825   : > { %v6435_v32 = vadd.f32 %v10116_v43, %v6434_v56 }
 0x826   : > { %v6652_v41 = vmax.f32 %v6610_v13, 0.0 }
 0x827   : > { %v6675_v37 = vpop.trf.xlu0 }
 0x828   : > { %6700 = vxpose.xlu1.b32.cont [10/16] (narrow) %v6652_v41, 8 }
 0x82c   : > { %v6436_v10 = vpop.f32.mrf.mxu3 }
 0x82d   : > { %v6437_v58 = vadd.f32 %v10116_v43, %v6436_v10 }
 0x834   : > { %v6439_v29 = vpop.f32.mrf.mxu3 }
 0x835   : > { %v6440_v0 = vadd.f32 %v10116_v43, %v6439_v29 }
 0x837   : > { %v6523_v24 = vpop.f32.mrf.mxu1 }
 0x838   : > { %v6524_v3 = vadd.f32 %v6523_v24, %v6435_v32 }
 0x83c   : > { %v6612_v25 = vpop.f32.mrf.mxu2  ;;  %v6441_v61 = vpop.f32.mrf.mxu3 }
 0x83d   : > { %v6613_v6 = vadd.f32 %v6612_v25, %v6524_v3  ;;  %v6442_v59 = vadd.f32 %v10116_v43, %v6441_v61 }
 0x83f   : > { %v6653_v60 = vmax.f32 %v6613_v6, 0.0  ;;  %v6525_v12 = vpop.f32.mrf.mxu1 }
 0x840   : > { %v6526_v7 = vadd.f32 %v6525_v12, %v6437_v58 }
 0x841   : > { %6701 = vxpose.xlu1.b32.cont [11/16] (narrow) %v6653_v60, 8 }
 0x844   : > { %v6614_v31 = vpop.f32.mrf.mxu2 }
 0x845   : > { %v6615_v46 = vadd.f32 %v6614_v31, %v6526_v7 }
 0x847   : > { %v6654_v57 = vmax.f32 %v6615_v46, 0.0 }
 0x849   : > { %6702 = vxpose.xlu1.b32.cont [12/16] (narrow) %v6654_v57, 8 }
 0x853   : > { %v6528_v49 = vpop.f32.mrf.mxu1 }
 0x854   : > { %v6529_v54 = vadd.f32 %v6528_v49, %v6440_v0 }
 0x858   : > { %v6617_v39 = vpop.f32.mrf.mxu2  ;;  %v6444_v21 = vpop.f32.mrf.mxu3 }
 0x859   : > { %v6618_v11 = vadd.f32 %v6617_v39, %v6529_v54  ;;  %v6445_v14 = vadd.f32 %v10116_v43, %v6444_v21 }
 0x85b   : > { %v6655_v48 = vmax.f32 %v6618_v11, 0.0  ;;  %v6530_v40 = vpop.f32.mrf.mxu1 }
 0x85c   : > { %v6531_v23 = vadd.f32 %v6530_v40, %v6442_v59 }
 0x85d   : > { %6703 = vxpose.xlu1.b32.cont [13/16] (narrow) %v6655_v48, 8 }
 0x860   : > { %v6619_v5 = vpop.f32.mrf.mxu2  ;;  %v6446_v42 = vpop.f32.mrf.mxu3 }
 0x861   : > { %v6620_v20 = vadd.f32 %v6619_v5, %v6531_v23  ;;  %v6447_v26 = vadd.f32 %v10116_v43, %v6446_v42 }
 0x863   : > { %v6656_v34 = vmax.f32 %v6620_v20, 0.0  ;;  %v6533_v28 = vpop.f32.mrf.mxu1 }
 0x864   : > { %v6534_v9 = vadd.f32 %v6533_v28, %v6445_v14 }
 0x865   : > { %6704 = vxpose.xlu1.b32.cont [14/16] (narrow) %v6656_v34, 8 }
 0x868   : > { %v6622_v18 = vpop.f32.mrf.mxu2 }
 0x869   : > { %v6623_v53 = vadd.f32 %v6622_v18, %v6534_v9 }
 0x86b   : > { %v6657_v51 = vmax.f32 %v6623_v53, 0.0  ;;  %v6535_v2 = vpop.f32.mrf.mxu1 }
 0x86c   : > { %v6536_v62 = vadd.f32 %v6535_v2, %v6447_v26 }
 0x86d   : > { %6705 = vxpose.xlu1.b32.cont [15/16] (narrow) %v6657_v51, 8 }
 0x870   : > { %v6624_v50 = vpop.f32.mrf.mxu2 }
 0x871   : > { %v6625_v36 = vadd.f32 %v6624_v50, %v6536_v62 }
 0x873   : > { %v6658_v27 = vmax.f32 %v6625_v36, 0.0 }
 0x875   : > { %6706 = vxpose.xlu1.b32.end [16/16] (narrow) %v6658_v27, 8 }
 0x8a1   : > { %v6707_v4 = vpop.trf.xlu1 }
 0x8a2   : > { %v6725_v22 = vrot.slane %v6707_v4, 4 }
 0x8a4   : > { %v6727_v35 = vsel %vm6726_vm5, %v6675_v37, %v6725_v22 }
 0x8a5   : > { %6729 = vst [vmem:[%s332_s28] sm:$0x77] %v6727_v35 }
 0x8a6 PF: > { %s19_s30 = sadd.s32 1, %s7637_s30  }
 0x8a7   : > { %p16_p4 = scmp.ge.s32.totalorder %s19_s30, 4  }
 0x8a9   :  { %18 = sbr.rel (!%p16_p4) target bundleno = 1 (0x1), region = 92 }

</bundles_post_ra>
